<compile_context>
chip_gen: v6e
topology: v6e:2x2x1
jax: 0.10.0
libtpu: 0.0.40
codegen_flags: <defaults>
</compile_context>

<pallas_src>
import functools

import jax
import jax.numpy as jnp
from jax import lax
from jax.experimental import pallas as pl
from jax.experimental.pallas import tpu as pltpu

KERNEL_SIZE = 33
STRIDE = 2
DILATIONS = (1, 2, 4, 8, 16)
NUM_BRANCHES = len(DILATIONS)
MAX_PAD = (KERNEL_SIZE - 1) // 2 * max(DILATIONS)   # = 256
BN_EPS = 1e-5


def _fused_kernel(xe_ref, xo_ref, w_ref, b_ref, s_ref, t_ref, o_ref,
                  *, w_out, c_in, c_out):
    """TB batch rows, all 5 dilation branches fused.

    xe_ref/xo_ref: (TB, Wh, C_in)       even / odd phases of max-padded rows
    w_ref:         (NB, K*C_in, C_out)  per-branch im2col conv weights
    b_ref/s_ref/t_ref: (1, 1, NB*C_out) conv bias / fused eval-BN scale / shift
    o_ref:         (TB, W_out, NB*C_out)
    """
    tb = xe_ref.shape[0]
    accs = []
    for bi, d in enumerate(DILATIONS):
        pad_d = (KERNEL_SIZE - 1) // 2 * d
        # Build the im2col patch from STATIC ref slices (offsets are python
        # ints) -> one wide MXU contraction per branch instead of 33 tiny ones.
        taps = []
        for k in range(KERNEL_SIZE):
            off = MAX_PAD - pad_d + k * d          # static int
            j = off // 2
            src = xe_ref if off % 2 == 0 else xo_ref
            taps.append(src[:, j:j + w_out, :])    # (TB, W_out, C_in)
        patch = jnp.concatenate(taps, axis=-1)     # (TB, W_out, K*C_in)
        patch2d = patch.reshape(tb * w_out, KERNEL_SIZE * c_in)
        acc = jnp.dot(patch2d, w_ref[bi],
                      preferred_element_type=jnp.float32)  # (TB*W_out, C_out)
        accs.append(acc.reshape(tb, w_out, c_out))

    acc_all = jnp.concatenate(accs, axis=-1)       # (TB, W_out, NB*C_out) f32
    y = jnp.maximum(acc_all + b_ref[...], 0.0)     # conv bias + ReLU
    y = y * s_ref[...] + t_ref[...]                # eval-mode BatchNorm
    o_ref[...] = y.astype(o_ref.dtype)             # single fused (lane-denser) store


def _choose_tb(batch_rows, wh, w_out, c_in, nc, in_itemsize,
               budget_bytes=20 * 1024 * 1024, cap=256):
    """Pick the batch-row block size from a VMEM budget (v7x-safe)."""
    per_row = 2 * (2 * wh * c_in * in_itemsize)          # xe + xo, double-buffered
    per_row += 2 * (w_out * nc * 4)                      # f32 output, double-buffered
    per_row += w_out * KERNEL_SIZE * c_in * 4            # live im2col patch
    per_row += w_out * nc * 4                            # f32 accumulator
    tb = max(1, min(cap, budget_bytes // max(per_row, 1)))
    # Keep >=2 grid steps when possible so both v7x TensorCores get work.
    tb = min(tb, max(1, (batch_rows + 1) // 2))
    return int(tb)


def temporal_block_forward(x_nchw, params, *, compute_dtype=jnp.float32,
                           tb_rows=None):
    """Pallas TemporalBlock forward.  x_nchw: (N, C_in, H, W) -> NCHW out."""
    N, C_in, H, W = x_nchw.shape
    K = KERNEL_SIZE
    C_out = params["w"].shape[-1]
    NC = NUM_BRANCHES * C_out
    W_out = (W - 1) // STRIDE + 1
    B = N * H

    # Channels-last rows; pad ONCE with the max pad and phase-split ONCE
    # (shared by all 5 branches).
    x_rows = jnp.transpose(x_nchw, (0, 2, 3, 1)).reshape(B, W, C_in)
    x_rows = x_rows.astype(compute_dtype)
    pad_r = MAX_PAD + (W % 2)                       # keep padded width even
    x_pad = jnp.pad(x_rows, ((0, 0), (MAX_PAD, pad_r), (0, 0)))
    xe = x_pad[:, 0::2, :]                          # even width positions
    xo = x_pad[:, 1::2, :]                          # odd width positions
    Wh = xe.shape[1]

    if tb_rows is None:
        tb_rows = _choose_tb(B, Wh, W_out, C_in, NC,
                             jnp.dtype(compute_dtype).itemsize)
    n_blocks = pl.cdiv(B, tb_rows)
    B_pad = n_blocks * tb_rows
    if B_pad != B:                                  # pad rows; sliced off below
        xe = jnp.pad(xe, ((0, B_pad - B), (0, 0), (0, 0)))
        xo = jnp.pad(xo, ((0, B_pad - B), (0, 0), (0, 0)))

    w_all = params["w"].astype(compute_dtype)       # (NB, K*C_in, C_out)
    bias, scale, shift = params["b"], params["scale"], params["shift"]

    kern = functools.partial(_fused_kernel, w_out=W_out, c_in=C_in, c_out=C_out)

    y = pl.pallas_call(
        kern,
        out_shape=jax.ShapeDtypeStruct((B_pad, W_out, NC), jnp.float32),
        grid=(n_blocks,),
        in_specs=[
            pl.BlockSpec((tb_rows, Wh, C_in), lambda i: (i, 0, 0)),
            pl.BlockSpec((tb_rows, Wh, C_in), lambda i: (i, 0, 0)),
            pl.BlockSpec((NUM_BRANCHES, K * C_in, C_out), lambda i: (0, 0, 0)),
            pl.BlockSpec((1, 1, NC), lambda i: (0, 0, 0)),
            pl.BlockSpec((1, 1, NC), lambda i: (0, 0, 0)),
            pl.BlockSpec((1, 1, NC), lambda i: (0, 0, 0)),
        ],
        out_specs=pl.BlockSpec((tb_rows, W_out, NC), lambda i: (i, 0, 0)),
        compiler_params=pltpu.CompilerParams(
            dimension_semantics=("parallel",),
            vmem_limit_bytes=48 * 1024 * 1024),
    )(xe, xo, w_all, bias, scale, shift)

    y = y[:B].reshape(N, H, W_out, NC)
    return jnp.transpose(y, (0, 3, 1, 2))           # back to NCHW


def init_params(key, in_channels, out_channels):
    """Deterministic synthetic parameters (conv + BN per dilation branch)."""
    K = KERNEL_SIZE
    w_list, b_list, s_list, t_list, ref_params = [], [], [], [], []
    for _ in DILATIONS:
        key, k1, k2, k3, k4, k5, k6 = jax.random.split(key, 7)
        wt = 0.1 * jax.random.normal(
            k1, (out_channels, in_channels, 1, K), jnp.float32)
        bias = 0.1 * jax.random.normal(k2, (out_channels,), jnp.float32)
        gamma = 1.0 + 0.1 * jax.random.normal(k3, (out_channels,), jnp.float32)
        beta = 0.1 * jax.random.normal(k4, (out_channels,), jnp.float32)
        rmean = 0.1 * jax.random.normal(k5, (out_channels,), jnp.float32)
        rvar = 1.0 + 0.5 * jax.random.uniform(k6, (out_channels,), jnp.float32)

        # Fuse eval-mode BatchNorm into scale/shift.
        scale = gamma / jnp.sqrt(rvar + BN_EPS)
        shift = beta - rmean * scale
        # (C_out, C_in, 1, K) -> (K, C_in, C_out) -> (K*C_in, C_out): im2col weight.
        w_im2col = jnp.transpose(wt[:, :, 0, :], (2, 1, 0)).reshape(
            K * in_channels, out_channels)

        w_list.append(w_im2col)
        b_list.append(bias)
        s_list.append(scale)
        t_list.append(shift)
        ref_params.append(dict(wt=wt, bias=bias, gamma=gamma, beta=beta,
                               rmean=rmean, rvar=rvar))

    nc = NUM_BRANCHES * out_channels
    kernel_params = dict(
        w=jnp.stack(w_list, axis=0),                        # (NB, K*C_in, C_out)
        b=jnp.concatenate(b_list).reshape(1, 1, nc),
        scale=jnp.concatenate(s_list).reshape(1, 1, nc),
        shift=jnp.concatenate(t_list).reshape(1, 1, nc))
    return kernel_params, ref_params


def reference_forward(x, ref_params):
    """Pure-JAX reference (mirrors the PyTorch eval-mode forward)."""
    outs = []
    for d, p in zip(DILATIONS, ref_params):
        pad = (KERNEL_SIZE - 1) // 2 * d
        y = lax.conv_general_dilated(
            x, p["wt"], window_strides=(1, STRIDE),
            padding=((0, 0), (pad, pad)), rhs_dilation=(1, d),
            dimension_numbers=("NCHW", "OIHW", "NCHW"))
        y = y + p["bias"][None, :, None, None]
        y = jnp.maximum(y, 0.0)
        inv = p["gamma"] / jnp.sqrt(p["rvar"] + BN_EPS)
        y = ((y - p["rmean"][None, :, None, None]) * inv[None, :, None, None]
             + p["beta"][None, :, None, None])
        outs.append(y)
    return jnp.concatenate(outs, axis=1)


if __name__ == "__main__":
    N, C_IN, H, W = 2, 4, 4, 16
    C_OUT = 4

    key = jax.random.PRNGKey(0)
    key, xkey, pkey = jax.random.split(key, 3)
    x = jax.random.normal(xkey, (N, C_IN, H, W), jnp.float32)

    params, ref_params = init_params(pkey, C_IN, C_OUT)

    ref = jax.block_until_ready(reference_forward(x, ref_params))

    # f32 path: exact check.
    out = jax.block_until_ready(temporal_block_forward(x, params))
    W_OUT = (W - 1) // STRIDE + 1
    assert out.shape == (N, C_OUT * NUM_BRANCHES, H, W_OUT), out.shape
    assert ref.shape == out.shape, (ref.shape, out.shape)
    assert jnp.allclose(out, ref, atol=1e-3, rtol=1e-3), (
        float(jnp.max(jnp.abs(out - ref))))

    # bf16 activations/weights on the MXU (f32 accumulation + epilogue).
    out_bf16 = jax.block_until_ready(
        temporal_block_forward(x, params, compute_dtype=jnp.bfloat16))
    assert jnp.allclose(out_bf16, ref, atol=1e-1, rtol=1e-1), (
        float(jnp.max(jnp.abs(out_bf16 - ref))))

    print("KERNEL_OK")
</pallas_src>

<mosaic_0001>
module attributes {stable_mosaic.version = 11 : i64} {
  func.func @_fused_kernel(%arg0: i32, %arg1: memref<4x264x4xf32, #tpu.memory_space<vmem>>, %arg2: memref<4x264x4xf32, #tpu.memory_space<vmem>>, %arg3: memref<5x132x4xf32, #tpu.memory_space<vmem>>, %arg4: memref<1x1x20xf32, #tpu.memory_space<vmem>>, %arg5: memref<1x1x20xf32, #tpu.memory_space<vmem>>, %arg6: memref<1x1x20xf32, #tpu.memory_space<vmem>>, %arg7: memref<4x8x20xf32, #tpu.memory_space<vmem>>) attributes {dimension_semantics = [#tpu.dimension_semantics<parallel>], iteration_bounds = array<i64: 2>, scalar_prefetch = 0 : i64, scratch_operands = 0 : i64, tpu.core_type = #tpu.core_type<tc>, window_params = [{transform_indices = @transform_0, window_bounds = array<i64: 4, 264, 4>}, {transform_indices = @transform_1, window_bounds = array<i64: 4, 264, 4>}, {pipeline_mode = #tpu.pipeline_mode<synchronous>, transform_indices = @transform_2, window_bounds = array<i64: 5, 132, 4>}, {pipeline_mode = #tpu.pipeline_mode<synchronous>, transform_indices = @transform_3, window_bounds = array<i64: 1, 1, 20>}, {pipeline_mode = #tpu.pipeline_mode<synchronous>, transform_indices = @transform_4, window_bounds = array<i64: 1, 1, 20>}, {pipeline_mode = #tpu.pipeline_mode<synchronous>, transform_indices = @transform_5, window_bounds = array<i64: 1, 1, 20>}, {transform_indices = @transform_6, window_bounds = array<i64: 4, 8, 20>}]} {
    %c0 = arith.constant 0 : index
    %c120 = arith.constant 120 : index
    %c0_0 = arith.constant 0 : index
    %0 = vector.load %arg1[%c0, %c120, %c0_0] : memref<4x264x4xf32, #tpu.memory_space<vmem>>, vector<4x8x4xf32>
    %c0_1 = arith.constant 0 : index
    %c120_2 = arith.constant 120 : index
    %c0_3 = arith.constant 0 : index
    %1 = vector.load %arg2[%c0_1, %c120_2, %c0_3] : memref<4x264x4xf32, #tpu.memory_space<vmem>>, vector<4x8x4xf32>
    %c0_4 = arith.constant 0 : index
    %c121 = arith.constant 121 : index
    %c0_5 = arith.constant 0 : index
    %2 = vector.load %arg1[%c0_4, %c121, %c0_5] : memref<4x264x4xf32, #tpu.memory_space<vmem>>, vector<4x8x4xf32>
    %c0_6 = arith.constant 0 : index
    %c121_7 = arith.constant 121 : index
    %c0_8 = arith.constant 0 : index
    %3 = vector.load %arg2[%c0_6, %c121_7, %c0_8] : memref<4x264x4xf32, #tpu.memory_space<vmem>>, vector<4x8x4xf32>
    %c0_9 = arith.constant 0 : index
    %c122 = arith.constant 122 : index
    %c0_10 = arith.constant 0 : index
    %4 = vector.load %arg1[%c0_9, %c122, %c0_10] : memref<4x264x4xf32, #tpu.memory_space<vmem>>, vector<4x8x4xf32>
    %c0_11 = arith.constant 0 : index
    %c122_12 = arith.constant 122 : index
    %c0_13 = arith.constant 0 : index
    %5 = vector.load %arg2[%c0_11, %c122_12, %c0_13] : memref<4x264x4xf32, #tpu.memory_space<vmem>>, vector<4x8x4xf32>
    %c0_14 = arith.constant 0 : index
    %c123 = arith.constant 123 : index
    %c0_15 = arith.constant 0 : index
    %6 = vector.load %arg1[%c0_14, %c123, %c0_15] : memref<4x264x4xf32, #tpu.memory_space<vmem>>, vector<4x8x4xf32>
    %c0_16 = arith.constant 0 : index
    %c123_17 = arith.constant 123 : index
    %c0_18 = arith.constant 0 : index
    %7 = vector.load %arg2[%c0_16, %c123_17, %c0_18] : memref<4x264x4xf32, #tpu.memory_space<vmem>>, vector<4x8x4xf32>
    %c0_19 = arith.constant 0 : index
    %c124 = arith.constant 124 : index
    %c0_20 = arith.constant 0 : index
    %8 = vector.load %arg1[%c0_19, %c124, %c0_20] : memref<4x264x4xf32, #tpu.memory_space<vmem>>, vector<4x8x4xf32>
    %c0_21 = arith.constant 0 : index
    %c124_22 = arith.constant 124 : index
    %c0_23 = arith.constant 0 : index
    %9 = vector.load %arg2[%c0_21, %c124_22, %c0_23] : memref<4x264x4xf32, #tpu.memory_space<vmem>>, vector<4x8x4xf32>
    %c0_24 = arith.constant 0 : index
    %c125 = arith.constant 125 : index
    %c0_25 = arith.constant 0 : index
    %10 = vector.load %arg1[%c0_24, %c125, %c0_25] : memref<4x264x4xf32, #tpu.memory_space<vmem>>, vector<4x8x4xf32>
    %c0_26 = arith.constant 0 : index
    %c125_27 = arith.constant 125 : index
    %c0_28 = arith.constant 0 : index
    %11 = vector.load %arg2[%c0_26, %c125_27, %c0_28] : memref<4x264x4xf32, #tpu.memory_space<vmem>>, vector<4x8x4xf32>
    %c0_29 = arith.constant 0 : index
    %c126 = arith.constant 126 : index
    %c0_30 = arith.constant 0 : index
    %12 = vector.load %arg1[%c0_29, %c126, %c0_30] : memref<4x264x4xf32, #tpu.memory_space<vmem>>, vector<4x8x4xf32>
    %c0_31 = arith.constant 0 : index
    %c126_32 = arith.constant 126 : index
    %c0_33 = arith.constant 0 : index
    %13 = vector.load %arg2[%c0_31, %c126_32, %c0_33] : memref<4x264x4xf32, #tpu.memory_space<vmem>>, vector<4x8x4xf32>
    %c0_34 = arith.constant 0 : index
    %c127 = arith.constant 127 : index
    %c0_35 = arith.constant 0 : index
    %14 = vector.load %arg1[%c0_34, %c127, %c0_35] : memref<4x264x4xf32, #tpu.memory_space<vmem>>, vector<4x8x4xf32>
    %c0_36 = arith.constant 0 : index
    %c127_37 = arith.constant 127 : index
    %c0_38 = arith.constant 0 : index
    %15 = vector.load %arg2[%c0_36, %c127_37, %c0_38] : memref<4x264x4xf32, #tpu.memory_space<vmem>>, vector<4x8x4xf32>
    %c0_39 = arith.constant 0 : index
    %c128 = arith.constant 128 : index
    %c0_40 = arith.constant 0 : index
    %16 = vector.load %arg1[%c0_39, %c128, %c0_40] : memref<4x264x4xf32, #tpu.memory_space<vmem>>, vector<4x8x4xf32>
    %c0_41 = arith.constant 0 : index
    %c128_42 = arith.constant 128 : index
    %c0_43 = arith.constant 0 : index
    %17 = vector.load %arg2[%c0_41, %c128_42, %c0_43] : memref<4x264x4xf32, #tpu.memory_space<vmem>>, vector<4x8x4xf32>
    %c0_44 = arith.constant 0 : index
    %c129 = arith.constant 129 : index
    %c0_45 = arith.constant 0 : index
    %18 = vector.load %arg1[%c0_44, %c129, %c0_45] : memref<4x264x4xf32, #tpu.memory_space<vmem>>, vector<4x8x4xf32>
    %c0_46 = arith.constant 0 : index
    %c129_47 = arith.constant 129 : index
    %c0_48 = arith.constant 0 : index
    %19 = vector.load %arg2[%c0_46, %c129_47, %c0_48] : memref<4x264x4xf32, #tpu.memory_space<vmem>>, vector<4x8x4xf32>
    %c0_49 = arith.constant 0 : index
    %c130 = arith.constant 130 : index
    %c0_50 = arith.constant 0 : index
    %20 = vector.load %arg1[%c0_49, %c130, %c0_50] : memref<4x264x4xf32, #tpu.memory_space<vmem>>, vector<4x8x4xf32>
    %c0_51 = arith.constant 0 : index
    %c130_52 = arith.constant 130 : index
    %c0_53 = arith.constant 0 : index
    %21 = vector.load %arg2[%c0_51, %c130_52, %c0_53] : memref<4x264x4xf32, #tpu.memory_space<vmem>>, vector<4x8x4xf32>
    %c0_54 = arith.constant 0 : index
    %c131 = arith.constant 131 : index
    %c0_55 = arith.constant 0 : index
    %22 = vector.load %arg1[%c0_54, %c131, %c0_55] : memref<4x264x4xf32, #tpu.memory_space<vmem>>, vector<4x8x4xf32>
    %c0_56 = arith.constant 0 : index
    %c131_57 = arith.constant 131 : index
    %c0_58 = arith.constant 0 : index
    %23 = vector.load %arg2[%c0_56, %c131_57, %c0_58] : memref<4x264x4xf32, #tpu.memory_space<vmem>>, vector<4x8x4xf32>
    %c0_59 = arith.constant 0 : index
    %c132 = arith.constant 132 : index
    %c0_60 = arith.constant 0 : index
    %24 = vector.load %arg1[%c0_59, %c132, %c0_60] : memref<4x264x4xf32, #tpu.memory_space<vmem>>, vector<4x8x4xf32>
    %c0_61 = arith.constant 0 : index
    %c132_62 = arith.constant 132 : index
    %c0_63 = arith.constant 0 : index
    %25 = vector.load %arg2[%c0_61, %c132_62, %c0_63] : memref<4x264x4xf32, #tpu.memory_space<vmem>>, vector<4x8x4xf32>
    %c0_64 = arith.constant 0 : index
    %c133 = arith.constant 133 : index
    %c0_65 = arith.constant 0 : index
    %26 = vector.load %arg1[%c0_64, %c133, %c0_65] : memref<4x264x4xf32, #tpu.memory_space<vmem>>, vector<4x8x4xf32>
    %c0_66 = arith.constant 0 : index
    %c133_67 = arith.constant 133 : index
    %c0_68 = arith.constant 0 : index
    %27 = vector.load %arg2[%c0_66, %c133_67, %c0_68] : memref<4x264x4xf32, #tpu.memory_space<vmem>>, vector<4x8x4xf32>
    %c0_69 = arith.constant 0 : index
    %c134 = arith.constant 134 : index
    %c0_70 = arith.constant 0 : index
    %28 = vector.load %arg1[%c0_69, %c134, %c0_70] : memref<4x264x4xf32, #tpu.memory_space<vmem>>, vector<4x8x4xf32>
    %c0_71 = arith.constant 0 : index
    %c134_72 = arith.constant 134 : index
    %c0_73 = arith.constant 0 : index
    %29 = vector.load %arg2[%c0_71, %c134_72, %c0_73] : memref<4x264x4xf32, #tpu.memory_space<vmem>>, vector<4x8x4xf32>
    %c0_74 = arith.constant 0 : index
    %c135 = arith.constant 135 : index
    %c0_75 = arith.constant 0 : index
    %30 = vector.load %arg1[%c0_74, %c135, %c0_75] : memref<4x264x4xf32, #tpu.memory_space<vmem>>, vector<4x8x4xf32>
    %c0_76 = arith.constant 0 : index
    %c135_77 = arith.constant 135 : index
    %c0_78 = arith.constant 0 : index
    %31 = vector.load %arg2[%c0_76, %c135_77, %c0_78] : memref<4x264x4xf32, #tpu.memory_space<vmem>>, vector<4x8x4xf32>
    %c0_79 = arith.constant 0 : index
    %c136 = arith.constant 136 : index
    %c0_80 = arith.constant 0 : index
    %32 = vector.load %arg1[%c0_79, %c136, %c0_80] : memref<4x264x4xf32, #tpu.memory_space<vmem>>, vector<4x8x4xf32>
    %33 = tpu.concatenate %0, %1, %2, %3, %4, %5, %6, %7, %8, %9, %10, %11, %12, %13, %14, %15 in 2 : vector<4x8x4xf32>, vector<4x8x4xf32>, vector<4x8x4xf32>, vector<4x8x4xf32>, vector<4x8x4xf32>, vector<4x8x4xf32>, vector<4x8x4xf32>, vector<4x8x4xf32>, vector<4x8x4xf32>, vector<4x8x4xf32>, vector<4x8x4xf32>, vector<4x8x4xf32>, vector<4x8x4xf32>, vector<4x8x4xf32>, vector<4x8x4xf32>, vector<4x8x4xf32> -> vector<4x8x64xf32>
    %34 = tpu.concatenate %16, %17, %18, %19, %20, %21, %22, %23, %24, %25, %26, %27, %28, %29, %30, %31 in 2 : vector<4x8x4xf32>, vector<4x8x4xf32>, vector<4x8x4xf32>, vector<4x8x4xf32>, vector<4x8x4xf32>, vector<4x8x4xf32>, vector<4x8x4xf32>, vector<4x8x4xf32>, vector<4x8x4xf32>, vector<4x8x4xf32>, vector<4x8x4xf32>, vector<4x8x4xf32>, vector<4x8x4xf32>, vector<4x8x4xf32>, vector<4x8x4xf32>, vector<4x8x4xf32> -> vector<4x8x64xf32>
    %35 = tpu.concatenate %33, %34, %32 in 2 : vector<4x8x64xf32>, vector<4x8x64xf32>, vector<4x8x4xf32> -> vector<4x8x132xf32>
    %36 = vector.shape_cast %35 : vector<4x8x132xf32> to vector<32x132xf32>
    %c0_81 = arith.constant 0 : index
    %c0_82 = arith.constant 0 : index
    %c0_83 = arith.constant 0 : index
    %37 = vector.load %arg3[%c0_81, %c0_82, %c0_83] : memref<5x132x4xf32, #tpu.memory_space<vmem>>, vector<1x132x4xf32>
    %38 = vector.shape_cast %37 : vector<1x132x4xf32> to vector<132x4xf32>
    %cst = arith.constant dense<0.000000e+00> : vector<32x4xf32>
    %39 = tpu.matmul %36, %38, %cst {dimension_numbers = #tpu.dot_dimension_numbers<[1], [0], [0], [1], [0, 0, 1, 1], [], []>} : vector<32x132xf32>, vector<132x4xf32>, vector<32x4xf32> -> vector<32x4xf32>
    %40 = vector.shape_cast %39 : vector<32x4xf32> to vector<4x8x4xf32>
    %c0_84 = arith.constant 0 : index
    %c112 = arith.constant 112 : index
    %c0_85 = arith.constant 0 : index
    %41 = vector.load %arg1[%c0_84, %c112, %c0_85] : memref<4x264x4xf32, #tpu.memory_space<vmem>>, vector<4x8x4xf32>
    %c0_86 = arith.constant 0 : index
    %c113 = arith.constant 113 : index
    %c0_87 = arith.constant 0 : index
    %42 = vector.load %arg1[%c0_86, %c113, %c0_87] : memref<4x264x4xf32, #tpu.memory_space<vmem>>, vector<4x8x4xf32>
    %c0_88 = arith.constant 0 : index
    %c114 = arith.constant 114 : index
    %c0_89 = arith.constant 0 : index
    %43 = vector.load %arg1[%c0_88, %c114, %c0_89] : memref<4x264x4xf32, #tpu.memory_space<vmem>>, vector<4x8x4xf32>
    %c0_90 = arith.constant 0 : index
    %c115 = arith.constant 115 : index
    %c0_91 = arith.constant 0 : index
    %44 = vector.load %arg1[%c0_90, %c115, %c0_91] : memref<4x264x4xf32, #tpu.memory_space<vmem>>, vector<4x8x4xf32>
    %c0_92 = arith.constant 0 : index
    %c116 = arith.constant 116 : index
    %c0_93 = arith.constant 0 : index
    %45 = vector.load %arg1[%c0_92, %c116, %c0_93] : memref<4x264x4xf32, #tpu.memory_space<vmem>>, vector<4x8x4xf32>
    %c0_94 = arith.constant 0 : index
    %c117 = arith.constant 117 : index
    %c0_95 = arith.constant 0 : index
    %46 = vector.load %arg1[%c0_94, %c117, %c0_95] : memref<4x264x4xf32, #tpu.memory_space<vmem>>, vector<4x8x4xf32>
    %c0_96 = arith.constant 0 : index
    %c118 = arith.constant 118 : index
    %c0_97 = arith.constant 0 : index
    %47 = vector.load %arg1[%c0_96, %c118, %c0_97] : memref<4x264x4xf32, #tpu.memory_space<vmem>>, vector<4x8x4xf32>
    %c0_98 = arith.constant 0 : index
    %c119 = arith.constant 119 : index
    %c0_99 = arith.constant 0 : index
    %48 = vector.load %arg1[%c0_98, %c119, %c0_99] : memref<4x264x4xf32, #tpu.memory_space<vmem>>, vector<4x8x4xf32>
    %c0_100 = arith.constant 0 : index
    %c120_101 = arith.constant 120 : index
    %c0_102 = arith.constant 0 : index
    %49 = vector.load %arg1[%c0_100, %c120_101, %c0_102] : memref<4x264x4xf32, #tpu.memory_space<vmem>>, vector<4x8x4xf32>
    %c0_103 = arith.constant 0 : index
    %c121_104 = arith.constant 121 : index
    %c0_105 = arith.constant 0 : index
    %50 = vector.load %arg1[%c0_103, %c121_104, %c0_105] : memref<4x264x4xf32, #tpu.memory_space<vmem>>, vector<4x8x4xf32>
    %c0_106 = arith.constant 0 : index
    %c122_107 = arith.constant 122 : index
    %c0_108 = arith.constant 0 : index
    %51 = vector.load %arg1[%c0_106, %c122_107, %c0_108] : memref<4x264x4xf32, #tpu.memory_space<vmem>>, vector<4x8x4xf32>
    %c0_109 = arith.constant 0 : index
    %c123_110 = arith.constant 123 : index
    %c0_111 = arith.constant 0 : index
    %52 = vector.load %arg1[%c0_109, %c123_110, %c0_111] : memref<4x264x4xf32, #tpu.memory_space<vmem>>, vector<4x8x4xf32>
    %c0_112 = arith.constant 0 : index
    %c124_113 = arith.constant 124 : index
    %c0_114 = arith.constant 0 : index
    %53 = vector.load %arg1[%c0_112, %c124_113, %c0_114] : memref<4x264x4xf32, #tpu.memory_space<vmem>>, vector<4x8x4xf32>
    %c0_115 = arith.constant 0 : index
    %c125_116 = arith.constant 125 : index
    %c0_117 = arith.constant 0 : index
    %54 = vector.load %arg1[%c0_115, %c125_116, %c0_117] : memref<4x264x4xf32, #tpu.memory_space<vmem>>, vector<4x8x4xf32>
    %c0_118 = arith.constant 0 : index
    %c126_119 = arith.constant 126 : index
    %c0_120 = arith.constant 0 : index
    %55 = vector.load %arg1[%c0_118, %c126_119, %c0_120] : memref<4x264x4xf32, #tpu.memory_space<vmem>>, vector<4x8x4xf32>
    %c0_121 = arith.constant 0 : index
    %c127_122 = arith.constant 127 : index
    %c0_123 = arith.constant 0 : index
    %56 = vector.load %arg1[%c0_121, %c127_122, %c0_123] : memref<4x264x4xf32, #tpu.memory_space<vmem>>, vector<4x8x4xf32>
    %c0_124 = arith.constant 0 : index
    %c128_125 = arith.constant 128 : index
    %c0_126 = arith.constant 0 : index
    %57 = vector.load %arg1[%c0_124, %c128_125, %c0_126] : memref<4x264x4xf32, #tpu.memory_space<vmem>>, vector<4x8x4xf32>
    %c0_127 = arith.constant 0 : index
    %c129_128 = arith.constant 129 : index
    %c0_129 = arith.constant 0 : index
    %58 = vector.load %arg1[%c0_127, %c129_128, %c0_129] : memref<4x264x4xf32, #tpu.memory_space<vmem>>, vector<4x8x4xf32>
    %c0_130 = arith.constant 0 : index
    %c130_131 = arith.constant 130 : index
    %c0_132 = arith.constant 0 : index
    %59 = vector.load %arg1[%c0_130, %c130_131, %c0_132] : memref<4x264x4xf32, #tpu.memory_space<vmem>>, vector<4x8x4xf32>
    %c0_133 = arith.constant 0 : index
    %c131_134 = arith.constant 131 : index
    %c0_135 = arith.constant 0 : index
    %60 = vector.load %arg1[%c0_133, %c131_134, %c0_135] : memref<4x264x4xf32, #tpu.memory_space<vmem>>, vector<4x8x4xf32>
    %c0_136 = arith.constant 0 : index
    %c132_137 = arith.constant 132 : index
    %c0_138 = arith.constant 0 : index
    %61 = vector.load %arg1[%c0_136, %c132_137, %c0_138] : memref<4x264x4xf32, #tpu.memory_space<vmem>>, vector<4x8x4xf32>
    %c0_139 = arith.constant 0 : index
    %c133_140 = arith.constant 133 : index
    %c0_141 = arith.constant 0 : index
    %62 = vector.load %arg1[%c0_139, %c133_140, %c0_141] : memref<4x264x4xf32, #tpu.memory_space<vmem>>, vector<4x8x4xf32>
    %c0_142 = arith.constant 0 : index
    %c134_143 = arith.constant 134 : index
    %c0_144 = arith.constant 0 : index
    %63 = vector.load %arg1[%c0_142, %c134_143, %c0_144] : memref<4x264x4xf32, #tpu.memory_space<vmem>>, vector<4x8x4xf32>
    %c0_145 = arith.constant 0 : index
    %c135_146 = arith.constant 135 : index
    %c0_147 = arith.constant 0 : index
    %64 = vector.load %arg1[%c0_145, %c135_146, %c0_147] : memref<4x264x4xf32, #tpu.memory_space<vmem>>, vector<4x8x4xf32>
    %c0_148 = arith.constant 0 : index
    %c136_149 = arith.constant 136 : index
    %c0_150 = arith.constant 0 : index
    %65 = vector.load %arg1[%c0_148, %c136_149, %c0_150] : memref<4x264x4xf32, #tpu.memory_space<vmem>>, vector<4x8x4xf32>
    %c0_151 = arith.constant 0 : index
    %c137 = arith.constant 137 : index
    %c0_152 = arith.constant 0 : index
    %66 = vector.load %arg1[%c0_151, %c137, %c0_152] : memref<4x264x4xf32, #tpu.memory_space<vmem>>, vector<4x8x4xf32>
    %c0_153 = arith.constant 0 : index
    %c138 = arith.constant 138 : index
    %c0_154 = arith.constant 0 : index
    %67 = vector.load %arg1[%c0_153, %c138, %c0_154] : memref<4x264x4xf32, #tpu.memory_space<vmem>>, vector<4x8x4xf32>
    %c0_155 = arith.constant 0 : index
    %c139 = arith.constant 139 : index
    %c0_156 = arith.constant 0 : index
    %68 = vector.load %arg1[%c0_155, %c139, %c0_156] : memref<4x264x4xf32, #tpu.memory_space<vmem>>, vector<4x8x4xf32>
    %c0_157 = arith.constant 0 : index
    %c140 = arith.constant 140 : index
    %c0_158 = arith.constant 0 : index
    %69 = vector.load %arg1[%c0_157, %c140, %c0_158] : memref<4x264x4xf32, #tpu.memory_space<vmem>>, vector<4x8x4xf32>
    %c0_159 = arith.constant 0 : index
    %c141 = arith.constant 141 : index
    %c0_160 = arith.constant 0 : index
    %70 = vector.load %arg1[%c0_159, %c141, %c0_160] : memref<4x264x4xf32, #tpu.memory_space<vmem>>, vector<4x8x4xf32>
    %c0_161 = arith.constant 0 : index
    %c142 = arith.constant 142 : index
    %c0_162 = arith.constant 0 : index
    %71 = vector.load %arg1[%c0_161, %c142, %c0_162] : memref<4x264x4xf32, #tpu.memory_space<vmem>>, vector<4x8x4xf32>
    %c0_163 = arith.constant 0 : index
    %c143 = arith.constant 143 : index
    %c0_164 = arith.constant 0 : index
    %72 = vector.load %arg1[%c0_163, %c143, %c0_164] : memref<4x264x4xf32, #tpu.memory_space<vmem>>, vector<4x8x4xf32>
    %c0_165 = arith.constant 0 : index
    %c144 = arith.constant 144 : index
    %c0_166 = arith.constant 0 : index
    %73 = vector.load %arg1[%c0_165, %c144, %c0_166] : memref<4x264x4xf32, #tpu.memory_space<vmem>>, vector<4x8x4xf32>
    %74 = tpu.concatenate %41, %42, %43, %44, %45, %46, %47, %48, %49, %50, %51, %52, %53, %54, %55, %56 in 2 : vector<4x8x4xf32>, vector<4x8x4xf32>, vector<4x8x4xf32>, vector<4x8x4xf32>, vector<4x8x4xf32>, vector<4x8x4xf32>, vector<4x8x4xf32>, vector<4x8x4xf32>, vector<4x8x4xf32>, vector<4x8x4xf32>, vector<4x8x4xf32>, vector<4x8x4xf32>, vector<4x8x4xf32>, vector<4x8x4xf32>, vector<4x8x4xf32>, vector<4x8x4xf32> -> vector<4x8x64xf32>
    %75 = tpu.concatenate %57, %58, %59, %60, %61, %62, %63, %64, %65, %66, %67, %68, %69, %70, %71, %72 in 2 : vector<4x8x4xf32>, vector<4x8x4xf32>, vector<4x8x4xf32>, vector<4x8x4xf32>, vector<4x8x4xf32>, vector<4x8x4xf32>, vector<4x8x4xf32>, vector<4x8x4xf32>, vector<4x8x4xf32>, vector<4x8x4xf32>, vector<4x8x4xf32>, vector<4x8x4xf32>, vector<4x8x4xf32>, vector<4x8x4xf32>, vector<4x8x4xf32>, vector<4x8x4xf32> -> vector<4x8x64xf32>
    %76 = tpu.concatenate %74, %75, %73 in 2 : vector<4x8x64xf32>, vector<4x8x64xf32>, vector<4x8x4xf32> -> vector<4x8x132xf32>
    %77 = vector.shape_cast %76 : vector<4x8x132xf32> to vector<32x132xf32>
    %c1 = arith.constant 1 : index
    %c0_167 = arith.constant 0 : index
    %c0_168 = arith.constant 0 : index
    %78 = vector.load %arg3[%c1, %c0_167, %c0_168] : memref<5x132x4xf32, #tpu.memory_space<vmem>>, vector<1x132x4xf32>
    %79 = vector.shape_cast %78 : vector<1x132x4xf32> to vector<132x4xf32>
    %cst_169 = arith.constant dense<0.000000e+00> : vector<32x4xf32>
    %80 = tpu.matmul %77, %79, %cst_169 {dimension_numbers = #tpu.dot_dimension_numbers<[1], [0], [0], [1], [0, 0, 1, 1], [], []>} : vector<32x132xf32>, vector<132x4xf32>, vector<32x4xf32> -> vector<32x4xf32>
    %81 = vector.shape_cast %80 : vector<32x4xf32> to vector<4x8x4xf32>
    %c0_170 = arith.constant 0 : index
    %c96 = arith.constant 96 : index
    %c0_171 = arith.constant 0 : index
    %82 = vector.load %arg1[%c0_170, %c96, %c0_171] : memref<4x264x4xf32, #tpu.memory_space<vmem>>, vector<4x8x4xf32>
    %c0_172 = arith.constant 0 : index
    %c98 = arith.constant 98 : index
    %c0_173 = arith.constant 0 : index
    %83 = vector.load %arg1[%c0_172, %c98, %c0_173] : memref<4x264x4xf32, #tpu.memory_space<vmem>>, vector<4x8x4xf32>
    %c0_174 = arith.constant 0 : index
    %c100 = arith.constant 100 : index
    %c0_175 = arith.constant 0 : index
    %84 = vector.load %arg1[%c0_174, %c100, %c0_175] : memref<4x264x4xf32, #tpu.memory_space<vmem>>, vector<4x8x4xf32>
    %c0_176 = arith.constant 0 : index
    %c102 = arith.constant 102 : index
    %c0_177 = arith.constant 0 : index
    %85 = vector.load %arg1[%c0_176, %c102, %c0_177] : memref<4x264x4xf32, #tpu.memory_space<vmem>>, vector<4x8x4xf32>
    %c0_178 = arith.constant 0 : index
    %c104 = arith.constant 104 : index
    %c0_179 = arith.constant 0 : index
    %86 = vector.load %arg1[%c0_178, %c104, %c0_179] : memref<4x264x4xf32, #tpu.memory_space<vmem>>, vector<4x8x4xf32>
    %c0_180 = arith.constant 0 : index
    %c106 = arith.constant 106 : index
    %c0_181 = arith.constant 0 : index
    %87 = vector.load %arg1[%c0_180, %c106, %c0_181] : memref<4x264x4xf32, #tpu.memory_space<vmem>>, vector<4x8x4xf32>
    %c0_182 = arith.constant 0 : index
    %c108 = arith.constant 108 : index
    %c0_183 = arith.constant 0 : index
    %88 = vector.load %arg1[%c0_182, %c108, %c0_183] : memref<4x264x4xf32, #tpu.memory_space<vmem>>, vector<4x8x4xf32>
    %c0_184 = arith.constant 0 : index
    %c110 = arith.constant 110 : index
    %c0_185 = arith.constant 0 : index
    %89 = vector.load %arg1[%c0_184, %c110, %c0_185] : memref<4x264x4xf32, #tpu.memory_space<vmem>>, vector<4x8x4xf32>
    %c0_186 = arith.constant 0 : index
    %c112_187 = arith.constant 112 : index
    %c0_188 = arith.constant 0 : index
    %90 = vector.load %arg1[%c0_186, %c112_187, %c0_188] : memref<4x264x4xf32, #tpu.memory_space<vmem>>, vector<4x8x4xf32>
    %c0_189 = arith.constant 0 : index
    %c114_190 = arith.constant 114 : index
    %c0_191 = arith.constant 0 : index
    %91 = vector.load %arg1[%c0_189, %c114_190, %c0_191] : memref<4x264x4xf32, #tpu.memory_space<vmem>>, vector<4x8x4xf32>
    %c0_192 = arith.constant 0 : index
    %c116_193 = arith.constant 116 : index
    %c0_194 = arith.constant 0 : index
    %92 = vector.load %arg1[%c0_192, %c116_193, %c0_194] : memref<4x264x4xf32, #tpu.memory_space<vmem>>, vector<4x8x4xf32>
    %c0_195 = arith.constant 0 : index
    %c118_196 = arith.constant 118 : index
    %c0_197 = arith.constant 0 : index
    %93 = vector.load %arg1[%c0_195, %c118_196, %c0_197] : memref<4x264x4xf32, #tpu.memory_space<vmem>>, vector<4x8x4xf32>
    %c0_198 = arith.constant 0 : index
    %c120_199 = arith.constant 120 : index
    %c0_200 = arith.constant 0 : index
    %94 = vector.load %arg1[%c0_198, %c120_199, %c0_200] : memref<4x264x4xf32, #tpu.memory_space<vmem>>, vector<4x8x4xf32>
    %c0_201 = arith.constant 0 : index
    %c122_202 = arith.constant 122 : index
    %c0_203 = arith.constant 0 : index
    %95 = vector.load %arg1[%c0_201, %c122_202, %c0_203] : memref<4x264x4xf32, #tpu.memory_space<vmem>>, vector<4x8x4xf32>
    %c0_204 = arith.constant 0 : index
    %c124_205 = arith.constant 124 : index
    %c0_206 = arith.constant 0 : index
    %96 = vector.load %arg1[%c0_204, %c124_205, %c0_206] : memref<4x264x4xf32, #tpu.memory_space<vmem>>, vector<4x8x4xf32>
    %c0_207 = arith.constant 0 : index
    %c126_208 = arith.constant 126 : index
    %c0_209 = arith.constant 0 : index
    %97 = vector.load %arg1[%c0_207, %c126_208, %c0_209] : memref<4x264x4xf32, #tpu.memory_space<vmem>>, vector<4x8x4xf32>
    %c0_210 = arith.constant 0 : index
    %c128_211 = arith.constant 128 : index
    %c0_212 = arith.constant 0 : index
    %98 = vector.load %arg1[%c0_210, %c128_211, %c0_212] : memref<4x264x4xf32, #tpu.memory_space<vmem>>, vector<4x8x4xf32>
    %c0_213 = arith.constant 0 : index
    %c130_214 = arith.constant 130 : index
    %c0_215 = arith.constant 0 : index
    %99 = vector.load %arg1[%c0_213, %c130_214, %c0_215] : memref<4x264x4xf32, #tpu.memory_space<vmem>>, vector<4x8x4xf32>
    %c0_216 = arith.constant 0 : index
    %c132_217 = arith.constant 132 : index
    %c0_218 = arith.constant 0 : index
    %100 = vector.load %arg1[%c0_216, %c132_217, %c0_218] : memref<4x264x4xf32, #tpu.memory_space<vmem>>, vector<4x8x4xf32>
    %c0_219 = arith.constant 0 : index
    %c134_220 = arith.constant 134 : index
    %c0_221 = arith.constant 0 : index
    %101 = vector.load %arg1[%c0_219, %c134_220, %c0_221] : memref<4x264x4xf32, #tpu.memory_space<vmem>>, vector<4x8x4xf32>
    %c0_222 = arith.constant 0 : index
    %c136_223 = arith.constant 136 : index
    %c0_224 = arith.constant 0 : index
    %102 = vector.load %arg1[%c0_222, %c136_223, %c0_224] : memref<4x264x4xf32, #tpu.memory_space<vmem>>, vector<4x8x4xf32>
    %c0_225 = arith.constant 0 : index
    %c138_226 = arith.constant 138 : index
    %c0_227 = arith.constant 0 : index
    %103 = vector.load %arg1[%c0_225, %c138_226, %c0_227] : memref<4x264x4xf32, #tpu.memory_space<vmem>>, vector<4x8x4xf32>
    %c0_228 = arith.constant 0 : index
    %c140_229 = arith.constant 140 : index
    %c0_230 = arith.constant 0 : index
    %104 = vector.load %arg1[%c0_228, %c140_229, %c0_230] : memref<4x264x4xf32, #tpu.memory_space<vmem>>, vector<4x8x4xf32>
    %c0_231 = arith.constant 0 : index
    %c142_232 = arith.constant 142 : index
    %c0_233 = arith.constant 0 : index
    %105 = vector.load %arg1[%c0_231, %c142_232, %c0_233] : memref<4x264x4xf32, #tpu.memory_space<vmem>>, vector<4x8x4xf32>
    %c0_234 = arith.constant 0 : index
    %c144_235 = arith.constant 144 : index
    %c0_236 = arith.constant 0 : index
    %106 = vector.load %arg1[%c0_234, %c144_235, %c0_236] : memref<4x264x4xf32, #tpu.memory_space<vmem>>, vector<4x8x4xf32>
    %c0_237 = arith.constant 0 : index
    %c146 = arith.constant 146 : index
    %c0_238 = arith.constant 0 : index
    %107 = vector.load %arg1[%c0_237, %c146, %c0_238] : memref<4x264x4xf32, #tpu.memory_space<vmem>>, vector<4x8x4xf32>
    %c0_239 = arith.constant 0 : index
    %c148 = arith.constant 148 : index
    %c0_240 = arith.constant 0 : index
    %108 = vector.load %arg1[%c0_239, %c148, %c0_240] : memref<4x264x4xf32, #tpu.memory_space<vmem>>, vector<4x8x4xf32>
    %c0_241 = arith.constant 0 : index
    %c150 = arith.constant 150 : index
    %c0_242 = arith.constant 0 : index
    %109 = vector.load %arg1[%c0_241, %c150, %c0_242] : memref<4x264x4xf32, #tpu.memory_space<vmem>>, vector<4x8x4xf32>
    %c0_243 = arith.constant 0 : index
    %c152 = arith.constant 152 : index
    %c0_244 = arith.constant 0 : index
    %110 = vector.load %arg1[%c0_243, %c152, %c0_244] : memref<4x264x4xf32, #tpu.memory_space<vmem>>, vector<4x8x4xf32>
    %c0_245 = arith.constant 0 : index
    %c154 = arith.constant 154 : index
    %c0_246 = arith.constant 0 : index
    %111 = vector.load %arg1[%c0_245, %c154, %c0_246] : memref<4x264x4xf32, #tpu.memory_space<vmem>>, vector<4x8x4xf32>
    %c0_247 = arith.constant 0 : index
    %c156 = arith.constant 156 : index
    %c0_248 = arith.constant 0 : index
    %112 = vector.load %arg1[%c0_247, %c156, %c0_248] : memref<4x264x4xf32, #tpu.memory_space<vmem>>, vector<4x8x4xf32>
    %c0_249 = arith.constant 0 : index
    %c158 = arith.constant 158 : index
    %c0_250 = arith.constant 0 : index
    %113 = vector.load %arg1[%c0_249, %c158, %c0_250] : memref<4x264x4xf32, #tpu.memory_space<vmem>>, vector<4x8x4xf32>
    %c0_251 = arith.constant 0 : index
    %c160 = arith.constant 160 : index
    %c0_252 = arith.constant 0 : index
    %114 = vector.load %arg1[%c0_251, %c160, %c0_252] : memref<4x264x4xf32, #tpu.memory_space<vmem>>, vector<4x8x4xf32>
    %115 = tpu.concatenate %82, %83, %84, %85, %86, %87, %88, %89, %90, %91, %92, %93, %94, %95, %96, %97 in 2 : vector<4x8x4xf32>, vector<4x8x4xf32>, vector<4x8x4xf32>, vector<4x8x4xf32>, vector<4x8x4xf32>, vector<4x8x4xf32>, vector<4x8x4xf32>, vector<4x8x4xf32>, vector<4x8x4xf32>, vector<4x8x4xf32>, vector<4x8x4xf32>, vector<4x8x4xf32>, vector<4x8x4xf32>, vector<4x8x4xf32>, vector<4x8x4xf32>, vector<4x8x4xf32> -> vector<4x8x64xf32>
    %116 = tpu.concatenate %98, %99, %100, %101, %102, %103, %104, %105, %106, %107, %108, %109, %110, %111, %112, %113 in 2 : vector<4x8x4xf32>, vector<4x8x4xf32>, vector<4x8x4xf32>, vector<4x8x4xf32>, vector<4x8x4xf32>, vector<4x8x4xf32>, vector<4x8x4xf32>, vector<4x8x4xf32>, vector<4x8x4xf32>, vector<4x8x4xf32>, vector<4x8x4xf32>, vector<4x8x4xf32>, vector<4x8x4xf32>, vector<4x8x4xf32>, vector<4x8x4xf32>, vector<4x8x4xf32> -> vector<4x8x64xf32>
    %117 = tpu.concatenate %115, %116, %114 in 2 : vector<4x8x64xf32>, vector<4x8x64xf32>, vector<4x8x4xf32> -> vector<4x8x132xf32>
    %118 = vector.shape_cast %117 : vector<4x8x132xf32> to vector<32x132xf32>
    %c2 = arith.constant 2 : index
    %c0_253 = arith.constant 0 : index
    %c0_254 = arith.constant 0 : index
    %119 = vector.load %arg3[%c2, %c0_253, %c0_254] : memref<5x132x4xf32, #tpu.memory_space<vmem>>, vector<1x132x4xf32>
    %120 = vector.shape_cast %119 : vector<1x132x4xf32> to vector<132x4xf32>
    %cst_255 = arith.constant dense<0.000000e+00> : vector<32x4xf32>
    %121 = tpu.matmul %118, %120, %cst_255 {dimension_numbers = #tpu.dot_dimension_numbers<[1], [0], [0], [1], [0, 0, 1, 1], [], []>} : vector<32x132xf32>, vector<132x4xf32>, vector<32x4xf32> -> vector<32x4xf32>
    %122 = vector.shape_cast %121 : vector<32x4xf32> to vector<4x8x4xf32>
    %c0_256 = arith.constant 0 : index
    %c64 = arith.constant 64 : index
    %c0_257 = arith.constant 0 : index
    %123 = vector.load %arg1[%c0_256, %c64, %c0_257] : memref<4x264x4xf32, #tpu.memory_space<vmem>>, vector<4x8x4xf32>
    %c0_258 = arith.constant 0 : index
    %c68 = arith.constant 68 : index
    %c0_259 = arith.constant 0 : index
    %124 = vector.load %arg1[%c0_258, %c68, %c0_259] : memref<4x264x4xf32, #tpu.memory_space<vmem>>, vector<4x8x4xf32>
    %c0_260 = arith.constant 0 : index
    %c72 = arith.constant 72 : index
    %c0_261 = arith.constant 0 : index
    %125 = vector.load %arg1[%c0_260, %c72, %c0_261] : memref<4x264x4xf32, #tpu.memory_space<vmem>>, vector<4x8x4xf32>
    %c0_262 = arith.constant 0 : index
    %c76 = arith.constant 76 : index
    %c0_263 = arith.constant 0 : index
    %126 = vector.load %arg1[%c0_262, %c76, %c0_263] : memref<4x264x4xf32, #tpu.memory_space<vmem>>, vector<4x8x4xf32>
    %c0_264 = arith.constant 0 : index
    %c80 = arith.constant 80 : index
    %c0_265 = arith.constant 0 : index
    %127 = vector.load %arg1[%c0_264, %c80, %c0_265] : memref<4x264x4xf32, #tpu.memory_space<vmem>>, vector<4x8x4xf32>
    %c0_266 = arith.constant 0 : index
    %c84 = arith.constant 84 : index
    %c0_267 = arith.constant 0 : index
    %128 = vector.load %arg1[%c0_266, %c84, %c0_267] : memref<4x264x4xf32, #tpu.memory_space<vmem>>, vector<4x8x4xf32>
    %c0_268 = arith.constant 0 : index
    %c88 = arith.constant 88 : index
    %c0_269 = arith.constant 0 : index
    %129 = vector.load %arg1[%c0_268, %c88, %c0_269] : memref<4x264x4xf32, #tpu.memory_space<vmem>>, vector<4x8x4xf32>
    %c0_270 = arith.constant 0 : index
    %c92 = arith.constant 92 : index
    %c0_271 = arith.constant 0 : index
    %130 = vector.load %arg1[%c0_270, %c92, %c0_271] : memref<4x264x4xf32, #tpu.memory_space<vmem>>, vector<4x8x4xf32>
    %c0_272 = arith.constant 0 : index
    %c96_273 = arith.constant 96 : index
    %c0_274 = arith.constant 0 : index
    %131 = vector.load %arg1[%c0_272, %c96_273, %c0_274] : memref<4x264x4xf32, #tpu.memory_space<vmem>>, vector<4x8x4xf32>
    %c0_275 = arith.constant 0 : index
    %c100_276 = arith.constant 100 : index
    %c0_277 = arith.constant 0 : index
    %132 = vector.load %arg1[%c0_275, %c100_276, %c0_277] : memref<4x264x4xf32, #tpu.memory_space<vmem>>, vector<4x8x4xf32>
    %c0_278 = arith.constant 0 : index
    %c104_279 = arith.constant 104 : index
    %c0_280 = arith.constant 0 : index
    %133 = vector.load %arg1[%c0_278, %c104_279, %c0_280] : memref<4x264x4xf32, #tpu.memory_space<vmem>>, vector<4x8x4xf32>
    %c0_281 = arith.constant 0 : index
    %c108_282 = arith.constant 108 : index
    %c0_283 = arith.constant 0 : index
    %134 = vector.load %arg1[%c0_281, %c108_282, %c0_283] : memref<4x264x4xf32, #tpu.memory_space<vmem>>, vector<4x8x4xf32>
    %c0_284 = arith.constant 0 : index
    %c112_285 = arith.constant 112 : index
    %c0_286 = arith.constant 0 : index
    %135 = vector.load %arg1[%c0_284, %c112_285, %c0_286] : memref<4x264x4xf32, #tpu.memory_space<vmem>>, vector<4x8x4xf32>
    %c0_287 = arith.constant 0 : index
    %c116_288 = arith.constant 116 : index
    %c0_289 = arith.constant 0 : index
    %136 = vector.load %arg1[%c0_287, %c116_288, %c0_289] : memref<4x264x4xf32, #tpu.memory_space<vmem>>, vector<4x8x4xf32>
    %c0_290 = arith.constant 0 : index
    %c120_291 = arith.constant 120 : index
    %c0_292 = arith.constant 0 : index
    %137 = vector.load %arg1[%c0_290, %c120_291, %c0_292] : memref<4x264x4xf32, #tpu.memory_space<vmem>>, vector<4x8x4xf32>
    %c0_293 = arith.constant 0 : index
    %c124_294 = arith.constant 124 : index
    %c0_295 = arith.constant 0 : index
    %138 = vector.load %arg1[%c0_293, %c124_294, %c0_295] : memref<4x264x4xf32, #tpu.memory_space<vmem>>, vector<4x8x4xf32>
    %c0_296 = arith.constant 0 : index
    %c128_297 = arith.constant 128 : index
    %c0_298 = arith.constant 0 : index
    %139 = vector.load %arg1[%c0_296, %c128_297, %c0_298] : memref<4x264x4xf32, #tpu.memory_space<vmem>>, vector<4x8x4xf32>
    %c0_299 = arith.constant 0 : index
    %c132_300 = arith.constant 132 : index
    %c0_301 = arith.constant 0 : index
    %140 = vector.load %arg1[%c0_299, %c132_300, %c0_301] : memref<4x264x4xf32, #tpu.memory_space<vmem>>, vector<4x8x4xf32>
    %c0_302 = arith.constant 0 : index
    %c136_303 = arith.constant 136 : index
    %c0_304 = arith.constant 0 : index
    %141 = vector.load %arg1[%c0_302, %c136_303, %c0_304] : memref<4x264x4xf32, #tpu.memory_space<vmem>>, vector<4x8x4xf32>
    %c0_305 = arith.constant 0 : index
    %c140_306 = arith.constant 140 : index
    %c0_307 = arith.constant 0 : index
    %142 = vector.load %arg1[%c0_305, %c140_306, %c0_307] : memref<4x264x4xf32, #tpu.memory_space<vmem>>, vector<4x8x4xf32>
    %c0_308 = arith.constant 0 : index
    %c144_309 = arith.constant 144 : index
    %c0_310 = arith.constant 0 : index
    %143 = vector.load %arg1[%c0_308, %c144_309, %c0_310] : memref<4x264x4xf32, #tpu.memory_space<vmem>>, vector<4x8x4xf32>
    %c0_311 = arith.constant 0 : index
    %c148_312 = arith.constant 148 : index
    %c0_313 = arith.constant 0 : index
    %144 = vector.load %arg1[%c0_311, %c148_312, %c0_313] : memref<4x264x4xf32, #tpu.memory_space<vmem>>, vector<4x8x4xf32>
    %c0_314 = arith.constant 0 : index
    %c152_315 = arith.constant 152 : index
    %c0_316 = arith.constant 0 : index
    %145 = vector.load %arg1[%c0_314, %c152_315, %c0_316] : memref<4x264x4xf32, #tpu.memory_space<vmem>>, vector<4x8x4xf32>
    %c0_317 = arith.constant 0 : index
    %c156_318 = arith.constant 156 : index
    %c0_319 = arith.constant 0 : index
    %146 = vector.load %arg1[%c0_317, %c156_318, %c0_319] : memref<4x264x4xf32, #tpu.memory_space<vmem>>, vector<4x8x4xf32>
    %c0_320 = arith.constant 0 : index
    %c160_321 = arith.constant 160 : index
    %c0_322 = arith.constant 0 : index
    %147 = vector.load %arg1[%c0_320, %c160_321, %c0_322] : memref<4x264x4xf32, #tpu.memory_space<vmem>>, vector<4x8x4xf32>
    %c0_323 = arith.constant 0 : index
    %c164 = arith.constant 164 : index
    %c0_324 = arith.constant 0 : index
    %148 = vector.load %arg1[%c0_323, %c164, %c0_324] : memref<4x264x4xf32, #tpu.memory_space<vmem>>, vector<4x8x4xf32>
    %c0_325 = arith.constant 0 : index
    %c168 = arith.constant 168 : index
    %c0_326 = arith.constant 0 : index
    %149 = vector.load %arg1[%c0_325, %c168, %c0_326] : memref<4x264x4xf32, #tpu.memory_space<vmem>>, vector<4x8x4xf32>
    %c0_327 = arith.constant 0 : index
    %c172 = arith.constant 172 : index
    %c0_328 = arith.constant 0 : index
    %150 = vector.load %arg1[%c0_327, %c172, %c0_328] : memref<4x264x4xf32, #tpu.memory_space<vmem>>, vector<4x8x4xf32>
    %c0_329 = arith.constant 0 : index
    %c176 = arith.constant 176 : index
    %c0_330 = arith.constant 0 : index
    %151 = vector.load %arg1[%c0_329, %c176, %c0_330] : memref<4x264x4xf32, #tpu.memory_space<vmem>>, vector<4x8x4xf32>
    %c0_331 = arith.constant 0 : index
    %c180 = arith.constant 180 : index
    %c0_332 = arith.constant 0 : index
    %152 = vector.load %arg1[%c0_331, %c180, %c0_332] : memref<4x264x4xf32, #tpu.memory_space<vmem>>, vector<4x8x4xf32>
    %c0_333 = arith.constant 0 : index
    %c184 = arith.constant 184 : index
    %c0_334 = arith.constant 0 : index
    %153 = vector.load %arg1[%c0_333, %c184, %c0_334] : memref<4x264x4xf32, #tpu.memory_space<vmem>>, vector<4x8x4xf32>
    %c0_335 = arith.constant 0 : index
    %c188 = arith.constant 188 : index
    %c0_336 = arith.constant 0 : index
    %154 = vector.load %arg1[%c0_335, %c188, %c0_336] : memref<4x264x4xf32, #tpu.memory_space<vmem>>, vector<4x8x4xf32>
    %c0_337 = arith.constant 0 : index
    %c192 = arith.constant 192 : index
    %c0_338 = arith.constant 0 : index
    %155 = vector.load %arg1[%c0_337, %c192, %c0_338] : memref<4x264x4xf32, #tpu.memory_space<vmem>>, vector<4x8x4xf32>
    %156 = tpu.concatenate %123, %124, %125, %126, %127, %128, %129, %130, %131, %132, %133, %134, %135, %136, %137, %138 in 2 : vector<4x8x4xf32>, vector<4x8x4xf32>, vector<4x8x4xf32>, vector<4x8x4xf32>, vector<4x8x4xf32>, vector<4x8x4xf32>, vector<4x8x4xf32>, vector<4x8x4xf32>, vector<4x8x4xf32>, vector<4x8x4xf32>, vector<4x8x4xf32>, vector<4x8x4xf32>, vector<4x8x4xf32>, vector<4x8x4xf32>, vector<4x8x4xf32>, vector<4x8x4xf32> -> vector<4x8x64xf32>
    %157 = tpu.concatenate %139, %140, %141, %142, %143, %144, %145, %146, %147, %148, %149, %150, %151, %152, %153, %154 in 2 : vector<4x8x4xf32>, vector<4x8x4xf32>, vector<4x8x4xf32>, vector<4x8x4xf32>, vector<4x8x4xf32>, vector<4x8x4xf32>, vector<4x8x4xf32>, vector<4x8x4xf32>, vector<4x8x4xf32>, vector<4x8x4xf32>, vector<4x8x4xf32>, vector<4x8x4xf32>, vector<4x8x4xf32>, vector<4x8x4xf32>, vector<4x8x4xf32>, vector<4x8x4xf32> -> vector<4x8x64xf32>
    %158 = tpu.concatenate %156, %157, %155 in 2 : vector<4x8x64xf32>, vector<4x8x64xf32>, vector<4x8x4xf32> -> vector<4x8x132xf32>
    %159 = vector.shape_cast %158 : vector<4x8x132xf32> to vector<32x132xf32>
    %c3 = arith.constant 3 : index
    %c0_339 = arith.constant 0 : index
    %c0_340 = arith.constant 0 : index
    %160 = vector.load %arg3[%c3, %c0_339, %c0_340] : memref<5x132x4xf32, #tpu.memory_space<vmem>>, vector<1x132x4xf32>
    %161 = vector.shape_cast %160 : vector<1x132x4xf32> to vector<132x4xf32>
    %cst_341 = arith.constant dense<0.000000e+00> : vector<32x4xf32>
    %162 = tpu.matmul %159, %161, %cst_341 {dimension_numbers = #tpu.dot_dimension_numbers<[1], [0], [0], [1], [0, 0, 1, 1], [], []>} : vector<32x132xf32>, vector<132x4xf32>, vector<32x4xf32> -> vector<32x4xf32>
    %163 = vector.shape_cast %162 : vector<32x4xf32> to vector<4x8x4xf32>
    %c0_342 = arith.constant 0 : index
    %c0_343 = arith.constant 0 : index
    %c0_344 = arith.constant 0 : index
    %164 = vector.load %arg1[%c0_342, %c0_343, %c0_344] : memref<4x264x4xf32, #tpu.memory_space<vmem>>, vector<4x8x4xf32>
    %c0_345 = arith.constant 0 : index
    %c8 = arith.constant 8 : index
    %c0_346 = arith.constant 0 : index
    %165 = vector.load %arg1[%c0_345, %c8, %c0_346] : memref<4x264x4xf32, #tpu.memory_space<vmem>>, vector<4x8x4xf32>
    %c0_347 = arith.constant 0 : index
    %c16 = arith.constant 16 : index
    %c0_348 = arith.constant 0 : index
    %166 = vector.load %arg1[%c0_347, %c16, %c0_348] : memref<4x264x4xf32, #tpu.memory_space<vmem>>, vector<4x8x4xf32>
    %c0_349 = arith.constant 0 : index
    %c24 = arith.constant 24 : index
    %c0_350 = arith.constant 0 : index
    %167 = vector.load %arg1[%c0_349, %c24, %c0_350] : memref<4x264x4xf32, #tpu.memory_space<vmem>>, vector<4x8x4xf32>
    %c0_351 = arith.constant 0 : index
    %c32 = arith.constant 32 : index
    %c0_352 = arith.constant 0 : index
    %168 = vector.load %arg1[%c0_351, %c32, %c0_352] : memref<4x264x4xf32, #tpu.memory_space<vmem>>, vector<4x8x4xf32>
    %c0_353 = arith.constant 0 : index
    %c40 = arith.constant 40 : index
    %c0_354 = arith.constant 0 : index
    %169 = vector.load %arg1[%c0_353, %c40, %c0_354] : memref<4x264x4xf32, #tpu.memory_space<vmem>>, vector<4x8x4xf32>
    %c0_355 = arith.constant 0 : index
    %c48 = arith.constant 48 : index
    %c0_356 = arith.constant 0 : index
    %170 = vector.load %arg1[%c0_355, %c48, %c0_356] : memref<4x264x4xf32, #tpu.memory_space<vmem>>, vector<4x8x4xf32>
    %c0_357 = arith.constant 0 : index
    %c56 = arith.constant 56 : index
    %c0_358 = arith.constant 0 : index
    %171 = vector.load %arg1[%c0_357, %c56, %c0_358] : memref<4x264x4xf32, #tpu.memory_space<vmem>>, vector<4x8x4xf32>
    %c0_359 = arith.constant 0 : index
    %c64_360 = arith.constant 64 : index
    %c0_361 = arith.constant 0 : index
    %172 = vector.load %arg1[%c0_359, %c64_360, %c0_361] : memref<4x264x4xf32, #tpu.memory_space<vmem>>, vector<4x8x4xf32>
    %c0_362 = arith.constant 0 : index
    %c72_363 = arith.constant 72 : index
    %c0_364 = arith.constant 0 : index
    %173 = vector.load %arg1[%c0_362, %c72_363, %c0_364] : memref<4x264x4xf32, #tpu.memory_space<vmem>>, vector<4x8x4xf32>
    %c0_365 = arith.constant 0 : index
    %c80_366 = arith.constant 80 : index
    %c0_367 = arith.constant 0 : index
    %174 = vector.load %arg1[%c0_365, %c80_366, %c0_367] : memref<4x264x4xf32, #tpu.memory_space<vmem>>, vector<4x8x4xf32>
    %c0_368 = arith.constant 0 : index
    %c88_369 = arith.constant 88 : index
    %c0_370 = arith.constant 0 : index
    %175 = vector.load %arg1[%c0_368, %c88_369, %c0_370] : memref<4x264x4xf32, #tpu.memory_space<vmem>>, vector<4x8x4xf32>
    %c0_371 = arith.constant 0 : index
    %c96_372 = arith.constant 96 : index
    %c0_373 = arith.constant 0 : index
    %176 = vector.load %arg1[%c0_371, %c96_372, %c0_373] : memref<4x264x4xf32, #tpu.memory_space<vmem>>, vector<4x8x4xf32>
    %c0_374 = arith.constant 0 : index
    %c104_375 = arith.constant 104 : index
    %c0_376 = arith.constant 0 : index
    %177 = vector.load %arg1[%c0_374, %c104_375, %c0_376] : memref<4x264x4xf32, #tpu.memory_space<vmem>>, vector<4x8x4xf32>
    %c0_377 = arith.constant 0 : index
    %c112_378 = arith.constant 112 : index
    %c0_379 = arith.constant 0 : index
    %178 = vector.load %arg1[%c0_377, %c112_378, %c0_379] : memref<4x264x4xf32, #tpu.memory_space<vmem>>, vector<4x8x4xf32>
    %c0_380 = arith.constant 0 : index
    %c120_381 = arith.constant 120 : index
    %c0_382 = arith.constant 0 : index
    %179 = vector.load %arg1[%c0_380, %c120_381, %c0_382] : memref<4x264x4xf32, #tpu.memory_space<vmem>>, vector<4x8x4xf32>
    %c0_383 = arith.constant 0 : index
    %c128_384 = arith.constant 128 : index
    %c0_385 = arith.constant 0 : index
    %180 = vector.load %arg1[%c0_383, %c128_384, %c0_385] : memref<4x264x4xf32, #tpu.memory_space<vmem>>, vector<4x8x4xf32>
    %c0_386 = arith.constant 0 : index
    %c136_387 = arith.constant 136 : index
    %c0_388 = arith.constant 0 : index
    %181 = vector.load %arg1[%c0_386, %c136_387, %c0_388] : memref<4x264x4xf32, #tpu.memory_space<vmem>>, vector<4x8x4xf32>
    %c0_389 = arith.constant 0 : index
    %c144_390 = arith.constant 144 : index
    %c0_391 = arith.constant 0 : index
    %182 = vector.load %arg1[%c0_389, %c144_390, %c0_391] : memref<4x264x4xf32, #tpu.memory_space<vmem>>, vector<4x8x4xf32>
    %c0_392 = arith.constant 0 : index
    %c152_393 = arith.constant 152 : index
    %c0_394 = arith.constant 0 : index
    %183 = vector.load %arg1[%c0_392, %c152_393, %c0_394] : memref<4x264x4xf32, #tpu.memory_space<vmem>>, vector<4x8x4xf32>
    %c0_395 = arith.constant 0 : index
    %c160_396 = arith.constant 160 : index
    %c0_397 = arith.constant 0 : index
    %184 = vector.load %arg1[%c0_395, %c160_396, %c0_397] : memref<4x264x4xf32, #tpu.memory_space<vmem>>, vector<4x8x4xf32>
    %c0_398 = arith.constant 0 : index
    %c168_399 = arith.constant 168 : index
    %c0_400 = arith.constant 0 : index
    %185 = vector.load %arg1[%c0_398, %c168_399, %c0_400] : memref<4x264x4xf32, #tpu.memory_space<vmem>>, vector<4x8x4xf32>
    %c0_401 = arith.constant 0 : index
    %c176_402 = arith.constant 176 : index
    %c0_403 = arith.constant 0 : index
    %186 = vector.load %arg1[%c0_401, %c176_402, %c0_403] : memref<4x264x4xf32, #tpu.memory_space<vmem>>, vector<4x8x4xf32>
    %c0_404 = arith.constant 0 : index
    %c184_405 = arith.constant 184 : index
    %c0_406 = arith.constant 0 : index
    %187 = vector.load %arg1[%c0_404, %c184_405, %c0_406] : memref<4x264x4xf32, #tpu.memory_space<vmem>>, vector<4x8x4xf32>
    %c0_407 = arith.constant 0 : index
    %c192_408 = arith.constant 192 : index
    %c0_409 = arith.constant 0 : index
    %188 = vector.load %arg1[%c0_407, %c192_408, %c0_409] : memref<4x264x4xf32, #tpu.memory_space<vmem>>, vector<4x8x4xf32>
    %c0_410 = arith.constant 0 : index
    %c200 = arith.constant 200 : index
    %c0_411 = arith.constant 0 : index
    %189 = vector.load %arg1[%c0_410, %c200, %c0_411] : memref<4x264x4xf32, #tpu.memory_space<vmem>>, vector<4x8x4xf32>
    %c0_412 = arith.constant 0 : index
    %c208 = arith.constant 208 : index
    %c0_413 = arith.constant 0 : index
    %190 = vector.load %arg1[%c0_412, %c208, %c0_413] : memref<4x264x4xf32, #tpu.memory_space<vmem>>, vector<4x8x4xf32>
    %c0_414 = arith.constant 0 : index
    %c216 = arith.constant 216 : index
    %c0_415 = arith.constant 0 : index
    %191 = vector.load %arg1[%c0_414, %c216, %c0_415] : memref<4x264x4xf32, #tpu.memory_space<vmem>>, vector<4x8x4xf32>
    %c0_416 = arith.constant 0 : index
    %c224 = arith.constant 224 : index
    %c0_417 = arith.constant 0 : index
    %192 = vector.load %arg1[%c0_416, %c224, %c0_417] : memref<4x264x4xf32, #tpu.memory_space<vmem>>, vector<4x8x4xf32>
    %c0_418 = arith.constant 0 : index
    %c232 = arith.constant 232 : index
    %c0_419 = arith.constant 0 : index
    %193 = vector.load %arg1[%c0_418, %c232, %c0_419] : memref<4x264x4xf32, #tpu.memory_space<vmem>>, vector<4x8x4xf32>
    %c0_420 = arith.constant 0 : index
    %c240 = arith.constant 240 : index
    %c0_421 = arith.constant 0 : index
    %194 = vector.load %arg1[%c0_420, %c240, %c0_421] : memref<4x264x4xf32, #tpu.memory_space<vmem>>, vector<4x8x4xf32>
    %c0_422 = arith.constant 0 : index
    %c248 = arith.constant 248 : index
    %c0_423 = arith.constant 0 : index
    %195 = vector.load %arg1[%c0_422, %c248, %c0_423] : memref<4x264x4xf32, #tpu.memory_space<vmem>>, vector<4x8x4xf32>
    %c0_424 = arith.constant 0 : index
    %c256 = arith.constant 256 : index
    %c0_425 = arith.constant 0 : index
    %196 = vector.load %arg1[%c0_424, %c256, %c0_425] : memref<4x264x4xf32, #tpu.memory_space<vmem>>, vector<4x8x4xf32>
    %197 = tpu.concatenate %164, %165, %166, %167, %168, %169, %170, %171, %172, %173, %174, %175, %176, %177, %178, %179 in 2 : vector<4x8x4xf32>, vector<4x8x4xf32>, vector<4x8x4xf32>, vector<4x8x4xf32>, vector<4x8x4xf32>, vector<4x8x4xf32>, vector<4x8x4xf32>, vector<4x8x4xf32>, vector<4x8x4xf32>, vector<4x8x4xf32>, vector<4x8x4xf32>, vector<4x8x4xf32>, vector<4x8x4xf32>, vector<4x8x4xf32>, vector<4x8x4xf32>, vector<4x8x4xf32> -> vector<4x8x64xf32>
    %198 = tpu.concatenate %180, %181, %182, %183, %184, %185, %186, %187, %188, %189, %190, %191, %192, %193, %194, %195 in 2 : vector<4x8x4xf32>, vector<4x8x4xf32>, vector<4x8x4xf32>, vector<4x8x4xf32>, vector<4x8x4xf32>, vector<4x8x4xf32>, vector<4x8x4xf32>, vector<4x8x4xf32>, vector<4x8x4xf32>, vector<4x8x4xf32>, vector<4x8x4xf32>, vector<4x8x4xf32>, vector<4x8x4xf32>, vector<4x8x4xf32>, vector<4x8x4xf32>, vector<4x8x4xf32> -> vector<4x8x64xf32>
    %199 = tpu.concatenate %197, %198, %196 in 2 : vector<4x8x64xf32>, vector<4x8x64xf32>, vector<4x8x4xf32> -> vector<4x8x132xf32>
    %200 = vector.shape_cast %199 : vector<4x8x132xf32> to vector<32x132xf32>
    %c4 = arith.constant 4 : index
    %c0_426 = arith.constant 0 : index
    %c0_427 = arith.constant 0 : index
    %201 = vector.load %arg3[%c4, %c0_426, %c0_427] : memref<5x132x4xf32, #tpu.memory_space<vmem>>, vector<1x132x4xf32>
    %202 = vector.shape_cast %201 : vector<1x132x4xf32> to vector<132x4xf32>
    %cst_428 = arith.constant dense<0.000000e+00> : vector<32x4xf32>
    %203 = tpu.matmul %200, %202, %cst_428 {dimension_numbers = #tpu.dot_dimension_numbers<[1], [0], [0], [1], [0, 0, 1, 1], [], []>} : vector<32x132xf32>, vector<132x4xf32>, vector<32x4xf32> -> vector<32x4xf32>
    %204 = vector.shape_cast %203 : vector<32x4xf32> to vector<4x8x4xf32>
    %205 = tpu.concatenate %40, %81, %122, %163, %204 in 2 : vector<4x8x4xf32>, vector<4x8x4xf32>, vector<4x8x4xf32>, vector<4x8x4xf32>, vector<4x8x4xf32> -> vector<4x8x20xf32>
    %c0_429 = arith.constant 0 : index
    %c0_430 = arith.constant 0 : index
    %c0_431 = arith.constant 0 : index
    %206 = vector.load %arg4[%c0_429, %c0_430, %c0_431] : memref<1x1x20xf32, #tpu.memory_space<vmem>>, vector<1x1x20xf32>
    %207 = vector.broadcast %206 : vector<1x1x20xf32> to vector<4x8x20xf32>
    %208 = arith.addf %205, %207 : vector<4x8x20xf32>
    %cst_432 = arith.constant 0.000000e+00 : f32
    %209 = vector.broadcast %cst_432 : f32 to vector<4x8x20xf32>
    %210 = arith.maximumf %208, %209 : vector<4x8x20xf32>
    %c0_433 = arith.constant 0 : index
    %c0_434 = arith.constant 0 : index
    %c0_435 = arith.constant 0 : index
    %211 = vector.load %arg5[%c0_433, %c0_434, %c0_435] : memref<1x1x20xf32, #tpu.memory_space<vmem>>, vector<1x1x20xf32>
    %212 = vector.broadcast %211 : vector<1x1x20xf32> to vector<4x8x20xf32>
    %213 = arith.mulf %210, %212 : vector<4x8x20xf32>
    %c0_436 = arith.constant 0 : index
    %c0_437 = arith.constant 0 : index
    %c0_438 = arith.constant 0 : index
    %214 = vector.load %arg6[%c0_436, %c0_437, %c0_438] : memref<1x1x20xf32, #tpu.memory_space<vmem>>, vector<1x1x20xf32>
    %215 = vector.broadcast %214 : vector<1x1x20xf32> to vector<4x8x20xf32>
    %216 = arith.addf %213, %215 : vector<4x8x20xf32>
    %c0_439 = arith.constant 0 : index
    %c0_440 = arith.constant 0 : index
    %c0_441 = arith.constant 0 : index
    %217 = vector.load %arg7[%c0_439, %c0_440, %c0_441] : memref<4x8x20xf32, #tpu.memory_space<vmem>>, vector<4x8x20xf32>
    tpu.vector_store %arg7[%c0_439, %c0_440, %c0_441], %216 {strides = array<i32>} : memref<4x8x20xf32, #tpu.memory_space<vmem>>, vector<4x8x20xf32>,
    return
  }
  func.func @transform_0(%arg0: i32) -> (i32, i32, i32) {
    %c0_i32 = arith.constant 0 : i32
    %c0_i32_0 = arith.constant 0 : i32
    %c0_i32_1 = arith.constant 0 : i32
    return %arg0, %c0_i32, %c0_i32_0 : i32, i32, i32
  }
  func.func @transform_1(%arg0: i32) -> (i32, i32, i32) {
    %c0_i32 = arith.constant 0 : i32
    %c0_i32_0 = arith.constant 0 : i32
    %c0_i32_1 = arith.constant 0 : i32
    return %arg0, %c0_i32, %c0_i32_0 : i32, i32, i32
  }
  func.func @transform_2(%arg0: i32) -> (i32, i32, i32) {
    %c0_i32 = arith.constant 0 : i32
    %c0_i32_0 = arith.constant 0 : i32
    %c0_i32_1 = arith.constant 0 : i32
    %c0_i32_2 = arith.constant 0 : i32
    return %c0_i32, %c0_i32_0, %c0_i32_1 : i32, i32, i32
  }
  func.func @transform_3(%arg0: i32) -> (i32, i32, i32) {
    %c0_i32 = arith.constant 0 : i32
    %c0_i32_0 = arith.constant 0 : i32
    %c0_i32_1 = arith.constant 0 : i32
    %c0_i32_2 = arith.constant 0 : i32
    return %c0_i32, %c0_i32_0, %c0_i32_1 : i32, i32, i32
  }
  func.func @transform_4(%arg0: i32) -> (i32, i32, i32) {
    %c0_i32 = arith.constant 0 : i32
    %c0_i32_0 = arith.constant 0 : i32
    %c0_i32_1 = arith.constant 0 : i32
    %c0_i32_2 = arith.constant 0 : i32
    return %c0_i32, %c0_i32_0, %c0_i32_1 : i32, i32, i32
  }
  func.func @transform_5(%arg0: i32) -> (i32, i32, i32) {
    %c0_i32 = arith.constant 0 : i32
    %c0_i32_0 = arith.constant 0 : i32
    %c0_i32_1 = arith.constant 0 : i32
    %c0_i32_2 = arith.constant 0 : i32
    return %c0_i32, %c0_i32_0, %c0_i32_1 : i32, i32, i32
  }
  func.func @transform_6(%arg0: i32) -> (i32, i32, i32) {
    %c0_i32 = arith.constant 0 : i32
    %c0_i32_0 = arith.constant 0 : i32
    %c0_i32_1 = arith.constant 0 : i32
    return %arg0, %c0_i32, %c0_i32_0 : i32, i32, i32
  }
}

</mosaic_0001>

<bundles_post_ra>
// kernel: tpu_custom_call.1
= control target key start
LH: loop header
LB: loop body
LE: loop exit
PB: predicated region body
PF: predicated region fallthrough
CT: control target
= control target key end

     0   :  { %s9880_s0 = inlined_call_operand.vmem [shape: f32[8,264,4], index: 0, kind: input, shape index: {}]   ;;  %s9881_s1 = inlined_call_operand.vmem [shape: f32[8,264,4], index: 1, kind: input, shape index: {}]   ;;  %s9882_s2 = inlined_call_operand.vmem [shape: f32[5,132,4], index: 2, kind: input, shape index: {}]   ;;  %s9883_s3 = inlined_call_operand.vmem [shape: f32[1,1,20], index: 3, kind: input, shape index: {}]   ;;  %s9884_s4 = inlined_call_operand.vmem [shape: f32[1,1,20], index: 4, kind: input, shape index: {}]   ;;  %s9885_s5 = inlined_call_operand.vmem [shape: f32[1,1,20], index: 5, kind: input, shape index: {}]   ;;  %s9886_s6 = inlined_call_operand.hbm [shape: f32[8,8,20], index: 6, kind: output, shape index: {}]  }
   0x1   :  { %9994 = sst [smem:[#allocation40_spill]] %s9880_s0 }
   0x2   :  { %9995 = sst [smem:[#allocation41_spill]] %s9881_s1 }
   0x3   :  { %11 = vsyncpa [#allocation3], 0 }
   0x4   :  { %13 = vsyncpa [#allocation3 + $0x1], 0  ;;  %s6364_s21 = smov 0   ;;  %s6366_s22 = smov 0  }
   0x5   :  { %s6368_s23 = smov 0   ;;  %s6370_s24 = smov 0  }
   0x6 LB: > { %9996 = sst [smem:[#allocation5_spill]] %s6296_s21  ;;  %s6385_s25 = sadd.s32 4294967295, %s6308_s24   ;;  %s6308_s24 = sphi %s6370_s24, %s10266_s24   ;;  %s6304_s23 = sphi %s6368_s23, %s10268_s23   ;;  %s6300_s22 = sphi %s6366_s22, %s10270_s22   ;;  %s6296_s21 = sphi %s6364_s21, %s10269_s21  }
   0x7   : > { %9997 = sst [smem:[#allocation6_spill]] %s6304_s23  ;;  %s4344_s26 = sadd.s32 4294967294, %s6308_s24  }
   0x8   : > { %9998 = sst [smem:[#allocation7_spill]] %s6308_s24  ;;  %s6389_s27 = sadd.s32 1, %s6308_s24  }
   0x9   : > { %9999 = sst [smem:[#allocation8_spill]] %s6389_s27  ;;  %s162_s28 = sadd.s32 1, %s6304_s23 }
   0xa   : > { %s159_s29 = ssub.s32 %s6308_s24, %s6389_s27  ;;  %p172_p0 = scmp.ne.s32.totalorder %s6304_s23, %s6300_s22 }
   0xb   : > { %p160_p1 = scmp.eq.s32.totalorder %s159_s29, 0  ;;  %p173_p2 = scmp.eq.s32.totalorder %s6385_s25, 1 }
   0xc   : > { %p178_p3 = scmp.ne.s32.totalorder %s6300_s22, %s6296_s21  ;;  %p179_p4 = scmp.eq.s32.totalorder %s4344_s26, 1 }
   0xd   : > { %s6400_s30 = scalar_select %p160_p1, %s6304_s23, %s162_s28  }
   0xe   : > { %p6402_p5 = por %p173_p2, %p172_p0  ;;  %p6406_p6 = por %p179_p4, %p178_p3 }
   0xf   : > { %10000 = sst [smem:[#allocation9_spill]] %s6400_s30  ;;  %p4347_p7 = scmp.ge.s32.totalorder %s6308_s24, 1 }
  0x10   : > { %s10002_s8 = scalar_select %p6406_p6, 1, 0 }
  0x11   : > { %p229_p8 = scmp.lt.s32.totalorder %s6308_s24, 3 }
  0x12   : > { %10003 = sst [smem:[#allocation10_spill]] %s10002_s8 }
  0x13   : > { %p230_p9 = pnand %p4347_p7, %p229_p8 }
  0x15   : > { %233 = sbr.rel (%p230_p9) target bundleno = 1491 (0x5d3), region = 44 }
  0x1a   : > { %s4349_s9 = sshll.u32 %s6385_s25, 2  ;;  %s10004_s1 = sld [smem:[#allocation41_spill]]  ;;  %vm653_vm0 = vcmask 31744   ;;  %vm658_vm1 = vcmask 64512   ;;  %vm663_vm2 = vcmask 97280   ;;  %vm668_vm3 = vcmask 130048  }
  0x1b   : > { %p267_p10 = scmp.lt.s32.totalorder %s4349_s9, 7  ;;  %s10005_s0 = sld [smem:[#allocation40_spill]]  ;;  %vm673_vm4 = vcmask 162816   ;;  %vm678_vm5 = vcmask 195584   ;;  %vm683_vm6 = vcmask 228352   ;;  %vm9970_vm7 = vcmask 261120  }
  0x1c   : > { %s9906_s17 = smov 4   ;;  %s9901_s18 = smov 8   ;;  %vm9968_vm8 = vcmask 293888   ;;  %vm9969_vm9 = vcmask 326656   ;;  %vm9954_vm10 = vcmask 359424   ;;  %vm708_vm11 = vcmask 392192  }
  0x1d   : > { %s10272_s9 = smov (!%p267_p10, %s4349_s9), 7  ;;  %s9899_s19 = smov 12   ;;  %vm713_vm12 = vcmask 424960   ;;  %vm718_vm13 = vcmask 457728   ;;  %vm723_vm14 = vcmask 490496   ;;  %vm9938_vm15 = vcmask 1043456  }
  0x1e   : > { %s4489_s10 = smul.u32 264, %s10272_s9  ;;  %s9896_s20 = smov 16  }
  0x1f   : > { %s9945_s26 = smov 20   ;;  %s9943_s28 = smov 24  }
  0x20   : > { %s6416_s13 = scalar_lea.vmem %s10004_s1, %s4489_s10  ;;  %s9941_s29 = smov 28  }
  0x21   : > { %s6421_s16 = scalar_lea.vmem %s10005_s0, %s4489_s10  ;;  %v285_v0 = vld [vmem:[%s6416_s13 + $0x78] sm:$0xff]  ;;  %v286_v1 = vld [vmem:[%s6416_s13 + $0x180] sm:$0xff]  ;;  %v287_v5 = vld [vmem:[%s6416_s13 + $0x288] sm:$0xff]  ;;  %s9939_s9 = smov 32  }
  0x22   : > { %v289_v2 = vld [vmem:[%s6421_s16 + $0x79] sm:$0xff]  ;;  %v4547_v3 = vpack.i.bf16 %v286_v1, %v285_v0  ;;  %v290_v4 = vld [vmem:[%s6421_s16 + $0x181] sm:$0xff]  ;;  %v288_v6 = vld [vmem:[%s6416_s13 + $0x390] sm:$0xff]  ;;  %s9893_s10 = smov 36   ;;  %s9891_s11 = smov 40  }
  0x23   : > { %v6429_v7 = vpack.i.bf16 %v290_v4, %v289_v2  ;;  %v291_v8 = vld [vmem:[%s6421_s16 + $0x289] sm:$0xff]  ;;  %v292_v9 = vld [vmem:[%s6421_s16 + $0x391] sm:$0xff]  ;;  %v4552_v10 = vpack.i.bf16 %v288_v6, %v287_v5  ;;  %v293_v12 = vld [vmem:[%s6416_s13 + $0x79] sm:$0xff]  ;;  %s9936_s12 = smov 44   ;;  %s9887_s14 = smov 48  }
  0x24   : > { %4548 = vrot.lane.b32.xlu0 %v4547_v3, %s9906_s17  ;;  %v4562_v11 = vpack.i.bf16 %v292_v9, %v291_v8  ;;  %v294_v13 = vld [vmem:[%s6416_s13 + $0x181] sm:$0xff]  ;;  %v295_v14 = vld [vmem:[%s6416_s13 + $0x289] sm:$0xff]  ;;  %v296_v15 = vld [vmem:[%s6416_s13 + $0x391] sm:$0xff]  ;;  %s9889_s15 = smov 52   ;;  %s10076_s0 = smov 32  }
  0x25   : > { %4558 = vrot.lane.b32.xlu1 %v6429_v7, %s9901_s18  ;;  %v4567_v16 = vpack.i.bf16 %v294_v13, %v293_v12  ;;  %v4572_v17 = vpack.i.bf16 %v296_v15, %v295_v14  ;;  %v297_v18 = vld [vmem:[%s6421_s16 + $0x7a] sm:$0xff]  ;;  %v298_v19 = vld [vmem:[%s6421_s16 + $0x182] sm:$0xff]  ;;  %v299_v20 = vld [vmem:[%s6421_s16 + $0x28a] sm:$0xff]  ;;  %s10079_s1 = smov 44  }
  0x26   : > { %v300_v21 = vld [vmem:[%s6421_s16 + $0x392] sm:$0xff]  ;;  %v4577_v22 = vpack.i.bf16 %v298_v19, %v297_v18  ;;  %v301_v24 = vld [vmem:[%s6416_s13 + $0x7a] sm:$0xff]  ;;  %v302_v25 = vld [vmem:[%s6416_s13 + $0x182] sm:$0xff] }
  0x27   : > { %v4582_v23 = vpack.i.bf16 %v300_v21, %v299_v20  ;;  %v303_v26 = vld [vmem:[%s6416_s13 + $0x28a] sm:$0xff]  ;;  %v304_v27 = vld [vmem:[%s6416_s13 + $0x392] sm:$0xff]  ;;  %v4587_v28 = vpack.i.bf16 %v302_v25, %v301_v24  ;;  %v305_v30 = vld [vmem:[%s6421_s16 + $0x7b] sm:$0xff] }
  0x28   : > { %4553 = vrot.lane.b32.xlu0 %v4552_v10, %s9906_s17  ;;  %v4592_v29 = vpack.i.bf16 %v304_v27, %v303_v26  ;;  %v306_v31 = vld [vmem:[%s6421_s16 + $0x183] sm:$0xff]  ;;  %v307_v32 = vld [vmem:[%s6421_s16 + $0x28b] sm:$0xff]  ;;  %v308_v33 = vld [vmem:[%s6421_s16 + $0x393] sm:$0xff] }
  0x29   : > { %4563 = vrot.lane.b32.xlu1 %v4562_v11, %s9901_s18  ;;  %v4597_v34 = vpack.i.bf16 %v306_v31, %v305_v30  ;;  %v4602_v35 = vpack.i.bf16 %v308_v33, %v307_v32  ;;  %v309_v36 = vld [vmem:[%s6416_s13 + $0x7b] sm:$0xff]  ;;  %v310_v37 = vld [vmem:[%s6416_s13 + $0x183] sm:$0xff]  ;;  %v311_v38 = vld [vmem:[%s6416_s13 + $0x28b] sm:$0xff] }
  0x2a   : > { %v312_v39 = vld [vmem:[%s6416_s13 + $0x393] sm:$0xff]  ;;  %v4607_v40 = vpack.i.bf16 %v310_v37, %v309_v36  ;;  %v313_v42 = vld [vmem:[%s6421_s16 + $0x7c] sm:$0xff]  ;;  %v314_v43 = vld [vmem:[%s6421_s16 + $0x184] sm:$0xff] }
  0x2b   : > { %v4612_v41 = vpack.i.bf16 %v312_v39, %v311_v38  ;;  %v315_v44 = vld [vmem:[%s6421_s16 + $0x28c] sm:$0xff]  ;;  %v316_v45 = vld [vmem:[%s6421_s16 + $0x394] sm:$0xff]  ;;  %v4617_v46 = vpack.i.bf16 %v314_v43, %v313_v42  ;;  %v317_v48 = vld [vmem:[%s6416_s13 + $0x7c] sm:$0xff] }
  0x2c   : > { %4568 = vrot.lane.b32.xlu0 %v4567_v16, %s9899_s19  ;;  %v4622_v47 = vpack.i.bf16 %v316_v45, %v315_v44  ;;  %v318_v49 = vld [vmem:[%s6416_s13 + $0x184] sm:$0xff]  ;;  %v319_v50 = vld [vmem:[%s6416_s13 + $0x28c] sm:$0xff]  ;;  %v320_v51 = vld [vmem:[%s6416_s13 + $0x394] sm:$0xff] }
  0x2d   : > { %4573 = vrot.lane.b32.xlu1 %v4572_v17, %s9899_s19  ;;  %v4627_v52 = vpack.i.bf16 %v318_v49, %v317_v48  ;;  %v321_v53 = vld [vmem:[%s6421_s16 + $0x7d] sm:$0xff]  ;;  %v322_v54 = vld [vmem:[%s6421_s16 + $0x185] sm:$0xff]  ;;  %v4632_v55 = vpack.i.bf16 %v320_v51, %v319_v50  ;;  %v323_v56 = vld [vmem:[%s6421_s16 + $0x28d] sm:$0xff] }
  0x2e   : > { %v385_v57 = vld [vmem:[%s6421_s16 + $0x85] sm:$0xff]  ;;  %v386_v58 = vld [vmem:[%s6421_s16 + $0x18d] sm:$0xff]  ;;  %v324_v59 = vld [vmem:[%s6421_s16 + $0x395] sm:$0xff]  ;;  %v4637_v0 = vpack.i.bf16 %v322_v54, %v321_v53 }
  0x2f   : > { %v6484_v60 = vpack.i.bf16 %v386_v58, %v385_v57  ;;  %v387_v61 = vld [vmem:[%s6421_s16 + $0x295] sm:$0xff]  ;;  %v388_v62 = vld [vmem:[%s6421_s16 + $0x39d] sm:$0xff]  ;;  %v4642_v1 = vpack.i.bf16 %v324_v59, %v323_v56  ;;  %v326_v3 = vld [vmem:[%s6416_s13 + $0x185] sm:$0xff] }
  0x30   : > { %4578 = vrot.lane.b32.xlu0 %v4577_v22, %s9896_s20  ;;  %v6488_v63 = vpack.i.bf16 %v388_v62, %v387_v61  ;;  %v325_v2 = vld [vmem:[%s6416_s13 + $0x7d] sm:$0xff]  ;;  %v327_v4 = vld [vmem:[%s6416_s13 + $0x28d] sm:$0xff]  ;;  %v328_v5 = vld [vmem:[%s6416_s13 + $0x395] sm:$0xff] }
  0x31   : > { %4583 = vrot.lane.b32.xlu1 %v4582_v23, %s9896_s20  ;;  %v401_v6 = vld [vmem:[%s6421_s16 + $0x87] sm:$0xff]  ;;  %v402_v8 = vld [vmem:[%s6421_s16 + $0x18f] sm:$0xff]  ;;  %v403_v10 = vld [vmem:[%s6421_s16 + $0x297] sm:$0xff]  ;;  %v4647_v12 = vpack.i.bf16 %v326_v3, %v325_v2  ;;  %v4652_v14 = vpack.i.bf16 %v328_v5, %v327_v4 }
  0x32   : > { %v6498_v9 = vpack.i.bf16 %v402_v8, %v401_v6  ;;  %v404_v11 = vld [vmem:[%s6421_s16 + $0x39f] sm:$0xff]  ;;  %v331_v17 = vld [vmem:[%s6421_s16 + $0x28e] sm:$0xff]  ;;  %v332_v18 = vld [vmem:[%s6421_s16 + $0x396] sm:$0xff] }
  0x33   : > { %v6503_v13 = vpack.i.bf16 %v404_v11, %v403_v10  ;;  %v329_v15 = vld [vmem:[%s6421_s16 + $0x7e] sm:$0xff]  ;;  %v330_v16 = vld [vmem:[%s6421_s16 + $0x186] sm:$0xff]  ;;  %v6514_v20 = vpack.i.bf16 %v332_v18, %v331_v17  ;;  %v335_v23 = vld [vmem:[%s6416_s13 + $0x28e] sm:$0xff] }
  0x34   : > { %4588 = vrot.lane.b32.xlu0 %v4587_v28, %s9945_s26  ;;  %v6511_v19 = vpack.i.bf16 %v330_v16, %v329_v15  ;;  %v333_v21 = vld [vmem:[%s6416_s13 + $0x7e] sm:$0xff]  ;;  %v334_v22 = vld [vmem:[%s6416_s13 + $0x186] sm:$0xff]  ;;  %v336_v24 = vld [vmem:[%s6416_s13 + $0x396] sm:$0xff] }
  0x35   : > { %4593 = vrot.lane.b32.xlu1 %v4592_v29, %s9945_s26  ;;  %v4667_v25 = vpack.i.bf16 %v334_v22, %v333_v21  ;;  %v4672_v26 = vpack.i.bf16 %v336_v24, %v335_v23  ;;  %v337_v27 = vld [vmem:[%s6421_s16 + $0x7f] sm:$0xff]  ;;  %v338_v28 = vld [vmem:[%s6421_s16 + $0x187] sm:$0xff]  ;;  %v339_v29 = vld [vmem:[%s6421_s16 + $0x28f] sm:$0xff] }
  0x36   : > { %v340_v30 = vld [vmem:[%s6421_s16 + $0x397] sm:$0xff]  ;;  %v6529_v31 = vpack.i.bf16 %v338_v28, %v337_v27  ;;  %v341_v33 = vld [vmem:[%s6416_s13 + $0x7f] sm:$0xff]  ;;  %v362_v58 = vld [vmem:[%s6421_s16 + $0x18a] sm:$0xff] }
  0x37   : > { %v6532_v32 = vpack.i.bf16 %v340_v30, %v339_v29  ;;  %v344_v36 = vld [vmem:[%s6416_s13 + $0x397] sm:$0xff]  ;;  %v349_v39 = vld [vmem:[%s6416_s13 + $0x80] sm:$0xff]  ;;  %v366_v2 = vld [vmem:[%s6416_s13 + $0x18a] sm:$0xff] }
  0x38   : > { %4598 = vrot.lane.b32.xlu0 %v4597_v34, %s9943_s28  ;;  %v342_v34 = vld [vmem:[%s6416_s13 + $0x187] sm:$0xff]  ;;  %v352_v42 = vld [vmem:[%s6416_s13 + $0x398] sm:$0xff] }
  0x39   : > { %4603 = vrot.lane.b32.xlu1 %v4602_v35, %s9943_s28  ;;  %v343_v35 = vld [vmem:[%s6416_s13 + $0x28f] sm:$0xff]  ;;  %v4687_v37 = vpack.i.bf16 %v342_v34, %v341_v33  ;;  %v353_v45 = vld [vmem:[%s6421_s16 + $0x81] sm:$0xff]  ;;  %v356_v48 = vld [vmem:[%s6421_s16 + $0x399] sm:$0xff] }
  0x3a   : > { %v4692_v38 = vpack.i.bf16 %v344_v36, %v343_v35  ;;  %v357_v51 = vld [vmem:[%s6416_s13 + $0x81] sm:$0xff]  ;;  %v359_v53 = vld [vmem:[%s6416_s13 + $0x291] sm:$0xff]  ;;  %v360_v54 = vld [vmem:[%s6416_s13 + $0x399] sm:$0xff] }
  0x3b   : > { %v4722_v56 = vpack.i.bf16 %v360_v54, %v359_v53  ;;  %v361_v57 = vld [vmem:[%s6421_s16 + $0x82] sm:$0xff]  ;;  %v363_v59 = vld [vmem:[%s6421_s16 + $0x292] sm:$0xff]  ;;  %v364_v61 = vld [vmem:[%s6421_s16 + $0x39a] sm:$0xff] }
  0x3c   : > { %4608 = vrot.lane.b32.xlu0 %v4607_v40, %s9941_s29  ;;  %v350_v40 = vld [vmem:[%s6416_s13 + $0x188] sm:$0xff]  ;;  %v6571_v62 = vpack.i.bf16 %v362_v58, %v361_v57  ;;  %v367_v3 = vld [vmem:[%s6416_s13 + $0x292] sm:$0xff]  ;;  %v368_v4 = vld [vmem:[%s6416_s13 + $0x39a] sm:$0xff] }
  0x3d   : > { %4613 = vrot.lane.b32.xlu1 %v4612_v41, %s9941_s29  ;;  %v351_v41 = vld [vmem:[%s6416_s13 + $0x290] sm:$0xff]  ;;  %v4697_v43 = vpack.i.bf16 %v350_v40, %v349_v39  ;;  %v4742_v6 = vpack.i.bf16 %v368_v4, %v367_v3  ;;  %v369_v8 = vld [vmem:[%s6421_s16 + $0x83] sm:$0xff]  ;;  %v376_v21 = vld [vmem:[%s6416_s13 + $0x39b] sm:$0xff] }
  0x3e   : > { %v4702_v44 = vpack.i.bf16 %v352_v42, %v351_v41  ;;  %v370_v10 = vld [vmem:[%s6421_s16 + $0x18b] sm:$0xff]  ;;  %v371_v11 = vld [vmem:[%s6421_s16 + $0x293] sm:$0xff]  ;;  %v373_v16 = vld [vmem:[%s6416_s13 + $0x83] sm:$0xff] }
  0x3f   : > { %v374_v17 = vld [vmem:[%s6416_s13 + $0x18b] sm:$0xff]  ;;  %v375_v18 = vld [vmem:[%s6416_s13 + $0x293] sm:$0xff]  ;;  %v380_v27 = vld [vmem:[%s6421_s16 + $0x39c] sm:$0xff] }
  0x40   : > { %4618 = vrot.lane.b32.xlu0 %v4617_v46, %s9939_s9  ;;  %v354_v46 = vld [vmem:[%s6421_s16 + $0x189] sm:$0xff]  ;;  %v4757_v22 = vpack.i.bf16 %v374_v17, %v373_v16  ;;  %v4762_v23 = vpack.i.bf16 %v376_v21, %v375_v18  ;;  %v383_v34 = vld [vmem:[%s6416_s13 + $0x294] sm:$0xff]  ;;  %v384_v35 = vld [vmem:[%s6416_s13 + $0x39c] sm:$0xff] }
  0x41   : > { %4623 = vrot.lane.b32.xlu1 %v4622_v47, %s9939_s9  ;;  %v355_v47 = vld [vmem:[%s6421_s16 + $0x291] sm:$0xff]  ;;  %v6553_v49 = vpack.i.bf16 %v354_v46, %v353_v45  ;;  %v377_v24 = vld [vmem:[%s6421_s16 + $0x84] sm:$0xff]  ;;  %v1176_v39 = vld [vmem:[%s6421_s16 + $0x17a] sm:$0xff] }
  0x42   : > { %v6556_v50 = vpack.i.bf16 %v356_v48, %v355_v47  ;;  %v381_v30 = vld [vmem:[%s6416_s13 + $0x84] sm:$0xff]  ;;  %v382_v33 = vld [vmem:[%s6416_s13 + $0x18c] sm:$0xff]  ;;  %v395_v53 = vld [vmem:[%s6421_s16 + $0x296] sm:$0xff] }
  0x43   : > { %v4777_v36 = vpack.i.bf16 %v382_v33, %v381_v30  ;;  %v389_v41 = vld [vmem:[%s6416_s13 + $0x85] sm:$0xff]  ;;  %v390_v42 = vld [vmem:[%s6416_s13 + $0x18d] sm:$0xff]  ;;  %v1172_v16 = vld [vmem:[%s6421_s16 + $0x179] sm:$0xff] }
  0x44   : > { %4628 = vrot.lane.b32.xlu0 %v4627_v52, %s9893_s10  ;;  %v358_v52 = vld [vmem:[%s6416_s13 + $0x189] sm:$0xff]  ;;  %v4797_v45 = vpack.i.bf16 %v390_v42, %v389_v41  ;;  %v396_v54 = vld [vmem:[%s6421_s16 + $0x39e] sm:$0xff]  ;;  %v1191_v17 = vld [vmem:[%s6421_s16 + $0x76] sm:$0xff] }
  0x45   : > { %4633 = vrot.lane.b32.xlu1 %v4632_v55, %s9893_s10  ;;  %v4717_v55 = vpack.i.bf16 %v358_v52, %v357_v51  ;;  %v393_v46 = vld [vmem:[%s6421_s16 + $0x86] sm:$0xff]  ;;  %v394_v48 = vld [vmem:[%s6421_s16 + $0x18e] sm:$0xff]  ;;  %v6646_v57 = vpack.i.bf16 %v396_v54, %v395_v53  ;;  %v1192_v18 = vld [vmem:[%s6421_s16 + $0x17e] sm:$0xff] }
  0x46   : > { %v1177_v51 = vld [vmem:[%s6421_s16 + $0x282] sm:$0xff]  ;;  %v1178_v52 = vld [vmem:[%s6421_s16 + $0x38a] sm:$0xff] }
  0x47   : > { %v397_v58 = vld [vmem:[%s6416_s13 + $0x86] sm:$0xff] }
  0x48   : > { %4638 = vrot.lane.b32.xlu0 %v4637_v0, %s9891_s11  ;;  %v6574_v0 = vpack.i.bf16 %v364_v61, %v363_v59  ;;  %v398_v59 = vld [vmem:[%s6416_s13 + $0x18e] sm:$0xff]  ;;  %v399_v61 = vld [vmem:[%s6416_s13 + $0x296] sm:$0xff]  ;;  %v1181_v41 = vld [vmem:[%s6421_s16 + $0x283] sm:$0xff] }
  0x49   : > { %4643 = vrot.lane.b32.xlu1 %v4642_v1, %s9891_s11  ;;  %v365_v1 = vld [vmem:[%s6416_s13 + $0x82] sm:$0xff]  ;;  %v1182_v42 = vld [vmem:[%s6421_s16 + $0x38b] sm:$0xff] }
  0x4a   : > { %v4737_v5 = vpack.i.bf16 %v366_v2, %v365_v1  ;;  %v400_v1 = vld [vmem:[%s6416_s13 + $0x39e] sm:$0xff]  ;;  %v4817_v2 = vpack.i.bf16 %v398_v59, %v397_v58  ;;  %v405_v4 = vld [vmem:[%s6416_s13 + $0x87] sm:$0xff] }
  0x4b   : > { %v4822_v3 = vpack.i.bf16 %v400_v1, %v399_v61 }
  0x4c   : > { %4648 = vrot.lane.b32.xlu0 %v4647_v12, %s9936_s12  ;;  %v372_v12 = vld [vmem:[%s6421_s16 + $0x39b] sm:$0xff] }
  0x4d   : > { %4653 = vrot.lane.b32.xlu1 %v4652_v14, %s9936_s12  ;;  %v6589_v14 = vpack.i.bf16 %v370_v10, %v369_v8  ;;  %v6592_v15 = vpack.i.bf16 %v372_v12, %v371_v11  ;;  %v408_v8 = vld [vmem:[%s6416_s13 + $0x39f] sm:$0xff]  ;;  %v1171_v11 = vld [vmem:[%s6421_s16 + $0x71] sm:$0xff] }
  0x4e   : > { %v4847_v30 = vpack.i.bf16 %v1172_v16, %v1171_v11 }
  0x50   : > { %4658 = vrot.lane.b32.xlu0 %v6511_v19, %s9887_s14 }
  0x51   : > { %4663 = vrot.lane.b32.xlu1 %v6514_v20, %s9887_s14  ;;  %s9934_s14 = smov 56  }
  0x54   : > { %4668 = vrot.lane.b32.xlu0 %v4667_v25, %s9889_s15  ;;  %v378_v25 = vld [vmem:[%s6421_s16 + $0x18c] sm:$0xff] }
  0x55   : > { %4673 = vrot.lane.b32.xlu1 %v4672_v26, %s9889_s15  ;;  %s9908_s15 = smov 60   ;;  %v379_v26 = vld [vmem:[%s6421_s16 + $0x294] sm:$0xff]  ;;  %v6607_v28 = vpack.i.bf16 %v378_v25, %v377_v24  ;;  %v6674_v24 = vpack.i.bf16 %v1192_v18, %v1191_v17 }
  0x56   : > { %v6610_v29 = vpack.i.bf16 %v380_v27, %v379_v26  ;;  %v1193_v26 = vld [vmem:[%s6421_s16 + $0x286] sm:$0xff]  ;;  %v1194_v27 = vld [vmem:[%s6421_s16 + $0x38e] sm:$0xff] }
  0x57   : > { %v6681_v33 = vpack.i.bf16 %v1194_v27, %v1193_v26 }
  0x58   : > { %4678 = vrot.lane.b32.xlu0 %v6529_v31, %s9934_s14 }
  0x59   : > { %4683 = vrot.lane.b32.xlu1 %v6532_v32, %s9934_s14 }
  0x5c   : > { %4688 = vrot.lane.b32.xlu0 %v4687_v37, %s9908_s15  ;;  %v4782_v37 = vpack.i.bf16 %v384_v35, %v383_v34 }
  0x5d   : > { %4693 = vrot.lane.b32.xlu1 %v4692_v38, %s9908_s15  ;;  %v1175_v38 = vld [vmem:[%s6421_s16 + $0x72] sm:$0xff] }
  0x5e   : > { %v6622_v40 = vpack.i.bf16 %v1176_v39, %v1175_v38  ;;  %v1180_v38 = vld [vmem:[%s6421_s16 + $0x17b] sm:$0xff] }
  0x60   : > { %4698 = vrot.lane.b32.xlu0 %v4697_v43, %s9906_s17  ;;  %10006 = vst [vmem:[#allocation11_spill] sm:$0xff] %v6622_v40  ;;  %v391_v43 = vld [vmem:[%s6416_s13 + $0x295] sm:$0xff] }
  0x61   : > { %4703 = vrot.lane.b32.xlu1 %v4702_v44, %s9906_s17  ;;  %v392_v44 = vld [vmem:[%s6416_s13 + $0x39d] sm:$0xff] }
  0x62   : > { %v4802_v47 = vpack.i.bf16 %v392_v44, %v391_v43 }
  0x64   : > { %4708 = vrot.lane.b32.xlu0 %v6553_v49, %s9901_s18 }
  0x65   : > { %4713 = vrot.lane.b32.xlu1 %v6556_v50, %s9901_s18 }
  0x68   : > { %4718 = vrot.lane.b32.xlu0 %v4717_v55, %s9899_s19  ;;  %v6640_v55 = vpack.i.bf16 %v1178_v52, %v1177_v51  ;;  %v1185_v51 = vld [vmem:[%s6421_s16 + $0x284] sm:$0xff]  ;;  %v1186_v52 = vld [vmem:[%s6421_s16 + $0x38c] sm:$0xff] }
  0x69   : > { %4723 = vrot.lane.b32.xlu1 %v4722_v56, %s9899_s19  ;;  %v6643_v56 = vpack.i.bf16 %v394_v48, %v393_v46  ;;  %v1184_v46 = vld [vmem:[%s6421_s16 + $0x17c] sm:$0xff]  ;;  %v4882_v58 = vpack.i.bf16 %v1186_v52, %v1185_v51 }
  0x6a   : > { %10007 = vst [vmem:[#allocation12_spill] sm:$0xff] %v6640_v55 }
  0x6c   : > { %4728 = vrot.lane.b32.xlu0 %v6571_v62, %s9896_s20 }
  0x6d   : > { %4733 = vrot.lane.b32.xlu1 %v6574_v0, %s9896_s20 }
  0x70   : > { %4738 = vrot.lane.b32.xlu0 %v4737_v5, %s9945_s26  ;;  %v406_v5 = vld [vmem:[%s6416_s13 + $0x18f] sm:$0xff] }
  0x71   : > { %4743 = vrot.lane.b32.xlu1 %v4742_v6, %s9945_s26  ;;  %v407_v6 = vld [vmem:[%s6416_s13 + $0x297] sm:$0xff]  ;;  %v4837_v10 = vpack.i.bf16 %v406_v5, %v405_v4  ;;  %s10034_s13 = smov 36  }
  0x72   : > { %v4842_v12 = vpack.i.bf16 %v408_v8, %v407_v6 }
  0x74   : > { %4748 = vrot.lane.b32.xlu0 %v6589_v14, %s9943_s28 }
  0x75   : > { %4753 = vrot.lane.b32.xlu1 %v6592_v15, %s9943_s28 }
  0x78   : > { %4758 = vrot.lane.b32.xlu0 %v4757_v22, %s9941_s29  ;;  %v1173_v22 = vld [vmem:[%s6421_s16 + $0x281] sm:$0xff] }
  0x79   : > { %4763 = vrot.lane.b32.xlu1 %v4762_v23, %s9941_s29  ;;  %v1174_v23 = vld [vmem:[%s6421_s16 + $0x389] sm:$0xff] }
  0x7a   : > { %v4852_v34 = vpack.i.bf16 %v1174_v23, %v1173_v22 }
  0x7c   : > { %4768 = vrot.lane.b32.xlu0 %v6607_v28, %s9939_s9 }
  0x7d   : > { %4773 = vrot.lane.b32.xlu1 %v6610_v29, %s9939_s9 }
  0x80   : > { %4778 = vrot.lane.b32.xlu0 %v4777_v36, %s9893_s10 }
  0x81   : > { %4783 = vrot.lane.b32.xlu1 %v4782_v37, %s9893_s10  ;;  %s10009_s10 = smov 52   ;;  %v1179_v37 = vld [vmem:[%s6421_s16 + $0x73] sm:$0xff] }
  0x82   : > { %v4867_v44 = vpack.i.bf16 %v1180_v38, %v1179_v37 }
  0x84   : > { %4788 = vrot.lane.b32.xlu0 %v6484_v60, %s9891_s11 }
  0x85   : > { %4793 = vrot.lane.b32.xlu1 %v6488_v63, %s9891_s11  ;;  %s10008_s11 = smov 48  }
  0x88   : > { %4798 = vrot.lane.b32.xlu0 %v4797_v45, %s9936_s12  ;;  %v1183_v45 = vld [vmem:[%s6421_s16 + $0x74] sm:$0xff] }
  0x89   : > { %4803 = vrot.lane.b32.xlu1 %v4802_v47, %s9936_s12  ;;  %v4872_v47 = vpack.i.bf16 %v1182_v42, %v1181_v41  ;;  %v4877_v54 = vpack.i.bf16 %v1184_v46, %v1183_v45  ;;  %v6765_v46 = vld [vmem:[%s6421_s16 + $0x88] sm:$0xff] }
  0x8a   : > { %4354 = vmatprep.mubr.msk.f32.mxu0 %vm653_vm0, %v6765_v46 }
  0x8c   : > { %4808 = vrot.lane.b32.xlu0 %v6643_v56, %s10008_s11 }
  0x8d   : > { %4813 = vrot.lane.b32.xlu1 %v6646_v57, %s10008_s11 }
  0x90   : > { %4818 = vrot.lane.b32.xlu0 %v4817_v2, %s10009_s10 }
  0x91   : > { %4823 = vrot.lane.b32.xlu1 %v4822_v3, %s10009_s10 }
  0x94   : > { %4828 = vrot.lane.b32.xlu0 %v6498_v9, %s9934_s14 }
  0x95   : > { %4833 = vrot.lane.b32.xlu1 %v6503_v13, %s9934_s14 }
  0x96   : > { %v6670_v21 = vpop.permute.xlu0 %4548 }
  0x97   : > { %v6676_v25 = vpop.permute.xlu1 %4558 }
  0x98   : > { %4838 = vrot.lane.b32.xlu0 %v4837_v10, %s9908_s15 }
  0x99   : > { %4843 = vrot.lane.b32.xlu1 %v4842_v12, %s9908_s15  ;;  %s9932_s15 = smov 64  }
  0x9a   : > { %v6684_v35 = vpop.permute.xlu0 %4553 }
  0x9b   : > { %v6686_v36 = vpop.permute.xlu1 %4563 }
  0x9c   : > { %4848 = vrot.lane.b32.xlu0 %v4847_v30, %s9906_s17 }
  0x9d   : > { %4853 = vrot.lane.b32.xlu1 %v4852_v34, %s9906_s17  ;;  %s10037_s17 = smov 4  }
  0x9e   : > { %v6692_v39 = vpop.permute.xlu0 %4568 }
  0x9f   : > { %v6696_v43 = vpop.permute.xlu1 %4573 }
  0xa0   : > { %4858 = vrot.lane.b32.xlu0 %v6622_v40, %s9901_s18  ;;  %v1064_v40 = vld [vmem:[%s9882_s2 + $0x78] sm:$0xff] }
  0xa1   : > { %4863 = vrot.lane.b32.xlu1 %v6640_v55, %s9901_s18  ;;  %s10035_s18 = smov 40  }
  0xa2   : > { %v6704_v48 = vpop.permute.xlu0 %4578 }
  0xa3   : > { %v6708_v53 = vpop.permute.xlu1 %4583 }
  0xa4   : > { %10010 = vst [vmem:[#allocation13_spill] sm:$0xff] %v6708_v53  ;;  %4868 = vrot.lane.b32.xlu0 %v4867_v44, %s9899_s19 }
  0xa5   : > { %4873 = vrot.lane.b32.xlu1 %v4872_v47, %s9899_s19  ;;  %s10036_s19 = smov 60  }
  0xa6   : > { %v6712_v59 = vpop.permute.xlu0 %4588 }
  0xa7   : > { %10011 = vst [vmem:[#allocation14_spill] sm:$0xff] %v6712_v59  ;;  %v6714_v61 = vpop.permute.xlu1 %4593  ;;  %v1056_v59 = vld [vmem:[%s9882_s2 + $0x38] sm:$0xff] }
  0xa8   : > { %10012 = vst [vmem:[#allocation15_spill] sm:$0xff] %v6714_v61  ;;  %4878 = vrot.lane.b32.xlu0 %v4877_v54, %s9896_s20 }
  0xa9   : > { %4883 = vrot.lane.b32.xlu1 %v4882_v58, %s9896_s20  ;;  %v9921_v58 = vmov 0.0   ;;  %s10038_s20 = smov 8  }
  0xaa   : > { %v6718_v1 = vpop.permute.xlu0 %4598  ;;  %1082 = vmatprep.subr.mxu0 %v9921_v58  ;;  %1824 = vmatprep.subr.mxu1 %v9921_v58 }
  0xab   : > { %10013 = vst [vmem:[#allocation16_spill] sm:$0xff] %v6718_v1  ;;  %v6720_v2 = vpop.permute.xlu1 %4603  ;;  %1083 = vmatpush1.msra.mxu0 %v1064_v40  ;;  %v347_v40 = vld [vmem:[%s6421_s16 + $0x290] sm:$0xff] }
  0xac   : > { %10014 = vst [vmem:[#allocation17_spill] sm:$0xff] %v6720_v2  ;;  %1084 = vmatprep.subr.mxu0 %v9921_v58 }
  0xae   : > { %v6722_v3 = vpop.permute.xlu0 %4608 }
  0xaf   : > { %10015 = vst [vmem:[#allocation18_spill] sm:$0xff] %v6722_v3  ;;  %v6724_v4 = vpop.permute.xlu1 %4613 }
  0xb0   : > { %10016 = vst [vmem:[#allocation19_spill] sm:$0xff] %v6724_v4 }
  0xb2   : > { %v6726_v5 = vpop.permute.xlu0 %4618 }
  0xb3   : > { %10017 = vst [vmem:[#allocation20_spill] sm:$0xff] %v6726_v5  ;;  %v6728_v6 = vpop.permute.xlu1 %4623  ;;  %v346_v5 = vld [vmem:[%s6421_s16 + $0x188] sm:$0xff] }
  0xb4   : > { %10018 = vst [vmem:[#allocation21_spill] sm:$0xff] %v6728_v6 }
  0xb6   : > { %v6730_v8 = vpop.permute.xlu0 %4628 }
  0xb7   : > { %10019 = vst [vmem:[#allocation22_spill] sm:$0xff] %v6730_v8  ;;  %v6732_v10 = vpop.permute.xlu1 %4633  ;;  %v10033_v8 = vmov 0.0  }
  0xb8   : > { %10020 = vst [vmem:[#allocation23_spill] sm:$0xff] %v6732_v10  ;;  %v1061_v10 = vld [vmem:[%s9882_s2 + $0x60] sm:$0xff] }
  0xba   : > { %v6734_v11 = vpop.permute.xlu0 %4638 }
  0xbb   : > { %10021 = vst [vmem:[#allocation24_spill] sm:$0xff] %v6734_v11  ;;  %v6736_v12 = vpop.permute.xlu1 %4643 }
  0xbc   : > { %10022 = vst [vmem:[#allocation25_spill] sm:$0xff] %v6736_v12 }
  0xbe   : > { %v6738_v16 = vpop.permute.xlu0 %4648 }
  0xbf   : > { %10023 = vst [vmem:[#allocation26_spill] sm:$0xff] %v6738_v16  ;;  %v6740_v17 = vpop.permute.xlu1 %4653 }
  0xc0   : > { %10024 = vst [vmem:[#allocation27_spill] sm:$0xff] %v6740_v17 }
  0xc2   : > { %v6742_v18 = vpop.permute.xlu0 %4658 }
  0xc3   : > { %10025 = vst [vmem:[#allocation28_spill] sm:$0xff] %v6742_v18  ;;  %v6744_v22 = vpop.permute.xlu1 %4663  ;;  %v1059_v18 = vld [vmem:[%s9882_s2 + $0x50] sm:$0xff] }
  0xc4   : > { %10026 = vst [vmem:[#allocation29_spill] sm:$0xff] %v6744_v22  ;;  %v1062_v22 = vld [vmem:[%s9882_s2 + $0x68] sm:$0xff] }
  0xc6   : > { %v6746_v23 = vpop.permute.xlu0 %4668 }
  0xc7   : > { %10027 = vst [vmem:[#allocation30_spill] sm:$0xff] %v6746_v23  ;;  %v6748_v26 = vpop.permute.xlu1 %4673 }
  0xc8   : > { %10028 = vst [vmem:[#allocation31_spill] sm:$0xff] %v6748_v26 }
  0xca   : > { %v6750_v27 = vpop.permute.xlu0 %4678 }
  0xcb   : > { %10029 = vst [vmem:[#allocation32_spill] sm:$0xff] %v6750_v27  ;;  %v6752_v30 = vpop.permute.xlu1 %4683 }
  0xcc   : > { %10030 = vst [vmem:[#allocation33_spill] sm:$0xff] %v6752_v30 }
  0xce   : > { %v6754_v34 = vpop.permute.xlu0 %4688 }
  0xcf   : > { %10031 = vst [vmem:[#allocation34_spill] sm:$0xff] %v6754_v34  ;;  %v6756_v37 = vpop.permute.xlu1 %4693 }
  0xd0   : > { %10032 = vst [vmem:[#allocation35_spill] sm:$0xff] %v6756_v37  ;;  %v1063_v37 = vld [vmem:[%s9882_s2 + $0x70] sm:$0xff] }
  0xd1   : > { %1085 = vmatpush1.msra.mxu0 %v1063_v37  ;;  %v348_v37 = vld [vmem:[%s6421_s16 + $0x398] sm:$0xff] }
  0xd2   : > { %v6758_v38 = vpop.permute.xlu0 %4698  ;;  %1086 = vmatprep.subr.mxu0 %v9921_v58 }
  0xd3   : > { %v4704_v41 = vpop.permute.xlu1 %4703  ;;  %1087 = vmatpush1.msra.mxu0 %v1062_v22  ;;  %v1060_v22 = vld [vmem:[%s9882_s2 + $0x58] sm:$0xff]  ;;  %v4701_v6 = vunpack.i.h.bf16 %v6758_v38 }
  0xd4   : > { %v4705_v17 = vunpack.i.l.bf16 %v4704_v41  ;;  %v4706_v34 = vunpack.i.h.bf16 %v4704_v41  ;;  %1088 = vmatprep.subr.mxu0 %v9921_v58 }
  0xd5   : > { %1089 = vmatpush1.msra.mxu0 %v1061_v10 }
  0xd6   : > { %v6760_v42 = vpop.permute.xlu0 %4708  ;;  %1090 = vmatprep.subr.mxu0 %v9921_v58  ;;  %v970_v41 = vsel %vm653_vm0, %v347_v40, %v4705_v17  ;;  %v971_v10 = vsel %vm653_vm0, %v348_v37, %v4706_v34  ;;  %v4700_v17 = vunpack.i.l.bf16 %v6758_v38  ;;  %v1058_v34 = vld [vmem:[%s9882_s2 + $0x48] sm:$0xff]  ;;  %v345_v37 = vld [vmem:[%s6421_s16 + $0x80] sm:$0xff]  ;;  %v969_v38 = vsel %vm653_vm0, %v346_v5, %v4701_v6 }
  0xd7   : > { %v4714_v44 = vpop.permute.xlu1 %4713  ;;  %1091 = vmatpush1.msra.mxu0 %v1060_v22  ;;  %v4710_v22 = vunpack.i.l.bf16 %v6760_v42 }
  0xd8   : > { %v4715_v23 = vunpack.i.l.bf16 %v4714_v44  ;;  %v4716_v16 = vunpack.i.h.bf16 %v4714_v44  ;;  %1092 = vmatprep.subr.mxu0 %v10033_v8  ;;  %v968_v61 = vsel %vm653_vm0, %v345_v37, %v4700_v17 }
  0xd9   : > { %1093 = vmatpush1.msra.mxu0 %v1059_v18 }
  0xda   : > { %v6762_v45 = vpop.permute.xlu0 %4718  ;;  %v974_v44 = vsel %vm658_vm1, %v970_v41, %v4715_v23  ;;  %1094 = vmatprep.subr.mxu0 %v10033_v8  ;;  %v975_v18 = vsel %vm658_vm1, %v971_v10, %v4716_v16  ;;  %v1057_v23 = vld [vmem:[%s9882_s2 + $0x40] sm:$0xff] }
  0xdb   : > { %v6767_v47 = vpop.permute.xlu1 %4723  ;;  %1095 = vmatpush1.msra.mxu0 %v1058_v34  ;;  %v4721_v16 = vunpack.i.h.bf16 %v6762_v45  ;;  %v4720_v10 = vunpack.i.l.bf16 %v6762_v45  ;;  %v972_v45 = vsel %vm658_vm1, %v968_v61, %v4710_v22 }
  0xdc   : > { %v4725_v4 = vunpack.i.l.bf16 %v6767_v47  ;;  %v4726_v40 = vunpack.i.h.bf16 %v6767_v47  ;;  %v4711_v47 = vunpack.i.h.bf16 %v6760_v42  ;;  %1096 = vmatprep.subr.mxu0 %v10033_v8 }
  0xdd   : > { %1097 = vmatpush1.msra.mxu0 %v1057_v23  ;;  %v976_v61 = vsel %vm663_vm2, %v972_v45, %v4720_v10 }
  0xde   : > { %v6771_v51 = vpop.permute.xlu0 %4728  ;;  %v978_v34 = vsel %vm663_vm2, %v974_v44, %v4725_v4  ;;  %v979_v5 = vsel %vm663_vm2, %v975_v18, %v4726_v40  ;;  %1098 = vmatprep.subr.mxu0 %v10033_v8  ;;  %v1055_v4 = vld [vmem:[%s9882_s2 + $0x30] sm:$0xff]  ;;  %v973_v40 = vsel %vm658_vm1, %v969_v38, %v4711_v47 }
  0xdf   : > { %v6773_v52 = vpop.permute.xlu1 %4733  ;;  %v4731_v6 = vunpack.i.h.bf16 %v6771_v51  ;;  %v4730_v42 = vunpack.i.l.bf16 %v6771_v51  ;;  %1099 = vmatpush1.msra.mxu0 %v1056_v59 }
  0xe0   : > { %v4735_v41 = vunpack.i.l.bf16 %v6773_v52  ;;  %v4736_v1 = vunpack.i.h.bf16 %v6773_v52  ;;  %1100 = vmatprep.subr.mxu0 %v10033_v8 }
  0xe1   : > { %1101 = vmatpush1.msra.mxu0 %v1055_v4  ;;  %v980_v38 = vsel %vm668_vm3, %v976_v61, %v4730_v42 }
  0xe2   : > { %v6775_v54 = vpop.permute.xlu0 %4738  ;;  %v982_v37 = vsel %vm668_vm3, %v978_v34, %v4735_v41  ;;  %v983_v22 = vsel %vm668_vm3, %v979_v5, %v4736_v1  ;;  %1102 = vmatprep.subr.mxu0 %v10033_v8  ;;  %v1053_v1 = vld [vmem:[%s9882_s2 + $0x20] sm:$0xff] }
  0xe3   : > { %v6779_v55 = vpop.permute.xlu1 %4743  ;;  %v4741_v52 = vunpack.i.h.bf16 %v6775_v54  ;;  %v4740_v17 = vunpack.i.l.bf16 %v6775_v54  ;;  %v977_v54 = vsel %vm663_vm2, %v973_v40, %v4721_v16  ;;  %v1054_v16 = vld [vmem:[%s9882_s2 + $0x28] sm:$0xff] }
  0xe4   : > { %v4745_v44 = vunpack.i.l.bf16 %v6779_v55  ;;  %v4746_v18 = vunpack.i.h.bf16 %v6779_v55  ;;  %v981_v55 = vsel %vm668_vm3, %v977_v54, %v4731_v6  ;;  %1103 = vmatpush1.msra.mxu0 %v1054_v16  ;;  %v1051_v54 = vld [vmem:[%s9882_s2 + $0x10] sm:$0xff] }
  0xe5   : > { %v985_v10 = vsel %vm673_vm4, %v981_v55, %v4741_v52  ;;  %1104 = vmatprep.subr.mxu0 %v10033_v8  ;;  %v1052_v52 = vld [vmem:[%s9882_s2 + $0x18] sm:$0xff] }
  0xe6   : > { %v6787_v30 = vpop.permute.xlu0 %4748  ;;  %v986_v34 = vsel %vm673_vm4, %v982_v37, %v4745_v44  ;;  %1105 = vmatpush1.msra.mxu0 %v1053_v1 }
  0xe7   : > { %v6789_v26 = vpop.permute.xlu1 %4753  ;;  %v4750_v23 = vunpack.i.l.bf16 %v6787_v30  ;;  %v4751_v59 = vunpack.i.h.bf16 %v6787_v30  ;;  %v984_v30 = vsel %vm673_vm4, %v980_v38, %v4740_v17  ;;  %1106 = vmatprep.subr.mxu0 %v10033_v8 }
  0xe8   : > { %v4756_v47 = vunpack.i.h.bf16 %v6789_v26  ;;  %v4755_v41 = vunpack.i.l.bf16 %v6789_v26  ;;  %v987_v26 = vsel %vm673_vm4, %v983_v22, %v4746_v18  ;;  %1107 = vmatpush1.msra.mxu0 %v1052_v52 }
  0xe9   : > { %v988_v6 = vsel %vm678_vm5, %v984_v30, %v4750_v23  ;;  %v989_v17 = vsel %vm678_vm5, %v985_v10, %v4751_v59  ;;  %1108 = vmatprep.subr.mxu0 %v10033_v8 }
  0xea   : > { %v6796_v12 = vpop.permute.xlu0 %4758  ;;  %v990_v18 = vsel %vm678_vm5, %v986_v34, %v4755_v41  ;;  %1109 = vmatpush1.msra.mxu0 %v1051_v54 }
  0xeb   : > { %v6802_v27 = vpop.permute.xlu1 %4763  ;;  %v4761_v42 = vunpack.i.h.bf16 %v6796_v12  ;;  %v4760_v4 = vunpack.i.l.bf16 %v6796_v12  ;;  %v991_v12 = vsel %vm678_vm5, %v987_v26, %v4756_v47  ;;  %1110 = vmatprep.subr.mxu0 %v10033_v8 }
  0xec   : > { %v4766_v44 = vunpack.i.h.bf16 %v6802_v27  ;;  %v4765_v40 = vunpack.i.l.bf16 %v6802_v27 }
  0xed   : > { %v993_v47 = vsel %vm683_vm6, %v989_v17, %v4761_v42 }
  0xee   : > { %v6814_v11 = vpop.permute.xlu0 %4768  ;;  %v995_v30 = vsel %vm683_vm6, %v991_v12, %v4766_v44 }
  0xef   : > { %v6818_v58 = vpop.permute.xlu1 %4773  ;;  %v4770_v37 = vunpack.i.l.bf16 %v6814_v11  ;;  %v4771_v23 = vunpack.i.h.bf16 %v6814_v11  ;;  %v992_v11 = vsel %vm683_vm6, %v988_v6, %v4760_v4 }
  0xf0   : > { %v4775_v61 = vunpack.i.l.bf16 %v6818_v58  ;;  %v4776_v27 = vunpack.i.h.bf16 %v6818_v58  ;;  %v994_v58 = vsel %vm683_vm6, %v990_v18, %v4765_v40 }
  0xf1   : > { %v996_v10 = vsel %vm9970_vm7, %v992_v11, %v4770_v37 }
  0xf2   : > { %v6833_v3 = vpop.permute.xlu0 %4778  ;;  %v998_v26 = vsel %vm9970_vm7, %v994_v58, %v4775_v61  ;;  %v999_v4 = vsel %vm9970_vm7, %v995_v30, %v4776_v27 }
  0xf3   : > { %v6841_v2 = vpop.permute.xlu1 %4783  ;;  %v4781_v22 = vunpack.i.h.bf16 %v6833_v3  ;;  %v4780_v59 = vunpack.i.l.bf16 %v6833_v3  ;;  %v1050_v3 = vld [vmem:[%s9882_s2 + $0x8] sm:$0xff] }
  0xf4   : > { %v4785_v38 = vunpack.i.l.bf16 %v6841_v2  ;;  %v4786_v41 = vunpack.i.h.bf16 %v6841_v2  ;;  %v997_v2 = vsel %vm9970_vm7, %v993_v47, %v4771_v23  ;;  %1111 = vmatpush1.msra.mxu0 %v1050_v3  ;;  %v1049_v23 = vld [vmem:[%s9882_s2] sm:$0xff] }
  0xf5   : > { %v1000_v52 = vsel %vm9968_vm8, %v996_v10, %v4780_v59  ;;  %v1001_v17 = vsel %vm9968_vm8, %v997_v2, %v4781_v22  ;;  %1112 = vmatprep.subr.mxu0 %v10033_v8 }
  0xf6   : > { %v6863_v51 = vpop.permute.xlu0 %4788  ;;  %v1003_v40 = vsel %vm9968_vm8, %v999_v4, %v4786_v41  ;;  %1113 = vmatpush1.msra.mxu0 %v1049_v23 }
  0xf7   : > { %v6869_v53 = vpop.permute.xlu1 %4793  ;;  %v4790_v16 = vunpack.i.l.bf16 %v6863_v51  ;;  %v4791_v34 = vunpack.i.h.bf16 %v6863_v51  ;;  %v1002_v51 = vsel %vm9968_vm8, %v998_v26, %v4785_v38  ;;  %1144 = vmatprep.subr.mxu0 %v10033_v8 }
  0xf8   : > { %v4796_v6 = vunpack.i.h.bf16 %v6869_v53  ;;  %v4795_v42 = vunpack.i.l.bf16 %v6869_v53 }
  0xf9   : > { %v1004_v37 = vsel %vm9969_vm9, %v1000_v52, %v4790_v16  ;;  %v1005_v61 = vsel %vm9969_vm9, %v1001_v17, %v4791_v34 }
  0xfa   : > { %v6890_v5 = vpop.permute.xlu0 %4798  ;;  %v1006_v22 = vsel %vm9969_vm9, %v1002_v51, %v4795_v42  ;;  %v1007_v59 = vsel %vm9969_vm9, %v1003_v40, %v4796_v6 }
  0xfb   : > { %v6896_v45 = vpop.permute.xlu1 %4803  ;;  %v4801_v18 = vunpack.i.h.bf16 %v6890_v5  ;;  %v4800_v53 = vunpack.i.l.bf16 %v6890_v5  ;;  %v1065_v5 = vld [vmem:[%s9882_s2 + $0x80] sm:$0xf] }
  0xfc   : > { %v4806_v54 = vunpack.i.h.bf16 %v6896_v45  ;;  %v4805_v27 = vunpack.i.l.bf16 %v6896_v45  ;;  %4353 = vmatpush2.msk.msra.mxu0 %vm9938_vm15, %v1065_v5  ;;  %vm9953_vm15 = vcmask 523264  }
  0xfd   : > { %v1008_v58 = vsel %vm9954_vm10, %v1004_v37, %v4800_v53  ;;  %v1009_v30 = vsel %vm9954_vm10, %v1005_v61, %v4801_v18  ;;  %2566 = vmatprep.subr.mxu0 %v10033_v8 }
  0xfe   : > { %v6918_v55 = vpop.permute.xlu0 %4808  ;;  %v1011_v26 = vsel %vm9954_vm10, %v1007_v59, %v4806_v54 }
  0xff   : > { %v6924_v1 = vpop.permute.xlu1 %4813  ;;  %v4811_v38 = vunpack.i.h.bf16 %v6918_v55  ;;  %v4810_v11 = vunpack.i.l.bf16 %v6918_v55  ;;  %v1010_v55 = vsel %vm9954_vm10, %v1006_v22, %v4805_v27 }
 0x100   : > { %v4816_v47 = vunpack.i.h.bf16 %v6924_v1  ;;  %v4815_v45 = vunpack.i.l.bf16 %v6924_v1 }
 0x101   : > { %v1012_v42 = vsel %vm708_vm11, %v1008_v58, %v4810_v11  ;;  %v1013_v4 = vsel %vm708_vm11, %v1009_v30, %v4811_v38 }
 0x102   : > { %v4819_v44 = vpop.permute.xlu0 %4818  ;;  %v1014_v51 = vsel %vm708_vm11, %v1010_v55, %v4815_v45 }
 0x103   : > { %v4824_v12 = vpop.permute.xlu1 %4823  ;;  %v4821_v41 = vunpack.i.h.bf16 %v4819_v44  ;;  %v4820_v16 = vunpack.i.l.bf16 %v4819_v44  ;;  %v1015_v44 = vsel %vm708_vm11, %v1011_v26, %v4816_v47 }
 0x104   : > { %v4826_v10 = vunpack.i.h.bf16 %v4824_v12  ;;  %v4825_v34 = vunpack.i.l.bf16 %v4824_v12 }
 0x105   : > { %v1016_v40 = vsel %vm713_vm12, %v1012_v42, %v4820_v16  ;;  %v1017_v37 = vsel %vm713_vm12, %v1013_v4, %v4821_v41  ;;  %v1187_v41 = vld [vmem:[%s6421_s16 + $0x75] sm:$0xff]  ;;  %v1188_v16 = vld [vmem:[%s6421_s16 + $0x17d] sm:$0xff]  ;;  %v1197_v42 = vld [vmem:[%s6421_s16 + $0x287] sm:$0xff] }
 0x106   : > { %v4829_v3 = vpop.permute.xlu0 %4828  ;;  %v1018_v53 = vsel %vm713_vm12, %v1014_v51, %v4825_v34  ;;  %v1019_v12 = vsel %vm713_vm12, %v1015_v44, %v4826_v10  ;;  %v1189_v10 = vld [vmem:[%s6421_s16 + $0x285] sm:$0xff]  ;;  %v1190_v34 = vld [vmem:[%s6421_s16 + $0x38d] sm:$0xff]  ;;  %v4892_v55 = vpack.i.bf16 %v1188_v16, %v1187_v41  ;;  %v7003_v51 = vld [vmem:[%s6421_s16 + $0x78] sm:$0xff] }
 0x107   : > { %v4834_v2 = vpop.permute.xlu1 %4833  ;;  %v4831_v6 = vunpack.i.h.bf16 %v4829_v3  ;;  %v4830_v1 = vunpack.i.l.bf16 %v4829_v3  ;;  %v4902_v26 = vpack.i.bf16 %v1190_v34, %v1189_v10  ;;  %v1198_v4 = vld [vmem:[%s6421_s16 + $0x38f] sm:$0xff]  ;;  %v7006_v44 = vld [vmem:[%s6421_s16 + $0x180] sm:$0xff] }
 0x108   : > { %v4836_v52 = vunpack.i.h.bf16 %v4834_v2  ;;  %v4835_v17 = vunpack.i.l.bf16 %v4834_v2  ;;  %v6106_v41 = vld [vmem:[%s6421_s16 + $0x393] sm:$0xff] }
 0x109   : > { %v1020_v22 = vsel %vm718_vm13, %v1016_v40, %v4830_v1  ;;  %v1021_v59 = vsel %vm718_vm13, %v1017_v37, %v4831_v6  ;;  %v1195_v6 = vld [vmem:[%s6421_s16 + $0x77] sm:$0xff]  ;;  %v1196_v1 = vld [vmem:[%s6421_s16 + $0x17f] sm:$0xff]  ;;  %v7009_v40 = vld [vmem:[%s6421_s16 + $0x288] sm:$0xff] }
 0x10a   : > { %v4839_v18 = vpop.permute.xlu0 %4838  ;;  %v1022_v47 = vsel %vm718_vm13, %v1018_v53, %v4835_v17  ;;  %v1023_v45 = vsel %vm718_vm13, %v1019_v12, %v4836_v52  ;;  %v4917_v52 = vpack.i.bf16 %v1196_v1, %v1195_v6  ;;  %v4922_v17 = vpack.i.bf16 %v1198_v4, %v1197_v42  ;;  %v7012_v37 = vld [vmem:[%s6421_s16 + $0x390] sm:$0xff] }
 0x10b   : > { %v4841_v23 = vunpack.i.h.bf16 %v4839_v18  ;;  %v4840_v61 = vunpack.i.l.bf16 %v4839_v18  ;;  %v4844_v54 = vpop.permute.xlu1 %4843  ;;  %v4927_v18 = vpack.i.bf16 %v7006_v44, %v7003_v51  ;;  %v4932_v53 = vpack.i.bf16 %v7012_v37, %v7009_v40  ;;  %v6097_v12 = vld [vmem:[%s6421_s16 + $0x289] sm:$0xff]  ;;  %v6110_v34 = vld [vmem:[%s6421_s16 + $0x394] sm:$0xff] }
 0x10c   : > { %v4846_v27 = vunpack.i.h.bf16 %v4844_v54  ;;  %v4845_v5 = vunpack.i.l.bf16 %v4844_v54  ;;  %v6099_v54 = vld [vmem:[%s6421_s16 + $0x7a] sm:$0xff]  ;;  %v6109_v10 = vld [vmem:[%s6421_s16 + $0x28c] sm:$0xff] }
 0x10d   : > { %v1024_v38 = vsel %vm723_vm14, %v1020_v22, %v4840_v61  ;;  %v1025_v11 = vsel %vm723_vm14, %v1021_v59, %v4841_v23  ;;  %v6098_v23 = vld [vmem:[%s6421_s16 + $0x391] sm:$0xff] }
 0x10e   : > { %v4887_v3 = vpack.i.bf16 %v1025_v11, %v1024_v38  ;;  %v1026_v58 = vsel %vm723_vm14, %v1022_v47, %v4845_v5  ;;  %v1027_v30 = vsel %vm723_vm14, %v1023_v45, %v4846_v27  ;;  %v4942_v61 = vpack.i.bf16 %v6098_v23, %v6097_v12  ;;  %v6100_v27 = vld [vmem:[%s6421_s16 + $0x182] sm:$0xff]  ;;  %v6101_v22 = vld [vmem:[%s6421_s16 + $0x28a] sm:$0xff]  ;;  %v6102_v59 = vld [vmem:[%s6421_s16 + $0x392] sm:$0xff] }
 0x10f   : > { %v4897_v2 = vpack.i.bf16 %v1027_v30, %v1026_v58  ;;  %v4947_v5 = vpack.i.bf16 %v6100_v27, %v6099_v54  ;;  %v4952_v38 = vpack.i.bf16 %v6102_v59, %v6101_v22  ;;  %v6103_v11 = vld [vmem:[%s6421_s16 + $0x7b] sm:$0xff]  ;;  %v6104_v47 = vld [vmem:[%s6421_s16 + $0x183] sm:$0xff]  ;;  %v6113_v1 = vld [vmem:[%s6421_s16 + $0x28d] sm:$0xff] }
 0x110   : > { %4888 = vrot.lane.b32.xlu0 %v4887_v3, %s9932_s15  ;;  %v4957_v45 = vpack.i.bf16 %v6104_v47, %v6103_v11  ;;  %v6107_v3 = vld [vmem:[%s6421_s16 + $0x7c] sm:$0xff]  ;;  %v6108_v58 = vld [vmem:[%s6421_s16 + $0x184] sm:$0xff]  ;;  %v1211_v12 = vld [vmem:[%s6421_s16 + $0x8c] sm:$0xff]  ;;  %v4551_v11 = vunpack.i.h.bf16 %v6670_v21  ;;  %v4555_v47 = vunpack.i.l.bf16 %v6684_v35 }
 0x111   : > { %4898 = vrot.lane.b32.xlu1 %v4897_v2, %s9932_s15  ;;  %v4967_v30 = vpack.i.bf16 %v6108_v58, %v6107_v3  ;;  %v4972_v2 = vpack.i.bf16 %v6110_v34, %v6109_v10  ;;  %v6114_v42 = vld [vmem:[%s6421_s16 + $0x395] sm:$0xff]  ;;  %s10039_s15 = smov 12   ;;  %v1214_v54 = vld [vmem:[%s6421_s16 + $0x3a4] sm:$0xff]  ;;  %v1215_v59 = vld [vmem:[%s6421_s16 + $0x8d] sm:$0xff]  ;;  %v4560_v3 = vunpack.i.l.bf16 %v6676_v25  ;;  %v7135_v58 = vpop.permute.xlu0 %4848  ;;  %v4561_v10 = vunpack.i.h.bf16 %v6676_v25 }
 0x112   : > { %v4982_v4 = vpack.i.bf16 %v6114_v42, %v6113_v1  ;;  %v1212_v23 = vld [vmem:[%s6421_s16 + $0x194] sm:$0xff]  ;;  %v4565_v34 = vunpack.i.l.bf16 %v6686_v36  ;;  %v4566_v1 = vunpack.i.h.bf16 %v6686_v36  ;;  %v1221_v42 = vld [vmem:[%s6421_s16 + $0x29e] sm:$0xff] }
 0x113   : > { %v5117_v27 = vpack.i.bf16 %v1212_v23, %v1211_v12  ;;  %v10043_v12 = vld [vmem:[#allocation15_spill] sm:$0xff] }
 0x114   : > { %4893 = vrot.lane.b32.xlu0 %v4892_v55, %s9945_s26  ;;  %v6111_v55 = vld [vmem:[%s6421_s16 + $0x7d] sm:$0xff] }
 0x115   : > { %4903 = vrot.lane.b32.xlu1 %v4902_v26, %s9945_s26  ;;  %v6112_v26 = vld [vmem:[%s6421_s16 + $0x185] sm:$0xff] }
 0x116   : > { %v4977_v6 = vpack.i.bf16 %v6112_v26, %v6111_v55  ;;  %v1220_v55 = vld [vmem:[%s6421_s16 + $0x196] sm:$0xff]  ;;  %v655_v26 = vsel %vm653_vm0, %v7006_v44, %v4551_v11  ;;  %v4575_v44 = vunpack.i.l.bf16 %v6696_v43 }
 0x118   : > { %4908 = vrot.lane.b32.xlu0 %v6674_v24, %s9943_s28 }
 0x119   : > { %4913 = vrot.lane.b32.xlu1 %v6681_v33, %s9943_s28 }
 0x11c   : > { %4918 = vrot.lane.b32.xlu0 %v4917_v52, %s9941_s29  ;;  %v1209_v52 = vld [vmem:[%s6421_s16 + $0x29b] sm:$0xff] }
 0x11d   : > { %4923 = vrot.lane.b32.xlu1 %v4922_v17, %s9941_s29  ;;  %v1210_v17 = vld [vmem:[%s6421_s16 + $0x3a3] sm:$0xff] }
 0x120   : > { %4928 = vrot.lane.b32.xlu0 %v4927_v18, %s9939_s9 }
 0x121   : > { %4933 = vrot.lane.b32.xlu1 %v4932_v53, %s9939_s9  ;;  %v5112_v53 = vpack.i.bf16 %v1210_v17, %v1209_v52  ;;  %v10042_v52 = vld [vmem:[#allocation14_spill] sm:$0xff] }
 0x122   : > { %v4590_v17 = vunpack.i.l.bf16 %v10042_v52 }
 0x124   : > { %4938 = vrot.lane.b32.xlu0 %v6429_v7, %s10034_s13  ;;  %v6105_v7 = vld [vmem:[%s6421_s16 + $0x28b] sm:$0xff] }
 0x125   : > { %4943 = vrot.lane.b32.xlu1 %v4942_v61, %s10034_s13  ;;  %v4962_v16 = vpack.i.bf16 %v6106_v41, %v6105_v7  ;;  %v1213_v61 = vld [vmem:[%s6421_s16 + $0x29c] sm:$0xff]  ;;  %v1218_v7 = vld [vmem:[%s6421_s16 + $0x3a5] sm:$0xff]  ;;  %v4556_v41 = vunpack.i.h.bf16 %v6684_v35 }
 0x126   : > { %v5122_v22 = vpack.i.bf16 %v1214_v54, %v1213_v61  ;;  %v4596_v54 = vunpack.i.h.bf16 %v10043_v12 }
 0x127   : > { %v657_v25 = vsel %vm653_vm0, %v7012_v37, %v4556_v41  ;;  %v4576_v37 = vunpack.i.h.bf16 %v6696_v43  ;;  %v1226_v43 = vld [vmem:[%s6421_s16 + $0x3a7] sm:$0xff]  ;;  %v10046_v41 = vld [vmem:[#allocation17_spill] sm:$0xff] }
 0x128   : > { %4948 = vrot.lane.b32.xlu0 %v4947_v5, %s10035_s18  ;;  %v4550_v5 = vunpack.i.l.bf16 %v6670_v21 }
 0x129   : > { %4953 = vrot.lane.b32.xlu1 %v4952_v38, %s10035_s18  ;;  %v1216_v38 = vld [vmem:[%s6421_s16 + $0x195] sm:$0xff] }
 0x12a   : > { %v654_v21 = vsel %vm653_vm0, %v7003_v51, %v4550_v5  ;;  %v1222_v51 = vld [vmem:[%s6421_s16 + $0x3a6] sm:$0xff] }
 0x12c   : > { %4958 = vrot.lane.b32.xlu0 %v4957_v45, %s9936_s12  ;;  %v1217_v45 = vld [vmem:[%s6421_s16 + $0x29d] sm:$0xff] }
 0x12d   : > { %4963 = vrot.lane.b32.xlu1 %v4962_v16, %s9936_s12  ;;  %v7132_v16 = vpop.permute.xlu1 %4853  ;;  %v5132_v35 = vpack.i.bf16 %v1218_v7, %v1217_v45 }
 0x130   : > { %4968 = vrot.lane.b32.xlu0 %v4967_v30, %s10008_s11  ;;  %v5127_v30 = vpack.i.bf16 %v1216_v38, %v1215_v59 }
 0x131   : > { %4973 = vrot.lane.b32.xlu1 %v4972_v2, %s10008_s11  ;;  %v1219_v2 = vld [vmem:[%s6421_s16 + $0x8e] sm:$0xff] }
 0x132   : > { %v7159_v36 = vpack.i.bf16 %v1220_v55, %v1219_v2 }
 0x134   : > { %4978 = vrot.lane.b32.xlu0 %v4977_v6, %s10009_s10  ;;  %v656_v6 = vsel %vm653_vm0, %v7009_v40, %v4555_v47  ;;  %v660_v40 = vsel %vm658_vm1, %v655_v26, %v4561_v10 }
 0x135   : > { %4983 = vrot.lane.b32.xlu1 %v4982_v4, %s10009_s10  ;;  %v4571_v4 = vunpack.i.h.bf16 %v6692_v39 }
 0x138   : > { %4988 = vrot.lane.b32.xlu0 %v6511_v19, %s9934_s14  ;;  %v7084_v19 = vld [vmem:[%s6421_s16 + $0x190] sm:$0xff] }
 0x139   : > { %4993 = vrot.lane.b32.xlu1 %v6514_v20, %s9934_s14  ;;  %s10040_s14 = smov 16   ;;  %v7087_v20 = vld [vmem:[%s6421_s16 + $0x298] sm:$0xff] }
 0x13c   : > { %4998 = vrot.lane.b32.xlu0 %v6529_v31, %s10036_s19  ;;  %v7090_v31 = vld [vmem:[%s6421_s16 + $0x3a0] sm:$0xff] }
 0x13d   : > { %5003 = vrot.lane.b32.xlu1 %v6532_v32, %s10036_s19  ;;  %v1199_v32 = vld [vmem:[%s6421_s16 + $0x89] sm:$0xff] }
 0x140   : > { %5008 = vrot.lane.b32.xlu0 %v6553_v49, %s10037_s17  ;;  %v1200_v49 = vld [vmem:[%s6421_s16 + $0x191] sm:$0xff] }
 0x141   : > { %5013 = vrot.lane.b32.xlu1 %v6556_v50, %s10037_s17  ;;  %v1201_v50 = vld [vmem:[%s6421_s16 + $0x299] sm:$0xff] }
 0x144   : > { %5018 = vrot.lane.b32.xlu0 %v6571_v62, %s10038_s20  ;;  %v1202_v62 = vld [vmem:[%s6421_s16 + $0x3a1] sm:$0xff] }
 0x145   : > { %5023 = vrot.lane.b32.xlu1 %v6574_v0, %s10038_s20  ;;  %v5092_v0 = vpack.i.bf16 %v1202_v62, %v1201_v50  ;;  %v1223_v50 = vld [vmem:[%s6421_s16 + $0x8f] sm:$0xff]  ;;  %v1224_v62 = vld [vmem:[%s6421_s16 + $0x197] sm:$0xff] }
 0x146   : > { %v5147_v23 = vpack.i.bf16 %v1224_v62, %v1223_v50  ;;  %v10051_v62 = vld [vmem:[#allocation21_spill] sm:$0xff] }
 0x148   : > { %5028 = vrot.lane.b32.xlu0 %v6589_v14, %s10039_s15  ;;  %v1203_v14 = vld [vmem:[%s6421_s16 + $0x8a] sm:$0xff] }
 0x149   : > { %5033 = vrot.lane.b32.xlu1 %v6592_v15, %s10039_s15  ;;  %v1205_v15 = vld [vmem:[%s6421_s16 + $0x29a] sm:$0xff] }
 0x14c   : > { %5038 = vrot.lane.b32.xlu0 %v6607_v28, %s10040_s14  ;;  %v1206_v28 = vld [vmem:[%s6421_s16 + $0x3a2] sm:$0xff] }
 0x14d   : > { %5043 = vrot.lane.b32.xlu1 %v6610_v29, %s10040_s14 }
 0x150   : > { %5048 = vrot.lane.b32.xlu0 %v6484_v60, %s9945_s26  ;;  %v5077_v60 = vpack.i.bf16 %v7084_v19, %v6765_v46  ;;  %v1208_v46 = vld [vmem:[%s6421_s16 + $0x193] sm:$0xff] }
 0x151   : > { %5053 = vrot.lane.b32.xlu1 %v6488_v63, %s9945_s26  ;;  %v5082_v63 = vpack.i.bf16 %v7090_v31, %v7087_v20  ;;  %s10072_s26 = smov 64  }
 0x154   : > { %5058 = vrot.lane.b32.xlu0 %v6643_v56, %s9943_s28  ;;  %v5102_v56 = vpack.i.bf16 %v1206_v28, %v1205_v15  ;;  %v7175_v28 = vpop.permute.xlu0 %4858 }
 0x155   : > { %5063 = vrot.lane.b32.xlu1 %v6646_v57, %s9943_s28  ;;  %v1207_v57 = vld [vmem:[%s6421_s16 + $0x8b] sm:$0xff]  ;;  %s10073_s28 = smov 20  }
 0x156   : > { %v5107_v18 = vpack.i.bf16 %v1208_v46, %v1207_v57  ;;  %v665_v57 = vsel %vm663_vm2, %v660_v40, %v4571_v4  ;;  %v10050_v40 = vld [vmem:[#allocation22_spill] sm:$0xff] }
 0x158   : > { %5068 = vrot.lane.b32.xlu0 %v6498_v9, %s9941_s29  ;;  %v5087_v9 = vpack.i.bf16 %v1200_v49, %v1199_v32  ;;  %v661_v32 = vsel %vm658_vm1, %v656_v6, %v4565_v34  ;;  %v7165_v49 = vpack.i.bf16 %v1222_v51, %v1221_v42  ;;  %v7207_v26 = vpop.permute.xlu0 %4868  ;;  %v10048_v42 = vld [vmem:[#allocation19_spill] sm:$0xff] }
 0x159   : > { %5073 = vrot.lane.b32.xlu1 %v6503_v13, %s9941_s29  ;;  %v1204_v13 = vld [vmem:[%s6421_s16 + $0x192] sm:$0xff]  ;;  %v4615_v51 = vunpack.i.l.bf16 %v10048_v42  ;;  %s10074_s29 = smov 24  }
 0x15a   : > { %v5097_v29 = vpack.i.bf16 %v1204_v13, %v1203_v14  ;;  %v4580_v14 = vunpack.i.l.bf16 %v6704_v48  ;;  %v10041_v13 = vld [vmem:[#allocation13_spill] sm:$0xff] }
 0x15b   : > { %v4585_v15 = vunpack.i.l.bf16 %v10041_v13  ;;  %v4586_v46 = vunpack.i.h.bf16 %v10041_v13 }
 0x15c   : > { %5078 = vrot.lane.b32.xlu0 %v5077_v60, %s9939_s9  ;;  %v4570_v60 = vunpack.i.l.bf16 %v6692_v39  ;;  %v7167_v39 = vpop.permute.xlu1 %4863 }
 0x15d   : > { %5083 = vrot.lane.b32.xlu1 %v5082_v63, %s9939_s9  ;;  %v659_v63 = vsel %vm658_vm1, %v654_v21, %v4560_v3  ;;  %v4606_v3 = vunpack.i.h.bf16 %v10046_v41  ;;  %s10075_s9 = smov 28  }
 0x160   : > { %5088 = vrot.lane.b32.xlu0 %v5087_v9, %s10034_s13  ;;  %v662_v9 = vsel %vm658_vm1, %v657_v25, %v4566_v1  ;;  %v7201_v21 = vpop.permute.xlu1 %4873  ;;  %v10049_v25 = vld [vmem:[#allocation20_spill] sm:$0xff] }
 0x161   : > { %5093 = vrot.lane.b32.xlu1 %v5092_v0, %s10034_s13  ;;  %v4581_v0 = vunpack.i.h.bf16 %v6704_v48  ;;  %v4595_v48 = vunpack.i.l.bf16 %v10043_v12  ;;  %v667_v61 = vsel %vm663_vm2, %v662_v9, %v4576_v37  ;;  %v4620_v4 = vunpack.i.l.bf16 %v10049_v25 }
 0x162   : > { %v672_v45 = vsel %vm668_vm3, %v667_v61, %v4586_v46  ;;  %v4625_v9 = vunpack.i.l.bf16 %v10051_v62  ;;  %v10055_v61 = vld [vmem:[#allocation30_spill] sm:$0xff] }
 0x163   : > { %v670_v38 = vsel %vm668_vm3, %v665_v57, %v4581_v0  ;;  %v677_v6 = vsel %vm673_vm4, %v672_v45, %v4596_v54  ;;  %v10052_v0 = vld [vmem:[#allocation24_spill] sm:$0xff]  ;;  %v4670_v54 = vunpack.i.l.bf16 %v10055_v61 }
 0x164   : > { %5098 = vrot.lane.b32.xlu0 %v5097_v29, %s10035_s18  ;;  %v1225_v29 = vld [vmem:[%s6421_s16 + $0x29f] sm:$0xff]  ;;  %v682_v50 = vsel %vm678_vm5, %v677_v6, %v4606_v3 }
 0x165   : > { %5103 = vrot.lane.b32.xlu1 %v5102_v56, %s10035_s18  ;;  %v664_v56 = vsel %vm663_vm2, %v659_v63, %v4570_v60  ;;  %v4616_v63 = vunpack.i.h.bf16 %v10048_v42 }
 0x166   : > { %v669_v59 = vsel %vm668_vm3, %v664_v56, %v4580_v14  ;;  %v4640_v14 = vunpack.i.l.bf16 %v10052_v0 }
 0x167   : > { %v674_v7 = vsel %vm673_vm4, %v669_v59, %v4590_v17  ;;  %v10054_v17 = vld [vmem:[#allocation28_spill] sm:$0xff]  ;;  %v687_v12 = vsel %vm683_vm6, %v682_v50, %v4616_v63 }
 0x168   : > { %5108 = vrot.lane.b32.xlu0 %v5107_v18, %s9936_s12  ;;  %v666_v18 = vsel %vm663_vm2, %v661_v32, %v4575_v44  ;;  %v4621_v44 = vunpack.i.h.bf16 %v10049_v25  ;;  %v4630_v32 = vunpack.i.l.bf16 %v10050_v40 }
 0x169   : > { %5113 = vrot.lane.b32.xlu1 %v5112_v53, %s9936_s12  ;;  %v4591_v53 = vunpack.i.h.bf16 %v10042_v52  ;;  %s10044_s12 = smov 56   ;;  %v671_v11 = vsel %vm668_vm3, %v666_v18, %v4585_v15  ;;  %v4631_v52 = vunpack.i.h.bf16 %v10050_v40  ;;  %v4660_v18 = vunpack.i.l.bf16 %v10054_v17 }
 0x16a   : > { %v676_v34 = vsel %vm673_vm4, %v671_v11, %v4595_v48 }
 0x16b   : > { %v675_v10 = vsel %vm673_vm4, %v670_v38, %v4591_v53  ;;  %v7231_v53 = vpop.permute.xlu1 %4883  ;;  %v10056_v38 = vld [vmem:[#allocation32_spill] sm:$0xff] }
 0x16c   : > { %5118 = vrot.lane.b32.xlu0 %v5117_v27, %s10008_s11  ;;  %v10045_v27 = vld [vmem:[#allocation16_spill] sm:$0xff]  ;;  %v4680_v11 = vunpack.i.l.bf16 %v10056_v38 }
 0x16d   : > { %5123 = vrot.lane.b32.xlu1 %v5122_v22, %s10008_s11  ;;  %v4600_v5 = vunpack.i.l.bf16 %v10045_v27  ;;  %v5152_v22 = vpack.i.bf16 %v1226_v43, %v1225_v29  ;;  %v4601_v47 = vunpack.i.h.bf16 %v10045_v27  ;;  %v4626_v29 = vunpack.i.h.bf16 %v10051_v62  ;;  %v10053_v43 = vld [vmem:[#allocation26_spill] sm:$0xff]  ;;  %v7237_v27 = vpop.permute.xlu0 %4878 }
 0x16e   : > { %v4650_v56 = vunpack.i.l.bf16 %v10053_v43  ;;  %v4651_v45 = vunpack.i.h.bf16 %v10053_v43 }
 0x16f   : > { %v679_v1 = vsel %vm678_vm5, %v674_v7, %v4600_v5  ;;  %v680_v60 = vsel %vm678_vm5, %v675_v10, %v4601_v47  ;;  %v692_v47 = vsel %vm9970_vm7, %v687_v12, %v4626_v29  ;;  %v10058_v10 = vld [vmem:[#allocation23_spill] sm:$0xff]  ;;  %v10063_v12 = vld [vmem:[#allocation33_spill] sm:$0xff] }
 0x170   : > { %5128 = vrot.lane.b32.xlu0 %v5127_v30, %s10009_s10  ;;  %v4605_v30 = vunpack.i.l.bf16 %v10046_v41  ;;  %v10057_v41 = vld [vmem:[#allocation34_spill] sm:$0xff]  ;;  %v4636_v29 = vunpack.i.h.bf16 %v10058_v10 }
 0x171   : > { %5133 = vrot.lane.b32.xlu1 %v5132_v35, %s10009_s10  ;;  %v10047_v35 = vld [vmem:[#allocation18_spill] sm:$0xff]  ;;  %v4690_v3 = vunpack.i.l.bf16 %v10057_v41  ;;  %v4691_v50 = vunpack.i.h.bf16 %v10057_v41 }
 0x172   : > { %v4611_v2 = vunpack.i.h.bf16 %v10047_v35  ;;  %v4610_v55 = vunpack.i.l.bf16 %v10047_v35  ;;  %v681_v37 = vsel %vm678_vm5, %v676_v34, %v4605_v30  ;;  %v4635_v34 = vunpack.i.l.bf16 %v10058_v10 }
 0x173   : > { %v686_v57 = vsel %vm683_vm6, %v681_v37, %v4615_v51  ;;  %v4661_v35 = vunpack.i.h.bf16 %v10054_v17 }
 0x174   : > { %5138 = vrot.lane.b32.xlu0 %v7159_v36, %s10044_s12  ;;  %v684_v13 = vsel %vm683_vm6, %v679_v1, %v4610_v55  ;;  %v685_v15 = vsel %vm683_vm6, %v680_v60, %v4611_v2  ;;  %v691_v5 = vsel %vm9970_vm7, %v686_v57, %v4625_v9  ;;  %v10059_v55 = vld [vmem:[#allocation25_spill] sm:$0xff]  ;;  %v4671_v1 = vunpack.i.h.bf16 %v10055_v61  ;;  %v10062_v57 = vld [vmem:[#allocation31_spill] sm:$0xff] }
 0x175   : > { %5143 = vrot.lane.b32.xlu1 %v7165_v49, %s10044_s12  ;;  %v689_v46 = vsel %vm9970_vm7, %v684_v13, %v4620_v4  ;;  %v690_v48 = vsel %vm9970_vm7, %v685_v15, %v4621_v44  ;;  %v4645_v6 = vunpack.i.l.bf16 %v10059_v55  ;;  %v4681_v4 = vunpack.i.h.bf16 %v10056_v38 }
 0x176   : > { %v695_v30 = vsel %vm9968_vm8, %v690_v48, %v4631_v52  ;;  %v696_v43 = vsel %vm9968_vm8, %v691_v5, %v4635_v34  ;;  %v4646_v17 = vunpack.i.h.bf16 %v10059_v55  ;;  %v4685_v48 = vunpack.i.l.bf16 %v10063_v12 }
 0x178   : > { %5148 = vrot.lane.b32.xlu0 %v5147_v23, %s10036_s19  ;;  %v694_v23 = vsel %vm9968_vm8, %v689_v46, %v4630_v32  ;;  %v10060_v32 = vld [vmem:[#allocation27_spill] sm:$0xff]  ;;  %v4675_v46 = vunpack.i.l.bf16 %v10062_v57 }
 0x179   : > { %5153 = vrot.lane.b32.xlu1 %v5152_v22, %s10036_s19  ;;  %v4641_v22 = vunpack.i.h.bf16 %v10052_v0  ;;  %v699_v59 = vsel %vm9969_vm9, %v694_v23, %v4640_v14  ;;  %v4655_v37 = vunpack.i.l.bf16 %v10060_v32  ;;  %v10061_v0 = vld [vmem:[#allocation29_spill] sm:$0xff] }
 0x17a   : > { %v704_v7 = vsel %vm9954_vm10, %v699_v59, %v4650_v56  ;;  %v4665_v14 = vunpack.i.l.bf16 %v10061_v0 }
 0x17b   : > { %v709_v2 = vsel %vm708_vm11, %v704_v7, %v4660_v18  ;;  %v700_v25 = vsel %vm9969_vm9, %v695_v30, %v4641_v22  ;;  %v701_v18 = vsel %vm9969_vm9, %v696_v43, %v4645_v6  ;;  %v10064_v22 = vld [vmem:[#allocation35_spill] sm:$0xff] }
 0x17c   : > { %v714_v42 = vsel %vm713_vm12, %v709_v2, %v4670_v54  ;;  %v705_v40 = vsel %vm9954_vm10, %v700_v25, %v4651_v45  ;;  %v4656_v54 = vunpack.i.h.bf16 %v10060_v32  ;;  %v706_v5 = vsel %vm9954_vm10, %v701_v18, %v4655_v37 }
 0x17d   : > { %v719_v44 = vsel %vm718_vm13, %v714_v42, %v4680_v11  ;;  %v710_v9 = vsel %vm708_vm11, %v705_v40, %v4661_v35  ;;  %v4695_v59 = vunpack.i.l.bf16 %v10064_v22  ;;  %v4666_v11 = vunpack.i.h.bf16 %v10061_v0 }
 0x17e   : > { %v724_v62 = vsel %vm723_vm14, %v719_v44, %v4690_v3  ;;  %v715_v56 = vsel %vm713_vm12, %v710_v9, %v4671_v1  ;;  %v711_v45 = vsel %vm708_vm11, %v706_v5, %v4665_v14  ;;  %v697_v3 = vsel %vm9968_vm8, %v692_v47, %v4636_v29 }
 0x17f   : > { %v720_v61 = vsel %vm718_vm13, %v715_v56, %v4681_v4  ;;  %v716_v30 = vsel %vm713_vm12, %v711_v45, %v4675_v46  ;;  %v702_v34 = vsel %vm9969_vm9, %v697_v3, %v4646_v17  ;;  %v4686_v35 = vunpack.i.h.bf16 %v10063_v12  ;;  %v4373_v45 = vld [vmem:[%s9882_s2 + $0x100] sm:$0xff] }
 0x180   : > { %v725_v38 = vsel %vm723_vm14, %v720_v61, %v4691_v50  ;;  %v721_v55 = vsel %vm718_vm13, %v716_v30, %v4685_v48  ;;  %v707_v47 = vsel %vm9954_vm10, %v702_v34, %v4656_v54  ;;  %v4696_v6 = vunpack.i.h.bf16 %v10064_v22  ;;  %1825 = vmatpush1.msra.mxu1 %v4373_v45  ;;  %v4370_v34 = vld [vmem:[%s9882_s2 + $0xe8] sm:$0xff] }
 0x181   : > { %v726_v1 = vsel %vm723_vm14, %v721_v55, %v4695_v59  ;;  %v712_v42 = vsel %vm708_vm11, %v707_v47, %v4666_v11  ;;  %1826 = vmatprep.subr.mxu1 %v10033_v8 }
 0x182   : > { %v4889_v51 = vpop.permute.xlu0 %4888 }
 0x183   : > { %v4890_v60 = vunpack.i.l.bf16 %v4889_v51  ;;  %v4899_v63 = vpop.permute.xlu1 %4898  ;;  %v4891_v13 = vunpack.i.h.bf16 %v4889_v51 }
 0x184   : > { %v4900_v7 = vunpack.i.l.bf16 %v4899_v63  ;;  %v4901_v51 = vunpack.i.h.bf16 %v4899_v63 }
 0x185   : > { %v1045_v15 = vsel %vm9953_vm15, %v724_v62, %v4890_v60  ;;  %v1046_v41 = vsel %vm9953_vm15, %v725_v38, %v4891_v13 }
 0x186   : > { %v7268_v52 = vpop.permute.xlu0 %4893  ;;  %1147 = vmatmul.mubr.f32.vlgmr.msra.gmra.mxu0 %v1045_v15  ;;  %v1047_v25 = vsel %vm9953_vm15, %v726_v1, %v4900_v7  ;;  %v4369_v1 = vld [vmem:[%s9882_s2 + $0xe0] sm:$0xff] }
 0x187   : > { %v7273_v23 = vpop.permute.xlu1 %4903  ;;  %4355 = vmatprep.mubr.msk.f32.mxu0 %vm653_vm0, %v7084_v19  ;;  %v4676_v19 = vunpack.i.h.bf16 %v10062_v57 }
 0x189   : > { %v717_v4 = vsel %vm713_vm12, %v712_v42, %v4676_v19  ;;  %v4371_v19 = vld [vmem:[%s9882_s2 + $0xf0] sm:$0xff] }
 0x18a   : > { %v7288_v10 = vpop.permute.xlu0 %4908  ;;  %1152 = vmatmul.mubr.f32.gmra.mxu0 %v1046_v41  ;;  %v4372_v41 = vld [vmem:[%s9882_s2 + $0xf8] sm:$0xff] }
 0x18b   : > { %v7292_v2 = vpop.permute.xlu1 %4913  ;;  %4356 = vmatprep.mubr.msk.f32.mxu0 %vm653_vm0, %v7087_v20  ;;  %v722_v20 = vsel %vm718_vm13, %v717_v4, %v4686_v35  ;;  %1827 = vmatpush1.msra.mxu1 %v4372_v41  ;;  %v4368_v4 = vld [vmem:[%s9882_s2 + $0xd8] sm:$0xff] }
 0x18c   : > { %v727_v40 = vsel %vm723_vm14, %v722_v20, %v4696_v6  ;;  %1828 = vmatprep.subr.mxu1 %v10033_v8  ;;  %v7384_v6 = vld [vmem:[%s6421_s16 + $0x90] sm:$0xff]  ;;  %v6115_v20 = vld [vmem:[%s6421_s16 + $0x398] sm:$0xff] }
 0x18d   : > { %v1048_v32 = vsel %vm9953_vm15, %v727_v40, %v4901_v51  ;;  %1829 = vmatpush1.msra.mxu1 %v4371_v19  ;;  %4376 = vmatprep.mubr.msk.f32.mxu1 %vm653_vm0, %v7384_v6  ;;  %vm10071_vm15 = vcmask 1043456  }
 0x18e   : > { %v7303_v60 = vpop.permute.xlu0 %4918  ;;  %1157 = vmatmul.mubr.f32.gmra.mxu0 %v1047_v25  ;;  %1830 = vmatprep.subr.mxu1 %v10033_v8 }
 0x18f   : > { %v7305_v44 = vpop.permute.xlu1 %4923  ;;  %4357 = vmatprep.mubr.msk.f32.mxu0 %vm653_vm0, %v7090_v31  ;;  %1831 = vmatpush1.msra.mxu1 %v4370_v34 }
 0x190   : > { %1832 = vmatprep.subr.mxu1 %v10033_v8 }
 0x191   : > { %1833 = vmatpush1.msra.mxu1 %v4369_v1 }
 0x192   : > { %v7312_v37 = vpop.permute.xlu0 %4928  ;;  %1162 = vmatmul.mubr.f32.gmra.mxu0 %v1048_v32  ;;  %v6116_v32 = vld [vmem:[%s6421_s16 + $0x290] sm:$0xff]  ;;  %1834 = vmatprep.subr.mxu1 %v10033_v8 }
 0x193   : > { %v7314_v63 = vpop.permute.xlu1 %4933  ;;  %1835 = vmatpush1.msra.mxu1 %v4368_v4 }
 0x194   : > { %1836 = vmatprep.subr.mxu1 %v10033_v8 }
 0x196   : > { %v7316_v50 = vpop.permute.xlu0 %4938 }
 0x197   : > { %v7318_v62 = vpop.permute.xlu1 %4943 }
 0x19a   : > { %v7320_v9 = vpop.permute.xlu0 %4948 }
 0x19b   : > { %v7322_v0 = vpop.permute.xlu1 %4953 }
 0x19c   : > { %10065 = vst [vmem:[#allocation13_spill] sm:$0xff] %v7322_v0 }
 0x19e   : > { %v7324_v31 = vpop.permute.xlu0 %4958 }
 0x19f   : > { %v7326_v14 = vpop.permute.xlu1 %4963 }
 0x1a0   : > { %10066 = vst [vmem:[#allocation14_spill] sm:$0xff] %v7326_v14 }
 0x1a2   : > { %v7328_v13 = vpop.permute.xlu0 %4968 }
 0x1a3   : > { %v7330_v15 = vpop.permute.xlu1 %4973 }
 0x1a4   : > { %10067 = vst [vmem:[#allocation15_spill] sm:$0xff] %v7330_v15 }
 0x1a6   : > { %v7332_v29 = vpop.permute.xlu0 %4978 }
 0x1a7   : > { %v7334_v43 = vpop.permute.xlu1 %4983 }
 0x1a8   : > { %10068 = vst [vmem:[#allocation16_spill] sm:$0xff] %v7334_v43 }
 0x1aa   : > { %v7336_v56 = vpop.permute.xlu0 %4988 }
 0x1ab   : > { %v7338_v57 = vpop.permute.xlu1 %4993 }
 0x1ac   : > { %10069 = vst [vmem:[#allocation17_spill] sm:$0xff] %v7338_v57 }
 0x1ae   : > { %v7340_v46 = vpop.permute.xlu0 %4998 }
 0x1af   : > { %v7342_v17 = vpop.permute.xlu1 %5003 }
 0x1b0   : > { %10070 = vst [vmem:[#allocation18_spill] sm:$0xff] %v7342_v17 }
 0x1b2   : > { %v7344_v18 = vpop.permute.xlu0 %5008 }
 0x1b3   : > { %v5014_v12 = vpop.permute.xlu1 %5013  ;;  %v5011_v41 = vunpack.i.h.bf16 %v7344_v18 }
 0x1b4   : > { %v5016_v35 = vunpack.i.h.bf16 %v5014_v12  ;;  %v5015_v55 = vunpack.i.l.bf16 %v5014_v12 }
 0x1b6   : > { %v7346_v48 = vpop.permute.xlu0 %5018  ;;  %v1714_v40 = vsel %vm653_vm0, %v6115_v20, %v5016_v35  ;;  %v1713_v12 = vsel %vm653_vm0, %v6116_v32, %v5015_v55  ;;  %v4367_v35 = vld [vmem:[%s9882_s2 + $0xd0] sm:$0xff] }
 0x1b7   : > { %v5024_v61 = vpop.permute.xlu1 %5023  ;;  %v5021_v20 = vunpack.i.h.bf16 %v7346_v48  ;;  %1837 = vmatpush1.msra.mxu1 %v4367_v35 }
 0x1b8   : > { %v5026_v42 = vunpack.i.h.bf16 %v5024_v61  ;;  %v5025_v51 = vunpack.i.l.bf16 %v5024_v61  ;;  %v5010_v61 = vunpack.i.l.bf16 %v7344_v18  ;;  %v5020_v18 = vunpack.i.l.bf16 %v7346_v48  ;;  %1838 = vmatprep.subr.mxu1 %v10033_v8 }
 0x1ba   : > { %v7348_v54 = vpop.permute.xlu0 %5028  ;;  %v1717_v55 = vsel %vm658_vm1, %v1713_v12, %v5025_v51  ;;  %v1718_v1 = vsel %vm658_vm1, %v1714_v40, %v5026_v42  ;;  %v6117_v42 = vld [vmem:[%s6421_s16 + $0x188] sm:$0xff]  ;;  %v6118_v40 = vld [vmem:[%s6421_s16 + $0x80] sm:$0xff] }
 0x1bb   : > { %v7350_v5 = vpop.permute.xlu1 %5033  ;;  %v5031_v32 = vunpack.i.h.bf16 %v7348_v54  ;;  %v5030_v17 = vunpack.i.l.bf16 %v7348_v54  ;;  %v1712_v51 = vsel %vm653_vm0, %v6117_v42, %v5011_v41  ;;  %v1711_v48 = vsel %vm653_vm0, %v6118_v40, %v5010_v61  ;;  %v4365_v41 = vld [vmem:[%s9882_s2 + $0xc0] sm:$0xff]  ;;  %v4364_v61 = vld [vmem:[%s9882_s2 + $0xb8] sm:$0xff] }
 0x1bc   : > { %v5036_v19 = vunpack.i.h.bf16 %v7350_v5  ;;  %v5035_v34 = vunpack.i.l.bf16 %v7350_v5  ;;  %v4366_v5 = vld [vmem:[%s9882_s2 + $0xc8] sm:$0xff] }
 0x1bd   : > { %1839 = vmatpush1.msra.mxu1 %v4366_v5 }
 0x1be   : > { %v7352_v22 = vpop.permute.xlu0 %5038  ;;  %v1721_v43 = vsel %vm663_vm2, %v1717_v55, %v5035_v34  ;;  %v1722_v15 = vsel %vm663_vm2, %v1718_v1, %v5036_v19  ;;  %1840 = vmatprep.subr.mxu1 %v10033_v8  ;;  %v1716_v34 = vsel %vm658_vm1, %v1712_v51, %v5021_v20 }
 0x1bf   : > { %v7354_v59 = vpop.permute.xlu1 %5043  ;;  %v5041_v54 = vunpack.i.h.bf16 %v7352_v22  ;;  %v5040_v14 = vunpack.i.l.bf16 %v7352_v22  ;;  %1841 = vmatpush1.msra.mxu1 %v4365_v41  ;;  %v1720_v5 = vsel %vm663_vm2, %v1716_v34, %v5031_v32 }
 0x1c0   : > { %v5046_v12 = vunpack.i.h.bf16 %v7354_v59  ;;  %v5045_v35 = vunpack.i.l.bf16 %v7354_v59  ;;  %v1715_v59 = vsel %vm658_vm1, %v1711_v48, %v5020_v18  ;;  %1842 = vmatprep.subr.mxu1 %v10033_v8 }
 0x1c1   : > { %v1719_v22 = vsel %vm663_vm2, %v1715_v59, %v5030_v17  ;;  %1843 = vmatpush1.msra.mxu1 %v4364_v61  ;;  %v1724_v32 = vsel %vm668_vm3, %v1720_v5, %v5041_v54 }
 0x1c2   : > { %v7356_v38 = vpop.permute.xlu0 %5048  ;;  %v1725_v20 = vsel %vm668_vm3, %v1721_v43, %v5045_v35  ;;  %v1726_v18 = vsel %vm668_vm3, %v1722_v15, %v5046_v12  ;;  %v1723_v17 = vsel %vm668_vm3, %v1719_v22, %v5040_v14  ;;  %1844 = vmatprep.subr.mxu1 %v10033_v8  ;;  %v4363_v43 = vld [vmem:[%s9882_s2 + $0xb0] sm:$0xff]  ;;  %v4362_v15 = vld [vmem:[%s9882_s2 + $0xa8] sm:$0xff] }
 0x1c3   : > { %v7358_v11 = vpop.permute.xlu1 %5053  ;;  %v5051_v19 = vunpack.i.h.bf16 %v7356_v38  ;;  %v5050_v55 = vunpack.i.l.bf16 %v7356_v38  ;;  %1845 = vmatpush1.msra.mxu1 %v4363_v43 }
 0x1c4   : > { %v5056_v42 = vunpack.i.h.bf16 %v7358_v11  ;;  %v5055_v40 = vunpack.i.l.bf16 %v7358_v11  ;;  %1846 = vmatprep.subr.mxu1 %v10033_v8 }
 0x1c5   : > { %v1728_v14 = vsel %vm673_vm4, %v1724_v32, %v5051_v19  ;;  %1847 = vmatpush1.msra.mxu1 %v4362_v15 }
 0x1c6   : > { %v7363_v7 = vpop.permute.xlu0 %5058  ;;  %v1729_v35 = vsel %vm673_vm4, %v1725_v20, %v5055_v40  ;;  %1848 = vmatprep.subr.mxu1 %v10033_v8  ;;  %v4361_v40 = vld [vmem:[%s9882_s2 + $0xa0] sm:$0xff]  ;;  %v4360_v20 = vld [vmem:[%s9882_s2 + $0x98] sm:$0xff] }
 0x1c7   : > { %v7368_v3 = vpop.permute.xlu1 %5063  ;;  %v5061_v38 = vunpack.i.h.bf16 %v7363_v7  ;;  %v5060_v51 = vunpack.i.l.bf16 %v7363_v7  ;;  %v1727_v7 = vsel %vm673_vm4, %v1723_v17, %v5050_v55  ;;  %1849 = vmatpush1.msra.mxu1 %v4361_v40 }
 0x1c8   : > { %v5066_v48 = vunpack.i.h.bf16 %v7368_v3  ;;  %v5065_v11 = vunpack.i.l.bf16 %v7368_v3  ;;  %v1730_v3 = vsel %vm673_vm4, %v1726_v18, %v5056_v42  ;;  %1850 = vmatprep.subr.mxu1 %v10033_v8 }
 0x1c9   : > { %v1731_v59 = vsel %vm678_vm5, %v1727_v7, %v5060_v51  ;;  %v1732_v34 = vsel %vm678_vm5, %v1728_v14, %v5061_v38  ;;  %1851 = vmatpush1.msra.mxu1 %v4360_v20 }
 0x1ca   : > { %v7375_v30 = vpop.permute.xlu0 %5068  ;;  %v1733_v22 = vsel %vm678_vm5, %v1729_v35, %v5065_v11  ;;  %v1734_v5 = vsel %vm678_vm5, %v1730_v3, %v5066_v48  ;;  %1852 = vmatprep.subr.mxu1 %v10033_v8 }
 0x1cb   : > { %v7380_v47 = vpop.permute.xlu1 %5073  ;;  %v5071_v54 = vunpack.i.h.bf16 %v7375_v30  ;;  %v5070_v41 = vunpack.i.l.bf16 %v7375_v30 }
 0x1cc   : > { %v5076_v19 = vunpack.i.h.bf16 %v7380_v47  ;;  %v5075_v55 = vunpack.i.l.bf16 %v7380_v47 }
 0x1cd   : > { %v1736_v32 = vsel %vm683_vm6, %v1732_v34, %v5071_v54  ;;  %v4359_v54 = vld [vmem:[%s9882_s2 + $0x90] sm:$0xff] }
 0x1ce   : > { %v7392_v25 = vpop.permute.xlu0 %5078  ;;  %v1737_v15 = vsel %vm683_vm6, %v1733_v22, %v5075_v55  ;;  %1853 = vmatpush1.msra.mxu1 %v4359_v54 }
 0x1cf   : > { %v7401_v45 = vpop.permute.xlu1 %5083  ;;  %v5081_v42 = vunpack.i.h.bf16 %v7392_v25  ;;  %v5080_v30 = vunpack.i.l.bf16 %v7392_v25  ;;  %v1735_v25 = vsel %vm683_vm6, %v1731_v59, %v5070_v41  ;;  %1854 = vmatprep.subr.mxu1 %v10033_v8 }
 0x1d0   : > { %v5086_v47 = vunpack.i.h.bf16 %v7401_v45  ;;  %v5085_v18 = vunpack.i.l.bf16 %v7401_v45  ;;  %v1738_v45 = vsel %vm683_vm6, %v1734_v5, %v5076_v19 }
 0x1d1   : > { %v1739_v14 = vsel %vm9970_vm7, %v1735_v25, %v5080_v30  ;;  %v1740_v35 = vsel %vm9970_vm7, %v1736_v32, %v5081_v42  ;;  %v4358_v30 = vld [vmem:[%s9882_s2 + $0x88] sm:$0xff] }
 0x1d2   : > { %v7416_v4 = vpop.permute.xlu0 %5088  ;;  %v1741_v41 = vsel %vm9970_vm7, %v1737_v15, %v5085_v18  ;;  %v1742_v59 = vsel %vm9970_vm7, %v1738_v45, %v5086_v47  ;;  %1855 = vmatpush1.msra.mxu1 %v4358_v30  ;;  %v4374_v32 = vld [vmem:[%s9882_s2 + $0x108] sm:$0xf] }
 0x1d3   : > { %v7423_v57 = vpop.permute.xlu1 %5093  ;;  %v5091_v38 = vunpack.i.h.bf16 %v7416_v4  ;;  %v5090_v51 = vunpack.i.l.bf16 %v7416_v4  ;;  %1886 = vmatprep.subr.mxu1 %v10033_v8 }
 0x1d4   : > { %v5096_v48 = vunpack.i.h.bf16 %v7423_v57  ;;  %v5095_v11 = vunpack.i.l.bf16 %v7423_v57  ;;  %4375 = vmatpush2.msk.msra.mxu1 %vm10071_vm15, %v4374_v32  ;;  %vm10087_vm15 = vcmask 523264  }
 0x1d5   : > { %v1744_v34 = vsel %vm9968_vm8, %v1740_v35, %v5091_v38  ;;  %3308 = vmatprep.subr.mxu1 %v10033_v8 }
 0x1d6   : > { %v7447_v1 = vpop.permute.xlu0 %5098  ;;  %v1745_v55 = vsel %vm9968_vm8, %v1741_v41, %v5095_v11 }
 0x1d7   : > { %v7453_v0 = vpop.permute.xlu1 %5103  ;;  %v5101_v7 = vunpack.i.h.bf16 %v7447_v1  ;;  %v5100_v4 = vunpack.i.l.bf16 %v7447_v1  ;;  %v1743_v1 = vsel %vm9968_vm8, %v1739_v14, %v5090_v51 }
 0x1d8   : > { %v5106_v3 = vunpack.i.h.bf16 %v7453_v0  ;;  %v5105_v57 = vunpack.i.l.bf16 %v7453_v0  ;;  %v1746_v0 = vsel %vm9968_vm8, %v1742_v59, %v5096_v48 }
 0x1d9   : > { %v1747_v40 = vsel %vm9969_vm9, %v1743_v1, %v5100_v4  ;;  %v1748_v20 = vsel %vm9969_vm9, %v1744_v34, %v5101_v7 }
 0x1da   : > { %v7473_v12 = vpop.permute.xlu0 %5108  ;;  %v1749_v38 = vsel %vm9969_vm9, %v1745_v55, %v5105_v57 }
 0x1db   : > { %v7479_v61 = vpop.permute.xlu1 %5113  ;;  %v5111_v22 = vunpack.i.h.bf16 %v7473_v12  ;;  %v5110_v5 = vunpack.i.l.bf16 %v7473_v12  ;;  %v1750_v12 = vsel %vm9969_vm9, %v1746_v0, %v5106_v3 }
 0x1dc   : > { %v5116_v47 = vunpack.i.h.bf16 %v7479_v61  ;;  %v5115_v18 = vunpack.i.l.bf16 %v7479_v61 }
 0x1dd   : > { %v1751_v61 = vsel %vm9954_vm10, %v1747_v40, %v5110_v5  ;;  %v1752_v4 = vsel %vm9954_vm10, %v1748_v20, %v5111_v22 }
 0x1de   : > { %v5119_v17 = vpop.permute.xlu0 %5118  ;;  %v1753_v3 = vsel %vm9954_vm10, %v1749_v38, %v5115_v18  ;;  %v1754_v57 = vsel %vm9954_vm10, %v1750_v12, %v5116_v47 }
 0x1df   : > { %v5124_v43 = vpop.permute.xlu1 %5123  ;;  %v5121_v51 = vunpack.i.h.bf16 %v5119_v17  ;;  %v5120_v25 = vunpack.i.l.bf16 %v5119_v17 }
 0x1e0   : > { %v5126_v48 = vunpack.i.h.bf16 %v5124_v43  ;;  %v5125_v11 = vunpack.i.l.bf16 %v5124_v43 }
 0x1e1   : > { %v1755_v41 = vsel %vm708_vm11, %v1751_v61, %v5120_v25  ;;  %v1756_v59 = vsel %vm708_vm11, %v1752_v4, %v5121_v51 }
 0x1e2   : > { %v5129_v19 = vpop.permute.xlu0 %5128  ;;  %v1758_v55 = vsel %vm708_vm11, %v1754_v57, %v5126_v48 }
 0x1e3   : > { %v5134_v42 = vpop.permute.xlu1 %5133  ;;  %v5131_v15 = vunpack.i.h.bf16 %v5129_v19  ;;  %v5130_v45 = vunpack.i.l.bf16 %v5129_v19  ;;  %v1757_v19 = vsel %vm708_vm11, %v1753_v3, %v5125_v11 }
 0x1e4   : > { %v5136_v14 = vunpack.i.h.bf16 %v5134_v42  ;;  %v5135_v35 = vunpack.i.l.bf16 %v5134_v42 }
 0x1e5   : > { %v1759_v0 = vsel %vm713_vm12, %v1755_v41, %v5130_v45  ;;  %v1760_v22 = vsel %vm713_vm12, %v1756_v59, %v5131_v15  ;;  %v1913_v15 = vld [vmem:[%s6421_s16 + $0x62] sm:$0xff]  ;;  %v1914_v45 = vld [vmem:[%s6421_s16 + $0x16a] sm:$0xff]  ;;  %v1919_v41 = vld [vmem:[%s6421_s16 + $0x274] sm:$0xff] }
 0x1e6   : > { %v5139_v7 = vpop.permute.xlu0 %5138  ;;  %v1761_v42 = vsel %vm713_vm12, %v1757_v19, %v5135_v35  ;;  %v1762_v30 = vsel %vm713_vm12, %v1758_v55, %v5136_v14  ;;  %v1915_v14 = vld [vmem:[%s6421_s16 + $0x272] sm:$0xff]  ;;  %v1916_v35 = vld [vmem:[%s6421_s16 + $0x37a] sm:$0xff]  ;;  %v5167_v3 = vpack.i.bf16 %v1914_v45, %v1913_v15  ;;  %v1921_v19 = vld [vmem:[%s6421_s16 + $0x66] sm:$0xff] }
 0x1e7   : > { %v5144_v17 = vpop.permute.xlu1 %5143  ;;  %v5141_v54 = vunpack.i.h.bf16 %v5139_v7  ;;  %v5140_v43 = vunpack.i.l.bf16 %v5139_v7  ;;  %v5172_v57 = vpack.i.bf16 %v1916_v35, %v1915_v14  ;;  %v1920_v59 = vld [vmem:[%s6421_s16 + $0x37c] sm:$0xff]  ;;  %v1922_v55 = vld [vmem:[%s6421_s16 + $0x16e] sm:$0xff] }
 0x1e8   : > { %v5146_v1 = vunpack.i.h.bf16 %v5144_v17  ;;  %v5145_v34 = vunpack.i.l.bf16 %v5144_v17  ;;  %v1933_v15 = vld [vmem:[%s6421_s16 + $0x6c] sm:$0xff]  ;;  %v1934_v45 = vld [vmem:[%s6421_s16 + $0x174] sm:$0xff] }
 0x1e9   : > { %v1763_v18 = vsel %vm718_vm13, %v1759_v0, %v5140_v43  ;;  %v1764_v38 = vsel %vm718_vm13, %v1760_v22, %v5141_v54  ;;  %v1917_v54 = vld [vmem:[%s6421_s16 + $0x64] sm:$0xff]  ;;  %v1918_v43 = vld [vmem:[%s6421_s16 + $0x16c] sm:$0xff]  ;;  %v1923_v0 = vld [vmem:[%s6421_s16 + $0x276] sm:$0xff] }
 0x1ea   : > { %v5149_v5 = vpop.permute.xlu0 %5148  ;;  %v1765_v25 = vsel %vm718_vm13, %v1761_v42, %v5145_v34  ;;  %v1766_v32 = vsel %vm718_vm13, %v1762_v30, %v5146_v1  ;;  %v5177_v1 = vpack.i.bf16 %v1918_v43, %v1917_v54  ;;  %v5182_v34 = vpack.i.bf16 %v1920_v59, %v1919_v41  ;;  %v1924_v22 = vld [vmem:[%s6421_s16 + $0x37e] sm:$0xff]  ;;  %v1925_v30 = vld [vmem:[%s6421_s16 + $0x68] sm:$0xff]  ;;  %v7605_v41 = vld [vmem:[%s6421_s16 + $0x70] sm:$0xff] }
 0x1eb   : > { %v5154_v40 = vpop.permute.xlu1 %5153  ;;  %v5151_v20 = vunpack.i.h.bf16 %v5149_v5  ;;  %v5150_v47 = vunpack.i.l.bf16 %v5149_v5  ;;  %v5187_v5 = vpack.i.bf16 %v1922_v55, %v1921_v19  ;;  %v5192_v42 = vpack.i.bf16 %v1924_v22, %v1923_v0  ;;  %v1937_v35 = vld [vmem:[%s6421_s16 + $0x6e] sm:$0xff]  ;;  %v7608_v59 = vld [vmem:[%s6421_s16 + $0x178] sm:$0xff]  ;;  %v10077_v0 = vld [vmem:[#allocation11_spill] sm:$0xff] }
 0x1ec   : > { %v5156_v12 = vunpack.i.h.bf16 %v5154_v40  ;;  %v5155_v51 = vunpack.i.l.bf16 %v5154_v40  ;;  %v1926_v40 = vld [vmem:[%s6421_s16 + $0x170] sm:$0xff]  ;;  %v5237_v19 = vpack.i.bf16 %v7608_v59, %v7605_v41 }
 0x1ed   : > { %v1767_v48 = vsel %vm723_vm14, %v1763_v18, %v5150_v47  ;;  %v1768_v11 = vsel %vm723_vm14, %v1764_v38, %v5151_v20  ;;  %v1927_v20 = vld [vmem:[%s6421_s16 + $0x278] sm:$0xff]  ;;  %v1928_v47 = vld [vmem:[%s6421_s16 + $0x380] sm:$0xff]  ;;  %v5197_v18 = vpack.i.bf16 %v1926_v40, %v1925_v30  ;;  %v10078_v30 = vld [vmem:[#allocation12_spill] sm:$0xff] }
 0x1ee   : > { %v1769_v7 = vsel %vm723_vm14, %v1765_v25, %v5155_v51  ;;  %v1770_v61 = vsel %vm723_vm14, %v1766_v32, %v5156_v12  ;;  %v5157_v4 = vpack.i.bf16 %v1768_v11, %v1767_v48  ;;  %v5202_v38 = vpack.i.bf16 %v1928_v47, %v1927_v20  ;;  %v1929_v12 = vld [vmem:[%s6421_s16 + $0x6a] sm:$0xff]  ;;  %v1930_v51 = vld [vmem:[%s6421_s16 + $0x172] sm:$0xff]  ;;  %v1931_v25 = vld [vmem:[%s6421_s16 + $0x27a] sm:$0xff] }
 0x1ef   : > { %v5162_v17 = vpack.i.bf16 %v1770_v61, %v1769_v7  ;;  %v1932_v32 = vld [vmem:[%s6421_s16 + $0x382] sm:$0xff]  ;;  %v5207_v48 = vpack.i.bf16 %v1930_v51, %v1929_v12  ;;  %v6119_v22 = vld [vmem:[%s6421_s16 + $0x74] sm:$0xff]  ;;  %v6122_v20 = vld [vmem:[%s6421_s16 + $0x38c] sm:$0xff] }
 0x1f0   : > { %5158 = vrot.lane.b32.xlu0 %v5157_v4, %s10072_s26  ;;  %v5212_v11 = vpack.i.bf16 %v1932_v32, %v1931_v25  ;;  %v1935_v7 = vld [vmem:[%s6421_s16 + $0x27c] sm:$0xff]  ;;  %v1936_v61 = vld [vmem:[%s6421_s16 + $0x384] sm:$0xff]  ;;  %v5217_v4 = vpack.i.bf16 %v1934_v45, %v1933_v15  ;;  %v6126_v25 = vld [vmem:[%s6421_s16 + $0x390] sm:$0xff] }
 0x1f1   : > { %5163 = vrot.lane.b32.xlu1 %v5162_v17, %s10072_s26  ;;  %v5222_v14 = vpack.i.bf16 %v1936_v61, %v1935_v7  ;;  %v1938_v17 = vld [vmem:[%s6421_s16 + $0x176] sm:$0xff]  ;;  %v6121_v40 = vld [vmem:[%s6421_s16 + $0x284] sm:$0xff] }
 0x1f2   : > { %v5227_v54 = vpack.i.bf16 %v1938_v17, %v1937_v35  ;;  %v5262_v47 = vpack.i.bf16 %v6122_v20, %v6121_v40  ;;  %v6125_v51 = vld [vmem:[%s6421_s16 + $0x288] sm:$0xff]  ;;  %v6130_v45 = vld [vmem:[%s6421_s16 + $0x392] sm:$0xff] }
 0x1f3   : > { %v5282_v32 = vpack.i.bf16 %v6126_v25, %v6125_v51  ;;  %v6129_v15 = vld [vmem:[%s6421_s16 + $0x28a] sm:$0xff]  ;;  %v6134_v35 = vld [vmem:[%s6421_s16 + $0x394] sm:$0xff] }
 0x1f4   : > { %5168 = vrot.lane.b32.xlu0 %v5167_v3, %s10037_s17  ;;  %v1939_v3 = vld [vmem:[%s6421_s16 + $0x27e] sm:$0xff]  ;;  %v5292_v7 = vpack.i.bf16 %v6130_v45, %v6129_v15  ;;  %v6147_v25 = vld [vmem:[%s6421_s16 + $0x86] sm:$0xff] }
 0x1f5   : > { %5173 = vrot.lane.b32.xlu1 %v5172_v57, %s10037_s17  ;;  %v1940_v57 = vld [vmem:[%s6421_s16 + $0x386] sm:$0xff] }
 0x1f6   : > { %v5232_v43 = vpack.i.bf16 %v1940_v57, %v1939_v3  ;;  %v6132_v61 = vld [vmem:[%s6421_s16 + $0x184] sm:$0xff] }
 0x1f7   : > { %v6135_v3 = vld [vmem:[%s6421_s16 + $0x7e] sm:$0xff]  ;;  %v6136_v57 = vld [vmem:[%s6421_s16 + $0x186] sm:$0xff] }
 0x1f8   : > { %5178 = vrot.lane.b32.xlu0 %v5177_v1, %s10038_s20  ;;  %v7611_v1 = vld [vmem:[%s6421_s16 + $0x280] sm:$0xff]  ;;  %v6151_v45 = vld [vmem:[%s6421_s16 + $0x88] sm:$0xff] }
 0x1f9   : > { %5183 = vrot.lane.b32.xlu1 %v5182_v34, %s10038_s20  ;;  %v7614_v34 = vld [vmem:[%s6421_s16 + $0x388] sm:$0xff] }
 0x1fa   : > { %v5242_v55 = vpack.i.bf16 %v7614_v34, %v7611_v1  ;;  %v6143_v20 = vld [vmem:[%s6421_s16 + $0x84] sm:$0xff] }
 0x1fc   : > { %5188 = vrot.lane.b32.xlu0 %v5187_v5, %s10039_s15  ;;  %v6120_v5 = vld [vmem:[%s6421_s16 + $0x17c] sm:$0xff] }
 0x1fd   : > { %5193 = vrot.lane.b32.xlu1 %v5192_v42, %s10039_s15  ;;  %v5257_v42 = vpack.i.bf16 %v6120_v5, %v6119_v22  ;;  %v6140_v22 = vld [vmem:[%s6421_s16 + $0x18a] sm:$0xff] }
 0x200   : > { %5198 = vrot.lane.b32.xlu0 %v5197_v18, %s10040_s14  ;;  %v6123_v18 = vld [vmem:[%s6421_s16 + $0x78] sm:$0xff] }
 0x201   : > { %5203 = vrot.lane.b32.xlu1 %v5202_v38, %s10040_s14  ;;  %v6124_v38 = vld [vmem:[%s6421_s16 + $0x180] sm:$0xff] }
 0x202   : > { %v5277_v12 = vpack.i.bf16 %v6124_v38, %v6123_v18  ;;  %v6145_v38 = vld [vmem:[%s6421_s16 + $0x294] sm:$0xff] }
 0x204   : > { %5208 = vrot.lane.b32.xlu0 %v5207_v48, %s10073_s28  ;;  %v6127_v48 = vld [vmem:[%s6421_s16 + $0x7a] sm:$0xff] }
 0x205   : > { %5213 = vrot.lane.b32.xlu1 %v5212_v11, %s10073_s28  ;;  %v6128_v11 = vld [vmem:[%s6421_s16 + $0x182] sm:$0xff] }
 0x208   : > { %5218 = vrot.lane.b32.xlu0 %v5217_v4, %s10074_s29 }
 0x209   : > { %5223 = vrot.lane.b32.xlu1 %v5222_v14, %s10074_s29  ;;  %v6133_v14 = vld [vmem:[%s6421_s16 + $0x28c] sm:$0xff] }
 0x20a   : > { %v5302_v17 = vpack.i.bf16 %v6134_v35, %v6133_v14  ;;  %v6155_v35 = vld [vmem:[%s6421_s16 + $0x8a] sm:$0xff] }
 0x20c   : > { %5228 = vrot.lane.b32.xlu0 %v5227_v54, %s10075_s9  ;;  %v5307_v54 = vpack.i.bf16 %v6136_v57, %v6135_v3  ;;  %v6157_v57 = vld [vmem:[%s6421_s16 + $0x29a] sm:$0xff] }
 0x20d   : > { %5233 = vrot.lane.b32.xlu1 %v5232_v43, %s10075_s9  ;;  %v6137_v43 = vld [vmem:[%s6421_s16 + $0x28e] sm:$0xff] }
 0x210   : > { %5238 = vrot.lane.b32.xlu0 %v5237_v19, %s10076_s0  ;;  %v6138_v19 = vld [vmem:[%s6421_s16 + $0x396] sm:$0xff] }
 0x211   : > { %5243 = vrot.lane.b32.xlu1 %v5242_v55, %s10076_s0  ;;  %v5312_v55 = vpack.i.bf16 %v6138_v19, %v6137_v43  ;;  %v6159_v19 = vld [vmem:[%s6421_s16 + $0x8c] sm:$0xff] }
 0x214   : > { %5248 = vrot.lane.b32.xlu0 %v10077_v0, %s10034_s13  ;;  %v6139_v0 = vld [vmem:[%s6421_s16 + $0x82] sm:$0xff] }
 0x215   : > { %5253 = vrot.lane.b32.xlu1 %v10078_v30, %s10034_s13  ;;  %v5317_v5 = vpack.i.bf16 %v6140_v22, %v6139_v0  ;;  %v6142_v30 = vld [vmem:[%s6421_s16 + $0x39a] sm:$0xff] }
 0x216   : > { %v6161_v22 = vld [vmem:[%s6421_s16 + $0x29c] sm:$0xff] }
 0x218   : > { %5258 = vrot.lane.b32.xlu0 %v5257_v42, %s10035_s18  ;;  %v6141_v42 = vld [vmem:[%s6421_s16 + $0x292] sm:$0xff] }
 0x219   : > { %5263 = vrot.lane.b32.xlu1 %v5262_v47, %s10035_s18  ;;  %v5322_v40 = vpack.i.bf16 %v6142_v30, %v6141_v42  ;;  %v6144_v47 = vld [vmem:[%s6421_s16 + $0x18c] sm:$0xff]  ;;  %v7699_v30 = vld [vmem:[%s6421_s16 + $0x198] sm:$0xff] }
 0x21a   : > { %v5327_v18 = vpack.i.bf16 %v6144_v47, %v6143_v20  ;;  %v4850_v20 = vunpack.i.l.bf16 %v7135_v58 }
 0x21c   : > { %5268 = vrot.lane.b32.xlu0 %v6674_v24, %s10079_s1  ;;  %v5287_v24 = vpack.i.bf16 %v6128_v11, %v6127_v48  ;;  %v6149_v11 = vld [vmem:[%s6421_s16 + $0x296] sm:$0xff] }
 0x21d   : > { %5273 = vrot.lane.b32.xlu1 %v6681_v33, %s10079_s1  ;;  %v6131_v33 = vld [vmem:[%s6421_s16 + $0x7c] sm:$0xff] }
 0x21e   : > { %v5297_v4 = vpack.i.bf16 %v6132_v61, %v6131_v33  ;;  %v6153_v61 = vld [vmem:[%s6421_s16 + $0x298] sm:$0xff] }
 0x220   : > { %5278 = vrot.lane.b32.xlu0 %v5277_v12, %s10008_s11  ;;  %v6146_v12 = vld [vmem:[%s6421_s16 + $0x39c] sm:$0xff] }
 0x221   : > { %5283 = vrot.lane.b32.xlu1 %v5282_v32, %s10008_s11  ;;  %v5332_v51 = vpack.i.bf16 %v6146_v12, %v6145_v38  ;;  %v6148_v32 = vld [vmem:[%s6421_s16 + $0x18e] sm:$0xff]  ;;  %v4855_v12 = vunpack.i.l.bf16 %v7132_v16 }
 0x222   : > { %v5337_v48 = vpack.i.bf16 %v6148_v32, %v6147_v25  ;;  %v7709_v38 = vld [vmem:[%s6421_s16 + $0x3a8] sm:$0xff]  ;;  %v5387_v32 = vpack.i.bf16 %v7699_v30, %v7384_v6  ;;  %v4865_v6 = vunpack.i.l.bf16 %v7167_v39 }
 0x224   : > { %5288 = vrot.lane.b32.xlu0 %v5287_v24, %s10009_s10  ;;  %v6150_v24 = vld [vmem:[%s6421_s16 + $0x39e] sm:$0xff] }
 0x225   : > { %5293 = vrot.lane.b32.xlu1 %v5292_v7, %s10009_s10  ;;  %v5342_v15 = vpack.i.bf16 %v6150_v24, %v6149_v11  ;;  %v6152_v7 = vld [vmem:[%s6421_s16 + $0x190] sm:$0xff] }
 0x226   : > { %v5347_v33 = vpack.i.bf16 %v6152_v7, %v6151_v45  ;;  %v1941_v24 = vld [vmem:[%s6421_s16 + $0x92] sm:$0xff]  ;;  %v1944_v7 = vld [vmem:[%s6421_s16 + $0x3aa] sm:$0xff] }
 0x228   : > { %5298 = vrot.lane.b32.xlu0 %v5297_v4, %s10044_s12  ;;  %v6154_v4 = vld [vmem:[%s6421_s16 + $0x3a0] sm:$0xff] }
 0x229   : > { %5303 = vrot.lane.b32.xlu1 %v5302_v17, %s10044_s12  ;;  %v5352_v14 = vpack.i.bf16 %v6154_v4, %v6153_v61  ;;  %v6156_v17 = vld [vmem:[%s6421_s16 + $0x192] sm:$0xff]  ;;  %v4871_v61 = vunpack.i.h.bf16 %v7207_v26 }
 0x22a   : > { %v5357_v3 = vpack.i.bf16 %v6156_v17, %v6155_v35 }
 0x22c   : > { %5308 = vrot.lane.b32.xlu0 %v5307_v54, %s10036_s19  ;;  %v6158_v54 = vld [vmem:[%s6421_s16 + $0x3a2] sm:$0xff] }
 0x22d   : > { %5313 = vrot.lane.b32.xlu1 %v5312_v55, %s10036_s19  ;;  %v5362_v43 = vpack.i.bf16 %v6158_v54, %v6157_v57  ;;  %v6160_v55 = vld [vmem:[%s6421_s16 + $0x194] sm:$0xff]  ;;  %v1946_v57 = vld [vmem:[%s6421_s16 + $0x19c] sm:$0xff]  ;;  %v4876_v54 = vunpack.i.h.bf16 %v7201_v21 }
 0x22e   : > { %v5367_v0 = vpack.i.bf16 %v6160_v55, %v6159_v19  ;;  %v1948_v19 = vld [vmem:[%s6421_s16 + $0x3ac] sm:$0xff]  ;;  %v4881_v55 = vunpack.i.h.bf16 %v7237_v27 }
 0x230   : > { %5318 = vrot.lane.b32.xlu0 %v5317_v5, %s10037_s17  ;;  %v6162_v5 = vld [vmem:[%s6421_s16 + $0x3a4] sm:$0xff] }
 0x231   : > { %5323 = vrot.lane.b32.xlu1 %v5322_v40, %s10037_s17  ;;  %v5372_v42 = vpack.i.bf16 %v6162_v5, %v6161_v22  ;;  %v4851_v40 = vunpack.i.h.bf16 %v7135_v58  ;;  %v4861_v58 = vunpack.i.h.bf16 %v7175_v28 }
 0x234   : > { %5328 = vrot.lane.b32.xlu0 %v5327_v18, %s10038_s20  ;;  %v7706_v18 = vld [vmem:[%s6421_s16 + $0x2a0] sm:$0xff] }
 0x235   : > { %5333 = vrot.lane.b32.xlu1 %v5332_v51, %s10038_s20  ;;  %v4856_v51 = vunpack.i.h.bf16 %v7132_v16  ;;  %v5392_v11 = vpack.i.bf16 %v7709_v38, %v7706_v18  ;;  %v1444_v16 = vsel %vm653_vm0, %v7608_v59, %v4851_v40  ;;  %v4870_v59 = vunpack.i.l.bf16 %v7207_v26 }
 0x236   : > { %v1448_v17 = vsel %vm658_vm1, %v1444_v16, %v4861_v58  ;;  %v4885_v40 = vunpack.i.l.bf16 %v7231_v53  ;;  %v1950_v58 = vld [vmem:[%s6421_s16 + $0x19e] sm:$0xff]  ;;  %v1951_v16 = vld [vmem:[%s6421_s16 + $0x2a6] sm:$0xff] }
 0x238   : > { %5338 = vrot.lane.b32.xlu0 %v5337_v48, %s10039_s15  ;;  %v4860_v48 = vunpack.i.l.bf16 %v7175_v28  ;;  %v1943_v28 = vld [vmem:[%s6421_s16 + $0x2a2] sm:$0xff] }
 0x239   : > { %5343 = vrot.lane.b32.xlu1 %v5342_v15, %s10039_s15  ;;  %v1942_v15 = vld [vmem:[%s6421_s16 + $0x19a] sm:$0xff] }
 0x23c   : > { %5348 = vrot.lane.b32.xlu0 %v5347_v33, %s10040_s14  ;;  %v4866_v33 = vunpack.i.h.bf16 %v7167_v39  ;;  %v5402_v39 = vpack.i.bf16 %v1944_v7, %v1943_v28  ;;  %v4905_v28 = vunpack.i.l.bf16 %v7273_v23 }
 0x23d   : > { %5353 = vrot.lane.b32.xlu1 %v5352_v14, %s10040_s14  ;;  %v5397_v14 = vpack.i.bf16 %v1942_v15, %v1941_v24  ;;  %v4906_v24 = vunpack.i.h.bf16 %v7273_v23 }
 0x240   : > { %5358 = vrot.lane.b32.xlu0 %v5357_v3, %s10073_s28  ;;  %v1945_v3 = vld [vmem:[%s6421_s16 + $0x94] sm:$0xff] }
 0x241   : > { %5363 = vrot.lane.b32.xlu1 %v5362_v43, %s10073_s28  ;;  %v1947_v43 = vld [vmem:[%s6421_s16 + $0x2a4] sm:$0xff] }
 0x244   : > { %5368 = vrot.lane.b32.xlu0 %v5367_v0, %s10074_s29  ;;  %v4880_v0 = vunpack.i.l.bf16 %v7237_v27  ;;  %v4896_v27 = vunpack.i.h.bf16 %v7268_v52 }
 0x245   : > { %5373 = vrot.lane.b32.xlu1 %v5372_v42, %s10074_s29  ;;  %v1452_v42 = vsel %vm663_vm2, %v1448_v17, %v4871_v61 }
 0x246   : > { %v7703_v47 = vpop.f32.mrf.mxu0 }
 0x247   : > { %10080 = vst [vmem:[#allocation19_spill] sm:$0xff] %v7703_v47 }
 0x248   : > { %5378 = vrot.lane.b32.xlu0 %v7159_v36, %s10075_s9  ;;  %v1150_v25 = vpop.f32.mrf.mxu0  ;;  %v1443_v36 = vsel %vm653_vm0, %v7605_v41, %v4850_v20  ;;  %v1446_v41 = vsel %vm653_vm0, %v7614_v34, %v4856_v51  ;;  %v7761_v20 = vpack.i.bf16 %v1946_v57, %v1945_v3  ;;  %v4886_v51 = vunpack.i.h.bf16 %v7231_v53  ;;  %v1955_v3 = vld [vmem:[%s6421_s16 + $0x2a8] sm:$0xff]  ;;  %v1956_v57 = vld [vmem:[%s6421_s16 + $0x3b0] sm:$0xff] }
 0x249   : > { %5383 = vrot.lane.b32.xlu1 %v7165_v49, %s10075_s9  ;;  %v1445_v49 = vsel %vm653_vm0, %v7611_v1, %v4855_v12  ;;  %v1447_v35 = vsel %vm658_vm1, %v1443_v36, %v4860_v48  ;;  %v4875_v1 = vunpack.i.l.bf16 %v7201_v21  ;;  %v1450_v22 = vsel %vm658_vm1, %v1446_v41, %v4866_v33  ;;  %v1952_v36 = vld [vmem:[%s6421_s16 + $0x3ae] sm:$0xff] }
 0x24a   : > { %v7730_v45 = vpop.f32.mrf.mxu0  ;;  %v1449_v26 = vsel %vm658_vm1, %v1445_v49, %v4865_v6  ;;  %v1451_v5 = vsel %vm663_vm2, %v1447_v35, %v4870_v59  ;;  %v5412_v25 = vpack.i.bf16 %v1948_v19, %v1947_v43  ;;  %v1454_v48 = vsel %vm663_vm2, %v1450_v22, %v4876_v54  ;;  %v1954_v35 = vld [vmem:[%s6421_s16 + $0x1a0] sm:$0xff] }
 0x24b   : > { %10081 = vst [vmem:[#allocation20_spill] sm:$0xff] %v7730_v45  ;;  %v1453_v12 = vsel %vm663_vm2, %v1449_v26, %v4875_v1  ;;  %v1455_v53 = vsel %vm668_vm3, %v1451_v5, %v4880_v0  ;;  %v1456_v6 = vsel %vm668_vm3, %v1452_v42, %v4881_v55  ;;  %v4911_v49 = vunpack.i.h.bf16 %v7288_v10 }
 0x24c   : > { %5388 = vrot.lane.b32.xlu0 %v5387_v32, %s10076_s0  ;;  %v1155_v4 = vpop.f32.mrf.mxu0  ;;  %v1949_v32 = vld [vmem:[%s6421_s16 + $0x96] sm:$0xff]  ;;  %v1457_v7 = vsel %vm668_vm3, %v1453_v12, %v4885_v40  ;;  %v1458_v59 = vsel %vm668_vm3, %v1454_v48, %v4886_v51  ;;  %v1460_v41 = vsel %vm673_vm4, %v1456_v6, %v4896_v27  ;;  %v5422_v23 = vpack.i.bf16 %v1952_v36, %v1951_v16 }
 0x24d   : > { %5393 = vrot.lane.b32.xlu1 %v5392_v11, %s10076_s0  ;;  %v4895_v11 = vunpack.i.l.bf16 %v7268_v52  ;;  %v4910_v52 = vunpack.i.l.bf16 %v7288_v10  ;;  %v5417_v61 = vpack.i.bf16 %v1950_v58, %v1949_v32  ;;  %v4915_v4 = vunpack.i.l.bf16 %v7292_v2  ;;  %v1957_v40 = vld [vmem:[%s6421_s16 + $0x9a] sm:$0xff]  ;;  %v1959_v32 = vld [vmem:[%s6421_s16 + $0x2aa] sm:$0xff]  ;;  %v1960_v58 = vld [vmem:[%s6421_s16 + $0x3b2] sm:$0xff] }
 0x24e   : > { %v7750_v34 = vpop.f32.mrf.mxu0  ;;  %v1462_v10 = vsel %vm673_vm4, %v1458_v59, %v4906_v24  ;;  %v4916_v1 = vunpack.i.h.bf16 %v7292_v2  ;;  %v1461_v26 = vsel %vm673_vm4, %v1457_v7, %v4905_v28  ;;  %v4921_v54 = vunpack.i.h.bf16 %v7303_v60 }
 0x24f   : > { %10082 = vst [vmem:[#allocation22_spill] sm:$0xff] %v7750_v34  ;;  %v1459_v17 = vsel %vm673_vm4, %v1455_v53, %v4895_v11  ;;  %v4926_v43 = vunpack.i.h.bf16 %v7305_v44  ;;  %v4925_v19 = vunpack.i.l.bf16 %v7305_v44  ;;  %v1464_v0 = vsel %vm678_vm5, %v1460_v41, %v4911_v49 }
 0x250   : > { %5398 = vrot.lane.b32.xlu0 %v5397_v14, %s10034_s13  ;;  %v1160_v21 = vpop.f32.mrf.mxu0  ;;  %v1953_v14 = vld [vmem:[%s6421_s16 + $0x98] sm:$0xff]  ;;  %v1463_v55 = vsel %vm678_vm5, %v1459_v17, %v4910_v52  ;;  %v4931_v2 = vunpack.i.h.bf16 %v7312_v37  ;;  %v1465_v5 = vsel %vm678_vm5, %v1461_v26, %v4915_v4  ;;  %v4930_v42 = vunpack.i.l.bf16 %v7312_v37  ;;  %v1963_v4 = vld [vmem:[%s6421_s16 + $0x2ac] sm:$0xff] }
 0x251   : > { %5403 = vrot.lane.b32.xlu1 %v5402_v39, %s10034_s13  ;;  %v4920_v39 = vunpack.i.l.bf16 %v7303_v60  ;;  %v7804_v22 = vpack.i.bf16 %v1954_v35, %v1953_v14  ;;  %v4936_v60 = vunpack.i.h.bf16 %v7314_v63  ;;  %v7810_v44 = vpack.i.bf16 %v1956_v57, %v1955_v3  ;;  %v1958_v21 = vld [vmem:[%s6421_s16 + $0x1a2] sm:$0xff]  ;;  %v10084_v57 = vld [vmem:[#allocation13_spill] sm:$0xff] }
 0x252   : > { %v7772_v15 = vpop.f32.mrf.mxu0  ;;  %v1466_v12 = vsel %vm678_vm5, %v1462_v10, %v4916_v1  ;;  %v4935_v27 = vunpack.i.l.bf16 %v7314_v63  ;;  %v1468_v37 = vsel %vm683_vm6, %v1464_v0, %v4921_v54  ;;  %v1469_v48 = vsel %vm683_vm6, %v1465_v5, %v4925_v19  ;;  %v1961_v52 = vld [vmem:[%s6421_s16 + $0x9c] sm:$0xff] }
 0x253   : > { %10083 = vst [vmem:[#allocation21_spill] sm:$0xff] %v7772_v15  ;;  %v1467_v51 = vsel %vm683_vm6, %v1463_v55, %v4920_v39  ;;  %v1470_v11 = vsel %vm683_vm6, %v1466_v12, %v4926_v43  ;;  %v4950_v24 = vunpack.i.l.bf16 %v7320_v9  ;;  %v1472_v16 = vsel %vm9970_vm7, %v1468_v37, %v4931_v2  ;;  %v1965_v19 = vld [vmem:[%s6421_s16 + $0x9e] sm:$0xff]  ;;  %v1966_v55 = vld [vmem:[%s6421_s16 + $0x1a6] sm:$0xff]  ;;  %v1968_v12 = vld [vmem:[%s6421_s16 + $0x3b6] sm:$0xff] }
 0x254   : > { %5408 = vrot.lane.b32.xlu0 %v7761_v20, %s10035_s18  ;;  %v1165_v33 = vpop.f32.mrf.mxu0  ;;  %v4941_v36 = vunpack.i.h.bf16 %v7316_v50  ;;  %v4960_v63 = vunpack.i.l.bf16 %v7324_v31  ;;  %v5437_v53 = vpack.i.bf16 %v1958_v21, %v1957_v40  ;;  %v7830_v6 = vsel %vm9970_vm7, %v1470_v11, %v4936_v60  ;;  %v10085_v2 = vld [vmem:[#allocation14_spill] sm:$0xff]  ;;  %v1967_v21 = vld [vmem:[%s6421_s16 + $0x2ae] sm:$0xff] }
 0x255   : > { %5413 = vrot.lane.b32.xlu1 %v5412_v25, %s10035_s18  ;;  %v4940_v25 = vunpack.i.l.bf16 %v7316_v50  ;;  %v1471_v28 = vsel %vm9970_vm7, %v1467_v51, %v4930_v42  ;;  %v4970_v7 = vunpack.i.l.bf16 %v7328_v13  ;;  %v5442_v49 = vpack.i.bf16 %v1960_v58, %v1959_v32  ;;  %v1962_v50 = vld [vmem:[%s6421_s16 + $0x1a4] sm:$0xff]  ;;  %v6164_v15 = vld [vmem:[%s6421_s16 + $0x290] sm:$0xff] }
 0x256   : > { %v1473_v33 = vsel %vm9970_vm7, %v1469_v48, %v4935_v27  ;;  %v4951_v59 = vunpack.i.h.bf16 %v7320_v9  ;;  %v4980_v41 = vunpack.i.l.bf16 %v7332_v29  ;;  %v4945_v14 = vunpack.i.l.bf16 %v7318_v62  ;;  %v10086_v58 = vld [vmem:[#allocation15_spill] sm:$0xff] }
 0x257   : > { %v4961_v17 = vunpack.i.h.bf16 %v7324_v31  ;;  %v4990_v10 = vunpack.i.l.bf16 %v7336_v56  ;;  %v1476_v1 = vsel %vm9968_vm8, %v1472_v16, %v4941_v36  ;;  %v5000_v9 = vunpack.i.l.bf16 %v7340_v46 }
 0x258   : > { %5418 = vrot.lane.b32.xlu0 %v5417_v61, %s10079_s1  ;;  %v1475_v61 = vsel %vm9968_vm8, %v1471_v28, %v4940_v25  ;;  %v7852_v3 = vpack.i.bf16 %v1962_v50, %v1961_v52  ;;  %v4955_v26 = vunpack.i.l.bf16 %v10084_v57  ;;  %v4971_v54 = vunpack.i.h.bf16 %v7328_v13 }
 0x259   : > { %5423 = vrot.lane.b32.xlu1 %v5422_v23, %s10079_s1  ;;  %v1964_v23 = vld [vmem:[%s6421_s16 + $0x3b4] sm:$0xff]  ;;  %v1479_v35 = vsel %vm9969_vm9, %v1475_v61, %v4950_v24  ;;  %v1480_v0 = vsel %vm9969_vm9, %v1476_v1, %v4951_v59  ;;  %v4965_v5 = vunpack.i.l.bf16 %v10085_v2  ;;  %v4981_v60 = vunpack.i.h.bf16 %v7332_v29 }
 0x25a   : > { %v1483_v39 = vsel %vm9954_vm10, %v1479_v35, %v4960_v63  ;;  %v7858_v43 = vpack.i.bf16 %v1964_v23, %v1963_v4  ;;  %v1484_v13 = vsel %vm9954_vm10, %v1480_v0, %v4961_v17  ;;  %v4991_v51 = vunpack.i.h.bf16 %v7336_v56  ;;  %v10089_v61 = vld [vmem:[#allocation17_spill] sm:$0xff]  ;;  %v10090_v23 = vld [vmem:[#allocation18_spill] sm:$0xff] }
 0x25b   : > { %v1487_v31 = vsel %vm708_vm11, %v1483_v39, %v4970_v7  ;;  %v4975_v37 = vunpack.i.l.bf16 %v10086_v58  ;;  %v5001_v48 = vunpack.i.h.bf16 %v7340_v46  ;;  %v5457_v11 = vpack.i.bf16 %v1966_v55, %v1965_v19  ;;  %v10088_v46 = vld [vmem:[#allocation16_spill] sm:$0xff] }
 0x25c   : > { %5428 = vrot.lane.b32.xlu0 %v7804_v22, %s10008_s11  ;;  %v1491_v42 = vsel %vm713_vm12, %v1487_v31, %v4980_v41  ;;  %v1488_v24 = vsel %vm708_vm11, %v1484_v13, %v4971_v54  ;;  %v5462_v36 = vpack.i.bf16 %v1968_v12, %v1967_v21  ;;  %v4946_v63 = vunpack.i.h.bf16 %v7318_v62 }
 0x25d   : > { %5433 = vrot.lane.b32.xlu1 %v7810_v44, %s10008_s11  ;;  %v1495_v32 = vsel %vm718_vm13, %v1491_v42, %v4990_v10  ;;  %v4985_v28 = vunpack.i.l.bf16 %v10088_v46  ;;  %v1492_v7 = vsel %vm713_vm12, %v1488_v24, %v4981_v60  ;;  %v4956_v52 = vunpack.i.h.bf16 %v10084_v57 }
 0x25e   : > { %v1499_v29 = vsel %vm723_vm14, %v1495_v32, %v5000_v9  ;;  %v4995_v59 = vunpack.i.l.bf16 %v10089_v61  ;;  %v1496_v62 = vsel %vm718_vm13, %v1492_v7, %v4991_v51  ;;  %v4976_v17 = vunpack.i.h.bf16 %v10086_v58 }
 0x25f   : > { %v1500_v35 = vsel %vm723_vm14, %v1496_v62, %v5001_v48  ;;  %v1478_v39 = vsel %vm9968_vm8, %v7830_v6, %v4946_v63  ;;  %v4986_v9 = vunpack.i.h.bf16 %v10088_v46  ;;  %v4996_v31 = vunpack.i.h.bf16 %v10089_v61 }
 0x260   : > { %5438 = vrot.lane.b32.xlu0 %v5437_v53, %s10009_s10  ;;  %v1477_v53 = vsel %vm9968_vm8, %v1473_v33, %v4945_v14  ;;  %v4966_v33 = vunpack.i.h.bf16 %v10085_v2  ;;  %v5005_v14 = vunpack.i.l.bf16 %v10090_v23  ;;  %v1482_v54 = vsel %vm9969_vm9, %v1478_v39, %v4956_v52 }
 0x261   : > { %5443 = vrot.lane.b32.xlu1 %v5442_v49, %s10009_s10  ;;  %v1481_v50 = vsel %vm9969_vm9, %v1477_v53, %v4955_v26  ;;  %v5006_v0 = vunpack.i.h.bf16 %v10090_v23  ;;  %v7982_v23 = vld [vmem:[%s6421_s16 + $0xa0] sm:$0xff] }
 0x262   : > { %v5159_v40 = vpop.permute.xlu0 %5158  ;;  %v1485_v4 = vsel %vm9954_vm10, %v1481_v50, %v4965_v5  ;;  %v1486_v6 = vsel %vm9954_vm10, %v1482_v54, %v4966_v33  ;;  %vm10091_vm10 = vmmov %vm10087_vm15  ;;  %4398 = vmatprep.mubr.msk.f32.mxu0 %vm653_vm0, %v7982_v23  ;;  %v4395_v54 = vld [vmem:[%s9882_s2 + $0x188] sm:$0xff] }
 0x263   : > { %v5164_v27 = vpop.permute.xlu1 %5163  ;;  %v5160_v25 = vunpack.i.l.bf16 %v5159_v40  ;;  %v5161_v16 = vunpack.i.h.bf16 %v5159_v40  ;;  %v1489_v10 = vsel %vm708_vm11, %v1485_v4, %v4975_v37  ;;  %v1490_v5 = vsel %vm708_vm11, %v1486_v6, %v4976_v17  ;;  %2567 = vmatpush1.msra.mxu0 %v4395_v54 }
 0x264   : > { %5448 = vrot.lane.b32.xlu0 %v7852_v3, %s10044_s12  ;;  %v5165_v1 = vunpack.i.l.bf16 %v5164_v27  ;;  %v1493_v57 = vsel %vm713_vm12, %v1489_v10, %v4985_v28  ;;  %v5166_v60 = vunpack.i.h.bf16 %v5164_v27  ;;  %v1494_v40 = vsel %vm713_vm12, %v1490_v5, %v4986_v9  ;;  %2568 = vmatprep.subr.mxu0 %v10033_v8 }
 0x265   : > { %5453 = vrot.lane.b32.xlu1 %v7858_v43, %s10044_s12  ;;  %v1787_v56 = vsel %vm10087_vm15, %v1499_v29, %v5160_v25  ;;  %v1497_v55 = vsel %vm718_vm13, %v1493_v57, %v4995_v59 }
 0x266   : > { %v7884_v49 = vpop.permute.xlu0 %5168  ;;  %1889 = vmatmul.mubr.f32.vlgmr.msra.gmra.mxu1 %v1787_v56  ;;  %v1501_v2 = vsel %vm723_vm14, %v1497_v55, %v5005_v14 }
 0x267   : > { %v7889_v41 = vpop.permute.xlu1 %5173  ;;  %4377 = vmatprep.mubr.msk.f32.mxu1 %vm653_vm0, %v7699_v30  ;;  %v1788_v30 = vsel %vm10087_vm15, %v1500_v35, %v5161_v16  ;;  %v1789_v42 = vsel %vm10087_vm15, %v1501_v2, %v5165_v1  ;;  %v4392_v2 = vld [vmem:[%s9882_s2 + $0x170] sm:$0xff]  ;;  %vm10100_vm15 = vcmask 359424  }
 0x268   : > { %5458 = vrot.lane.b32.xlu0 %v5457_v11, %s10036_s19 }
 0x269   : > { %5463 = vrot.lane.b32.xlu1 %v5462_v36, %s10036_s19 }
 0x26a   : > { %v7907_v26 = vpop.permute.xlu0 %5178  ;;  %1894 = vmatmul.mubr.f32.gmra.mxu1 %v1788_v30 }
 0x26b   : > { %v7911_v19 = vpop.permute.xlu1 %5183  ;;  %4378 = vmatprep.mubr.msk.f32.mxu1 %vm653_vm0, %v7706_v18  ;;  %v1498_v18 = vsel %vm718_vm13, %v1494_v40, %v4996_v31  ;;  %v4394_v31 = vld [vmem:[%s9882_s2 + $0x180] sm:$0xff] }
 0x26c   : > { %v1502_v13 = vsel %vm723_vm14, %v1498_v18, %v5006_v0  ;;  %2569 = vmatpush1.msra.mxu0 %v4394_v31  ;;  %v4393_v0 = vld [vmem:[%s9882_s2 + $0x178] sm:$0xff]  ;;  %v4391_v18 = vld [vmem:[%s9882_s2 + $0x168] sm:$0xff] }
 0x26d   : > { %v1790_v51 = vsel %vm10091_vm10, %v1502_v13, %v5166_v60  ;;  %2570 = vmatprep.subr.mxu0 %v10033_v8  ;;  %v4390_v13 = vld [vmem:[%s9882_s2 + $0x160] sm:$0xff]  ;;  %vm10099_vm10 = vcmask 1043456  }
 0x26e   : > { %v7922_v21 = vpop.permute.xlu0 %5188  ;;  %1899 = vmatmul.mubr.f32.gmra.mxu1 %v1789_v42  ;;  %2571 = vmatpush1.msra.mxu0 %v4393_v0 }
 0x26f   : > { %v7924_v12 = vpop.permute.xlu1 %5193  ;;  %4379 = vmatprep.mubr.msk.f32.mxu1 %vm653_vm0, %v7709_v38  ;;  %2572 = vmatprep.subr.mxu0 %v10033_v8 }
 0x270   : > { %2573 = vmatpush1.msra.mxu0 %v4392_v2 }
 0x271   : > { %2574 = vmatprep.subr.mxu0 %v10033_v8 }
 0x272   : > { %v7931_v25 = vpop.permute.xlu0 %5198  ;;  %1904 = vmatmul.mubr.f32.gmra.mxu1 %v1790_v51  ;;  %2575 = vmatpush1.msra.mxu0 %v4391_v18 }
 0x273   : > { %v7933_v27 = vpop.permute.xlu1 %5203  ;;  %2576 = vmatprep.subr.mxu0 %v10033_v8 }
 0x274   : > { %2577 = vmatpush1.msra.mxu0 %v4390_v13 }
 0x275   : > { %2578 = vmatprep.subr.mxu0 %v10033_v8 }
 0x276   : > { %v7935_v32 = vpop.permute.xlu0 %5208 }
 0x277   : > { %v7937_v58 = vpop.permute.xlu1 %5213 }
 0x27a   : > { %v7939_v37 = vpop.permute.xlu0 %5218 }
 0x27b   : > { %v7941_v48 = vpop.permute.xlu1 %5223 }
 0x27e   : > { %v7943_v38 = vpop.permute.xlu0 %5228 }
 0x27f   : > { %v7945_v29 = vpop.permute.xlu1 %5233 }
 0x282   : > { %v7947_v11 = vpop.permute.xlu0 %5238 }
 0x283   : > { %v7949_v24 = vpop.permute.xlu1 %5243 }
 0x286   : > { %v7951_v16 = vpop.permute.xlu0 %5248 }
 0x287   : > { %v7953_v56 = vpop.permute.xlu1 %5253 }
 0x28a   : > { %v7955_v36 = vpop.permute.xlu0 %5258 }
 0x28b   : > { %v7957_v63 = vpop.permute.xlu1 %5263 }
 0x28c   : > { %10092 = vst [vmem:[#allocation24_spill] sm:$0xff] %v7957_v63 }
 0x28e   : > { %v7959_v53 = vpop.permute.xlu0 %5268 }
 0x28f   : > { %v7961_v46 = vpop.permute.xlu1 %5273 }
 0x290   : > { %10093 = vst [vmem:[#allocation26_spill] sm:$0xff] %v7961_v46 }
 0x292   : > { %v7963_v28 = vpop.permute.xlu0 %5278 }
 0x293   : > { %v7965_v7 = vpop.permute.xlu1 %5283 }
 0x294   : > { %10094 = vst [vmem:[#allocation28_spill] sm:$0xff] %v7965_v7  ;;  %v6165_v7 = vld [vmem:[%s6421_s16 + $0x188] sm:$0xff] }
 0x296   : > { %v7967_v52 = vpop.permute.xlu0 %5288 }
 0x297   : > { %v7969_v50 = vpop.permute.xlu1 %5293 }
 0x298   : > { %10095 = vst [vmem:[#allocation30_spill] sm:$0xff] %v7969_v50 }
 0x29a   : > { %v7971_v61 = vpop.permute.xlu0 %5298 }
 0x29b   : > { %v7973_v59 = vpop.permute.xlu1 %5303 }
 0x29c   : > { %10096 = vst [vmem:[#allocation32_spill] sm:$0xff] %v7973_v59 }
 0x29e   : > { %v7975_v62 = vpop.permute.xlu0 %5308 }
 0x29f   : > { %10097 = vst [vmem:[#allocation34_spill] sm:$0xff] %v7975_v62  ;;  %v7977_v33 = vpop.permute.xlu1 %5313 }
 0x2a0   : > { %10098 = vst [vmem:[#allocation23_spill] sm:$0xff] %v7977_v33 }
 0x2a2   : > { %v7979_v4 = vpop.permute.xlu0 %5318 }
 0x2a3   : > { %v5324_v14 = vpop.permute.xlu1 %5323  ;;  %v5321_v34 = vunpack.i.h.bf16 %v7979_v4  ;;  %v5320_v47 = vunpack.i.l.bf16 %v7979_v4 }
 0x2a4   : > { %v5326_v60 = vunpack.i.h.bf16 %v5324_v14  ;;  %v5325_v42 = vunpack.i.l.bf16 %v5324_v14  ;;  %v6163_v14 = vld [vmem:[%s6421_s16 + $0x398] sm:$0xff] }
 0x2a6   : > { %v7986_v35 = vpop.permute.xlu0 %5328  ;;  %v2456_v0 = vsel %vm653_vm0, %v6163_v14, %v5326_v60  ;;  %v2455_v2 = vsel %vm653_vm0, %v6164_v15, %v5325_v42  ;;  %v4389_v15 = vld [vmem:[%s9882_s2 + $0x158] sm:$0xff]  ;;  %v4388_v60 = vld [vmem:[%s9882_s2 + $0x150] sm:$0xff] }
 0x2a7   : > { %v5334_v17 = vpop.permute.xlu1 %5333  ;;  %v5331_v13 = vunpack.i.h.bf16 %v7986_v35  ;;  %v5330_v14 = vunpack.i.l.bf16 %v7986_v35  ;;  %2579 = vmatpush1.msra.mxu0 %v4389_v15 }
 0x2a8   : > { %v5336_v51 = vunpack.i.h.bf16 %v5334_v17  ;;  %v5335_v54 = vunpack.i.l.bf16 %v5334_v17  ;;  %2580 = vmatprep.subr.mxu0 %v10033_v8 }
 0x2a9   : > { %2581 = vmatpush1.msra.mxu0 %v4388_v60 }
 0x2aa   : > { %v7988_v10 = vpop.permute.xlu0 %5338  ;;  %v2459_v42 = vsel %vm658_vm1, %v2455_v2, %v5335_v54  ;;  %v2460_v4 = vsel %vm658_vm1, %v2456_v0, %v5336_v51  ;;  %v2454_v54 = vsel %vm653_vm0, %v6165_v7, %v5321_v34  ;;  %v6166_v2 = vld [vmem:[%s6421_s16 + $0x80] sm:$0xff]  ;;  %2582 = vmatprep.subr.mxu0 %v10033_v8  ;;  %v4387_v34 = vld [vmem:[%s9882_s2 + $0x148] sm:$0xff] }
 0x2ab   : > { %v7990_v1 = vpop.permute.xlu1 %5343  ;;  %v5341_v33 = vunpack.i.h.bf16 %v7988_v10  ;;  %v5340_v59 = vunpack.i.l.bf16 %v7988_v10  ;;  %v2453_v51 = vsel %vm653_vm0, %v6166_v2, %v5320_v47  ;;  %v4386_v47 = vld [vmem:[%s9882_s2 + $0x140] sm:$0xff]  ;;  %2583 = vmatpush1.msra.mxu0 %v4387_v34 }
 0x2ac   : > { %v5346_v17 = vunpack.i.h.bf16 %v7990_v1  ;;  %v5345_v18 = vunpack.i.l.bf16 %v7990_v1  ;;  %v2457_v7 = vsel %vm658_vm1, %v2453_v51, %v5330_v14  ;;  %2584 = vmatprep.subr.mxu0 %v10033_v8 }
 0x2ad   : > { %2585 = vmatpush1.msra.mxu0 %v4386_v47 }
 0x2ae   : > { %v7992_v30 = vpop.permute.xlu0 %5348  ;;  %v2463_v15 = vsel %vm663_vm2, %v2459_v42, %v5345_v18  ;;  %v2464_v46 = vsel %vm663_vm2, %v2460_v4, %v5346_v17  ;;  %2586 = vmatprep.subr.mxu0 %v10033_v8 }
 0x2af   : > { %v7994_v39 = vpop.permute.xlu1 %5353  ;;  %v5351_v10 = vunpack.i.h.bf16 %v7992_v30  ;;  %v5350_v63 = vunpack.i.l.bf16 %v7992_v30  ;;  %v2461_v30 = vsel %vm663_vm2, %v2457_v7, %v5340_v59 }
 0x2b0   : > { %v5356_v0 = vunpack.i.h.bf16 %v7994_v39  ;;  %v5355_v35 = vunpack.i.l.bf16 %v7994_v39  ;;  %v2458_v39 = vsel %vm658_vm1, %v2454_v54, %v5331_v13 }
 0x2b1   : > { %v2462_v42 = vsel %vm663_vm2, %v2458_v39, %v5341_v33  ;;  %v2465_v59 = vsel %vm668_vm3, %v2461_v30, %v5350_v63 }
 0x2b2   : > { %v7996_v9 = vpop.permute.xlu0 %5358  ;;  %v2467_v13 = vsel %vm668_vm3, %v2463_v15, %v5355_v35  ;;  %v2468_v14 = vsel %vm668_vm3, %v2464_v46, %v5356_v0  ;;  %v2466_v33 = vsel %vm668_vm3, %v2462_v42, %v5351_v10  ;;  %v4385_v35 = vld [vmem:[%s9882_s2 + $0x138] sm:$0xff]  ;;  %v4384_v46 = vld [vmem:[%s9882_s2 + $0x130] sm:$0xff] }
 0x2b3   : > { %v7998_v57 = vpop.permute.xlu1 %5363  ;;  %v5361_v17 = vunpack.i.h.bf16 %v7996_v9  ;;  %v5360_v18 = vunpack.i.l.bf16 %v7996_v9  ;;  %2587 = vmatpush1.msra.mxu0 %v4385_v35 }
 0x2b4   : > { %v5366_v4 = vunpack.i.h.bf16 %v7998_v57  ;;  %v5365_v2 = vunpack.i.l.bf16 %v7998_v57  ;;  %2588 = vmatprep.subr.mxu0 %v10033_v8 }
 0x2b5   : > { %v2470_v63 = vsel %vm673_vm4, %v2466_v33, %v5361_v17  ;;  %2589 = vmatpush1.msra.mxu0 %v4384_v46 }
 0x2b6   : > { %v8006_v55 = vpop.permute.xlu0 %5368  ;;  %v2471_v15 = vsel %vm673_vm4, %v2467_v13, %v5365_v2  ;;  %2590 = vmatprep.subr.mxu0 %v10033_v8  ;;  %v4383_v2 = vld [vmem:[%s9882_s2 + $0x128] sm:$0xff]  ;;  %v4382_v13 = vld [vmem:[%s9882_s2 + $0x120] sm:$0xff] }
 0x2b7   : > { %v8008_v6 = vpop.permute.xlu1 %5373  ;;  %v5371_v9 = vunpack.i.h.bf16 %v8006_v55  ;;  %v5370_v54 = vunpack.i.l.bf16 %v8006_v55  ;;  %v2469_v55 = vsel %vm673_vm4, %v2465_v59, %v5360_v18  ;;  %2591 = vmatpush1.msra.mxu0 %v4383_v2 }
 0x2b8   : > { %v5376_v51 = vunpack.i.h.bf16 %v8008_v6  ;;  %v5375_v57 = vunpack.i.l.bf16 %v8008_v6  ;;  %v2472_v6 = vsel %vm673_vm4, %v2468_v14, %v5366_v4  ;;  %2592 = vmatprep.subr.mxu0 %v10033_v8 }
 0x2b9   : > { %v2473_v7 = vsel %vm678_vm5, %v2469_v55, %v5370_v54  ;;  %v2474_v39 = vsel %vm678_vm5, %v2470_v63, %v5371_v9  ;;  %2593 = vmatpush1.msra.mxu0 %v4382_v13 }
 0x2ba   : > { %v8018_v5 = vpop.permute.xlu0 %5378  ;;  %v2475_v30 = vsel %vm678_vm5, %v2471_v15, %v5375_v57  ;;  %v2476_v42 = vsel %vm678_vm5, %v2472_v6, %v5376_v51  ;;  %2594 = vmatprep.subr.mxu0 %v10033_v8 }
 0x2bb   : > { %v8020_v40 = vpop.permute.xlu1 %5383  ;;  %v5381_v10 = vunpack.i.h.bf16 %v8018_v5  ;;  %v5380_v34 = vunpack.i.l.bf16 %v8018_v5 }
 0x2bc   : > { %v5386_v17 = vunpack.i.h.bf16 %v8020_v40  ;;  %v5385_v18 = vunpack.i.l.bf16 %v8020_v40 }
 0x2bd   : > { %v2478_v33 = vsel %vm683_vm6, %v2474_v39, %v5381_v10  ;;  %v4381_v10 = vld [vmem:[%s9882_s2 + $0x118] sm:$0xff] }
 0x2be   : > { %v8030_v31 = vpop.permute.xlu0 %5388  ;;  %v2479_v46 = vsel %vm683_vm6, %v2475_v30, %v5385_v18  ;;  %2595 = vmatpush1.msra.mxu0 %v4381_v10 }
 0x2bf   : > { %v8036_v45 = vpop.permute.xlu1 %5393  ;;  %v5391_v4 = vunpack.i.h.bf16 %v8030_v31  ;;  %v5390_v5 = vunpack.i.l.bf16 %v8030_v31  ;;  %v2477_v31 = vsel %vm683_vm6, %v2473_v7, %v5380_v34  ;;  %2596 = vmatprep.subr.mxu0 %v10033_v8 }
 0x2c0   : > { %v5396_v40 = vunpack.i.h.bf16 %v8036_v45  ;;  %v5395_v14 = vunpack.i.l.bf16 %v8036_v45  ;;  %v2480_v45 = vsel %vm683_vm6, %v2476_v42, %v5386_v17 }
 0x2c1   : > { %v2481_v63 = vsel %vm9970_vm7, %v2477_v31, %v5390_v5  ;;  %v2482_v15 = vsel %vm9970_vm7, %v2478_v33, %v5391_v4  ;;  %v4380_v5 = vld [vmem:[%s9882_s2 + $0x110] sm:$0xff] }
 0x2c2   : > { %v8054_v1 = vpop.permute.xlu0 %5398  ;;  %v2483_v34 = vsel %vm9970_vm7, %v2479_v46, %v5395_v14  ;;  %v2484_v7 = vsel %vm9970_vm7, %v2480_v45, %v5396_v40  ;;  %2597 = vmatpush1.msra.mxu0 %v4380_v5  ;;  %v4396_v33 = vld [vmem:[%s9882_s2 + $0x190] sm:$0xf] }
 0x2c3   : > { %v8058_v50 = vpop.permute.xlu1 %5403  ;;  %v5401_v9 = vunpack.i.h.bf16 %v8054_v1  ;;  %v5400_v54 = vunpack.i.l.bf16 %v8054_v1  ;;  %2628 = vmatprep.subr.mxu0 %v10033_v8 }
 0x2c4   : > { %v5406_v51 = vunpack.i.h.bf16 %v8058_v50  ;;  %v5405_v57 = vunpack.i.l.bf16 %v8058_v50  ;;  %4397 = vmatpush2.msk.msra.mxu0 %vm10099_vm10, %v4396_v33 }
 0x2c5   : > { %v2486_v39 = vsel %vm9968_vm8, %v2482_v15, %v5401_v9  ;;  %4050 = vmatprep.subr.mxu0 %v10033_v8 }
 0x2c6   : > { %v8082_v60 = vpop.permute.xlu0 %5408  ;;  %v2487_v18 = vsel %vm9968_vm8, %v2483_v34, %v5405_v57 }
 0x2c7   : > { %v8088_v62 = vpop.permute.xlu1 %5413  ;;  %v5411_v55 = vunpack.i.h.bf16 %v8082_v60  ;;  %v5410_v1 = vunpack.i.l.bf16 %v8082_v60  ;;  %v2485_v60 = vsel %vm9968_vm8, %v2481_v63, %v5400_v54 }
 0x2c8   : > { %v5416_v6 = vunpack.i.h.bf16 %v8088_v62  ;;  %v5415_v50 = vunpack.i.l.bf16 %v8088_v62  ;;  %v2488_v62 = vsel %vm9968_vm8, %v2484_v7, %v5406_v51  ;;  %vm10101_vm8 = vmmov %vm10100_vm15 }
 0x2c9   : > { %v2489_v2 = vsel %vm9969_vm9, %v2485_v60, %v5410_v1  ;;  %v2490_v13 = vsel %vm9969_vm9, %v2486_v39, %v5411_v55  ;;  %vm10103_vm7 = vmmov %vm10101_vm8 }
 0x2ca   : > { %v8108_v0 = vpop.permute.xlu0 %5418  ;;  %v2491_v9 = vsel %vm9969_vm9, %v2487_v18, %v5415_v50 }
 0x2cb   : > { %v8114_v47 = vpop.permute.xlu1 %5423  ;;  %v5421_v30 = vunpack.i.h.bf16 %v8108_v0  ;;  %v5420_v42 = vunpack.i.l.bf16 %v8108_v0  ;;  %v2492_v0 = vsel %vm9969_vm9, %v2488_v62, %v5416_v6  ;;  %vm10102_vm9 = vmmov %vm10101_vm8 }
 0x2cc   : > { %v5426_v40 = vunpack.i.h.bf16 %v8114_v47  ;;  %v5425_v14 = vunpack.i.l.bf16 %v8114_v47 }
 0x2cd   : > { %v2493_v47 = vsel %vm10100_vm15, %v2489_v2, %v5420_v42  ;;  %v2494_v1 = vsel %vm10101_vm8, %v2490_v13, %v5421_v30  ;;  %vm10112_vm15 = vcmask 293888  }
 0x2ce   : > { %v5429_v59 = vpop.permute.xlu0 %5428  ;;  %v2495_v6 = vsel %vm10102_vm9, %v2491_v9, %v5425_v14  ;;  %v2496_v50 = vsel %vm10103_vm7, %v2492_v0, %v5426_v40  ;;  %vm10108_vm7 = vcmask 261120  }
 0x2cf   : > { %v5434_v35 = vpop.permute.xlu1 %5433  ;;  %v5431_v54 = vunpack.i.h.bf16 %v5429_v59  ;;  %v5430_v31 = vunpack.i.l.bf16 %v5429_v59  ;;  %vm10109_vm8 = vmmov %vm10108_vm7 }
 0x2d0   : > { %v5436_v51 = vunpack.i.h.bf16 %v5434_v35  ;;  %v5435_v57 = vunpack.i.l.bf16 %v5434_v35  ;;  %vm10110_vm9 = vmmov %vm10108_vm7 }
 0x2d1   : > { %v2497_v34 = vsel %vm708_vm11, %v2493_v47, %v5430_v31  ;;  %v2498_v7 = vsel %vm708_vm11, %v2494_v1, %v5431_v54  ;;  %vm10111_vm10 = vmmov %vm10108_vm7 }
 0x2d2   : > { %v5439_v17 = vpop.permute.xlu0 %5438  ;;  %v2500_v18 = vsel %vm708_vm11, %v2496_v50, %v5436_v51 }
 0x2d3   : > { %v5444_v4 = vpop.permute.xlu1 %5443  ;;  %v5441_v46 = vunpack.i.h.bf16 %v5439_v17  ;;  %v5440_v45 = vunpack.i.l.bf16 %v5439_v17  ;;  %v2499_v17 = vsel %vm708_vm11, %v2495_v6, %v5435_v57 }
 0x2d4   : > { %v5446_v63 = vunpack.i.h.bf16 %v5444_v4  ;;  %v5445_v15 = vunpack.i.l.bf16 %v5444_v4 }
 0x2d5   : > { %v2501_v62 = vsel %vm713_vm12, %v2497_v34, %v5440_v45  ;;  %v2502_v30 = vsel %vm713_vm12, %v2498_v7, %v5441_v46  ;;  %v2655_v46 = vld [vmem:[%s6421_s16 + $0x44] sm:$0xff]  ;;  %v2656_v45 = vld [vmem:[%s6421_s16 + $0x14c] sm:$0xff]  ;;  %v2661_v34 = vld [vmem:[%s6421_s16 + $0x258] sm:$0xff] }
 0x2d6   : > { %v5449_v55 = vpop.permute.xlu0 %5448  ;;  %v2503_v4 = vsel %vm713_vm12, %v2499_v17, %v5445_v15  ;;  %v2504_v5 = vsel %vm713_vm12, %v2500_v18, %v5446_v63  ;;  %v2657_v63 = vld [vmem:[%s6421_s16 + $0x254] sm:$0xff]  ;;  %v2658_v15 = vld [vmem:[%s6421_s16 + $0x35c] sm:$0xff]  ;;  %v5477_v6 = vpack.i.bf16 %v2656_v45, %v2655_v46  ;;  %v2663_v18 = vld [vmem:[%s6421_s16 + $0x4c] sm:$0xff] }
 0x2d7   : > { %v5454_v59 = vpop.permute.xlu1 %5453  ;;  %v5451_v10 = vunpack.i.h.bf16 %v5449_v55  ;;  %v5450_v35 = vunpack.i.l.bf16 %v5449_v55  ;;  %v5482_v50 = vpack.i.bf16 %v2658_v15, %v2657_v63  ;;  %v2662_v7 = vld [vmem:[%s6421_s16 + $0x360] sm:$0xff]  ;;  %v2675_v45 = vld [vmem:[%s6421_s16 + $0x58] sm:$0xff] }
 0x2d8   : > { %v5456_v60 = vunpack.i.h.bf16 %v5454_v59  ;;  %v5455_v39 = vunpack.i.l.bf16 %v5454_v59  ;;  %v5492_v17 = vpack.i.bf16 %v2662_v7, %v2661_v34  ;;  %v8245_v7 = vld [vmem:[%s6421_s16 + $0x60] sm:$0xff] }
 0x2d9   : > { %v2505_v14 = vsel %vm718_vm13, %v2501_v62, %v5450_v35  ;;  %v2506_v9 = vsel %vm718_vm13, %v2502_v30, %v5451_v10  ;;  %v2659_v10 = vld [vmem:[%s6421_s16 + $0x48] sm:$0xff]  ;;  %v2660_v35 = vld [vmem:[%s6421_s16 + $0x150] sm:$0xff]  ;;  %v2665_v30 = vld [vmem:[%s6421_s16 + $0x25c] sm:$0xff] }
 0x2da   : > { %v5459_v42 = vpop.permute.xlu0 %5458  ;;  %v2507_v31 = vsel %vm718_vm13, %v2503_v4, %v5455_v39  ;;  %v2508_v33 = vsel %vm718_vm13, %v2504_v5, %v5456_v60  ;;  %v8208_v60 = vld [vmem:[%s6421_s16 + $0xc0] sm:$0xff]  ;;  %v5487_v39 = vpack.i.bf16 %v2660_v35, %v2659_v10  ;;  %v2664_v62 = vld [vmem:[%s6421_s16 + $0x154] sm:$0xff] }
 0x2db   : > { %v5464_v2 = vpop.permute.xlu1 %5463  ;;  %v5461_v13 = vunpack.i.h.bf16 %v5459_v42  ;;  %v5460_v40 = vunpack.i.l.bf16 %v5459_v42  ;;  %4420 = vmatprep.mubr.msk.f32.mxu1 %vm653_vm0, %v8208_v60  ;;  %v2666_v42 = vld [vmem:[%s6421_s16 + $0x364] sm:$0xff]  ;;  %v5497_v4 = vpack.i.bf16 %v2664_v62, %v2663_v18  ;;  %v2682_v10 = vld [vmem:[%s6421_s16 + $0x374] sm:$0xff] }
 0x2dc   : > { %v5466_v0 = vunpack.i.h.bf16 %v5464_v2  ;;  %v5465_v54 = vunpack.i.l.bf16 %v5464_v2  ;;  %v5502_v5 = vpack.i.bf16 %v2666_v42, %v2665_v30  ;;  %v2667_v2 = vld [vmem:[%s6421_s16 + $0x50] sm:$0xff]  ;;  %v8254_v18 = vld [vmem:[%s6421_s16 + $0x378] sm:$0xff]  ;;  %v6167_v42 = vld [vmem:[%s6421_s16 + $0x64] sm:$0xff] }
 0x2dd   : > { %v2509_v51 = vsel %vm723_vm14, %v2505_v14, %v5460_v40  ;;  %v2510_v57 = vsel %vm723_vm14, %v2506_v9, %v5461_v13  ;;  %v2668_v13 = vld [vmem:[%s6421_s16 + $0x158] sm:$0xff]  ;;  %v2669_v40 = vld [vmem:[%s6421_s16 + $0x260] sm:$0xff]  ;;  %v2670_v14 = vld [vmem:[%s6421_s16 + $0x368] sm:$0xff] }
 0x2de   : > { %v2511_v55 = vsel %vm723_vm14, %v2507_v31, %v5465_v54  ;;  %v2512_v47 = vsel %vm723_vm14, %v2508_v33, %v5466_v0  ;;  %v5467_v1 = vpack.i.bf16 %v2510_v57, %v2509_v51  ;;  %v5507_v9 = vpack.i.bf16 %v2668_v13, %v2667_v2  ;;  %v2671_v54 = vld [vmem:[%s6421_s16 + $0x54] sm:$0xff]  ;;  %v2672_v31 = vld [vmem:[%s6421_s16 + $0x15c] sm:$0xff]  ;;  %v2673_v33 = vld [vmem:[%s6421_s16 + $0x264] sm:$0xff] }
 0x2df   : > { %v5472_v59 = vpack.i.bf16 %v2512_v47, %v2511_v55  ;;  %v5512_v0 = vpack.i.bf16 %v2670_v14, %v2669_v40  ;;  %v2674_v51 = vld [vmem:[%s6421_s16 + $0x36c] sm:$0xff]  ;;  %v5517_v57 = vpack.i.bf16 %v2672_v31, %v2671_v54  ;;  %v2676_v55 = vld [vmem:[%s6421_s16 + $0x160] sm:$0xff]  ;;  %v6169_v2 = vld [vmem:[%s6421_s16 + $0x274] sm:$0xff] }
 0x2e0   : > { %5468 = vrot.lane.b32.xlu0 %v5467_v1, %s10072_s26  ;;  %v5522_v46 = vpack.i.bf16 %v2674_v51, %v2673_v33  ;;  %v2677_v47 = vld [vmem:[%s6421_s16 + $0x268] sm:$0xff]  ;;  %v2678_v1 = vld [vmem:[%s6421_s16 + $0x370] sm:$0xff]  ;;  %v5527_v63 = vpack.i.bf16 %v2676_v55, %v2675_v45  ;;  %v6170_v13 = vld [vmem:[%s6421_s16 + $0x37c] sm:$0xff] }
 0x2e1   : > { %5473 = vrot.lane.b32.xlu1 %v5472_v59, %s10072_s26  ;;  %v5532_v15 = vpack.i.bf16 %v2678_v1, %v2677_v47  ;;  %v2679_v59 = vld [vmem:[%s6421_s16 + $0x5c] sm:$0xff]  ;;  %v5562_v40 = vpack.i.bf16 %v6170_v13, %v6169_v2  ;;  %v6171_v14 = vld [vmem:[%s6421_s16 + $0x68] sm:$0xff]  ;;  %v6179_v1 = vld [vmem:[%s6421_s16 + $0x70] sm:$0xff] }
 0x2e2   : > { %v6173_v54 = vld [vmem:[%s6421_s16 + $0x278] sm:$0xff]  ;;  %v6174_v31 = vld [vmem:[%s6421_s16 + $0x380] sm:$0xff]  ;;  %v6175_v51 = vld [vmem:[%s6421_s16 + $0x6c] sm:$0xff] }
 0x2e3   : > { %v5572_v33 = vpack.i.bf16 %v6174_v31, %v6173_v54  ;;  %v6177_v45 = vld [vmem:[%s6421_s16 + $0x27c] sm:$0xff]  ;;  %v6178_v55 = vld [vmem:[%s6421_s16 + $0x384] sm:$0xff]  ;;  %v6188_v13 = vld [vmem:[%s6421_s16 + $0x8c] sm:$0xff] }
 0x2e4   : > { %5478 = vrot.lane.b32.xlu0 %v5477_v6, %s10037_s17  ;;  %v2680_v6 = vld [vmem:[%s6421_s16 + $0x164] sm:$0xff]  ;;  %v5582_v47 = vpack.i.bf16 %v6178_v55, %v6177_v45  ;;  %v2691_v55 = vld [vmem:[%s6421_s16 + $0xac] sm:$0xff] }
 0x2e5   : > { %5483 = vrot.lane.b32.xlu1 %v5482_v50, %s10037_s17  ;;  %v2681_v50 = vld [vmem:[%s6421_s16 + $0x26c] sm:$0xff]  ;;  %v5537_v35 = vpack.i.bf16 %v2680_v6, %v2679_v59  ;;  %v6181_v59 = vld [vmem:[%s6421_s16 + $0x280] sm:$0xff] }
 0x2e6   : > { %v5542_v34 = vpack.i.bf16 %v2682_v10, %v2681_v50  ;;  %v6182_v6 = vld [vmem:[%s6421_s16 + $0x388] sm:$0xff]  ;;  %v2699_v10 = vld [vmem:[%s6421_s16 + $0xb4] sm:$0xff] }
 0x2e7   : > { %v5592_v50 = vpack.i.bf16 %v6182_v6, %v6181_v59  ;;  %v8318_v31 = vld [vmem:[%s6421_s16 + $0x1a8] sm:$0xff]  ;;  %v8349_v59 = vld [vmem:[%s6421_s16 + $0xb8] sm:$0xff]  ;;  %v8352_v6 = vld [vmem:[%s6421_s16 + $0x1c0] sm:$0xff] }
 0x2e8   : > { %5488 = vrot.lane.b32.xlu0 %v5487_v39, %s10038_s20  ;;  %v8248_v39 = vld [vmem:[%s6421_s16 + $0x168] sm:$0xff] }
 0x2e9   : > { %5493 = vrot.lane.b32.xlu1 %v5492_v17, %s10038_s20  ;;  %v8251_v17 = vld [vmem:[%s6421_s16 + $0x270] sm:$0xff]  ;;  %v5547_v62 = vpack.i.bf16 %v8248_v39, %v8245_v7  ;;  %v8329_v45 = vld [vmem:[%s6421_s16 + $0xa8] sm:$0xff] }
 0x2ea   : > { %v5552_v30 = vpack.i.bf16 %v8254_v18, %v8251_v17 }
 0x2ec   : > { %5498 = vrot.lane.b32.xlu0 %v5497_v4, %s10039_s15  ;;  %v6168_v4 = vld [vmem:[%s6421_s16 + $0x16c] sm:$0xff] }
 0x2ed   : > { %5503 = vrot.lane.b32.xlu1 %v5502_v5, %s10039_s15  ;;  %v5557_v5 = vpack.i.bf16 %v6168_v4, %v6167_v42  ;;  %v8294_v4 = vld [vmem:[%s6421_s16 + $0x88] sm:$0xff] }
 0x2f0   : > { %5508 = vrot.lane.b32.xlu0 %v5507_v9, %s10040_s14  ;;  %v6172_v9 = vld [vmem:[%s6421_s16 + $0x170] sm:$0xff] }
 0x2f1   : > { %5513 = vrot.lane.b32.xlu1 %v5512_v0, %s10040_s14  ;;  %v5567_v0 = vpack.i.bf16 %v6172_v9, %v6171_v14  ;;  %v8306_v9 = vld [vmem:[%s6421_s16 + $0x90] sm:$0xff] }
 0x2f4   : > { %5518 = vrot.lane.b32.xlu0 %v5517_v57, %s10073_s28  ;;  %v6176_v57 = vld [vmem:[%s6421_s16 + $0x174] sm:$0xff] }
 0x2f5   : > { %5523 = vrot.lane.b32.xlu1 %v5522_v46, %s10073_s28  ;;  %v5577_v46 = vpack.i.bf16 %v6176_v57, %v6175_v51  ;;  %v2684_v51 = vld [vmem:[%s6421_s16 + $0x1ac] sm:$0xff]  ;;  %v5637_v57 = vpack.i.bf16 %v8318_v31, %v7982_v23 }
 0x2f8   : > { %5528 = vrot.lane.b32.xlu0 %v5527_v63, %s10074_s29  ;;  %v6180_v63 = vld [vmem:[%s6421_s16 + $0x178] sm:$0xff] }
 0x2f9   : > { %5533 = vrot.lane.b32.xlu1 %v5532_v15, %s10074_s29  ;;  %v5587_v15 = vpack.i.bf16 %v6180_v63, %v6179_v1  ;;  %v8341_v63 = vld [vmem:[%s6421_s16 + $0xb0] sm:$0xff] }
 0x2fc   : > { %5538 = vrot.lane.b32.xlu0 %v5537_v35, %s10075_s9  ;;  %v6183_v35 = vld [vmem:[%s6421_s16 + $0x74] sm:$0xff] }
 0x2fd   : > { %5543 = vrot.lane.b32.xlu1 %v5542_v34, %s10075_s9  ;;  %v5597_v34 = vpack.i.bf16 %v2699_v10, %v6183_v35  ;;  %v5662_v35 = vpack.i.bf16 %v8352_v6, %v8349_v59 }
 0x300   : > { %5548 = vrot.lane.b32.xlu0 %v5547_v62, %s10076_s0  ;;  %v6184_v62 = vld [vmem:[%s6421_s16 + $0x84] sm:$0xff] }
 0x301   : > { %5553 = vrot.lane.b32.xlu1 %v5552_v30, %s10076_s0  ;;  %v6185_v30 = vld [vmem:[%s6421_s16 + $0x18c] sm:$0xff] }
 0x302   : > { %v5602_v42 = vpack.i.bf16 %v6185_v30, %v6184_v62  ;;  %v2708_v62 = vld [vmem:[%s6421_s16 + $0x1c4] sm:$0xff] }
 0x304   : > { %5558 = vrot.lane.b32.xlu0 %v5557_v5, %s10034_s13  ;;  %v8297_v5 = vld [vmem:[%s6421_s16 + $0x190] sm:$0xff] }
 0x305   : > { %5563 = vrot.lane.b32.xlu1 %v5562_v40, %s10034_s13  ;;  %v5607_v2 = vpack.i.bf16 %v8297_v5, %v8294_v4  ;;  %v6189_v40 = vld [vmem:[%s6421_s16 + $0x194] sm:$0xff] }
 0x306   : > { %v5612_v14 = vpack.i.bf16 %v6189_v40, %v6188_v13  ;;  %v6192_v13 = vld [vmem:[%s6421_s16 + $0x294] sm:$0xff]  ;;  %v6193_v40 = vld [vmem:[%s6421_s16 + $0x39c] sm:$0xff] }
 0x308   : > { %5568 = vrot.lane.b32.xlu0 %v5567_v0, %s10035_s18  ;;  %v8309_v0 = vld [vmem:[%s6421_s16 + $0x198] sm:$0xff] }
 0x309   : > { %5573 = vrot.lane.b32.xlu1 %v5572_v33, %s10035_s18  ;;  %v5617_v54 = vpack.i.bf16 %v8309_v0, %v8306_v9  ;;  %v2683_v33 = vld [vmem:[%s6421_s16 + $0xa4] sm:$0xff] }
 0x30c   : > { %5578 = vrot.lane.b32.xlu0 %v5577_v46, %s10079_s1  ;;  %v5642_v46 = vpack.i.bf16 %v2684_v51, %v2683_v33  ;;  %v8372_v51 = vld [vmem:[%s6421_s16 + $0x298] sm:$0xff] }
 0x30d   : > { %5583 = vrot.lane.b32.xlu1 %v5582_v47, %s10079_s1  ;;  %v2692_v47 = vld [vmem:[%s6421_s16 + $0x1b4] sm:$0xff] }
 0x30e   : > { %v5652_v1 = vpack.i.bf16 %v2692_v47, %v2691_v55  ;;  %v6196_v55 = vld [vmem:[%s6421_s16 + $0x29c] sm:$0xff]  ;;  %v6197_v47 = vld [vmem:[%s6421_s16 + $0x3a4] sm:$0xff] }
 0x310   : > { %5588 = vrot.lane.b32.xlu0 %v5587_v15, %s10008_s11 }
 0x311   : > { %5593 = vrot.lane.b32.xlu1 %v5592_v50, %s10008_s11 }
 0x314   : > { %5598 = vrot.lane.b32.xlu0 %v5597_v34, %s10009_s10  ;;  %v2707_v34 = vld [vmem:[%s6421_s16 + $0xbc] sm:$0xff] }
 0x315   : > { %5603 = vrot.lane.b32.xlu1 %v5602_v42, %s10037_s17 }
 0x318   : > { %5608 = vrot.lane.b32.xlu0 %v5607_v2, %s10038_s20  ;;  %v5667_v2 = vpack.i.bf16 %v2708_v62, %v2707_v34  ;;  %v6200_v62 = vld [vmem:[%s6421_s16 + $0x2a4] sm:$0xff] }
 0x319   : > { %5613 = vrot.lane.b32.xlu1 %v5612_v14, %s10039_s15  ;;  %v5672_v14 = vpack.i.bf16 %v6193_v40, %v6192_v13  ;;  %v5175_v13 = vunpack.i.l.bf16 %v7889_v41  ;;  %v5176_v40 = vunpack.i.h.bf16 %v7889_v41  ;;  %v5186_v41 = vunpack.i.h.bf16 %v7911_v19 }
 0x31c   : > { %5618 = vrot.lane.b32.xlu0 %v5617_v54, %s10040_s14 }
 0x31d   : > { %5623 = vrot.lane.b32.xlu1 %v7761_v20, %s10073_s28  ;;  %v8332_v20 = vld [vmem:[%s6421_s16 + $0x1b0] sm:$0xff] }
 0x320   : > { %5628 = vrot.lane.b32.xlu0 %v7804_v22, %s10074_s29  ;;  %v5647_v22 = vpack.i.bf16 %v8332_v20, %v8329_v45 }
 0x321   : > { %5633 = vrot.lane.b32.xlu1 %v7852_v3, %s10075_s9  ;;  %v8344_v3 = vld [vmem:[%s6421_s16 + $0x1b8] sm:$0xff] }
 0x322   : > { %v5657_v10 = vpack.i.bf16 %v8344_v3, %v8341_v63 }
 0x324   : > { %5638 = vrot.lane.b32.xlu0 %v5637_v57, %s10076_s0  ;;  %v8375_v57 = vld [vmem:[%s6421_s16 + $0x3a0] sm:$0xff] }
 0x325   : > { %5643 = vrot.lane.b32.xlu1 %v5642_v46, %s10034_s13  ;;  %v5677_v46 = vpack.i.bf16 %v8375_v57, %v8372_v51 }
 0x326   : > { %v8346_v15 = vpop.f32.mrf.mxu1 }
 0x327   : > { %10104 = vst [vmem:[#allocation25_spill] sm:$0xff] %v8346_v15  ;;  %v5191_v15 = vunpack.i.h.bf16 %v7922_v21 }
 0x328   : > { %5648 = vrot.lane.b32.xlu0 %v5647_v22, %s10035_s18  ;;  %v1892_v50 = vpop.f32.mrf.mxu1  ;;  %v5682_v22 = vpack.i.bf16 %v6197_v47, %v6196_v55  ;;  %v8406_v55 = vld [vmem:[%s6421_s16 + $0x3b8] sm:$0xff]  ;;  %v2187_v47 = vsel %vm653_vm0, %v8251_v17, %v5175_v13 }
 0x329   : > { %5653 = vrot.lane.b32.xlu1 %v5652_v1, %s10079_s1  ;;  %v2700_v13 = vld [vmem:[%s6421_s16 + $0x1bc] sm:$0xff] }
 0x32a   : > { %v8362_v30 = vpop.f32.mrf.mxu1 }
 0x32b   : > { %10105 = vst [vmem:[#allocation27_spill] sm:$0xff] %v8362_v30  ;;  %v5190_v30 = vunpack.i.l.bf16 %v7922_v21 }
 0x32c   : > { %5658 = vrot.lane.b32.xlu0 %v5657_v10, %s10008_s11  ;;  %v1897_v42 = vpop.f32.mrf.mxu1  ;;  %v8386_v10 = vld [vmem:[%s6421_s16 + $0x2a0] sm:$0xff] }
 0x32d   : > { %5663 = vrot.lane.b32.xlu1 %v5662_v35, %s10044_s12  ;;  %v8389_v35 = vld [vmem:[%s6421_s16 + $0x3a8] sm:$0xff] }
 0x32e   : > { %v8368_v54 = vpop.f32.mrf.mxu1  ;;  %v5687_v34 = vpack.i.bf16 %v8389_v35, %v8386_v10  ;;  %v6201_v42 = vld [vmem:[%s6421_s16 + $0x3ac] sm:$0xff] }
 0x32f   : > { %10106 = vst [vmem:[#allocation29_spill] sm:$0xff] %v8368_v54 }
 0x330   : > { %5668 = vrot.lane.b32.xlu0 %v5667_v2, %s10036_s19  ;;  %v1902_v33 = vpop.f32.mrf.mxu1  ;;  %v5692_v2 = vpack.i.bf16 %v6201_v42, %v6200_v62  ;;  %v2188_v62 = vsel %vm653_vm0, %v8254_v18, %v5176_v40  ;;  %v5181_v42 = vunpack.i.h.bf16 %v7907_v26  ;;  %v5196_v18 = vunpack.i.h.bf16 %v7924_v12  ;;  %v2701_v40 = vld [vmem:[%s6421_s16 + $0x2c4] sm:$0xff] }
 0x331   : > { %5673 = vrot.lane.b32.xlu1 %v5672_v14, %s10037_s17  ;;  %v5171_v14 = vunpack.i.h.bf16 %v7884_v49  ;;  %v5185_v33 = vunpack.i.l.bf16 %v7911_v19  ;;  %v5717_v21 = vpack.i.bf16 %v2701_v40, %v2700_v13  ;;  %v2693_v13 = vld [vmem:[%s6421_s16 + $0x2bc] sm:$0xff]  ;;  %v2694_v40 = vld [vmem:[%s6421_s16 + $0x3c4] sm:$0xff] }
 0x332   : > { %v8382_v1 = vpop.f32.mrf.mxu1 }
 0x333   : > { %10107 = vst [vmem:[#allocation31_spill] sm:$0xff] %v8382_v1  ;;  %v5195_v1 = vunpack.i.l.bf16 %v7924_v12  ;;  %v2186_v19 = vsel %vm653_vm0, %v8248_v39, %v5171_v14  ;;  %v2191_v17 = vsel %vm658_vm1, %v2187_v47, %v5185_v33  ;;  %v5200_v39 = vunpack.i.l.bf16 %v7931_v25 }
 0x334   : > { %5678 = vrot.lane.b32.xlu0 %v5677_v46, %s10038_s20  ;;  %v1907_v50 = vpop.f32.mrf.mxu1  ;;  %v8403_v46 = vld [vmem:[%s6421_s16 + $0x2b0] sm:$0xff]  ;;  %v2190_v12 = vsel %vm658_vm1, %v2186_v19, %v5181_v42  ;;  %v5201_v33 = vunpack.i.h.bf16 %v7931_v25  ;;  %v5722_v25 = vpack.i.bf16 %v8372_v51, %v8294_v4  ;;  %v5220_v4 = vunpack.i.l.bf16 %v7939_v37 }
 0x335   : > { %5683 = vrot.lane.b32.xlu1 %v5682_v22, %s10039_s15  ;;  %v5170_v22 = vunpack.i.l.bf16 %v7884_v49  ;;  %v2685_v50 = vld [vmem:[%s6421_s16 + $0x2b4] sm:$0xff]  ;;  %v5707_v49 = vpack.i.bf16 %v8406_v55, %v8403_v46  ;;  %v2195_v47 = vsel %vm663_vm2, %v2191_v17, %v5195_v1  ;;  %v8455_v1 = vld [vmem:[%s6421_s16 + $0x3c0] sm:$0xff] }
 0x337   : > { %v2185_v54 = vsel %vm653_vm0, %v8245_v7, %v5170_v22  ;;  %v5206_v22 = vunpack.i.h.bf16 %v7933_v27 }
 0x338   : > { %5688 = vrot.lane.b32.xlu0 %v5687_v34, %s10040_s14  ;;  %v2686_v34 = vld [vmem:[%s6421_s16 + $0x3bc] sm:$0xff] }
 0x339   : > { %5693 = vrot.lane.b32.xlu1 %v5692_v2, %s10073_s28  ;;  %v5180_v2 = vunpack.i.l.bf16 %v7907_v26  ;;  %v5712_v26 = vpack.i.bf16 %v2686_v34, %v2685_v50  ;;  %v5211_v50 = vunpack.i.h.bf16 %v7935_v32  ;;  %v8452_v34 = vld [vmem:[%s6421_s16 + $0x2b8] sm:$0xff] }
 0x33a   : > { %v5727_v19 = vpack.i.bf16 %v8455_v1, %v8452_v34 }
 0x33b   : > { %v2189_v14 = vsel %vm658_vm1, %v2185_v54, %v5180_v2  ;;  %v5210_v54 = vunpack.i.l.bf16 %v7935_v32  ;;  %v5216_v2 = vunpack.i.h.bf16 %v7937_v58 }
 0x33c   : > { %5698 = vrot.lane.b32.xlu0 %v7810_v44, %s10074_s29  ;;  %v2192_v44 = vsel %vm658_vm1, %v2188_v62, %v5186_v41  ;;  %v2193_v7 = vsel %vm663_vm2, %v2189_v14, %v5190_v30  ;;  %v5215_v62 = vunpack.i.l.bf16 %v7937_v58  ;;  %v5732_v58 = vpack.i.bf16 %v8386_v10, %v8306_v9 }
 0x33d   : > { %5703 = vrot.lane.b32.xlu1 %v7858_v43, %s10075_s9  ;;  %v5205_v43 = vunpack.i.l.bf16 %v7933_v27  ;;  %v2196_v41 = vsel %vm663_vm2, %v2192_v44, %v5196_v18  ;;  %v2194_v27 = vsel %vm663_vm2, %v2190_v12, %v5191_v15  ;;  %v2197_v30 = vsel %vm668_vm3, %v2193_v7, %v5200_v39 }
 0x33e   : > { %v2198_v32 = vsel %vm668_vm3, %v2194_v27, %v5201_v33  ;;  %v2200_v51 = vsel %vm668_vm3, %v2196_v41, %v5206_v22  ;;  %v5221_v15 = vunpack.i.h.bf16 %v7939_v37  ;;  %v2201_v17 = vsel %vm673_vm4, %v2197_v30, %v5210_v54  ;;  %v6203_v41 = vld [vmem:[%s6421_s16 + $0x2a8] sm:$0xff]  ;;  %v8497_v54 = vld [vmem:[%s6421_s16 + $0x2c0] sm:$0xff] }
 0x33f   : > { %v2199_v42 = vsel %vm668_vm3, %v2195_v47, %v5205_v43  ;;  %v2202_v18 = vsel %vm673_vm4, %v2198_v32, %v5211_v50  ;;  %v5235_v44 = vunpack.i.l.bf16 %v7945_v29  ;;  %v5231_v39 = vunpack.i.h.bf16 %v7943_v38 }
 0x340   : > { %5708 = vrot.lane.b32.xlu0 %v5707_v49, %s10076_s0  ;;  %v5225_v49 = vunpack.i.l.bf16 %v7941_v48  ;;  %v2203_v37 = vsel %vm673_vm4, %v2199_v42, %v5215_v62  ;;  %v5230_v14 = vunpack.i.l.bf16 %v7943_v38  ;;  %v2204_v12 = vsel %vm673_vm4, %v2200_v51, %v5216_v2 }
 0x341   : > { %5713 = vrot.lane.b32.xlu1 %v5712_v26, %s10034_s13  ;;  %v5226_v26 = vunpack.i.h.bf16 %v7941_v48  ;;  %v2205_v48 = vsel %vm678_vm5, %v2201_v17, %v5220_v4  ;;  %v5236_v9 = vunpack.i.h.bf16 %v7945_v29  ;;  %v5240_v10 = vunpack.i.l.bf16 %v7947_v11  ;;  %v6202_v29 = vld [vmem:[%s6421_s16 + $0x98] sm:$0xff] }
 0x342   : > { %v2207_v43 = vsel %vm678_vm5, %v2203_v37, %v5225_v49  ;;  %v2206_v33 = vsel %vm678_vm5, %v2202_v18, %v5221_v15  ;;  %v5241_v47 = vunpack.i.h.bf16 %v7947_v11  ;;  %v5737_v7 = vpack.i.bf16 %v2694_v40, %v2693_v13 }
 0x343   : > { %v2208_v38 = vsel %vm678_vm5, %v2204_v12, %v5226_v26  ;;  %v5246_v22 = vunpack.i.h.bf16 %v7949_v24  ;;  %v5742_v50 = vpack.i.bf16 %v6203_v41, %v6202_v29  ;;  %v2211_v11 = vsel %vm683_vm6, %v2207_v43, %v5235_v44 }
 0x344   : > { %5718 = vrot.lane.b32.xlu0 %v5717_v21, %s10009_s10  ;;  %v5245_v21 = vunpack.i.l.bf16 %v7949_v24  ;;  %v2209_v27 = vsel %vm683_vm6, %v2205_v48, %v5230_v14  ;;  %v2210_v30 = vsel %vm683_vm6, %v2206_v33, %v5231_v39  ;;  %v5250_v62 = vunpack.i.l.bf16 %v7951_v16  ;;  %v10117_v48 = vld [vmem:[#allocation34_spill] sm:$0xff] }
 0x345   : > { %5723 = vrot.lane.b32.xlu1 %v5722_v25, %s10037_s17  ;;  %v8500_v25 = vld [vmem:[%s6421_s16 + $0x3c8] sm:$0xff]  ;;  %v2212_v42 = vsel %vm683_vm6, %v2208_v38, %v5236_v9  ;;  %v2213_v24 = vsel %vm10108_vm7, %v2209_v27, %v5240_v10  ;;  %v5251_v32 = vunpack.i.h.bf16 %v7951_v16  ;;  %v5260_v2 = vunpack.i.l.bf16 %v7955_v36  ;;  %vm10113_vm7 = vmmov %vm10112_vm15  ;;  %v8548_v38 = vld [vmem:[%s6421_s16 + $0x3d0] sm:$0xff] }
 0x346   : > { %v2214_v4 = vsel %vm10109_vm8, %v2210_v30, %v5241_v47  ;;  %v5255_v51 = vunpack.i.l.bf16 %v7953_v56  ;;  %v5270_v49 = vunpack.i.l.bf16 %v7959_v53  ;;  %v5747_v15 = vpack.i.bf16 %v8500_v25, %v8497_v54  ;;  %v10118_v10 = vld [vmem:[#allocation24_spill] sm:$0xff] }
 0x347   : > { %v8518_v17 = vsel %vm10111_vm10, %v2212_v42, %v5246_v22  ;;  %v5280_v16 = vunpack.i.l.bf16 %v7963_v28  ;;  %v5752_v18 = vpack.i.bf16 %v8403_v46, %v7982_v23  ;;  %v5256_v26 = vunpack.i.h.bf16 %v7953_v56  ;;  %v10122_v27 = vld [vmem:[#allocation28_spill] sm:$0xff] }
 0x348   : > { %5728 = vrot.lane.b32.xlu0 %v5727_v19, %s10035_s18  ;;  %v2215_v19 = vsel %vm10110_vm9, %v2211_v11, %v5245_v21  ;;  %v5261_v13 = vunpack.i.h.bf16 %v7955_v36  ;;  %v5290_v40 = vunpack.i.l.bf16 %v7967_v52  ;;  %v2218_v37 = vsel %vm10113_vm7, %v2214_v4, %v5251_v32  ;;  %vm10115_vm9 = vmmov %vm10113_vm7  ;;  %v10120_v21 = vld [vmem:[#allocation26_spill] sm:$0xff] }
 0x349   : > { %5733 = vrot.lane.b32.xlu1 %v5732_v58, %s10038_s20  ;;  %v2217_v58 = vsel %vm10112_vm15, %v2213_v24, %v5250_v62  ;;  %vm10114_vm8 = vcmask 326656   ;;  %v5271_v39 = vunpack.i.h.bf16 %v7959_v53  ;;  %v5300_v14 = vunpack.i.l.bf16 %v7971_v61 }
 0x34a   : > { %v2221_v44 = vsel %vm10114_vm8, %v2217_v58, %v5260_v2  ;;  %v2219_v23 = vsel %vm10115_vm9, %v2215_v19, %v5255_v51  ;;  %vm10116_vm10 = vcmask 359424   ;;  %v5310_v9 = vunpack.i.l.bf16 %v10117_v48  ;;  %vm10119_vm15 = vmmov %vm10114_vm8  ;;  %v2710_v58 = vld [vmem:[%s6421_s16 + $0x3d4] sm:$0xff] }
 0x34b   : > { %v2225_v12 = vsel %vm10116_vm10, %v2221_v44, %v5270_v49  ;;  %v5757_v36 = vpack.i.bf16 %v8375_v57, %v8297_v5  ;;  %v5265_v43 = vunpack.i.l.bf16 %v10118_v10  ;;  %v5281_v33 = vunpack.i.h.bf16 %v7963_v28  ;;  %vm10121_vm7 = vmmov %vm10116_vm10  ;;  %v10125_v49 = vld [vmem:[#allocation30_spill] sm:$0xff] }
 0x34c   : > { %5738 = vrot.lane.b32.xlu0 %v5737_v7, %s10079_s1  ;;  %v2229_v47 = vsel %vm708_vm11, %v2225_v12, %v5280_v16  ;;  %v5762_v53 = vpack.i.bf16 %v8452_v34, %v8329_v45  ;;  %v8545_v7 = vld [vmem:[%s6421_s16 + $0x2c8] sm:$0xff]  ;;  %v2222_v22 = vsel %vm10119_vm15, %v2218_v37, %v5261_v13  ;;  %v5275_v29 = vunpack.i.l.bf16 %v10120_v21  ;;  %vm10124_vm9 = vmmov %vm10119_vm15 }
 0x34d   : > { %5743 = vrot.lane.b32.xlu1 %v5742_v50, %s10039_s15  ;;  %v5291_v5 = vunpack.i.h.bf16 %v7967_v52  ;;  %v2233_v57 = vsel %vm713_vm12, %v2229_v47, %v5290_v40  ;;  %v2226_v41 = vsel %vm10121_vm7, %v2222_v22, %v5271_v39  ;;  %v5301_v50 = vunpack.i.h.bf16 %v7971_v61  ;;  %vm10126_vm10 = vmmov %vm10121_vm7  ;;  %v10127_v37 = vld [vmem:[#allocation32_spill] sm:$0xff] }
 0x34e   : > { %v2237_v11 = vsel %vm718_vm13, %v2233_v57, %v5300_v14  ;;  %v5285_v30 = vunpack.i.l.bf16 %v10122_v27  ;;  %v5311_v62 = vunpack.i.h.bf16 %v10117_v48  ;;  %v5767_v42 = vpack.i.bf16 %v8548_v38, %v8545_v7  ;;  %v10129_v14 = vld [vmem:[#allocation23_spill] sm:$0xff]  ;;  %v6205_v57 = vld [vmem:[%s6421_s16 + $0x3b0] sm:$0xff] }
 0x34f   : > { %v2241_v52 = vsel %vm723_vm14, %v2237_v11, %v5310_v9  ;;  %v2230_v61 = vsel %vm708_vm11, %v2226_v41, %v5281_v33  ;;  %vm10123_vm8 = vcmask 523264   ;;  %v5772_v2 = vpack.i.bf16 %v8389_v35, %v8309_v0 }
 0x350   : > { %5748 = vrot.lane.b32.xlu0 %v5747_v15, %s10008_s11  ;;  %v5266_v4 = vunpack.i.h.bf16 %v10118_v10  ;;  %v2223_v51 = vsel %vm10124_vm9, %v2219_v23, %v5265_v43  ;;  %v5295_v15 = vunpack.i.l.bf16 %v10125_v49  ;;  %v2234_v19 = vsel %vm713_vm12, %v2230_v61, %v5291_v5  ;;  %vm10130_vm15 = vmmov %vm10123_vm8  ;;  %v6204_v5 = vld [vmem:[%s6421_s16 + $0x1a0] sm:$0xff]  ;;  %v2702_v61 = vld [vmem:[%s6421_s16 + $0x3cc] sm:$0xff] }
 0x351   : > { %5753 = vrot.lane.b32.xlu1 %v5752_v18, %s10040_s14  ;;  %v2709_v18 = vld [vmem:[%s6421_s16 + $0x2cc] sm:$0xff]  ;;  %v5276_v13 = vunpack.i.h.bf16 %v10120_v21  ;;  %v2227_v40 = vsel %vm10126_vm10, %v2223_v51, %v5275_v29  ;;  %v5305_v44 = vunpack.i.l.bf16 %v10127_v37  ;;  %v2238_v35 = vsel %vm718_vm13, %v2234_v19, %v5301_v50 }
 0x352   : > { %v5469_v28 = vpop.permute.xlu0 %5468  ;;  %v5286_v39 = vunpack.i.h.bf16 %v10122_v27  ;;  %v5315_v23 = vunpack.i.l.bf16 %v10129_v14  ;;  %v2242_v12 = vsel %vm723_vm14, %v2238_v35, %v5311_v62  ;;  %v5777_v48 = vpack.i.bf16 %v8497_v54, %v8341_v63  ;;  %v2714_v35 = vld [vmem:[%s6421_s16 + $0x3d8] sm:$0xff] }
 0x353   : > { %v8557_v45 = vpop.permute.xlu1 %5473  ;;  %v5470_v34 = vunpack.i.l.bf16 %v5469_v28  ;;  %v5471_v24 = vunpack.i.h.bf16 %v5469_v28  ;;  %v2231_v9 = vsel %vm708_vm11, %v2227_v40, %v5285_v30  ;;  %v5782_v43 = vpack.i.bf16 %v2710_v58, %v2709_v18  ;;  %v2713_v30 = vld [vmem:[%s6421_s16 + $0x2d0] sm:$0xff] }
 0x354   : > { %5758 = vrot.lane.b32.xlu0 %v5757_v36, %s10037_s17  ;;  %v5475_v36 = vunpack.i.l.bf16 %v8557_v45  ;;  %vm10131_vm7 = vcmask 293888   ;;  %v5296_v47 = vunpack.i.h.bf16 %v10125_v49  ;;  %v2235_v63 = vsel %vm713_vm12, %v2231_v9, %v5295_v15  ;;  %v3429_v18 = vld [vmem:[%s6421_s16 + $0xd0] sm:$0xff]  ;;  %v3428_v9 = vld [vmem:[%s6421_s16 + $0x3e0] sm:$0xff] }
 0x355   : > { %5763 = vrot.lane.b32.xlu1 %v5762_v53, %s10073_s28  ;;  %v2529_v32 = vsel %vm10123_vm8, %v2241_v52, %v5470_v34  ;;  %v2530_v10 = vsel %vm10130_vm15, %v2242_v12, %v5471_v24  ;;  %v2220_v33 = vsel %vm10131_vm7, %v8518_v17, %v5256_v26  ;;  %vm10132_vm8 = vmmov %vm10124_vm9  ;;  %v5306_v22 = vunpack.i.h.bf16 %v10127_v37  ;;  %v3441_v24 = vld [vmem:[%s6421_s16 + $0xe8] sm:$0xff]  ;;  %v3433_v37 = vld [vmem:[%s6421_s16 + $0xd8] sm:$0xff] }
 0x356   : > { %v8574_v16 = vpop.permute.xlu0 %5478  ;;  %2631 = vmatmul.mubr.f32.vlgmr.msra.gmra.mxu0 %v2529_v32  ;;  %v2224_v53 = vsel %vm10132_vm8, %v2220_v33, %v5266_v4  ;;  %v2239_v56 = vsel %vm718_vm13, %v2235_v63, %v5305_v44  ;;  %vm10134_vm9 = vmmov %vm10126_vm10  ;;  %v5316_v26 = vunpack.i.h.bf16 %v10129_v14  ;;  %v5787_v28 = vpack.i.bf16 %v6205_v57, %v6204_v5  ;;  %v2712_v44 = vld [vmem:[%s6421_s16 + $0x1c8] sm:$0xff]  ;;  %v3437_v12 = vld [vmem:[%s6421_s16 + $0xe0] sm:$0xff] }
 0x357   : > { %v8581_v0 = vpop.permute.xlu1 %5483  ;;  %4399 = vmatprep.mubr.msk.f32.mxu0 %vm653_vm0, %v8318_v31  ;;  %v2228_v17 = vsel %vm10134_vm9, %v2224_v53, %v5276_v13  ;;  %v2243_v29 = vsel %vm723_vm14, %v2239_v56, %v5315_v23  ;;  %v5476_v50 = vunpack.i.h.bf16 %v8557_v45  ;;  %vm10135_vm10 = vmmov %vm10130_vm15  ;;  %v5792_v11 = vpack.i.bf16 %v8545_v7, %v8349_v59  ;;  %v3442_v33 = vld [vmem:[%s6421_s16 + $0x1f0] sm:$0xff]  ;;  %v3430_v53 = vld [vmem:[%s6421_s16 + $0x1d8] sm:$0xff] }
 0x358   : > { %10128 = vst [vmem:[#allocation33_spill] sm:$0xff] %v8581_v0  ;;  %5768 = vrot.lane.b32.xlu0 %v5767_v42, %s10044_s12  ;;  %v2232_v41 = vsel %vm708_vm11, %v2228_v17, %v5286_v39  ;;  %v5797_v59 = vpack.i.bf16 %v8406_v55, %v8318_v31  ;;  %vm10137_vm15 = vmmov %vm10135_vm10  ;;  %v5802_v42 = vpack.i.bf16 %v2713_v30, %v8208_v60  ;;  %v3427_v60 = vld [vmem:[%s6421_s16 + $0x2d8] sm:$0xff]  ;;  %v3447_v5 = vld [vmem:[%s6421_s16 + $0x300] sm:$0xff]  ;;  %vm10147_vm7 = vcmask 261120  }
 0x359   : > { %5773 = vrot.lane.b32.xlu1 %v5772_v2, %s10038_s20  ;;  %v2236_v34 = vsel %vm713_vm12, %v2232_v41, %v5296_v47  ;;  %v5807_v4 = vpack.i.bf16 %v3441_v24, %v2702_v61  ;;  %v5812_v31 = vpack.i.bf16 %v8455_v1, %v8332_v20  ;;  %v5822_v19 = vpack.i.bf16 %v8500_v25, %v8344_v3  ;;  %v3431_v20 = vld [vmem:[%s6421_s16 + $0x2e0] sm:$0xff]  ;;  %v3435_v3 = vld [vmem:[%s6421_s16 + $0x2e8] sm:$0xff]  ;;  %v3443_v47 = vld [vmem:[%s6421_s16 + $0x2f8] sm:$0xff] }
 0x35a   : > { %v8602_v54 = vpop.permute.xlu0 %5488  ;;  %2636 = vmatmul.mubr.f32.gmra.mxu0 %v2530_v10  ;;  %v2240_v45 = vsel %vm718_vm13, %v2236_v34, %v5306_v22  ;;  %v5827_v13 = vpack.i.bf16 %v3431_v20, %v3429_v18  ;;  %v5832_v40 = vpack.i.bf16 %v8548_v38, %v8352_v6  ;;  %v5837_v14 = vpack.i.bf16 %v3435_v3, %v3433_v37  ;;  %v3439_v6 = vld [vmem:[%s6421_s16 + $0x2f0] sm:$0xff]  ;;  %v3432_v22 = vld [vmem:[%s6421_s16 + $0x3e8] sm:$0xff]  ;;  %v3449_v34 = vld [vmem:[%s6421_s16 + $0xf8] sm:$0xff] }
 0x35b   : > { %v8606_v21 = vpop.permute.xlu1 %5493  ;;  %4400 = vmatprep.mubr.msk.f32.mxu0 %vm653_vm0, %v8403_v46  ;;  %v2531_v46 = vsel %vm10135_vm10, %v2243_v29, %v5475_v36  ;;  %v2244_v52 = vsel %vm723_vm14, %v2240_v45, %v5316_v26  ;;  %v5842_v23 = vpack.i.bf16 %v2714_v35, %v2712_v44  ;;  %v5847_v10 = vpack.i.bf16 %v3439_v6, %v3437_v12  ;;  %v3445_v29 = vld [vmem:[%s6421_s16 + $0xf0] sm:$0xff]  ;;  %v3451_v30 = vld [vmem:[%s6421_s16 + $0x308] sm:$0xff]  ;;  %v3444_v24 = vld [vmem:[%s6421_s16 + $0x400] sm:$0xff] }
 0x35c   : > { %10133 = vst [vmem:[#allocation35_spill] sm:$0xff] %v8606_v21  ;;  %5778 = vrot.lane.b32.xlu0 %v5777_v48, %s10074_s29  ;;  %v2532_v7 = vsel %vm10137_vm15, %v2244_v52, %v5476_v50  ;;  %v3426_v48 = vld [vmem:[%s6421_s16 + $0x1d0] sm:$0xff]  ;;  %v5857_v17 = vpack.i.bf16 %v3442_v33, %v3443_v47  ;;  %v5862_v26 = vpack.i.bf16 %v3432_v22, %v3430_v53  ;;  %v3438_v52 = vld [vmem:[%s6421_s16 + $0x1e8] sm:$0xff]  ;;  %v3450_v20 = vld [vmem:[%s6421_s16 + $0x200] sm:$0xff]  ;;  %vm10148_vm8 = vcmask 293888  }
 0x35d   : > { %5783 = vrot.lane.b32.xlu1 %v5782_v43, %s10036_s19  ;;  %v5852_v43 = vpack.i.bf16 %v3428_v9, %v3426_v48  ;;  %v3436_v41 = vld [vmem:[%s6421_s16 + $0x3f0] sm:$0xff]  ;;  %v8738_v44 = vld [vmem:[%s6421_s16 + $0x78] sm:$0xff]  ;;  %v8741_v35 = vld [vmem:[%s6421_s16 + $0x180] sm:$0xff]  ;;  %vm10149_vm9 = vcmask 326656   ;;  %vm10151_vm15 = vcmask 359424  }
 0x35e   : > { %v8624_v27 = vpop.permute.xlu0 %5498  ;;  %2641 = vmatmul.mubr.f32.gmra.mxu0 %v2531_v46  ;;  %v5867_v46 = vpack.i.bf16 %v3447_v5, %v3445_v29  ;;  %v6209_v6 = vld [vmem:[%s6421_s16 + $0x7c] sm:$0xff]  ;;  %v6210_v48 = vld [vmem:[%s6421_s16 + $0x184] sm:$0xff]  ;;  %v4417_v5 = vld [vmem:[%s9882_s2 + $0x210] sm:$0xff] }
 0x35f   : > { %v8627_v62 = vpop.permute.xlu1 %5503  ;;  %4401 = vmatprep.mubr.msk.f32.mxu0 %vm653_vm0, %v8406_v55  ;;  %v3425_v55 = vld [vmem:[%s6421_s16 + $0xc8] sm:$0xff]  ;;  %v5907_v9 = vpack.i.bf16 %v6210_v48, %v6209_v6  ;;  %v3405_v22 = vld [vmem:[%s6421_s16 + $0x18] sm:$0xff]  ;;  %3309 = vmatpush1.msra.mxu1 %v4417_v5  ;;  %vm10150_vm10 = vmmov %vm10147_vm7 }
 0x360   : > { %10136 = vst [vmem:[#allocation11_spill] sm:$0xff] %v8627_v62  ;;  %5788 = vrot.lane.b32.xlu0 %v5787_v28, %s10039_s15  ;;  %v5817_v15 = vpack.i.bf16 %v3427_v60, %v3425_v55  ;;  %v3434_v28 = vld [vmem:[%s6421_s16 + $0x1e0] sm:$0xff]  ;;  %v3448_v55 = vld [vmem:[%s6421_s16 + $0x408] sm:$0xff]  ;;  %3310 = vmatprep.subr.mxu1 %v10033_v8  ;;  %v9242_v62 = vld [vmem:[%s6421_s16 + $0x278] sm:$0xff] }
 0x361   : > { %5793 = vrot.lane.b32.xlu1 %v5792_v11, %s10075_s9  ;;  %v5872_v11 = vpack.i.bf16 %v3436_v41, %v3434_v28  ;;  %v4416_v28 = vld [vmem:[%s9882_s2 + $0x208] sm:$0xff] }
 0x362   : > { %v8641_v32 = vpop.permute.xlu0 %5508  ;;  %2646 = vmatmul.mubr.f32.gmra.mxu0 %v2532_v7  ;;  %3311 = vmatpush1.msra.mxu1 %v4416_v28 }
 0x363   : > { %v8643_v2 = vpop.permute.xlu1 %5513  ;;  %3312 = vmatprep.subr.mxu1 %v10033_v8 }
 0x364   : > { %10138 = vst [vmem:[#allocation12_spill] sm:$0xff] %v8643_v2  ;;  %5798 = vrot.lane.b32.xlu0 %v5797_v59, %s10040_s14  ;;  %v3440_v59 = vld [vmem:[%s6421_s16 + $0x3f8] sm:$0xff] }
 0x365   : > { %5803 = vrot.lane.b32.xlu1 %v5802_v42, %s10076_s0  ;;  %v5877_v42 = vpack.i.bf16 %v3451_v30, %v3449_v34  ;;  %v5882_v61 = vpack.i.bf16 %v3440_v59, %v3438_v52  ;;  %v4415_v30 = vld [vmem:[%s9882_s2 + $0x200] sm:$0xff]  ;;  %v6212_v59 = vld [vmem:[%s6421_s16 + $0x38c] sm:$0xff] }
 0x366   : > { %v8651_v51 = vpop.permute.xlu0 %5518  ;;  %v6211_v52 = vld [vmem:[%s6421_s16 + $0x284] sm:$0xff]  ;;  %3313 = vmatpush1.msra.mxu1 %v4415_v30 }
 0x367   : > { %v8653_v49 = vpop.permute.xlu1 %5523  ;;  %3314 = vmatprep.subr.mxu1 %v10033_v8 }
 0x368   : > { %10139 = vst [vmem:[#allocation13_spill] sm:$0xff] %v8653_v49  ;;  %5808 = vrot.lane.b32.xlu0 %v5807_v4, %s10009_s10 }
 0x369   : > { %5813 = vrot.lane.b32.xlu1 %v5812_v31, %s10073_s28  ;;  %v3446_v31 = vld [vmem:[%s6421_s16 + $0x1f8] sm:$0xff] }
 0x36a   : > { %v8661_v1 = vpop.permute.xlu0 %5528  ;;  %v5892_v18 = vpack.i.bf16 %v3448_v55, %v3446_v31  ;;  %v3415_v31 = vld [vmem:[%s6421_s16 + $0x238] sm:$0xff] }
 0x36b   : > { %v8663_v58 = vpop.permute.xlu1 %5533 }
 0x36c   : > { %10140 = vst [vmem:[#allocation14_spill] sm:$0xff] %v8663_v58  ;;  %5818 = vrot.lane.b32.xlu0 %v5817_v15, %s10034_s13  ;;  %v6206_v15 = vld [vmem:[%s6421_s16 + $0x17c] sm:$0xff] }
 0x36d   : > { %5823 = vrot.lane.b32.xlu1 %v5822_v19, %s10074_s29  ;;  %v5887_v19 = vpack.i.bf16 %v6206_v15, %v3444_v24  ;;  %v3413_v24 = vld [vmem:[%s6421_s16 + $0x28] sm:$0xff] }
 0x36e   : > { %v8671_v25 = vpop.permute.xlu0 %5538 }
 0x36f   : > { %v8675_v39 = vpop.permute.xlu1 %5543 }
 0x370   : > { %10141 = vst [vmem:[#allocation15_spill] sm:$0xff] %v8675_v39  ;;  %5828 = vrot.lane.b32.xlu0 %v5827_v13, %s10035_s18  ;;  %v3452_v13 = vld [vmem:[%s6421_s16 + $0x410] sm:$0xff] }
 0x371   : > { %5833 = vrot.lane.b32.xlu1 %v5832_v40, %s10075_s9  ;;  %v5897_v3 = vpack.i.bf16 %v3452_v13, %v3450_v20  ;;  %v4413_v13 = vld [vmem:[%s9882_s2 + $0x1f0] sm:$0xff] }
 0x372   : > { %v8681_v38 = vpop.permute.xlu0 %5548 }
 0x373   : > { %v8685_v36 = vpop.permute.xlu1 %5553 }
 0x374   : > { %10142 = vst [vmem:[#allocation16_spill] sm:$0xff] %v8685_v36  ;;  %5838 = vrot.lane.b32.xlu0 %v5837_v14, %s10079_s1  ;;  %v5902_v14 = vpack.i.bf16 %v8741_v35, %v8738_v44  ;;  %v6228_v36 = vld [vmem:[%s6421_s16 + $0x378] sm:$0xff] }
 0x375   : > { %5843 = vrot.lane.b32.xlu1 %v5842_v23, %s10076_s0 }
 0x376   : > { %v8691_v63 = vpop.permute.xlu0 %5558 }
 0x377   : > { %v8695_v56 = vpop.permute.xlu1 %5563 }
 0x378   : > { %10143 = vst [vmem:[#allocation17_spill] sm:$0xff] %v8695_v56  ;;  %5848 = vrot.lane.b32.xlu0 %v5847_v10, %s10008_s11  ;;  %v3397_v10 = vld [vmem:[%s6421_s16 + $0x8] sm:$0xff] }
 0x379   : > { %5853 = vrot.lane.b32.xlu1 %v5852_v43, %s10034_s13  ;;  %v3399_v43 = vld [vmem:[%s6421_s16 + $0x218] sm:$0xff] }
 0x37a   : > { %v8701_v57 = vpop.permute.xlu0 %5568  ;;  %v5917_v53 = vpack.i.bf16 %v3399_v43, %v3397_v10  ;;  %v3404_v10 = vld [vmem:[%s6421_s16 + $0x328] sm:$0xff] }
 0x37b   : > { %v8705_v50 = vpop.permute.xlu1 %5573 }
 0x37c   : > { %10144 = vst [vmem:[#allocation18_spill] sm:$0xff] %v8705_v50  ;;  %5858 = vrot.lane.b32.xlu0 %v5857_v17, %s10009_s10  ;;  %v3407_v17 = vld [vmem:[%s6421_s16 + $0x228] sm:$0xff] }
 0x37d   : > { %5863 = vrot.lane.b32.xlu1 %v5862_v26, %s10035_s18  ;;  %v5927_v41 = vpack.i.bf16 %v3407_v17, %v3405_v22 }
 0x37e   : > { %v8711_v45 = vpop.permute.xlu0 %5578 }
 0x37f   : > { %v8715_v7 = vpop.permute.xlu1 %5583 }
 0x380   : > { %10145 = vst [vmem:[#allocation34_spill] sm:$0xff] %v8715_v7  ;;  %5868 = vrot.lane.b32.xlu0 %v5867_v46, %s10044_s12 }
 0x381   : > { %5873 = vrot.lane.b32.xlu1 %v5872_v11, %s10079_s1 }
 0x382   : > { %v8720_v4 = vpop.permute.xlu0 %5588 }
 0x383   : > { %v8724_v60 = vpop.permute.xlu1 %5593 }
 0x384   : > { %10146 = vst [vmem:[#allocation24_spill] sm:$0xff] %v8724_v60  ;;  %5878 = vrot.lane.b32.xlu0 %v5877_v42, %s10036_s19  ;;  %v5937_v42 = vpack.i.bf16 %v6212_v59, %v6211_v52 }
 0x385   : > { %5883 = vrot.lane.b32.xlu1 %v5882_v61, %s10008_s11  ;;  %v4414_v61 = vld [vmem:[%s9882_s2 + $0x1f8] sm:$0xff] }
 0x386   : > { %v8731_v40 = vpop.permute.xlu0 %5598  ;;  %3315 = vmatpush1.msra.mxu1 %v4414_v61 }
 0x387   : > { %v8733_v37 = vpop.permute.xlu1 %5603  ;;  %3316 = vmatprep.subr.mxu1 %v10033_v8 }
 0x388   : > { %5888 = vrot.lane.b32.xlu0 %v5887_v19, %s10009_s10  ;;  %v5605_v11 = vunpack.i.l.bf16 %v8733_v37  ;;  %v8796_v19 = vld [vmem:[%s6421_s16 + $0x80] sm:$0xff]  ;;  %3317 = vmatpush1.msra.mxu1 %v4413_v13  ;;  %v5606_v6 = vunpack.i.h.bf16 %v8733_v37 }
 0x389   : > { %5893 = vrot.lane.b32.xlu1 %v5892_v18, %s10044_s12  ;;  %3318 = vmatprep.subr.mxu1 %v10033_v8  ;;  %v4411_v37 = vld [vmem:[%s9882_s2 + $0x1e0] sm:$0xff] }
 0x38a   : > { %v8745_v23 = vpop.permute.xlu0 %5608  ;;  %v3195_v18 = vsel %vm653_vm0, %v8796_v19, %v5605_v11  ;;  %v8831_v11 = vld [vmem:[%s6421_s16 + $0x188] sm:$0xff] }
 0x38b   : > { %v8747_v12 = vpop.permute.xlu1 %5613  ;;  %v5610_v55 = vunpack.i.l.bf16 %v8745_v23  ;;  %v5611_v5 = vunpack.i.h.bf16 %v8745_v23  ;;  %v3196_v30 = vsel %vm653_vm0, %v8831_v11, %v5606_v6 }
 0x38c   : > { %5898 = vrot.lane.b32.xlu0 %v5897_v3, %s10036_s19  ;;  %v5947_v3 = vpack.i.bf16 %v3415_v31, %v3413_v24  ;;  %v5615_v48 = vunpack.i.l.bf16 %v8747_v12  ;;  %v5616_v24 = vunpack.i.h.bf16 %v8747_v12  ;;  %v4408_v12 = vld [vmem:[%s9882_s2 + $0x1c8] sm:$0xff] }
 0x38d   : > { %5903 = vrot.lane.b32.xlu1 %v5902_v14, %s10044_s12  ;;  %v4412_v14 = vld [vmem:[%s9882_s2 + $0x1e8] sm:$0xff]  ;;  %v3199_v43 = vsel %vm658_vm1, %v3195_v18, %v5610_v55  ;;  %v4409_v55 = vld [vmem:[%s9882_s2 + $0x1d0] sm:$0xff]  ;;  %v3200_v18 = vsel %vm658_vm1, %v3196_v30, %v5611_v5  ;;  %v4407_v30 = vld [vmem:[%s9882_s2 + $0x1c0] sm:$0xff] }
 0x38e   : > { %v8755_v33 = vpop.permute.xlu0 %5618  ;;  %3319 = vmatpush1.msra.mxu1 %v4412_v14  ;;  %v3203_v59 = vsel %vm663_vm2, %v3199_v43, %v5615_v48  ;;  %v6216_v14 = vld [vmem:[%s6421_s16 + $0x394] sm:$0xff]  ;;  %v3423_v43 = vld [vmem:[%s6421_s16 + $0x248] sm:$0xff] }
 0x38f   : > { %v8757_v47 = vpop.permute.xlu1 %5623  ;;  %3320 = vmatprep.subr.mxu1 %v10033_v8  ;;  %v5621_v13 = vunpack.i.h.bf16 %v8755_v33 }
 0x390   : > { %5908 = vrot.lane.b32.xlu0 %v5907_v9, %s10036_s19  ;;  %v3402_v9 = vld [vmem:[%s6421_s16 + $0x118] sm:$0xff]  ;;  %3321 = vmatpush1.msra.mxu1 %v4411_v37  ;;  %v5625_v52 = vunpack.i.l.bf16 %v8757_v47  ;;  %v5626_v5 = vunpack.i.h.bf16 %v8757_v47 }
 0x391   : > { %v5957_v28 = vpack.i.bf16 %v3404_v10, %v3402_v9  ;;  %3322 = vmatprep.subr.mxu1 %v10033_v8  ;;  %v3421_v10 = vld [vmem:[%s6421_s16 + $0x38] sm:$0xff] }
 0x392   : > { %v8762_v26 = vpop.permute.xlu0 %5628  ;;  %v5977_v47 = vpack.i.bf16 %v3423_v43, %v3421_v10 }
 0x393   : > { %v8764_v29 = vpop.permute.xlu1 %5633 }
 0x394   : > { %5918 = vrot.lane.b32.xlu0 %v5917_v53, %s10037_s17  ;;  %v5620_v53 = vunpack.i.l.bf16 %v8755_v33  ;;  %v5635_v48 = vunpack.i.l.bf16 %v8764_v29 }
 0x396   : > { %v8774_v46 = vpop.permute.xlu0 %5638  ;;  %v3207_v23 = vsel %vm668_vm3, %v3203_v59, %v5620_v53 }
 0x397   : > { %v8777_v34 = vpop.permute.xlu1 %5643  ;;  %v3211_v9 = vsel %vm673_vm4, %v3207_v23, %v5625_v52  ;;  %v5640_v53 = vunpack.i.l.bf16 %v8774_v46  ;;  %v4406_v52 = vld [vmem:[%s9882_s2 + $0x1b8] sm:$0xff]  ;;  %v5631_v23 = vunpack.i.h.bf16 %v8762_v26  ;;  %v5641_v43 = vunpack.i.h.bf16 %v8774_v46 }
 0x398   : > { %5928 = vrot.lane.b32.xlu0 %v5927_v41, %s10039_s15  ;;  %v4410_v41 = vld [vmem:[%s9882_s2 + $0x1d8] sm:$0xff]  ;;  %v5646_v46 = vunpack.i.h.bf16 %v8777_v34 }
 0x399   : > { %3323 = vmatpush1.msra.mxu1 %v4410_v41 }
 0x39a   : > { %v8793_v15 = vpop.permute.xlu0 %5648  ;;  %3324 = vmatprep.subr.mxu1 %v10033_v8 }
 0x39b   : > { %v8800_v20 = vpop.permute.xlu1 %5653  ;;  %3325 = vmatpush1.msra.mxu1 %v4409_v55  ;;  %v3410_v55 = vld [vmem:[%s6421_s16 + $0x128] sm:$0xff] }
 0x39c   : > { %5938 = vrot.lane.b32.xlu0 %v5937_v42, %s10009_s10  ;;  %v5630_v42 = vunpack.i.l.bf16 %v8762_v26  ;;  %3326 = vmatprep.subr.mxu1 %v10033_v8  ;;  %v5636_v26 = vunpack.i.h.bf16 %v8764_v29 }
 0x39d   : > { %3327 = vmatpush1.msra.mxu1 %v4408_v12 }
 0x39e   : > { %v8817_v22 = vpop.permute.xlu0 %5658  ;;  %v3215_v33 = vsel %vm678_vm5, %v3211_v9, %v5630_v42  ;;  %3328 = vmatprep.subr.mxu1 %v10033_v8  ;;  %v5645_v42 = vunpack.i.l.bf16 %v8777_v34  ;;  %v4404_v9 = vld [vmem:[%s9882_s2 + $0x1a8] sm:$0xff] }
 0x39f   : > { %v8819_v17 = vpop.permute.xlu1 %5663  ;;  %3329 = vmatpush1.msra.mxu1 %v4407_v30 }
 0x3a0   : > { %5948 = vrot.lane.b32.xlu0 %v5947_v3, %s10073_s28  ;;  %v6215_v3 = vld [vmem:[%s6421_s16 + $0x28c] sm:$0xff]  ;;  %3330 = vmatprep.subr.mxu1 %v10033_v8 }
 0x3a1   : > { %v5967_v6 = vpack.i.bf16 %v6216_v14, %v6215_v3  ;;  %v5650_v14 = vunpack.i.l.bf16 %v8793_v15  ;;  %3331 = vmatpush1.msra.mxu1 %v4406_v52  ;;  %v5660_v52 = vunpack.i.l.bf16 %v8817_v22 }
 0x3a2   : > { %v8840_v61 = vpop.permute.xlu0 %5668  ;;  %3332 = vmatprep.subr.mxu1 %v10033_v8 }
 0x3a3   : > { %v8843_v31 = vpop.permute.xlu1 %5673 }
 0x3a4   : > { %5958 = vrot.lane.b32.xlu0 %v5957_v28, %s10038_s20  ;;  %v3204_v28 = vsel %vm663_vm2, %v3200_v18, %v5616_v24  ;;  %v3219_v24 = vsel %vm683_vm6, %v3215_v33, %v5635_v48  ;;  %v3412_v18 = vld [vmem:[%s6421_s16 + $0x338] sm:$0xff]  ;;  %v4405_v48 = vld [vmem:[%s9882_s2 + $0x1b0] sm:$0xff]  ;;  %v5655_v33 = vunpack.i.l.bf16 %v8800_v20 }
 0x3a5   : > { %v3208_v59 = vsel %vm668_vm3, %v3204_v28, %v5621_v13  ;;  %v3223_v3 = vsel %vm10147_vm7, %v3219_v24, %v5640_v53  ;;  %v5987_v29 = vpack.i.bf16 %v3412_v18, %v3410_v55  ;;  %3333 = vmatpush1.msra.mxu1 %v4405_v48  ;;  %v3416_v28 = vld [vmem:[%s6421_s16 + $0x340] sm:$0xff]  ;;  %v5651_v55 = vunpack.i.h.bf16 %v8793_v15  ;;  %vm10152_vm7 = vmmov %vm10148_vm8 }
 0x3a6   : > { %v8864_v37 = vpop.permute.xlu0 %5678  ;;  %v3227_v53 = vsel %vm10148_vm8, %v3223_v3, %v5645_v42  ;;  %3334 = vmatprep.subr.mxu1 %v10033_v8  ;;  %v4403_v42 = vld [vmem:[%s9882_s2 + $0x1a0] sm:$0xff]  ;;  %v3418_v3 = vld [vmem:[%s6421_s16 + $0x138] sm:$0xff]  ;;  %v5601_v15 = vunpack.i.h.bf16 %v8731_v40  ;;  %vm10153_vm8 = vmmov %vm10149_vm9 }
 0x3a7   : > { %v8868_v41 = vpop.permute.xlu1 %5683  ;;  %v3231_v30 = vsel %vm10149_vm9, %v3227_v53, %v5650_v14  ;;  %3335 = vmatpush1.msra.mxu1 %v4404_v9  ;;  %v3420_v14 = vld [vmem:[%s6421_s16 + $0x348] sm:$0xff]  ;;  %v5656_v9 = vunpack.i.h.bf16 %v8800_v20  ;;  %v5665_v53 = vunpack.i.l.bf16 %v8819_v17  ;;  %vm10154_vm9 = vcmask 1043456  }
 0x3a8   : > { %5968 = vrot.lane.b32.xlu0 %v5967_v6, %s10036_s19  ;;  %v3212_v6 = vsel %vm673_vm4, %v3208_v59, %v5626_v5  ;;  %v3414_v5 = vld [vmem:[%s6421_s16 + $0x130] sm:$0xff]  ;;  %3336 = vmatprep.subr.mxu1 %v10033_v8  ;;  %v3235_v34 = vsel %vm10151_vm15, %v3231_v30, %v5655_v33  ;;  %v3422_v30 = vld [vmem:[%s6421_s16 + $0x140] sm:$0xff]  ;;  %v5686_v60 = vunpack.i.h.bf16 %v8868_v41 }
 0x3a9   : > { %v3216_v10 = vsel %vm678_vm5, %v3212_v6, %v5631_v23  ;;  %v5997_v18 = vpack.i.bf16 %v3416_v28, %v3414_v5  ;;  %3337 = vmatpush1.msra.mxu1 %v4403_v42  ;;  %v3239_v6 = vsel %vm708_vm11, %v3235_v34, %v5660_v52  ;;  %v5661_v5 = vunpack.i.h.bf16 %v8817_v22  ;;  %v3424_v52 = vld [vmem:[%s6421_s16 + $0x350] sm:$0xff] }
 0x3aa   : > { %v8887_v13 = vpop.permute.xlu0 %5688  ;;  %v3220_v23 = vsel %vm683_vm6, %v3216_v10, %v5636_v26  ;;  %3338 = vmatprep.subr.mxu1 %v10033_v8  ;;  %v4402_v26 = vld [vmem:[%s9882_s2 + $0x198] sm:$0xff]  ;;  %v6007_v28 = vpack.i.bf16 %v3420_v14, %v3418_v3  ;;  %v3243_v20 = vsel %vm713_vm12, %v3239_v6, %v5601_v15  ;;  %v5670_v42 = vunpack.i.l.bf16 %v8840_v61 }
 0x3ab   : > { %v8891_v12 = vpop.permute.xlu1 %5693  ;;  %v3224_v24 = vsel %vm10150_vm10, %v3220_v23, %v5641_v43  ;;  %3339 = vmatpush1.msra.mxu1 %v4402_v26  ;;  %vm10155_vm10 = vmmov %vm10151_vm15  ;;  %v3247_v34 = vsel %vm718_vm13, %v3243_v20, %v5665_v53  ;;  %v6017_v3 = vpack.i.bf16 %v3424_v52, %v3422_v30  ;;  %v5671_v14 = vunpack.i.h.bf16 %v8840_v61  ;;  %v8965_v6 = vld [vmem:[%s6421_s16 + $0x358] sm:$0xff]  ;;  %v3403_v53 = vld [vmem:[%s6421_s16 + $0x220] sm:$0xff] }
 0x3ac   : > { %5978 = vrot.lane.b32.xlu0 %v5977_v47, %s10075_s9  ;;  %v3228_v10 = vsel %vm10152_vm7, %v3224_v24, %v5646_v46  ;;  %3370 = vmatprep.subr.mxu1 %v10033_v8  ;;  %10156 = vst [vmem:[#allocation26_spill] sm:$0xff] %v8965_v6  ;;  %v5691_v7 = vunpack.i.h.bf16 %v8887_v13  ;;  %v5695_v56 = vunpack.i.l.bf16 %v8891_v12  ;;  %v5696_v58 = vunpack.i.h.bf16 %v8891_v12  ;;  %v3408_v12 = vld [vmem:[%s6421_s16 + $0x330] sm:$0xff] }
 0x3ad   : > { %v3232_v33 = vsel %vm10153_vm8, %v3228_v10, %v5651_v55  ;;  %v5666_v55 = vunpack.i.h.bf16 %v8819_v17  ;;  %v8971_v17 = vld [vmem:[%s6421_s16 + $0x148] sm:$0xff]  ;;  %v3251_v10 = vsel %vm723_vm14, %v3247_v34, %v5670_v42  ;;  %v3411_v42 = vld [vmem:[%s6421_s16 + $0x230] sm:$0xff]  ;;  %v5675_v34 = vunpack.i.l.bf16 %v8843_v31 }
 0x3ae   : > { %v8910_v59 = vpop.permute.xlu0 %5698  ;;  %v3236_v23 = vsel %vm10155_vm10, %v3232_v33, %v5656_v9  ;;  %v3401_v33 = vld [vmem:[%s6421_s16 + $0x10] sm:$0xff]  ;;  %vm10157_vm15 = vcmask 261120   ;;  %vm10159_vm8 = vcmask 293888  }
 0x3af   : > { %v8914_v47 = vpop.permute.xlu1 %5703  ;;  %v5922_v30 = vpack.i.bf16 %v3403_v53, %v3401_v33  ;;  %v5680_v33 = vunpack.i.l.bf16 %v8864_v37  ;;  %v6219_v53 = vld [vmem:[%s6421_s16 + $0x158] sm:$0xff]  ;;  %v5701_v49 = vunpack.i.h.bf16 %v8910_v59  ;;  %vm10158_vm7 = vmmov %vm10157_vm15 }
 0x3b0   : > { %5988 = vrot.lane.b32.xlu0 %v5987_v29, %s10040_s14  ;;  %v4418_v29 = vld [vmem:[%s9882_s2 + $0x218] sm:$0xf]  ;;  %vm10161_vm10 = vmmov %vm10159_vm8 }
 0x3b1   : > { %4419 = vmatpush2.msk.msra.mxu1 %vm10154_vm9, %v4418_v29  ;;  %vm10160_vm9 = vcmask 326656  }
 0x3b2   : > { %v8931_v48 = vpop.permute.xlu0 %5708  ;;  %4455 = vmatprep.subr.mxu1 %v10033_v8 }
 0x3b3   : > { %v8936_v43 = vpop.permute.xlu1 %5713 }
 0x3b4   : > { %5998 = vrot.lane.b32.xlu0 %v5997_v18, %s10073_s28  ;;  %v3240_v18 = vsel %vm708_vm11, %v3236_v23, %v5661_v5  ;;  %v3409_v23 = vld [vmem:[%s6421_s16 + $0x20] sm:$0xff] }
 0x3b6   : > { %v8951_v46 = vpop.permute.xlu0 %5718 }
 0x3b7   : > { %v8955_v22 = vpop.permute.xlu1 %5723  ;;  %v5720_v24 = vunpack.i.l.bf16 %v8951_v46 }
 0x3b8   : > { %6008 = vrot.lane.b32.xlu0 %v6007_v28, %s10074_s29  ;;  %v6027_v28 = vpack.i.bf16 %v8965_v6, %v8971_v17 }
 0x3b9   : > { %v3244_v26 = vsel %vm713_vm12, %v3240_v18, %v5720_v24  ;;  %v6217_v24 = vld [vmem:[%s6421_s16 + $0x150] sm:$0xff] }
 0x3ba   : > { %v3248_v15 = vsel %vm718_vm13, %v3244_v26, %v5666_v55  ;;  %v8968_v9 = vpop.permute.xlu0 %5728  ;;  %v6218_v55 = vld [vmem:[%s6421_s16 + $0x360] sm:$0xff]  ;;  %v5676_v26 = vunpack.i.h.bf16 %v8843_v31  ;;  %v5681_v31 = vunpack.i.h.bf16 %v8864_v37  ;;  %v5690_v37 = vunpack.i.l.bf16 %v8887_v13 }
 0x3bb   : > { %v8974_v29 = vpop.permute.xlu1 %5733  ;;  %v3252_v61 = vsel %vm723_vm14, %v3248_v15, %v5671_v14  ;;  %v6037_v18 = vpack.i.bf16 %v6218_v55, %v6217_v24  ;;  %v5932_v14 = vpack.i.bf16 %v3411_v42, %v3409_v23  ;;  %v9006_v24 = vld [vmem:[%s6421_s16 + $0x290] sm:$0xff]  ;;  %v9015_v55 = vld [vmem:[%s6421_s16 + $0x398] sm:$0xff]  ;;  %v5700_v13 = vunpack.i.l.bf16 %v8910_v59  ;;  %v6230_v59 = vld [vmem:[%s6421_s16 + $0x380] sm:$0xff] }
 0x3bc   : > { %6018 = vrot.lane.b32.xlu0 %v6017_v3, %s10075_s9  ;;  %v5912_v5 = vpack.i.bf16 %v3252_v61, %v3251_v10  ;;  %v3398_v10 = vld [vmem:[%s6421_s16 + $0x110] sm:$0xff]  ;;  %v3400_v61 = vld [vmem:[%s6421_s16 + $0x320] sm:$0xff] }
 0x3bd   : > { %v5942_v42 = vpack.i.bf16 %v3400_v61, %v3398_v10  ;;  %v6224_v10 = vld [vmem:[%s6421_s16 + $0x370] sm:$0xff] }
 0x3be   : > { %v8982_v20 = vpop.permute.xlu0 %5738  ;;  %5913 = vrot.lane.b32.xlu1 %v5912_v5, %s10072_s26  ;;  %v6220_v5 = vld [vmem:[%s6421_s16 + $0x368] sm:$0xff] }
 0x3bf   : > { %v8985_v52 = vpop.permute.xlu1 %5743 }
 0x3c0   : > { %6028 = vrot.lane.b32.xlu0 %v6027_v28, %s10076_s0  ;;  %v6047_v28 = vpack.i.bf16 %v6220_v5, %v6219_v53  ;;  %v5685_v53 = vunpack.i.l.bf16 %v8868_v41 }
 0x3c2   : > { %v8993_v3 = vpop.permute.xlu0 %5748  ;;  %5923 = vrot.lane.b32.xlu1 %v5922_v30, %s10038_s20  ;;  %v3197_v30 = vsel %vm653_vm0, %v9006_v24, %v5675_v34 }
 0x3c3   : > { %v8997_v15 = vpop.permute.xlu1 %5753  ;;  %v3201_v34 = vsel %vm658_vm1, %v3197_v30, %v5680_v33  ;;  %v9034_v33 = vld [vmem:[%s6421_s16 + $0x288] sm:$0xff]  ;;  %v6226_v30 = vld [vmem:[%s6421_s16 + $0x390] sm:$0xff] }
 0x3c4   : > { %6038 = vrot.lane.b32.xlu0 %v6037_v18, %s10034_s13  ;;  %v3198_v18 = vsel %vm653_vm0, %v9015_v55, %v5676_v26 }
 0x3c5   : > { %v3202_v26 = vsel %vm658_vm1, %v3198_v18, %v5681_v31  ;;  %v3419_v31 = vld [vmem:[%s6421_s16 + $0x240] sm:$0xff] }
 0x3c6   : > { %v9011_v23 = vpop.permute.xlu0 %5758  ;;  %5933 = vrot.lane.b32.xlu1 %v5932_v14, %s10040_s14  ;;  %v6223_v14 = vld [vmem:[%s6421_s16 + $0x160] sm:$0xff] }
 0x3c7   : > { %v9020_v5 = vpop.permute.xlu1 %5763  ;;  %v6057_v61 = vpack.i.bf16 %v6224_v10, %v6223_v14  ;;  %v3205_v14 = vsel %vm663_vm2, %v3201_v34, %v5685_v53  ;;  %v3417_v10 = vld [vmem:[%s6421_s16 + $0x30] sm:$0xff]  ;;  %v3206_v53 = vsel %vm663_vm2, %v3202_v26, %v5686_v60  ;;  %v5710_v60 = vunpack.i.l.bf16 %v8931_v48 }
 0x3c8   : > { %6048 = vrot.lane.b32.xlu0 %v6047_v28, %s10035_s18  ;;  %v5952_v28 = vpack.i.bf16 %v6226_v30, %v9034_v33  ;;  %v3209_v18 = vsel %vm668_vm3, %v3205_v14, %v5690_v37  ;;  %v3210_v34 = vsel %vm668_vm3, %v3206_v53, %v5691_v7  ;;  %v5962_v14 = vpack.i.bf16 %v3419_v31, %v3417_v10  ;;  %v6229_v7 = vld [vmem:[%s6421_s16 + $0x170] sm:$0xff] }
 0x3c9   : > { %v3213_v2 = vsel %vm673_vm4, %v3209_v18, %v5695_v56  ;;  %v6077_v26 = vpack.i.bf16 %v6230_v59, %v6229_v7  ;;  %v3214_v10 = vsel %vm673_vm4, %v3210_v34, %v5696_v58  ;;  %v5711_v56 = vunpack.i.h.bf16 %v8931_v48 }
 0x3ca   : > { %v9030_v50 = vpop.permute.xlu0 %5768  ;;  %5943 = vrot.lane.b32.xlu1 %v5942_v42, %s10037_s17  ;;  %v6227_v42 = vld [vmem:[%s6421_s16 + $0x168] sm:$0xff]  ;;  %v3217_v6 = vsel %vm678_vm5, %v3213_v2, %v5700_v13  ;;  %v3218_v31 = vsel %vm678_vm5, %v3214_v10, %v5701_v49  ;;  %v5715_v13 = vunpack.i.l.bf16 %v8936_v43  ;;  %v6087_v49 = vpack.i.bf16 %v6226_v30, %v8741_v35 }
 0x3cb   : > { %v9040_v41 = vpop.permute.xlu1 %5773  ;;  %v6067_v39 = vpack.i.bf16 %v6228_v36, %v6227_v42  ;;  %v3406_v42 = vld [vmem:[%s6421_s16 + $0x120] sm:$0xff]  ;;  %v5716_v58 = vunpack.i.h.bf16 %v8936_v43  ;;  %v5740_v34 = vunpack.i.l.bf16 %v8982_v20  ;;  %v5741_v35 = vunpack.i.h.bf16 %v8982_v20 }
 0x3cc   : > { %6058 = vrot.lane.b32.xlu0 %v6057_v61, %s10079_s1  ;;  %v5705_v61 = vunpack.i.l.bf16 %v8914_v47  ;;  %v5972_v2 = vpack.i.bf16 %v3408_v12, %v3406_v42  ;;  %v5770_v20 = vunpack.i.l.bf16 %v9030_v50 }
 0x3ce   : > { %v9053_v37 = vpop.permute.xlu0 %5778  ;;  %5953 = vrot.lane.b32.xlu1 %v5952_v28, %s10044_s12  ;;  %v5706_v28 = vunpack.i.h.bf16 %v8914_v47  ;;  %v5730_v47 = vunpack.i.l.bf16 %v8968_v9 }
 0x3cf   : > { %v9058_v36 = vpop.permute.xlu1 %5783  ;;  %v5781_v21 = vunpack.i.h.bf16 %v9053_v37 }
 0x3d0   : > { %6068 = vrot.lane.b32.xlu0 %v6067_v39, %s10008_s11  ;;  %v3221_v39 = vsel %vm683_vm6, %v3217_v6, %v5705_v61  ;;  %v3222_v48 = vsel %vm683_vm6, %v3218_v31, %v5706_v28  ;;  %v5731_v6 = vunpack.i.h.bf16 %v8968_v9  ;;  %v5750_v61 = vunpack.i.l.bf16 %v8993_v3 }
 0x3d1   : > { %v3225_v7 = vsel %vm10157_vm15, %v3221_v39, %v5710_v60  ;;  %v5751_v60 = vunpack.i.h.bf16 %v8993_v3  ;;  %vm10162_vm15 = vcmask 359424   ;;  %v5786_v3 = vunpack.i.h.bf16 %v9058_v36 }
 0x3d2   : > { %v9071_v18 = vpop.permute.xlu0 %5788  ;;  %5963 = vrot.lane.b32.xlu1 %v5962_v14, %s10074_s29  ;;  %v3226_v14 = vsel %vm10158_vm7, %v3222_v48, %v5711_v56  ;;  %v3229_v12 = vsel %vm10159_vm8, %v3225_v7, %v5715_v13  ;;  %vm10163_vm7 = vmmov %vm10160_vm9  ;;  %v9128_v48 = vld [vmem:[%s9882_s2 + $0x290] sm:$0xff]  ;;  %s4454_s29 = sshll.u32 %s6385_s25, 9 }
 0x3d3   : > { %v9076_v53 = vpop.permute.xlu1 %5793  ;;  %v3233_v43 = vsel %vm10160_vm9, %v3229_v12, %v5730_v47  ;;  %v3230_v9 = vsel %vm10161_vm10, %v3226_v14, %v5716_v58  ;;  %vm10164_vm8 = vmmov %vm10162_vm15  ;;  %v5771_v47 = vunpack.i.h.bf16 %v9030_v50  ;;  %10166 = vst [vmem:[#allocation28_spill] sm:$0xff] %v9128_v48  ;;  %vm10177_vm9 = vcmask 261120   ;;  %s9832_s24 = scalar_lea.hbm %s9886_s6, %s4454_s29 }
 0x3d4   : > { %6078 = vrot.lane.b32.xlu0 %v6077_v26, %s10009_s10  ;;  %v3237_v59 = vsel %vm10162_vm15, %v3233_v43, %v5740_v34  ;;  %v5721_v26 = vunpack.i.h.bf16 %v8951_v46  ;;  %v3234_v28 = vsel %vm10163_vm7, %v3230_v9, %v5731_v6  ;;  %v9115_v46 = vld [vmem:[%s9882_s2 + $0x298] sm:$0xff]  ;;  %v5725_v6 = vunpack.i.l.bf16 %v8955_v22  ;;  %v9144_v43 = vld [vmem:[%s9882_s2 + $0x288] sm:$0xff]  ;;  %v10168_v9 = vld [vmem:[#allocation29_spill] sm:$0xff] }
 0x3d5   : > { %v3241_v10 = vsel %vm708_vm11, %v3237_v59, %v5750_v61  ;;  %v3238_v56 = vsel %vm10164_vm8, %v3234_v28, %v5741_v35  ;;  %4051 = vmatpush1.msra.mxu0 %v9115_v46  ;;  %10167 = vst [vmem:[#allocation30_spill] sm:$0xff] %v9144_v43  ;;  %v9154_v28 = vld [vmem:[%s6421_s16 + $0x40] sm:$0xff]  ;;  %vm10178_vm10 = vmmov %vm10177_vm9  ;;  %vm10180_vm15 = vcmask 293888   ;;  %vm10182_vm8 = vcmask 326656  }
 0x3d6   : > { %v9088_v42 = vpop.permute.xlu0 %5798  ;;  %5973 = vrot.lane.b32.xlu1 %v5972_v2, %s10039_s15  ;;  %v5785_v2 = vunpack.i.l.bf16 %v9058_v36  ;;  %v3242_v7 = vsel %vm708_vm11, %v3238_v56, %v5751_v60  ;;  %v3245_v36 = vsel %vm713_vm12, %v3241_v10, %v5721_v26  ;;  %4052 = vmatprep.subr.mxu0 %v10033_v8  ;;  %v5726_v60 = vunpack.i.h.bf16 %v8955_v22  ;;  %v9151_v26 = vld [vmem:[%s6421_s16 + $0x250] sm:$0xff]  ;;  %v9160_v10 = vld [vmem:[%s9882_s2 + $0x280] sm:$0xff]  ;;  %vm10181_vm7 = vmmov %vm10180_vm15 }
 0x3d7   : > { %v9093_v30 = vpop.permute.xlu1 %5803  ;;  %v3249_v50 = vsel %vm718_vm13, %v3245_v36, %v5770_v20  ;;  %4053 = vmatpush1.msra.mxu0 %v9128_v48  ;;  %10169 = vst [vmem:[#allocation32_spill] sm:$0xff] %v9151_v26  ;;  %10170 = vst [vmem:[#allocation23_spill] sm:$0xff] %v9160_v10  ;;  %v5735_v20 = vunpack.i.l.bf16 %v8974_v29  ;;  %v5992_v56 = vpack.i.bf16 %v9151_v26, %v9154_v28  ;;  %v5746_v36 = vunpack.i.h.bf16 %v8985_v52 }
 0x3d8   : > { %6088 = vrot.lane.b32.xlu0 %v6087_v49, %s10036_s19  ;;  %v10165_v49 = vld [vmem:[#allocation25_spill] sm:$0xff]  ;;  %v3253_v61 = vsel %vm723_vm14, %v3249_v50, %v5785_v2  ;;  %4054 = vmatprep.subr.mxu0 %v10033_v8  ;;  %v5736_v2 = vunpack.i.h.bf16 %v8974_v29  ;;  %v6232_v50 = vld [vmem:[%s6421_s16 + $0x258] sm:$0xff]  ;;  %v5765_v26 = vunpack.i.l.bf16 %v9020_v5  ;;  %v5801_v0 = vunpack.i.h.bf16 %v9088_v42 }
 0x3d9   : > { %4055 = vmatpush1.msra.mxu0 %v9144_v43  ;;  %v5806_v48 = vunpack.i.h.bf16 %v9093_v30 }
 0x3da   : > { %v9104_v31 = vpop.permute.xlu0 %5808  ;;  %4056 = vmatprep.subr.mxu0 %v10033_v8 }
 0x3db   : > { %v9109_v13 = vpop.permute.xlu1 %5813  ;;  %v5810_v39 = vunpack.i.l.bf16 %v9104_v31  ;;  %4057 = vmatpush1.msra.mxu0 %v9160_v10  ;;  %v5780_v10 = vunpack.i.l.bf16 %v9053_v37 }
 0x3dc   : > { %4139 = vrot.lane.b32.xlu0 %v10165_v49, %s10037_s17  ;;  %4058 = vmatprep.subr.mxu0 %v10033_v8  ;;  %v5745_v49 = vunpack.i.l.bf16 %v8985_v52  ;;  %v9205_v52 = vld [vmem:[%s9882_s2 + $0x268] sm:$0xff] }
 0x3dd   : > { %v3246_v58 = vsel %vm713_vm12, %v3242_v7, %v5810_v39  ;;  %v9178_v7 = vld [vmem:[%s9882_s2 + $0x278] sm:$0xff]  ;;  %10173 = vst [vmem:[#allocation36_spill] sm:$0xff] %v9205_v52 }
 0x3de   : > { %v3250_v34 = vsel %vm718_vm13, %v3246_v58, %v5771_v47  ;;  %v9132_v14 = vpop.permute.xlu0 %5818  ;;  %10171 = vst [vmem:[#allocation25_spill] sm:$0xff] %v9178_v7  ;;  %v3939_v47 = vsel %vm653_vm0, %v9006_v24, %v5726_v60  ;;  %4059 = vmatpush1.msra.mxu0 %v9178_v7  ;;  %v6231_v24 = vld [vmem:[%s6421_s16 + $0x48] sm:$0xff]  ;;  %v5775_v7 = vunpack.i.l.bf16 %v9040_v41 }
 0x3df   : > { %v9137_v12 = vpop.permute.xlu1 %5823  ;;  %v3254_v35 = vsel %vm723_vm14, %v3250_v34, %v5786_v3  ;;  %v3937_v3 = vsel %vm653_vm0, %v8796_v19, %v5725_v6  ;;  %4060 = vmatprep.subr.mxu0 %v10033_v8  ;;  %v9188_v19 = vld [vmem:[%s9882_s2 + $0x270] sm:$0xff]  ;;  %v6002_v34 = vpack.i.bf16 %v6232_v50, %v6231_v24  ;;  %v3943_v6 = vsel %vm658_vm1, %v3939_v47, %v5736_v2  ;;  %v9227_v50 = vld [vmem:[%s6421_s16 + $0x60] sm:$0xff] }
 0x3e0   : > { %4143 = vrot.lane.b32.xlu0 %v10168_v9, %s10037_s17  ;;  %v5982_v59 = vpack.i.bf16 %v3254_v35, %v3253_v61  ;;  %10172 = vst [vmem:[#allocation29_spill] sm:$0xff] %v9188_v19  ;;  %v3941_v29 = vsel %vm658_vm1, %v3937_v3, %v5735_v20  ;;  %4061 = vmatpush1.msra.mxu0 %v9188_v19  ;;  %v5755_v35 = vunpack.i.l.bf16 %v8997_v15  ;;  %v5756_v9 = vunpack.i.h.bf16 %v8997_v15  ;;  %v6234_v20 = vld [vmem:[%s6421_s16 + $0x260] sm:$0xff]  ;;  %v6235_v15 = vld [vmem:[%s6421_s16 + $0x58] sm:$0xff] }
 0x3e1   : > { %4062 = vmatprep.subr.mxu0 %v10033_v8  ;;  %v3945_v60 = vsel %vm663_vm2, %v3941_v29, %v5745_v49  ;;  %v9217_v3 = vld [vmem:[%s9882_s2 + $0x260] sm:$0xff]  ;;  %v3947_v2 = vsel %vm663_vm2, %v3943_v6, %v5746_v36  ;;  %v5761_v47 = vunpack.i.h.bf16 %v9011_v23  ;;  %v6236_v29 = vld [vmem:[%s6421_s16 + $0x268] sm:$0xff]  ;;  %v5760_v36 = vunpack.i.l.bf16 %v9011_v23  ;;  %v9260_v23 = vld [vmem:[%s9882_s2 + $0x258] sm:$0xff] }
 0x3e2   : > { %v9163_v22 = vpop.permute.xlu0 %5828  ;;  %5983 = vrot.lane.b32.xlu1 %v5982_v59, %s10072_s26  ;;  %4063 = vmatpush1.msra.mxu0 %v9205_v52  ;;  %v6233_v59 = vld [vmem:[%s6421_s16 + $0x50] sm:$0xff]  ;;  %10174 = vst [vmem:[#allocation37_spill] sm:$0xff] %v9217_v3  ;;  %v6022_v24 = vpack.i.bf16 %v6236_v29, %v6235_v15  ;;  %v9239_v52 = vld [vmem:[%s6421_s16 + $0x68] sm:$0xff]  ;;  %v9250_v29 = vld [vmem:[%s6421_s16 + $0x280] sm:$0xff]  ;;  %v3949_v19 = vsel %vm668_vm3, %v3945_v60, %v5755_v35  ;;  %v5795_v60 = vunpack.i.l.bf16 %v9076_v53 }
 0x3e3   : > { %v9172_v39 = vpop.permute.xlu1 %5833  ;;  %4064 = vmatprep.subr.mxu0 %v10033_v8  ;;  %v9247_v15 = vld [vmem:[%s6421_s16 + $0x70] sm:$0xff]  ;;  %10175 = vst [vmem:[#allocation38_spill] sm:$0xff] %v9260_v23  ;;  %v3938_v37 = vsel %vm653_vm0, %v8831_v11, %v5760_v36 }
 0x3e4   : > { %4065 = vmatpush1.msra.mxu0 %v9217_v3  ;;  %v5776_v3 = vunpack.i.h.bf16 %v9040_v41  ;;  %v9275_v35 = vld [vmem:[%s9882_s2 + $0x250] sm:$0xff]  ;;  %v5790_v41 = vunpack.i.l.bf16 %v9071_v18  ;;  %v3942_v11 = vsel %vm658_vm1, %v3938_v37, %v5775_v7 }
 0x3e5   : > { %4066 = vmatprep.subr.mxu0 %v10033_v8  ;;  %10176 = vst [vmem:[#allocation39_spill] sm:$0xff] %v9275_v35 }
 0x3e6   : > { %v9192_v58 = vpop.permute.xlu0 %5838  ;;  %5993 = vrot.lane.b32.xlu1 %v5992_v56, %s10076_s0  ;;  %v6012_v56 = vpack.i.bf16 %v6234_v20, %v6233_v59  ;;  %v9230_v59 = vld [vmem:[%s6421_s16 + $0x270] sm:$0xff]  ;;  %4067 = vmatpush1.msra.mxu0 %v9260_v23  ;;  %v3951_v20 = vsel %vm668_vm3, %v3947_v2, %v5756_v9  ;;  %v5791_v9 = vunpack.i.h.bf16 %v9071_v18  ;;  %v5796_v23 = vunpack.i.h.bf16 %v9076_v53  ;;  %v9297_v18 = vld [vmem:[%s9882_s2 + $0x248] sm:$0xff]  ;;  %s6327_s0 = smov [#allocation2]  }
 0x3e7   : > { %v9199_v61 = vpop.permute.xlu1 %5843  ;;  %4068 = vmatprep.subr.mxu0 %v10033_v8  ;;  %v5805_v53 = vunpack.i.l.bf16 %v9093_v30  ;;  %s6252_s27 = sshll.u32 %s6327_s0, 4  ;;  %s6253_s27 = int_to_ptr.vmem [resolvable:$false] %s6252_s27 }
 0x3e8   : > { %4069 = vmatpush1.msra.mxu0 %v9275_v35 }
 0x3e9   : > { %4070 = vmatprep.subr.mxu0 %v10033_v8 }
 0x3ea   : > { %v9221_v49 = vpop.permute.xlu0 %5848  ;;  %6003 = vrot.lane.b32.xlu1 %v6002_v34, %s10034_s13  ;;  %v5766_v34 = vunpack.i.h.bf16 %v9020_v5  ;;  %v3940_v5 = vsel %vm653_vm0, %v9015_v55, %v5761_v47  ;;  %v5800_v55 = vunpack.i.l.bf16 %v9088_v42  ;;  %4071 = vmatpush1.msra.mxu0 %v9297_v18  ;;  %s6254_s13 = scalar_lea.vmem %s6253_s27, 1024 }
 0x3eb   : > { %v9236_v6 = vpop.permute.xlu1 %5853  ;;  %v3944_v42 = vsel %vm658_vm1, %v3940_v5, %v5776_v3  ;;  %4072 = vmatprep.subr.mxu0 %v10033_v8  ;;  %v5815_v3 = vunpack.i.l.bf16 %v9109_v13 }
 0x3ec   : > { %v3955_v35 = vsel %vm673_vm4, %v3951_v20, %v5766_v34  ;;  %v3948_v20 = vsel %vm663_vm2, %v3944_v42, %v5791_v9  ;;  %v5831_v9 = vunpack.i.h.bf16 %v9163_v22  ;;  %v5845_v42 = vunpack.i.l.bf16 %v9199_v61 }
 0x3ed   : > { %v3959_v36 = vsel %vm678_vm5, %v3955_v35, %v5781_v21  ;;  %v3952_v34 = vsel %vm668_vm3, %v3948_v20, %v5801_v0  ;;  %v9330_v35 = vld [vmem:[%s9882_s2 + $0x238] sm:$0xff] }
 0x3ee   : > { %v9282_v2 = vpop.permute.xlu0 %5858  ;;  %6013 = vrot.lane.b32.xlu1 %v6012_v56, %s10035_s18  ;;  %v3953_v56 = vsel %vm673_vm4, %v3949_v19, %v5765_v26  ;;  %v9312_v26 = vld [vmem:[%s9882_s2 + $0x240] sm:$0xff]  ;;  %v3946_v19 = vsel %vm663_vm2, %v3942_v11, %v5790_v41  ;;  %v3963_v30 = vsel %vm683_vm6, %v3959_v36, %v5796_v23  ;;  %v5820_v23 = vunpack.i.l.bf16 %v9132_v14 }
 0x3ef   : > { %v9291_v47 = vpop.permute.xlu1 %5863  ;;  %v3957_v43 = vsel %vm678_vm5, %v3953_v56, %v5780_v10  ;;  %4073 = vmatpush1.msra.mxu0 %v9312_v26  ;;  %v3950_v10 = vsel %vm668_vm3, %v3946_v19, %v5800_v55  ;;  %v3967_v0 = vsel %vm10178_vm10, %v3963_v30, %v5806_v48  ;;  %v5830_v41 = vunpack.i.l.bf16 %v9163_v22  ;;  %v9347_v55 = vld [vmem:[%s9882_s2 + $0x230] sm:$0xff] }
 0x3f0   : > { %v3961_v7 = vsel %vm683_vm6, %v3957_v43, %v5795_v60  ;;  %v5816_v43 = vunpack.i.h.bf16 %v9109_v13  ;;  %4074 = vmatprep.subr.mxu0 %v10033_v8  ;;  %v5821_v60 = vunpack.i.h.bf16 %v9132_v14  ;;  %v5826_v13 = vunpack.i.h.bf16 %v9137_v12 }
 0x3f1   : > { %v3965_v5 = vsel %vm10177_vm9, %v3961_v7, %v5805_v53  ;;  %4075 = vmatpush1.msra.mxu0 %v9330_v35  ;;  %v3954_v14 = vsel %vm673_vm4, %v3950_v10, %v5815_v3  ;;  %v5811_v56 = vunpack.i.h.bf16 %v9104_v31  ;;  %v5836_v48 = vunpack.i.h.bf16 %v9172_v39  ;;  %vm10183_vm9 = vmmov %vm10182_vm8  ;;  %v9381_v10 = vld [vmem:[%s9882_s2 + $0x220] sm:$0xff] }
 0x3f2   : > { %v9318_v21 = vpop.permute.xlu0 %5868  ;;  %6023 = vrot.lane.b32.xlu1 %v6022_v24, %s10079_s1  ;;  %v5825_v24 = vunpack.i.l.bf16 %v9137_v12  ;;  %4076 = vmatprep.subr.mxu0 %v10033_v8  ;;  %v5835_v12 = vunpack.i.l.bf16 %v9172_v39  ;;  %v10179_v22 = vpack.i.bf16 %v9230_v59, %v9227_v50  ;;  %v3956_v53 = vsel %vm673_vm4, %v3952_v34, %v5816_v43  ;;  %v9366_v39 = vld [vmem:[%s9882_s2 + $0x228] sm:$0xff]  ;;  %v9386_v34 = vld [vmem:[%s9882_s2 + $0x2a0] sm:$0xf] }
 0x3f3   : > { %v9341_v37 = vpop.permute.xlu1 %5873  ;;  %4077 = vmatpush1.msra.mxu0 %v9347_v55  ;;  %v5841_v36 = vunpack.i.h.bf16 %v9192_v58  ;;  %v5840_v31 = vunpack.i.l.bf16 %v9192_v58  ;;  %v3969_v59 = vsel %vm10180_vm15, %v3965_v5, %v5820_v23  ;;  %v3971_v7 = vsel %vm10181_vm7, %v3967_v0, %v5821_v60  ;;  %v3453_v43 = vld [vmem:[%s6421_s16 + $0x100] sm:$0xff] }
 0x3f4   : > { %4078 = vmatprep.subr.mxu0 %v10033_v8  ;;  %v3958_v50 = vsel %vm678_vm5, %v3954_v14, %v5825_v24  ;;  %v5850_v19 = vunpack.i.l.bf16 %v9221_v49  ;;  %v3960_v20 = vsel %vm678_vm5, %v3956_v53, %v5826_v13  ;;  %v3973_v58 = vsel %vm10182_vm8, %v3969_v59, %v5830_v41  ;;  %4442 = vmatprep.mubr.msk.f32.mxu0 %vm653_vm0, %v3453_v43 }
 0x3f5   : > { %4079 = vmatpush1.msra.mxu0 %v9366_v39  ;;  %v3975_v3 = vsel %vm10183_vm9, %v3971_v7, %v5831_v9  ;;  %v5846_v30 = vunpack.i.h.bf16 %v9199_v61  ;;  %v3962_v5 = vsel %vm683_vm6, %v3958_v50, %v5835_v12  ;;  %v3964_v24 = vsel %vm683_vm6, %v3960_v20, %v5836_v48  ;;  %vm10188_vm9 = vmmov %vm10178_vm10 }
 0x3f6   : > { %v5879_v11 = vpop.permute.xlu0 %5878  ;;  %6033 = vrot.lane.b32.xlu1 %v10179_v22, %s10008_s11  ;;  %4080 = vmatprep.subr.mxu0 %v10033_v8  ;;  %v5855_v60 = vunpack.i.l.bf16 %v9236_v6  ;;  %v5851_v61 = vunpack.i.h.bf16 %v9221_v49  ;;  %v10184_v23 = vpack.i.bf16 %v9242_v62, %v9239_v52  ;;  %v3966_v0 = vsel %vm10178_vm10, %v3962_v5, %v5845_v42 }
 0x3f7   : > { %4081 = vmatpush1.msra.mxu0 %v9381_v10  ;;  %vm10185_vm15 = vcmask 359424   ;;  %v5860_v41 = vunpack.i.l.bf16 %v9282_v2  ;;  %v5884_v14 = vpop.permute.xlu1 %5883  ;;  %v5856_v49 = vunpack.i.h.bf16 %v9236_v6  ;;  %v5871_v52 = vunpack.i.h.bf16 %v9318_v21 }
 0x3f8   : > { %v3977_v13 = vsel %vm10185_vm15, %v3973_v58, %v5840_v31  ;;  %vm10186_vm7 = vmmov %vm10185_vm15  ;;  %4112 = vmatprep.subr.mxu0 %v10033_v8  ;;  %v5870_v48 = vunpack.i.l.bf16 %v9318_v21  ;;  %vm10187_vm8 = vcmask 1043456   ;;  %v3968_v22 = vsel %vm10188_vm9, %v3964_v24, %v5846_v30 }
 0x3f9   : > { %v3979_v9 = vsel %vm10186_vm7, %v3975_v3, %v5841_v36  ;;  %v3981_v62 = vsel %vm708_vm11, %v3977_v13, %v5850_v19  ;;  %4441 = vmatpush2.msk.msra.mxu0 %vm10187_vm8, %v9386_v34  ;;  %v5865_v53 = vunpack.i.l.bf16 %v9291_v47  ;;  %v5881_v42 = vunpack.i.h.bf16 %v5879_v11 }
 0x3fa   : > { %6043 = vrot.lane.b32.xlu1 %v10184_v23, %s10009_s10  ;;  %v9408_v12 = vpop.permute.xlu0 %5888  ;;  %v5880_v36 = vunpack.i.l.bf16 %v5879_v11  ;;  %vm10189_vm10 = vcmask 293888   ;;  %v3983_v6 = vsel %vm708_vm11, %v3979_v9, %v5851_v61  ;;  %v5866_v50 = vunpack.i.h.bf16 %v9291_v47 }
 0x3fb   : > { %v3970_v31 = vsel %vm10189_vm10, %v3966_v0, %v5855_v60  ;;  %v5875_v59 = vunpack.i.l.bf16 %v9341_v37  ;;  %v10190_v21 = vpack.i.bf16 %v9250_v29, %v9247_v15  ;;  %v3987_v7 = vsel %vm713_vm12, %v3983_v6, %v5860_v41  ;;  %vm10191_vm15 = vmmov %vm10189_vm10  ;;  %v5894_v29 = vpop.permute.xlu1 %5893 }
 0x3fc   : > { %v5876_v19 = vunpack.i.h.bf16 %v9341_v37  ;;  %v3985_v20 = vsel %vm713_vm12, %v3981_v62, %v5811_v56  ;;  %v5885_v11 = vunpack.i.l.bf16 %v5884_v14  ;;  %v3972_v58 = vsel %vm10191_vm15, %v3968_v22, %v5856_v49  ;;  %v6243_v22 = vld [vmem:[%s6421_s16 + $0x178] sm:$0xff] }
 0x3fd   : > { %v3989_v3 = vsel %vm718_vm13, %v3985_v20, %v5870_v48  ;;  %v3991_v47 = vsel %vm718_vm13, %v3987_v7, %v5871_v52  ;;  %v5886_v30 = vunpack.i.h.bf16 %v5884_v14  ;;  %vm10192_vm7 = vcmask 326656  }
 0x3fe   : > { %6053 = vrot.lane.b32.xlu1 %v10190_v21, %s10044_s12  ;;  %v3974_v43 = vsel %vm10192_vm7, %v3970_v31, %v5865_v53  ;;  %v3993_v5 = vsel %vm723_vm14, %v3989_v3, %v5880_v36  ;;  %v3995_v15 = vsel %vm723_vm14, %v3991_v47, %v5881_v42  ;;  %v5890_v24 = vunpack.i.l.bf16 %v9408_v12  ;;  %vm10193_vm8 = vmmov %vm10192_vm7  ;;  %v5899_v60 = vpop.permute.xlu0 %5898  ;;  %v10198_v21 = vld [vmem:[#allocation31_spill] sm:$0xff] }
 0x3ff   : > { %v3976_v37 = vsel %vm10193_vm8, %v3972_v58, %v5866_v50  ;;  %vm10194_vm9 = vcmask 359424   ;;  %v10195_v61 = vpack.i.bf16 %v9034_v33, %v8738_v44  ;;  %v5861_v23 = vunpack.i.h.bf16 %v9282_v2  ;;  %v6244_v44 = vld [vmem:[%s6421_s16 + $0x388] sm:$0xff] }
 0x400   : > { %v3978_v56 = vsel %vm10194_vm9, %v3974_v43, %v5875_v59  ;;  %vm10196_vm10 = vmmov %vm10194_vm9  ;;  %v6072_v41 = vpack.i.bf16 %v3995_v15, %v3993_v5  ;;  %v5896_v14 = vunpack.i.h.bf16 %v5894_v29  ;;  %v5895_v49 = vunpack.i.l.bf16 %v5894_v29  ;;  %v10197_v59 = vld [vmem:[#allocation27_spill] sm:$0xff] }
 0x401   : > { %v3980_v0 = vsel %vm10196_vm10, %v3976_v37, %v5876_v19  ;;  %v3982_v13 = vsel %vm708_vm11, %v3978_v56, %v5885_v11  ;;  %v5901_v52 = vunpack.i.h.bf16 %v5899_v60  ;;  %v5900_v48 = vunpack.i.l.bf16 %v5899_v60 }
 0x402   : > { %6063 = vrot.lane.b32.xlu1 %v10195_v61, %s10036_s19  ;;  %v3984_v9 = vsel %vm708_vm11, %v3980_v0, %v5886_v30  ;;  %v6082_v33 = vpack.i.bf16 %v6244_v44, %v6243_v22  ;;  %v3986_v2 = vsel %vm713_vm12, %v3982_v13, %v5861_v23  ;;  %v9453_v50 = vpop.permute.xlu0 %5908  ;;  %v5480_v30 = vunpack.i.l.bf16 %v8574_v16 }
 0x403   : > { %v3988_v62 = vsel %vm713_vm12, %v3984_v9, %v5890_v24  ;;  %v3990_v53 = vsel %vm718_vm13, %v3986_v2, %v5895_v49  ;;  %v5490_v5 = vunpack.i.l.bf16 %v8602_v54  ;;  %v5500_v15 = vunpack.i.l.bf16 %v8624_v27 }
 0x404   : > { %v3992_v42 = vsel %vm718_vm13, %v3988_v62, %v5896_v14  ;;  %v3994_v36 = vsel %vm723_vm14, %v3990_v53, %v5900_v48  ;;  %v5510_v24 = vunpack.i.l.bf16 %v8641_v32  ;;  %v5481_v56 = vunpack.i.h.bf16 %v8574_v16 }
 0x405   : > { %v3996_v31 = vsel %vm723_vm14, %v3992_v42, %v5901_v52  ;;  %v2927_v60 = vsel %vm653_vm0, %v9154_v28, %v5480_v30  ;;  %v5520_v61 = vunpack.i.l.bf16 %v8651_v51  ;;  %v5491_v0 = vunpack.i.h.bf16 %v8602_v54 }
 0x406   : > { %6073 = vrot.lane.b32.xlu1 %v6072_v41, %s10072_s26  ;;  %v6092_v6 = vpack.i.bf16 %v3996_v31, %v3994_v36  ;;  %v9459_v19 = vpop.permute.xlu0 %5918  ;;  %v2931_v13 = vsel %vm658_vm1, %v2927_v60, %v5490_v5  ;;  %v5530_v9 = vunpack.i.l.bf16 %v8661_v1  ;;  %v5501_v41 = vunpack.i.h.bf16 %v8624_v27  ;;  %v5904_v36 = vpop.permute.xlu1 %5903 }
 0x407   : > { %v2935_v14 = vsel %vm663_vm2, %v2931_v13, %v5500_v15  ;;  %v5540_v49 = vunpack.i.l.bf16 %v8671_v25  ;;  %v5511_v16 = vunpack.i.h.bf16 %v8641_v32  ;;  %v5550_v28 = vunpack.i.l.bf16 %v8681_v38 }
 0x408   : > { %v2939_v62 = vsel %vm668_vm3, %v2935_v14, %v5510_v24  ;;  %v2928_v52 = vsel %vm653_vm0, %v8971_v17, %v5481_v56  ;;  %v5521_v54 = vunpack.i.h.bf16 %v8651_v51  ;;  %v5560_v22 = vunpack.i.l.bf16 %v8691_v63 }
 0x409   : > { %v2943_v48 = vsel %vm673_vm4, %v2939_v62, %v5520_v61  ;;  %v2932_v27 = vsel %vm658_vm1, %v2928_v52, %v5491_v0  ;;  %v5531_v44 = vunpack.i.h.bf16 %v8661_v1  ;;  %v5570_v32 = vunpack.i.l.bf16 %v8701_v57  ;;  %v6245_v52 = vld [vmem:[%s6421_s16 + $0x1c8] sm:$0xff] }
 0x40a   : > { %6083 = vrot.lane.b32.xlu1 %v6082_v33, %s10044_s12  ;;  %v9463_v3 = vpop.permute.xlu0 %5928  ;;  %v2947_v33 = vsel %vm678_vm5, %v2943_v48, %v5530_v9  ;;  %v2936_v53 = vsel %vm663_vm2, %v2932_v27, %v5501_v41  ;;  %v5541_v17 = vunpack.i.h.bf16 %v8671_v25  ;;  %v5580_v42 = vunpack.i.l.bf16 %v8711_v45  ;;  %s263_s12 = sand.u32 1, %s6300_s22  }
 0x40b   : > { %v2951_v51 = vsel %vm683_vm6, %v2947_v33, %v5540_v49  ;;  %v2940_v31 = vsel %vm668_vm3, %v2936_v53, %v5511_v16  ;;  %vm10199_vm15 = vcmask 261120   ;;  %vm10200_vm7 = vcmask 293888   ;;  %v10208_v33 = vld [vmem:[#allocation30_spill] sm:$0xff]  ;;  %s4348_s19 = sshll.u32 %s263_s12, 5  ;;  %s9839_s1 = scalar_lea.sflag [#allocation3], %s263_s12 }
 0x40c   : > { %v2955_v1 = vsel %vm10199_vm15, %v2951_v51, %v5550_v28  ;;  %v5600_v25 = vunpack.i.l.bf16 %v8731_v40  ;;  %v5905_v30 = vunpack.i.l.bf16 %v5904_v36  ;;  %v5910_v15 = vunpack.i.l.bf16 %v9453_v50  ;;  %vm10201_vm10 = vmmov %vm10199_vm15  ;;  %v10211_v51 = vld [vmem:[#allocation35_spill] sm:$0xff]  ;;  %s265_s28 = scalar_lea.vmem [#allocation2], %s4348_s19 }
 0x40d   : > { %vm10202_vm15 = vmmov %vm10200_vm7  ;;  %v5891_v60 = vunpack.i.h.bf16 %v9408_v12  ;;  %v5911_v9 = vunpack.i.h.bf16 %v9453_v50  ;;  %s4270_s18 = sshll.u32 %s265_s28, 4  ;;  %s9834_s18 = int_to_ptr.vmem [resolvable:$true] %s4270_s18 }
 0x40e   : > { %6093 = vrot.lane.b32.xlu1 %v6092_v6, %s10072_s26  ;;  %v9470_v37 = vpop.permute.xlu0 %5938  ;;  %v5551_v6 = vunpack.i.h.bf16 %v8681_v38  ;;  %s6248_s25 = scalar_lea.vmem %s9834_s18, 512  ;;  %p6255_p0 = scmp.lt.s32.totalorder %s9834_s18, %s6253_s27 }
 0x40f   : > { %p6249_p11 = scmp.ne.s32.totalorder %s9834_s18, %s6248_s25  ;;  %p6256_p1 = scmp.lt.s32.totalorder %s6254_s13, %s6248_s25 }
 0x411   : > { %p6250_p12 = pnand %p6249_p11, %p6402_p5  ;;  %p6257_p2 = por %p6256_p1, %p6255_p0 }
 0x412   : > { %4141 = vrot.lane.b32.xlu1 %v10197_v59, %s10037_s17  ;;  %v9495_v2 = vpop.permute.xlu0 %5948  ;;  %v5590_v59 = vunpack.i.l.bf16 %v8720_v4 }
 0x413   : > { %p6251_p13 = pneg %p6250_p12 }
 0x415   : > { %p6258_p3 = pnand %p6257_p2, %p6251_p13 }
 0x416   : > { %4145 = vrot.lane.b32.xlu1 %v10198_v21, %s10037_s17  ;;  %v2632_v7 = vpop.f32.mrf.mxu0  ;;  %v2944_v21 = vsel %vm673_vm4, %v2940_v31, %v5521_v54  ;;  %v9519_v24 = vpop.permute.xlu0 %5958 }
 0x417   : > { %4155 = vrot.lane.b32.xlu0 %v2632_v7, %s10038_s20  ;;  %v5561_v7 = vunpack.i.h.bf16 %v8691_v63 }
 0x418   : > { %v2634_v20 = vpop.f32.mrf.mxu0 }
 0x419   : > { %v2959_v20 = vsel %vm10200_vm7, %v2955_v1, %v5560_v22  ;;  %vm10203_vm7 = vmmov %vm10193_vm8  ;;  %v10207_v22 = vld [vmem:[#allocation28_spill] sm:$0xff] }
 0x41a   : > { %v2637_v11 = vpop.f32.mrf.mxu0  ;;  %v9534_v28 = vpop.permute.xlu0 %5968 }
 0x41b   : > { %4157 = vrot.lane.b32.xlu1 %v2637_v11, %s10038_s20  ;;  %v2948_v11 = vsel %vm678_vm5, %v2944_v21, %v5531_v44  ;;  %v6246_v44 = vld [vmem:[%s6421_s16 + $0x2d0] sm:$0xff] }
 0x41c   : > { %v2639_v58 = vpop.f32.mrf.mxu0  ;;  %v2952_v38 = vsel %vm683_vm6, %v2948_v11, %v5541_v17  ;;  %v10210_v17 = vld [vmem:[#allocation23_spill] sm:$0xff]  ;;  %v10214_v21 = vld [vmem:[#allocation29_spill] sm:$0xff] }
 0x41d   : > { %v5571_v58 = vunpack.i.h.bf16 %v8701_v57  ;;  %v2956_v63 = vsel %vm10201_vm10, %v2952_v38, %v5551_v6  ;;  %v10213_v6 = vld [vmem:[#allocation32_spill] sm:$0xff] }
 0x41e   : > { %v2642_v47 = vpop.f32.mrf.mxu0  ;;  %v2960_v57 = vsel %vm10202_vm15, %v2956_v63, %v5561_v7  ;;  %v9552_v53 = vpop.permute.xlu0 %5978  ;;  %v10215_v7 = vld [vmem:[#allocation11_spill] sm:$0xff]  ;;  %vm10229_vm15 = vcmask 261120  }
 0x41f   : > { %4159 = vrot.lane.b32.xlu0 %v2642_v47, %s10038_s20  ;;  %v2963_v47 = vsel %vm10193_vm8, %v2959_v20, %v5570_v32  ;;  %v2964_v61 = vsel %vm10203_vm7, %v2960_v57, %v5571_v58  ;;  %vm10204_vm8 = vmmov %vm10194_vm9  ;;  %v10209_v32 = vld [vmem:[#allocation33_spill] sm:$0xff]  ;;  %v5505_v20 = vunpack.i.l.bf16 %v10215_v7  ;;  %v5506_v63 = vunpack.i.h.bf16 %v10215_v7 }
 0x420   : > { %v2644_v43 = vpop.f32.mrf.mxu0  ;;  %v2967_v5 = vsel %vm10194_vm9, %v2963_v47, %v5580_v42  ;;  %vm10205_vm9 = vcmask 523264   ;;  %v5495_v42 = vunpack.i.l.bf16 %v10211_v51  ;;  %v5486_v31 = vunpack.i.h.bf16 %v10209_v32  ;;  %v10216_v47 = vld [vmem:[#allocation36_spill] sm:$0xff] }
 0x421   : > { %v5581_v43 = vunpack.i.h.bf16 %v8711_v45  ;;  %v2971_v40 = vsel %vm708_vm11, %v2967_v5, %v5590_v59  ;;  %vm10206_vm10 = vmmov %vm10205_vm9  ;;  %vm10231_vm7 = vcmask 293888  }
 0x422   : > { %v2647_v29 = vpop.f32.mrf.mxu0  ;;  %v2975_v56 = vsel %vm713_vm12, %v2971_v40, %v5600_v25  ;;  %v5496_v25 = vunpack.i.h.bf16 %v10211_v51  ;;  %v9569_v58 = vpop.permute.xlu0 %5988 }
 0x423   : > { %4161 = vrot.lane.b32.xlu1 %v2647_v29, %s10038_s20  ;;  %v5591_v29 = vunpack.i.h.bf16 %v8720_v4  ;;  %v2979_v0 = vsel %vm718_vm13, %v2975_v56, %v5905_v30  ;;  %v2968_v4 = vsel %vm10204_vm8, %v2964_v61, %v5581_v43  ;;  %v10217_v30 = vld [vmem:[#allocation26_spill] sm:$0xff]  ;;  %v10218_v43 = vld [vmem:[#allocation12_spill] sm:$0xff]  ;;  %vm10232_vm8 = vcmask 326656  }
 0x424   : > { %v2649_v23 = vpop.f32.mrf.mxu0  ;;  %v2983_v41 = vsel %vm723_vm14, %v2979_v0, %v5910_v15  ;;  %v2930_v38 = vsel %vm653_vm0, %v10217_v30, %v5486_v31  ;;  %v5515_v5 = vunpack.i.l.bf16 %v10218_v43  ;;  %v10219_v15 = vld [vmem:[#allocation37_spill] sm:$0xff]  ;;  %v10220_v56 = vld [vmem:[#allocation38_spill] sm:$0xff]  ;;  %v5516_v61 = vunpack.i.h.bf16 %v10218_v43 }
 0x425   : > { %v5906_v23 = vunpack.i.h.bf16 %v5904_v36  ;;  %v2972_v14 = vsel %vm708_vm11, %v2968_v4, %v5591_v29  ;;  %v10212_v36 = vld [vmem:[#allocation25_spill] sm:$0xff]  ;;  %v2934_v57 = vsel %vm658_vm1, %v2930_v38, %v5496_v25  ;;  %v10222_v0 = vld [vmem:[#allocation14_spill] sm:$0xff] }
 0x426   : > { %v2976_v12 = vsel %vm713_vm12, %v2972_v14, %v5891_v60  ;;  %v10221_v60 = vld [vmem:[#allocation13_spill] sm:$0xff]  ;;  %v9589_v4 = vpop.permute.xlu0 %5998  ;;  %v10224_v14 = vld [vmem:[#allocation15_spill] sm:$0xff] }
 0x427   : > { %v2980_v50 = vsel %vm718_vm13, %v2976_v12, %v5906_v23 }
 0x428   : > { %v2984_v54 = vsel %vm723_vm14, %v2980_v50, %v5911_v9  ;;  %v10223_v9 = vld [vmem:[#allocation39_spill] sm:$0xff] }
 0x42a   : > { %v9615_v7 = vpop.permute.xlu0 %6008 }
 0x430   : > { %v5914_v45 = vpop.permute.xlu1 %5913 }
 0x431   : > { %v5915_v13 = vunpack.i.l.bf16 %v5914_v45  ;;  %v5916_v49 = vunpack.i.h.bf16 %v5914_v45  ;;  %v5525_v45 = vunpack.i.l.bf16 %v10221_v60 }
 0x433   : > { %v3271_v16 = vsel %vm10205_vm9, %v2983_v41, %v5915_v13  ;;  %v3272_v48 = vsel %vm10206_vm10, %v2984_v54, %v5916_v49  ;;  %v5535_v13 = vunpack.i.l.bf16 %v10222_v0  ;;  %v2938_v41 = vsel %vm663_vm2, %v2934_v57, %v5506_v63  ;;  %v10226_v54 = vld [vmem:[#allocation17_spill] sm:$0xff]  ;;  %vm10234_vm10 = vmmov %vm10229_vm15 }
 0x434   : > { %v9532_v62 = vpop.permute.xlu1 %5923  ;;  %3373 = vmatmul.mubr.f32.vlgmr.msra.gmra.mxu1 %v3271_v16  ;;  %v5545_v49 = vunpack.i.l.bf16 %v10224_v14  ;;  %v10225_v16 = vld [vmem:[#allocation16_spill] sm:$0xff]  ;;  %vm10233_vm9 = vcmask 359424  }
 0x435   : > { %4421 = vmatprep.mubr.msk.f32.mxu1 %vm653_vm0, %v6245_v52  ;;  %4472 = vmatpush1.msra.mxu1 %v9115_v46  ;;  %v5485_v46 = vunpack.i.l.bf16 %v10209_v32  ;;  %v5555_v12 = vunpack.i.l.bf16 %v10225_v16  ;;  %v5526_v52 = vunpack.i.h.bf16 %v10221_v60  ;;  %v5556_v31 = vunpack.i.h.bf16 %v10225_v16 }
 0x436   : > { %4456 = vmatprep.subr.mxu1 %v10033_v8 }
 0x437   : > { %4473 = vmatpush1.msra.mxu1 %v10207_v22  ;;  %v2929_v1 = vsel %vm653_vm0, %v10213_v6, %v5485_v46  ;;  %v10227_v46 = vld [vmem:[#allocation18_spill] sm:$0xff] }
 0x438   : > { %v9544_v27 = vpop.permute.xlu1 %5933  ;;  %3378 = vmatmul.mubr.f32.gmra.mxu1 %v3272_v48  ;;  %4457 = vmatprep.subr.mxu1 %v10033_v8  ;;  %v2933_v11 = vsel %vm658_vm1, %v2929_v1, %v5495_v42  ;;  %v5565_v48 = vunpack.i.l.bf16 %v10226_v54  ;;  %v10228_v42 = vld [vmem:[#allocation34_spill] sm:$0xff]  ;;  %v10230_v1 = vld [vmem:[#allocation24_spill] sm:$0xff]  ;;  %v5576_v30 = vunpack.i.h.bf16 %v10227_v46 }
 0x439   : > { %4422 = vmatprep.mubr.msk.f32.mxu1 %vm653_vm0, %v6246_v44  ;;  %4474 = vmatpush1.msra.mxu1 %v10208_v33  ;;  %v2937_v29 = vsel %vm663_vm2, %v2933_v11, %v5505_v20  ;;  %v2942_v44 = vsel %vm668_vm3, %v2938_v41, %v5516_v61  ;;  %v5536_v33 = vunpack.i.h.bf16 %v10222_v0  ;;  %v5566_v20 = vunpack.i.h.bf16 %v10226_v54  ;;  %v9642_v0 = vpop.permute.xlu0 %6018 }
 0x43a   : > { %4458 = vmatprep.subr.mxu1 %v10033_v8  ;;  %v2941_v23 = vsel %vm668_vm3, %v2937_v29, %v5515_v5  ;;  %v5940_v11 = vunpack.i.l.bf16 %v9470_v37  ;;  %v5586_v5 = vunpack.i.h.bf16 %v10228_v42  ;;  %v5596_v57 = vunpack.i.h.bf16 %v10230_v1 }
 0x43b   : > { %4475 = vmatpush1.msra.mxu1 %v10210_v17  ;;  %v2945_v50 = vsel %vm673_vm4, %v2941_v23, %v5525_v45  ;;  %v5575_v17 = vunpack.i.l.bf16 %v10227_v46  ;;  %v5970_v61 = vunpack.i.l.bf16 %v9534_v28 }
 0x43c   : > { %4459 = vmatprep.subr.mxu1 %v10033_v8  ;;  %v9561_v59 = vpop.permute.xlu1 %5943  ;;  %v2949_v32 = vsel %vm678_vm5, %v2945_v50, %v5535_v13 }
 0x43d   : > { %4476 = vmatpush1.msra.mxu1 %v10212_v36  ;;  %v2953_v51 = vsel %vm683_vm6, %v2949_v32, %v5545_v49  ;;  %v5585_v36 = vunpack.i.l.bf16 %v10228_v42  ;;  %v5945_v49 = vunpack.i.l.bf16 %v9561_v59  ;;  %v3455_v42 = vld [vmem:[%s6421_s16 + $0x310] sm:$0xff] }
 0x43e   : > { %4460 = vmatprep.subr.mxu1 %v10033_v8  ;;  %v2957_v6 = vsel %vm10229_vm15, %v2953_v51, %v5555_v12  ;;  %vm10235_vm15 = vmmov %vm10231_vm7  ;;  %v5971_v12 = vunpack.i.h.bf16 %v9534_v28 }
 0x43f   : > { %4477 = vmatpush1.msra.mxu1 %v10214_v21  ;;  %v5595_v21 = vunpack.i.l.bf16 %v10230_v1  ;;  %v2961_v25 = vsel %vm10231_vm7, %v2957_v6, %v5565_v48  ;;  %vm10236_vm7 = vmmov %vm10232_vm8 }
 0x440   : > { %4461 = vmatprep.subr.mxu1 %v10033_v8  ;;  %v9579_v40 = vpop.permute.xlu1 %5953  ;;  %v2965_v38 = vsel %vm10232_vm8, %v2961_v25, %v5575_v17  ;;  %vm10237_vm8 = vmmov %vm10233_vm9 }
 0x441   : > { %4478 = vmatpush1.msra.mxu1 %v10216_v47  ;;  %v5955_v43 = vunpack.i.l.bf16 %v9579_v40  ;;  %v5956_v13 = vunpack.i.h.bf16 %v9579_v40 }
 0x442   : > { %4462 = vmatprep.subr.mxu1 %v10033_v8 }
 0x443   : > { %4479 = vmatpush1.msra.mxu1 %v10219_v15  ;;  %v2969_v15 = vsel %vm10233_vm9, %v2965_v38, %v5585_v36  ;;  %vm10238_vm9 = vcmask 1043456   ;;  %v5991_v36 = vunpack.i.h.bf16 %v9569_v58  ;;  %v6000_v38 = vunpack.i.l.bf16 %v9589_v4 }
 0x444   : > { %4463 = vmatprep.subr.mxu1 %v10033_v8  ;;  %v9600_v22 = vpop.permute.xlu1 %5963 }
 0x445   : > { %4480 = vmatpush1.msra.mxu1 %v10220_v56  ;;  %v2973_v56 = vsel %vm708_vm11, %v2969_v15, %v5595_v21 }
 0x446   : > { %4464 = vmatprep.subr.mxu1 %v10033_v8  ;;  %v2977_v45 = vsel %vm713_vm12, %v2973_v56, %v5940_v11  ;;  %v6011_v56 = vunpack.i.h.bf16 %v9615_v7 }
 0x447   : > { %4481 = vmatpush1.msra.mxu1 %v10223_v9 }
 0x448   : > { %4465 = vmatprep.subr.mxu1 %v10033_v8  ;;  %v5974_v63 = vpop.permute.xlu1 %5973 }
 0x449   : > { %4482 = vmatpush1.msra.mxu1 %v9297_v18  ;;  %v5546_v18 = vunpack.i.h.bf16 %v10224_v14  ;;  %v5946_v14 = vunpack.i.h.bf16 %v9561_v59  ;;  %v5961_v59 = vunpack.i.h.bf16 %v9519_v24  ;;  %v5976_v46 = vunpack.i.h.bf16 %v5974_v63 }
 0x44a   : > { %4466 = vmatprep.subr.mxu1 %v10033_v8  ;;  %v5975_v17 = vunpack.i.l.bf16 %v5974_v63 }
 0x44b   : > { %4483 = vmatpush1.msra.mxu1 %v9312_v26  ;;  %v2946_v26 = vsel %vm673_vm4, %v2942_v44, %v5526_v52  ;;  %v3396_v52 = vld [vmem:[%s6421_s16 + $0x318] sm:$0xff]  ;;  %v5960_v44 = vunpack.i.l.bf16 %v9519_v24 }
 0x44c   : > { %4467 = vmatprep.subr.mxu1 %v10033_v8  ;;  %v2950_v47 = vsel %vm678_vm5, %v2946_v26, %v5536_v33  ;;  %v9665_v33 = vpop.permute.xlu0 %6028  ;;  %v3672_v28 = vsel %vm653_vm0, %v3396_v52, %v5946_v14  ;;  %v5921_v26 = vunpack.i.h.bf16 %v9459_v19  ;;  %v5950_v52 = vunpack.i.l.bf16 %v9495_v2 }
 0x44d   : > { %4484 = vmatpush1.msra.mxu1 %v9330_v35  ;;  %v2954_v35 = vsel %vm683_vm6, %v2950_v47, %v5546_v18  ;;  %v6247_v18 = vld [vmem:[%s6421_s16 + $0x3d8] sm:$0xff]  ;;  %v3676_v1 = vsel %vm658_vm1, %v3672_v28, %v5961_v59  ;;  %v3393_v47 = vld [vmem:[%s6421_s16] sm:$0xff]  ;;  %v5965_v59 = vunpack.i.l.bf16 %v9600_v22 }
 0x44e   : > { %4468 = vmatprep.subr.mxu1 %v10033_v8  ;;  %v2958_v29 = vsel %vm10234_vm10, %v2954_v35, %v5556_v31  ;;  %vm10239_vm10 = vcmask 523264   ;;  %v5990_v31 = vunpack.i.l.bf16 %v9569_v58  ;;  %v3680_v11 = vsel %vm663_vm2, %v3676_v1, %v5976_v46 }
 0x44f   : > { %4485 = vmatpush1.msra.mxu1 %v9347_v55  ;;  %v2962_v60 = vsel %vm10235_vm15, %v2958_v29, %v5566_v20  ;;  %v5941_v55 = vunpack.i.h.bf16 %v9470_v37  ;;  %vm10240_vm15 = vmmov %vm10239_vm10  ;;  %v5920_v20 = vunpack.i.l.bf16 %v9459_v19  ;;  %v6001_v58 = vunpack.i.h.bf16 %v9589_v4 }
 0x450   : > { %4469 = vmatprep.subr.mxu1 %v10033_v8  ;;  %v2966_v23 = vsel %vm10236_vm7, %v2962_v60, %v5576_v30  ;;  %v3395_v30 = vld [vmem:[%s6421_s16 + $0x210] sm:$0xff]  ;;  %v5926_v35 = vunpack.i.h.bf16 %v9532_v62  ;;  %v3684_v19 = vsel %vm668_vm3, %v3680_v11, %v5991_v36  ;;  %v6010_v60 = vunpack.i.l.bf16 %v9615_v7 }
 0x451   : > { %4486 = vmatpush1.msra.mxu1 %v9366_v39  ;;  %v2981_v39 = vsel %vm718_vm13, %v2977_v45, %v5955_v43  ;;  %v2970_v37 = vsel %vm10237_vm8, %v2966_v23, %v5586_v5  ;;  %v6039_v43 = vpop.permute.xlu0 %6038  ;;  %v5925_v5 = vunpack.i.l.bf16 %v9532_v62  ;;  %v3671_v29 = vsel %vm653_vm0, %v3395_v30, %v5921_v26 }
 0x452   : > { %4470 = vmatprep.subr.mxu1 %v10033_v8  ;;  %v2974_v41 = vsel %vm708_vm11, %v2970_v37, %v5596_v57  ;;  %v2985_v50 = vsel %vm723_vm14, %v2981_v39, %v5970_v61  ;;  %v3669_v57 = vsel %vm653_vm0, %v3393_v47, %v5920_v20  ;;  %v5931_v4 = vunpack.i.h.bf16 %v9463_v3 }
 0x453   : > { %4487 = vmatpush1.msra.mxu1 %v9381_v10  ;;  %v2978_v40 = vsel %vm713_vm12, %v2974_v41, %v5941_v55  ;;  %v3394_v10 = vld [vmem:[%s6421_s16 + $0x108] sm:$0xff]  ;;  %v5930_v55 = vunpack.i.l.bf16 %v9463_v3  ;;  %v3688_v45 = vsel %vm673_vm4, %v3684_v19, %v6001_v58  ;;  %v3675_v61 = vsel %vm658_vm1, %v3671_v29, %v5926_v35 }
 0x454   : > { %v5984_v9 = vpop.permute.xlu1 %5983  ;;  %4471 = vmatprep.subr.mxu1 %v10033_v8  ;;  %v2982_v48 = vsel %vm718_vm13, %v2978_v40, %v5956_v13  ;;  %v3670_v32 = vsel %vm653_vm0, %v3394_v10, %v5945_v49  ;;  %v3673_v23 = vsel %vm658_vm1, %v3669_v57, %v5925_v5  ;;  %v6021_v39 = vunpack.i.h.bf16 %v9642_v0 }
 0x455   : > { %v5985_v16 = vunpack.i.l.bf16 %v5984_v9  ;;  %4488 = vmatpush2.msk.msra.mxu1 %vm10238_vm9, %v9386_v34  ;;  %v5986_v8 = vunpack.i.h.bf16 %v5984_v9  ;;  %v2986_v51 = vsel %vm723_vm14, %v2982_v48, %v5971_v12  ;;  %v3674_v6 = vsel %vm658_vm1, %v3670_v32, %v5960_v44  ;;  %v6049_v9 = vpop.permute.xlu0 %6048 }
 0x456   : > { %v3678_v25 = vsel %vm663_vm2, %v3674_v6, %v5975_v17  ;;  %v6020_v37 = vunpack.i.l.bf16 %v9642_v0  ;;  %v5936_v7 = vunpack.i.h.bf16 %v9544_v27  ;;  %v5935_v41 = vunpack.i.l.bf16 %v9544_v27 }
 0x457   : > { %v3273_v54 = vsel %vm10239_vm10, %v2985_v50, %v5985_v16  ;;  %v3274_v24 = vsel %vm10240_vm15, %v2986_v51, %v5986_v8  ;;  %v3682_v15 = vsel %vm668_vm3, %v3678_v25, %v5990_v31  ;;  %v3692_v14 = vsel %vm678_vm5, %v3688_v45, %v6011_v56 }
 0x458   : > { %v9663_v34 = vpop.permute.xlu1 %5993  ;;  %3383 = vmatmul.mubr.f32.gmra.mxu1 %v3273_v54  ;;  %v3686_v62 = vsel %vm673_vm4, %v3682_v15, %v6000_v38  ;;  %v3677_v49 = vsel %vm663_vm2, %v3673_v23, %v5930_v55  ;;  %v3679_v16 = vsel %vm663_vm2, %v3675_v61, %v5931_v4  ;;  %v6031_v40 = vunpack.i.h.bf16 %v9665_v33 }
 0x459   : > { %4423 = vmatprep.mubr.msk.f32.mxu1 %vm653_vm0, %v6247_v18  ;;  %v3690_v3 = vsel %vm678_vm5, %v3686_v62, %v6010_v60  ;;  %v6030_v12 = vunpack.i.l.bf16 %v9665_v33  ;;  %v5951_v0 = vunpack.i.h.bf16 %v9495_v2  ;;  %v3696_v50 = vsel %vm683_vm6, %v3692_v14, %v6021_v39  ;;  %v6059_v28 = vpop.permute.xlu0 %6058 }
 0x45a   : > { %v3694_v27 = vsel %vm683_vm6, %v3690_v3, %v6020_v37  ;;  %v3681_v8 = vsel %vm668_vm3, %v3677_v49, %v5935_v41  ;;  %v3683_v54 = vsel %vm668_vm3, %v3679_v16, %v5936_v7  ;;  %v5966_v48 = vunpack.i.h.bf16 %v9600_v22 }
 0x45b   : > { %v6041_v44 = vunpack.i.h.bf16 %v6039_v43  ;;  %v6040_v33 = vunpack.i.l.bf16 %v6039_v43  ;;  %vm10241_vm7 = vcmask 261120   ;;  %v5981_v17 = vunpack.i.h.bf16 %v9552_v53 }
 0x45c   : > { %v9678_v21 = vpop.permute.xlu1 %6003  ;;  %3388 = vmatmul.mubr.f32.gmra.mxu1 %v3274_v24  ;;  %v3698_v32 = vsel %vm10241_vm7, %v3694_v27, %v6030_v12  ;;  %vm10242_vm8 = vmmov %vm10241_vm7  ;;  %v5980_v18 = vunpack.i.l.bf16 %v9552_v53  ;;  %v3685_v51 = vsel %vm673_vm4, %v3681_v8, %v5950_v52  ;;  %v6051_v24 = vunpack.i.h.bf16 %v6049_v9 }
 0x45d   : > { %4444 = vmatprep.mubr.msk.f32.mxu1 %vm653_vm0, %v3455_v42  ;;  %v3700_v46 = vsel %vm10242_vm8, %v3696_v50, %v6031_v40  ;;  %v3687_v42 = vsel %vm673_vm4, %v3683_v54, %v5951_v0  ;;  %v6050_v36 = vunpack.i.l.bf16 %v6049_v9  ;;  %v3689_v22 = vsel %vm678_vm5, %v3685_v51, %v5965_v59  ;;  %v6069_v58 = vpop.permute.xlu0 %6068  ;;  %vm10247_vm8 = vmmov %vm10241_vm7 }
 0x45e   : > { %v3691_v31 = vsel %vm678_vm5, %v3687_v42, %v5966_v48  ;;  %v5996_v6 = vunpack.i.h.bf16 %v9663_v34  ;;  %v5995_v1 = vunpack.i.l.bf16 %v9663_v34  ;;  %vm10243_vm9 = vcmask 293888  }
 0x45f   : > { %v3704_v26 = vsel %vm10243_vm9, %v3700_v46, %v6041_v44  ;;  %vm10244_vm10 = vmmov %vm10243_vm9  ;;  %v6061_v25 = vunpack.i.h.bf16 %v6059_v28  ;;  %v6060_v53 = vunpack.i.l.bf16 %v6059_v28  ;;  %v6006_v11 = vunpack.i.h.bf16 %v9678_v21  ;;  %v3456_v46 = vld [vmem:[%s6421_s16 + $0x418] sm:$0xff] }
 0x460   : > { %v9693_v63 = vpop.permute.xlu1 %6013  ;;  %v3702_v20 = vsel %vm10244_vm10, %v3698_v32, %v6040_v33  ;;  %v6005_v47 = vunpack.i.l.bf16 %v9678_v21  ;;  %v3693_v38 = vsel %vm683_vm6, %v3689_v22, %v5980_v18  ;;  %v3695_v43 = vsel %vm683_vm6, %v3691_v31, %v5981_v17  ;;  %vm10248_vm6 = vmmov %vm10243_vm9  ;;  %v3454_v32 = vld [vmem:[%s6421_s16 + $0x208] sm:$0xff] }
 0x461   : > { %v6016_v35 = vunpack.i.h.bf16 %v9693_v63  ;;  %v6015_v34 = vunpack.i.l.bf16 %v9693_v63  ;;  %vm10245_vm5 = vcmask 326656   ;;  %v3697_v21 = vsel %vm10241_vm7, %v3693_v38, %v5995_v1  ;;  %vm10249_vm9 = vmmov %vm10248_vm6  ;;  %v6079_v49 = vpop.permute.xlu0 %6078 }
 0x462   : > { %v3708_v19 = vsel %vm10245_vm5, %v3704_v26, %v6051_v24  ;;  %vm10246_vm15 = vmmov %vm10245_vm5  ;;  %v3699_v57 = vsel %vm10247_vm8, %v3695_v43, %v5996_v6  ;;  %v3701_v4 = vsel %vm10248_vm6, %v3697_v21, %v6005_v47  ;;  %v6071_v3 = vunpack.i.h.bf16 %v6069_v58 }
 0x463   : > { %v3706_v29 = vsel %vm10246_vm15, %v3702_v20, %v6050_v36  ;;  %v3703_v63 = vsel %vm10249_vm9, %v3699_v57, %v6006_v11  ;;  %vm10250_vm10 = vmmov %vm10245_vm5  ;;  %vm10251_vm15 = vcmask 359424   ;;  %v6070_v14 = vunpack.i.l.bf16 %v6069_v58 }
 0x464   : > { %v9705_v13 = vpop.permute.xlu1 %6023  ;;  %v3705_v61 = vsel %vm10250_vm10, %v3701_v4, %v6015_v34  ;;  %v3707_v23 = vsel %vm10245_vm5, %v3703_v63, %v6016_v35  ;;  %vm10252_vm7 = vmmov %vm10251_vm15  ;;  %v6081_v59 = vunpack.i.h.bf16 %v6079_v49  ;;  %v6080_v44 = vunpack.i.l.bf16 %v6079_v49 }
 0x465   : > { %v6026_v5 = vunpack.i.h.bf16 %v9705_v13  ;;  %v6025_v15 = vunpack.i.l.bf16 %v9705_v13  ;;  %vm10253_vm8 = vmmov %vm10252_vm7  ;;  %vm10255_vm9 = vcmask 523264   ;;  %v6089_v24 = vpop.permute.xlu0 %6088 }
 0x466   : > { %v3712_v52 = vsel %vm10253_vm8, %v3708_v19, %v6061_v25  ;;  %vm10254_vm6 = vmmov %vm10252_vm7  ;;  %v6091_v31 = vunpack.i.h.bf16 %v6089_v24  ;;  %v6090_v6 = vunpack.i.l.bf16 %v6089_v24 }
 0x467   : > { %v3709_v37 = vsel %vm10251_vm15, %v3705_v61, %v6025_v15  ;;  %v3711_v9 = vsel %vm10252_vm7, %v3707_v23, %v6026_v5  ;;  %v3710_v27 = vsel %vm10254_vm6, %v3706_v29, %v6060_v53  ;;  %vm10256_vm10 = vmmov %vm10255_vm9  ;;  %v3716_v18 = vsel %vm708_vm11, %v3712_v52, %v6071_v3 }
 0x468   : > { %v9717_v10 = vpop.permute.xlu1 %6033  ;;  %v3714_v51 = vsel %vm708_vm11, %v3710_v27, %v6070_v14  ;;  %v3720_v1 = vsel %vm713_vm12, %v3716_v18, %v6081_v59  ;;  %vm10258_vm5 = vmmov %vm10255_vm9  ;;  %v10261_v18 = vld [vmem:[#allocation20_spill] sm:$0xff] }
 0x469   : > { %v6036_v56 = vunpack.i.h.bf16 %v9717_v10  ;;  %v6035_v60 = vunpack.i.l.bf16 %v9717_v10  ;;  %v3718_v26 = vsel %vm713_vm12, %v3714_v51, %v6080_v44  ;;  %v4140_v23 = vpop.permute.xlu0 %4139  ;;  %v4447_v44 = vld [vmem:[%s9884_s4] ss:$0 sm:$0xff] }
 0x46b   : > { %v3713_v16 = vsel %vm708_vm11, %v3709_v37, %v6035_v60  ;;  %v3715_v40 = vsel %vm708_vm11, %v3711_v9, %v6036_v56  ;;  %vm10257_vm11 = vmmov %vm10255_vm9 }
 0x46c   : > { %v6044_v2 = vpop.permute.xlu1 %6043 }
 0x46d   : > { %v6046_v55 = vunpack.i.h.bf16 %v6044_v2  ;;  %v6045_v62 = vunpack.i.l.bf16 %v6044_v2 }
 0x46f   : > { %v3717_v12 = vsel %vm713_vm12, %v3713_v16, %v6045_v62  ;;  %v3719_v10 = vsel %vm713_vm12, %v3715_v40, %v6046_v55  ;;  %v10259_v16 = vld [vmem:[#allocation19_spill] sm:$0xff] }
 0x470   : > { %v6054_v30 = vpop.permute.xlu1 %6053  ;;  %v4199_v40 = vsel %vm653_vm0, %v10259_v16, %v4140_v23 }
 0x471   : > { %v6056_v13 = vunpack.i.h.bf16 %v6054_v30  ;;  %v6055_v39 = vunpack.i.l.bf16 %v6054_v30 }
 0x473   : > { %v3721_v50 = vsel %vm718_vm13, %v3717_v12, %v6055_v39  ;;  %v3723_v8 = vsel %vm718_vm13, %v3719_v10, %v6056_v13  ;;  %v4144_v13 = vpop.permute.xlu0 %4143  ;;  %v4446_v10 = vld [vmem:[%s9883_s3] ss:$0 sm:$0xff] }
 0x474   : > { %v6064_v45 = vpop.permute.xlu1 %6063 }
 0x475   : > { %v6066_v7 = vunpack.i.h.bf16 %v6064_v45  ;;  %v6065_v41 = vunpack.i.l.bf16 %v6064_v45 }
 0x477   : > { %v3725_v33 = vsel %vm723_vm14, %v3721_v50, %v6065_v41  ;;  %v3727_v28 = vsel %vm723_vm14, %v3723_v8, %v6066_v7  ;;  %v10260_v8 = vld [vmem:[#allocation22_spill] sm:$0xff] }
 0x478   : > { %v6074_v0 = vpop.permute.xlu1 %6073 }
 0x479   : > { %v6076_v54 = vunpack.i.h.bf16 %v6074_v0  ;;  %v6075_v48 = vunpack.i.l.bf16 %v6074_v0 }
 0x47b   : > { %v4013_v2 = vsel %vm10255_vm9, %v3725_v33, %v6075_v48  ;;  %v4015_v17 = vsel %vm10256_vm10, %v3727_v28, %v6076_v54  ;;  %v4201_v54 = vsel %vm653_vm0, %v10260_v8, %v4144_v13 }
 0x47c   : > { %v6084_v42 = vpop.permute.xlu1 %6083  ;;  %4115 = vmatmul.mubr.f32.vlgmr.msra.gmra.mxu0 %v4013_v2  ;;  %4125 = vmatmul.mubr.f32.vlgmr.msra.gmra.mxu1 %v4015_v17  ;;  %v4448_v2 = vld [vmem:[%s9885_s5] ss:$0 sm:$0xff] }
 0x47d   : > { %v6086_v36 = vunpack.i.h.bf16 %v6084_v42  ;;  %v6085_v22 = vunpack.i.l.bf16 %v6084_v42  ;;  %4443 = vmatprep.mubr.msk.f32.mxu0 %vm653_vm0, %v3454_v32  ;;  %4445 = vmatprep.mubr.msk.f32.mxu1 %vm653_vm0, %v3456_v46 }
 0x47f   : > { %v3724_v20 = vsel %vm718_vm13, %v3720_v1, %v6086_v36  ;;  %v3722_v25 = vsel %vm718_vm13, %v3718_v26, %v6085_v22 }
 0x480   : > { %v6094_v53 = vpop.permute.xlu1 %6093  ;;  %v3728_v30 = vsel %vm723_vm14, %v3724_v20, %v6091_v31  ;;  %v3726_v58 = vsel %vm723_vm14, %v3722_v25, %v6090_v6  ;;  %v10262_v20 = vld [vmem:[#allocation21_spill] sm:$0xff] }
 0x481   : > { %v6096_v11 = vunpack.i.h.bf16 %v6094_v53  ;;  %v6095_v47 = vunpack.i.l.bf16 %v6094_v53 }
 0x483   : > { %v4016_v38 = vsel %vm10257_vm11, %v3728_v30, %v6096_v11  ;;  %v4014_v43 = vsel %vm10258_vm5, %v3726_v58, %v6095_v47 }
 0x484   : > { %4130 = vmatmul.mubr.f32.gmra.mxu1 %v4016_v38  ;;  %4120 = vmatmul.mubr.f32.gmra.mxu0 %v4014_v43  ;;  %v4142_v39 = vpop.permute.xlu1 %4141 }
 0x485   : > { %v4200_v51 = vsel %vm653_vm0, %v10261_v18, %v4142_v39 }
 0x488   : > { %v4146_v9 = vpop.permute.xlu1 %4145 }
 0x489   : > { %v4156_v37 = vpop.permute.xlu0 %4155  ;;  %v4202_v25 = vsel %vm653_vm0, %v10262_v20, %v4146_v9 }
 0x48a   : > { %v4203_v12 = vsel %vm658_vm1, %v4199_v40, %v4156_v37 }
 0x48d   : > { %v4158_v41 = vpop.permute.xlu1 %4157 }
 0x48e   : > { %v4204_v36 = vsel %vm658_vm1, %v4200_v51, %v4158_v41 }
 0x491   : > { %v4160_v7 = vpop.permute.xlu0 %4159 }
 0x492   : > { %v4205_v59 = vsel %vm658_vm1, %v4201_v54, %v4160_v7 }
 0x495   : > { %v4162_v14 = vpop.permute.xlu1 %4161 }
 0x496   : > { %v4206_v47 = vsel %vm658_vm1, %v4202_v25, %v4162_v14 }
 0x4f4   : > { %v3374_v35 = vpop.f32.mrf.mxu1 }
 0x4f5   : > { %4171 = vrot.lane.b32.xlu0 %v3374_v35, %s10039_s15 }
 0x4f6   : > { %v3376_v34 = vpop.f32.mrf.mxu1 }
 0x4f8   : > { %v3379_v5 = vpop.f32.mrf.mxu1 }
 0x4f9   : > { %4173 = vrot.lane.b32.xlu1 %v3379_v5, %s10039_s15 }
 0x4fa   : > { %v3381_v15 = vpop.f32.mrf.mxu1 }
 0x518   : > { %v3384_v19 = vpop.f32.mrf.mxu1 }
 0x519   : > { %4175 = vrot.lane.b32.xlu0 %v3384_v19, %s10039_s15 }
 0x51a   : > { %v3386_v29 = vpop.f32.mrf.mxu1 }
 0x51c   : > { %v3389_v21 = vpop.f32.mrf.mxu1 }
 0x51d   : > { %4177 = vrot.lane.b32.xlu1 %v3389_v21, %s10039_s15 }
 0x51e   : > { %v3391_v57 = vpop.f32.mrf.mxu1 }
 0x53c   : > { %v4116_v56 = vpop.f32.mrf.mxu0  ;;  %v4126_v60 = vpop.f32.mrf.mxu1 }
 0x53d   : > { %4187 = vrot.lane.b32.xlu0 %v4116_v56, %s10040_s14 }
 0x53e   : > { %v4118_v4 = vpop.f32.mrf.mxu0  ;;  %v4128_v63 = vpop.f32.mrf.mxu1 }
 0x541   : > { %4191 = vrot.lane.b32.xlu0 %v4126_v60, %s10040_s14 }
 0x544   : > { %v4121_v55 = vpop.f32.mrf.mxu0  ;;  %v4131_v62 = vpop.f32.mrf.mxu1 }
 0x545   : > { %4189 = vrot.lane.b32.xlu1 %v4121_v55, %s10040_s14 }
 0x546   : > { %v4123_v45 = vpop.f32.mrf.mxu0  ;;  %v4133_v61 = vpop.f32.mrf.mxu1 }
 0x549   : > { %4193 = vrot.lane.b32.xlu1 %v4131_v62, %s10040_s14 }
 0x567   : > { %v4172_v3 = vpop.permute.xlu0 %4171 }
 0x568   : > { %v4207_v0 = vsel %vm663_vm2, %v4203_v12, %v4172_v3 }
 0x56b   : > { %v4174_v52 = vpop.permute.xlu1 %4173 }
 0x56c   : > { %v4208_v22 = vsel %vm663_vm2, %v4204_v36, %v4174_v52 }
 0x58b   : > { %v4176_v49 = vpop.permute.xlu0 %4175 }
 0x58c   : > { %v4209_v33 = vsel %vm663_vm2, %v4205_v59, %v4176_v49 }
 0x58f   : > { %v4178_v28 = vpop.permute.xlu1 %4177 }
 0x590   : > { %v4210_v30 = vsel %vm663_vm2, %v4206_v47, %v4178_v28 }
 0x5af   : > { %v4188_v27 = vpop.permute.xlu0 %4187 }
 0x5b0   : > { %v4211_v50 = vsel %vm668_vm3, %v4207_v0, %v4188_v27 }
 0x5b1   : > { %v4222_v48 = vadd.f32 %v4446_v10, %v4211_v50 }
 0x5b3   : > { %v4226_v32 = vmax.f32 %v4222_v48, 0.0  ;;  %v4192_v46 = vpop.permute.xlu0 %4191 }
 0x5b4   : > { %v4213_v17 = vsel %vm668_vm3, %v4209_v33, %v4192_v46 }
 0x5b5   : > { %v4237_v42 = vmul.f32 %v4447_v44, %v4226_v32  ;;  %v4224_v24 = vadd.f32 %v4446_v10, %v4213_v17 }
 0x5b7   : > { %v4248_v31 = vadd.f32 %v4448_v2, %v4237_v42  ;;  %v4228_v6 = vmax.f32 %v4224_v24, 0.0  ;;  %v4190_v1 = vpop.permute.xlu1 %4189 }
 0x5b8   : > { %v4212_v26 = vsel %vm668_vm3, %v4208_v22, %v4190_v1 }
 0x5b9   : > { %4252 = vst.msk [vmem:[%s265_s28] sm:$0xff] %vm673_vm4, %v4248_v31  ;;  %v4239_v53 = vmul.f32 %v4447_v44, %v4228_v6  ;;  %v4223_v11 = vadd.f32 %v4446_v10, %v4212_v26 }
 0x5bb   : > { %v4250_v58 = vadd.f32 %v4448_v2, %v4239_v53  ;;  %v4227_v38 = vmax.f32 %v4223_v11, 0.0  ;;  %v4194_v43 = vpop.permute.xlu1 %4193 }
 0x5bc   : > { %v4214_v35 = vsel %vm668_vm3, %v4210_v30, %v4194_v43 }
 0x5bd   : > { %4254 = vst.msk [vmem:[%s265_s28 + $0x10] sm:$0xff] %vm673_vm4, %v4250_v58  ;;  %v4238_v34 = vmul.f32 %v4447_v44, %v4227_v38  ;;  %v4225_v5 = vadd.f32 %v4446_v10, %v4214_v35 }
 0x5bf   : > { %v4249_v15 = vadd.f32 %v4448_v2, %v4238_v34  ;;  %v4229_v19 = vmax.f32 %v4225_v5, 0.0 }
 0x5c1   : > { %4253 = vst.msk [vmem:[%s265_s28 + $0x8] sm:$0xff] %vm673_vm4, %v4249_v15  ;;  %v4240_v29 = vmul.f32 %v4447_v44, %v4229_v19 }
 0x5c3   : > { %v4251_v21 = vadd.f32 %v4448_v2, %v4240_v29 }
 0x5c5   : > { %4255 = vst.msk [vmem:[%s265_s28 + $0x18] sm:$0xff] %vm673_vm4, %v4251_v21 }
 0x5c6   : > { %6261 = shalt.err (!%p6258_p3)
}
 0x5c7   : > { %s6262_s11 = scalar_lea.hbm %s9832_s24, 512  ;;  %s6266_s30 = scalar_lea.hbm %s9886_s6, 1024 }
 0x5c8   : > { %p6263_p4 = scmp.ne.s32.totalorder %s9832_s24, %s6262_s11  ;;  %p6267_p9 = scmp.lt.s32.totalorder %s9832_s24, %s9886_s6 }
 0x5c9   : > { %p6268_p10 = scmp.lt.s32.totalorder %s6266_s30, %s6262_s11 }
 0x5ca   : > { %p6264_p7 = pnand %p6263_p4, %p6402_p5 }
 0x5cb   : > { %p6269_p11 = por %p6268_p10, %p6267_p9 }
 0x5cc   : > { %p6265_p8 = pneg %p6264_p7 }
 0x5ce   : > { %p6270_p12 = pnand %p6269_p11, %p6265_p8 }
 0x5d0   : > { %6273 = shalt.err (!%p6270_p12)
}
 0x5d1   : > { %s6328_s12 = smov 128  }
 0x5d2   : > { %4490 = dma.vmem_to_hbm [thread:$0]  (%p6402_p5), %s9834_s18, 512, %s9832_s24, %s9839_s1, %s6328_s12, %s6328_s12, %s10038_s20  }
 0x5d3 PF: > { %s10263_s14 = sld [smem:[#allocation7_spill]] }
 0x5d4   : > { %s10264_s15 = sld [smem:[#allocation5_spill]] }
 0x5d9   : > { %p4496_p13 = scmp.ge.s32.totalorder %s10263_s14, 2 }
 0x5da   : > { %s4285_s17 = sand.u32 1, %s10264_s15  }
 0x5db   : > { %p4493_p0 = pnand %p4496_p13, %p6406_p6  ;;  %s4286_s26 = scalar_lea.sflag [#allocation3], %s4285_s17 }
 0x5dd   : > { %p4494_p1 = pneg %p4493_p0 }
 0x5df   : > { %6291 = dma.done.wait (%p4494_p1), %s4286_s26, 512  }
 0x5e0   : > { %6293 = vsyncadd (%p4494_p1), %s4286_s26, 4294966784  ;;  %s10266_s24 = sld [smem:[#allocation8_spill]]  ;;  %s10269_s21 = smov %s6300_s22 }
 0x5e1   : > { %s10267_s7 = sld [smem:[#allocation6_spill]] }
 0x5e2   : > { %s10268_s23 = sld [smem:[#allocation9_spill]] }
 0x5e6   : > { %p16_p2 = scmp.ge.s32.totalorder %s10266_s24, 4  }
 0x5e7   : > { %s10270_s22 = smov %s10267_s7 }
 0x5e8   :  { %18 = sbr.rel (!%p16_p2) target bundleno = 6 (0x6), region = 86 }
 0x5ed   :  { %4291 = vsyncpa [#allocation3], 1 }
 0x5ee   :  { %4293 = vsyncpa [#allocation3 + $0x1], 1 }

</bundles_post_ra>
